<compile_context>
chip_gen: v6e
topology: v6e:2x2x1
jax: 0.10.0
libtpu: 0.0.40
codegen_flags: <defaults>
</compile_context>

<pallas_src>
import functools

import numpy as np
import jax
import jax.numpy as jnp
from jax import lax
from jax.experimental import pallas as pl
from jax.experimental.pallas import tpu as pltpu


# ------------------------------------------------------------------ in-kernel helpers
def _shift_flat(x, s):
    """y[:, p] = x[:, p + s]; positions outside [0, P) are zero-filled."""
    C, P = x.shape
    if s == 0:
        return x
    if s > 0:
        return jnp.concatenate([x[:, s:], jnp.zeros((C, s), x.dtype)], axis=1)
    s = -s
    return jnp.concatenate([jnp.zeros((C, s), x.dtype), x[:, : P - s]], axis=1)


def _im2col(x, mask, W):
    """x: (Cin, P) with flat index p = n*H*W + h*W + w; mask: (9, P) 0/1 boundary mask.

    Returns (9*Cin, P) with row order (kh, kw, cin), matching an HWIO weight reshaped
    to (9*Cin, Cout)."""
    rows = []
    for kh in range(3):
        for kw in range(3):
            s = (kh - 1) * W + (kw - 1)
            k = kh * 3 + kw
            rows.append(_shift_flat(x, s) * mask[k : k + 1, :])
    return jnp.concatenate(rows, axis=0)


def _conv3x3(x, w, b, mask, W, relu=True):
    y = jnp.dot(w, _im2col(x, mask, W), preferred_element_type=jnp.float32) + b
    return jnp.maximum(y, 0.0) if relu else y


def _conv3x3_dual(xa, xb, wa, wb, b, mask, W):
    # conv3x3(concat([xa, xb], channels)) via split weights: no concat needed.
    ya = jnp.dot(wa, _im2col(xa, mask, W), preferred_element_type=jnp.float32)
    yb = jnp.dot(wb, _im2col(xb, mask, W), preferred_element_type=jnp.float32)
    return jnp.maximum(ya + yb + b, 0.0)


def _maxpool2x2(x, sel, W):
    # max over 2x2 windows via two lane shifts, then compact even rows/cols with a
    # 0/1 selection matmul (exact; stays on the MXU, no lane gather).
    m = jnp.maximum(x, _shift_flat(x, 1))
    m = jnp.maximum(m, _shift_flat(m, W))
    return jnp.dot(m, sel, preferred_element_type=jnp.float32)


def _deconv2x2(x, wd_ref, b, u_ref):
    # ConvTranspose2d(k=2, s=2): for each sub-pixel k=(di,dj):
    #   plane_k = W_k @ x  ->  scattered to the 2x-upsampled grid by the 0/1 matrix U_k.
    acc = None
    for k in range(4):
        y = jnp.dot(wd_ref[k], x, preferred_element_type=jnp.float32)
        z = jnp.dot(y, u_ref[k], preferred_element_type=jnp.float32)
        acc = z if acc is None else acc + z
    return acc + b


# ------------------------------------------------------------------ the fused kernel
def _unet_kernel(
    x_ref,
    e1w1_ref, e1b1_ref, e1w2_ref, e1b2_ref,
    e2w1_ref, e2b1_ref, e2w2_ref, e2b2_ref,
    bw1_ref, bb1_ref, bw2_ref, bb2_ref,
    u2w_ref, u2b_ref,
    d2w1a_ref, d2w1b_ref, d2b1_ref, d2w2_ref, d2b2_ref,
    fwa_ref, fwb_ref, fb_ref,
    u1w_ref, u1b_ref,
    d1w1a_ref, d1w1b_ref, d1b1_ref, d1w2_ref, d1b2_ref,
    ow_ref, ob_ref,
    mfull_ref, mhalf_ref, mquar_ref,
    s1_ref, s2_ref,
    u2u_ref, u1u_ref,
    o_ref,
    *, N, H, W,
):
    H2, W2 = H // 2, W // 2
    W4 = W // 4
    hw2 = H2 * W2

    x = x_ref[...]                       # (Cin_pad, N*H*W)
    mf = mfull_ref[...]                  # (9, N*H*W)
    mh = mhalf_ref[...]                  # (9, N*H2*W2)
    mq = mquar_ref[...]                  # (9, N*H4*W4)

    # ---------------- encoder level 1 (H x W) ----------------
    e1 = _conv3x3(x, e1w1_ref[...], e1b1_ref[...], mf, W)
    e1 = _conv3x3(e1, e1w2_ref[...], e1b2_ref[...], mf, W)
    p1 = _maxpool2x2(e1, s1_ref[...], W)

    # ---------------- encoder level 2 (H/2 x W/2) -------------
    e2 = _conv3x3(p1, e2w1_ref[...], e2b1_ref[...], mh, W2)
    e2 = _conv3x3(e2, e2w2_ref[...], e2b2_ref[...], mh, W2)
    p2 = _maxpool2x2(e2, s2_ref[...], W2)

    # ---------------- bottleneck (H/4 x W/4) ------------------
    bt = _conv3x3(p2, bw1_ref[...], bb1_ref[...], mq, W4)
    bt = _conv3x3(bt, bw2_ref[...], bb2_ref[...], mq, W4)

    # ---------------- decoder level 2 -------------------------
    d2u = _deconv2x2(bt, u2w_ref, u2b_ref[...], u2u_ref)               # (2C, N*H2*W2)
    d2 = _conv3x3_dual(d2u, e2, d2w1a_ref[...], d2w1b_ref[...], d2b1_ref[...], mh, W2)
    d2 = _conv3x3(d2, d2w2_ref[...], d2b2_ref[...], mh, W2)

    # ---- StackFeaturePooling('avg') fused into the 1x1 fuse conv (split weights) ----
    mean = d2[:, 0:hw2]
    for n in range(1, N):
        mean = mean + d2[:, n * hw2 : (n + 1) * hw2]
    mean = mean * (1.0 / N)
    t = jnp.dot(fwb_ref[...], mean, preferred_element_type=jnp.float32)      # (C, hw2)
    d2f = jnp.dot(fwa_ref[...], d2, preferred_element_type=jnp.float32) + fb_ref[...]
    d2f = d2f + jnp.concatenate([t] * N, axis=1)

    # ---------------- decoder level 1 -------------------------
    d1u = _deconv2x2(d2f, u1w_ref, u1b_ref[...], u1u_ref)              # (C, N*H*W)
    d1 = _conv3x3_dual(d1u, e1, d1w1a_ref[...], d1w1b_ref[...], d1b1_ref[...], mf, W)
    d1 = _conv3x3(d1, d1w2_ref[...], d1b2_ref[...], mf, W)

    # ---------------- 1x1 output conv -------------------------
    out = jnp.dot(ow_ref[...], d1, preferred_element_type=jnp.float32) + ob_ref[...]
    o_ref[...] = out.astype(o_ref.dtype)


# ------------------------------------------------------------------ host-side builders
def _conv_mask(N, H, W):
    """(9, N*H*W) 0/1 mask: entry k=(kh,kw) is 1 where the shifted read stays in-image."""
    P = N * H * W
    p = np.arange(P)
    w = p % W
    h = (p // W) % H
    M = np.zeros((9, P), np.float32)
    for kh in range(3):
        for kw in range(3):
            dh, dw = kh - 1, kw - 1
            M[kh * 3 + kw] = ((w + dw >= 0) & (w + dw < W) &
                              (h + dh >= 0) & (h + dh < H))
    return jnp.asarray(M)


def _pool_select(N, H, W):
    """(N*H*W, N*(H/2)*(W/2)) 0/1 matrix selecting the even-(h,w) positions."""
    Ho, Wo = H // 2, W // 2
    P_in, P_out = N * H * W, N * Ho * Wo
    q = np.arange(P_out)
    n, r = q // (Ho * Wo), q % (Ho * Wo)
    i, j = r // Wo, r % Wo
    p = n * H * W + (2 * i) * W + 2 * j
    S = np.zeros((P_in, P_out), np.float32)
    S[p, q] = 1.0
    return jnp.asarray(S)


def _upsample_scatter(N, H, W):
    """(4, N*H*W, N*2H*2W) 0/1 matrices scattering plane (di,dj) to its sub-pixel grid."""
    Ho, Wo = 2 * H, 2 * W
    P_in, P_out = N * H * W, N * Ho * Wo
    p = np.arange(P_in)
    n, r = p // (H * W), p % (H * W)
    i, j = r // W, r % W
    U = np.zeros((4, P_in, P_out), np.float32)
    for di in range(2):
        for dj in range(2):
            q = n * Ho * Wo + (2 * i + di) * Wo + (2 * j + dj)
            U[di * 2 + dj, p, q] = 1.0
    return jnp.asarray(U)


def _w3x3(w):          # HWIO (3,3,Cin,Cout) -> (Cout, 9*Cin), row order (kh,kw,cin)
    kh, kw, ci, co = w.shape
    return w.reshape(kh * kw * ci, co).T


def _w3x3_split(w, c_a):   # split along input channels (for concat-free skip fusion)
    return _w3x3(w[:, :, :c_a, :]), _w3x3(w[:, :, c_a:, :])


def _wdec(w):          # (2,2,Cin,Cout) -> (4, Cout, Cin), k = di*2 + dj
    return jnp.transpose(w, (0, 1, 3, 2)).reshape(4, w.shape[3], w.shape[2])


def _bcol(b):
    return b.reshape(-1, 1)


# ------------------------------------------------------------------ public forward
def collaborative_unet_forward(x_nchw, params):
    N, Cin, H, W = x_nchw.shape
    assert H % 4 == 0 and W % 4 == 0, "spatial dims must be divisible by 4"
    P = N * H * W
    p = params
    C = p["enc1"]["w1"].shape[-1]        # base channels
    C2 = 2 * C

    # Flat lane layout: p = n*H*W + h*W + w ; channels on sublanes.
    x2d = jnp.transpose(x_nchw, (1, 0, 2, 3)).reshape(Cin, P)

    # Pad input channels up to a multiple of 8 (keeps the first im2col sublane-aligned).
    cin_pad = ((Cin + 7) // 8) * 8
    w_e1_1 = p["enc1"]["w1"]
    if cin_pad != Cin:
        x2d = jnp.concatenate(
            [x2d, jnp.zeros((cin_pad - Cin, P), x2d.dtype)], axis=0)
        w_e1_1 = jnp.pad(w_e1_1, ((0, 0), (0, 0), (0, cin_pad - Cin), (0, 0)))

    d2w1a, d2w1b = _w3x3_split(p["dec2"]["w1"], C2)   # [deconv_out(2C), skip e2(2C)]
    d1w1a, d1w1b = _w3x3_split(p["dec1"]["w1"], C)    # [deconv_out(C),  skip e1(C)]

    args = [
        x2d,
        # encoder 1
        _w3x3(w_e1_1), _bcol(p["enc1"]["b1"]),
        _w3x3(p["enc1"]["w2"]), _bcol(p["enc1"]["b2"]),
        # encoder 2
        _w3x3(p["enc2"]["w1"]), _bcol(p["enc2"]["b1"]),
        _w3x3(p["enc2"]["w2"]), _bcol(p["enc2"]["b2"]),
        # bottleneck
        _w3x3(p["bottleneck"]["w1"]), _bcol(p["bottleneck"]["b1"]),
        _w3x3(p["bottleneck"]["w2"]), _bcol(p["bottleneck"]["b2"]),
        # up2
        _wdec(p["up2_w"]), _bcol(p["up2_b"]),
        # dec2 (first conv split over [deconv_out, e2])
        d2w1a, d2w1b, _bcol(p["dec2"]["b1"]),
        _w3x3(p["dec2"]["w2"]), _bcol(p["dec2"]["b2"]),
        # fuse 1x1 (split over [d2, stack-mean(d2)])
        p["fuse_w"][:C2, :].T, p["fuse_w"][C2:, :].T, _bcol(p["fuse_b"]),
        # up1
        _wdec(p["up1_w"]), _bcol(p["up1_b"]),
        # dec1 (first conv split over [deconv_out, e1])
        d1w1a, d1w1b, _bcol(p["dec1"]["b1"]),
        _w3x3(p["dec1"]["w2"]), _bcol(p["dec1"]["b2"]),
        # output 1x1
        p["out_w"].T, _bcol(p["out_b"]),
        # structure constants (baked at trace time)
        _conv_mask(N, H, W), _conv_mask(N, H // 2, W // 2), _conv_mask(N, H // 4, W // 4),
        _pool_select(N, H, W), _pool_select(N, H // 2, W // 2),
        _upsample_scatter(N, H // 4, W // 4), _upsample_scatter(N, H // 2, W // 2),
    ]

    out2d = pl.pallas_call(
        functools.partial(_unet_kernel, N=N, H=H, W=W),
        out_shape=jax.ShapeDtypeStruct((Cin, P), jnp.float32),
        compiler_params=pltpu.CompilerParams(vmem_limit_bytes=32 * 1024 * 1024),
    )(*args)

    return jnp.transpose(out2d.reshape(Cin, N, H, W), (1, 0, 2, 3))   # -> NCHW


# ------------------------------------------------------------------ parameters
def init_params(key, in_ch=3, C=8):
    scale = 0.05
    keys = iter(jax.random.split(key, 40))

    def w(shape):
        return scale * jax.random.normal(next(keys), shape, jnp.float32)

    def b(n):
        return scale * jax.random.normal(next(keys), (n,), jnp.float32)

    def block(cin, cout):
        return {"w1": w((3, 3, cin, cout)), "b1": b(cout),
                "w2": w((3, 3, cout, cout)), "b2": b(cout)}

    return {
        "enc1": block(in_ch, C),
        "enc2": block(C, 2 * C),
        "bottleneck": block(2 * C, 4 * C),
        "up2_w": w((2, 2, 4 * C, 2 * C)), "up2_b": b(2 * C),
        "dec2": block(4 * C, 2 * C),
        "fuse_w": w((4 * C, C)), "fuse_b": b(C),
        "up1_w": w((2, 2, C, C)), "up1_b": b(C),
        "dec1": block(2 * C, C),
        "out_w": w((C, in_ch)), "out_b": b(in_ch),
    }


# ------------------------------------------------------------------ pure-JAX reference
def _ref_conv3x3(x, w, b):
    y = lax.conv_general_dilated(x, w, (1, 1), "SAME",
                                 dimension_numbers=("NHWC", "HWIO", "NHWC"),
                                 precision=lax.Precision.HIGHEST)
    return y + b


def _ref_block(x, p):
    x = jnp.maximum(_ref_conv3x3(x, p["w1"], p["b1"]), 0.0)
    return jnp.maximum(_ref_conv3x3(x, p["w2"], p["b2"]), 0.0)


def _ref_maxpool(x):
    return lax.reduce_window(x, -jnp.inf, lax.max, (1, 2, 2, 1), (1, 2, 2, 1), "VALID")


def _ref_deconv(x, w, b):
    N, H, W, Cin = x.shape
    Cout = w.shape[-1]
    out = jnp.zeros((N, 2 * H, 2 * W, Cout), x.dtype)
    for di in range(2):
        for dj in range(2):
            y = jnp.einsum("nhwi,io->nhwo", x, w[di, dj],
                           precision=lax.Precision.HIGHEST)
            out = out.at[:, di::2, dj::2, :].set(y)
    return out + b


def _ref_conv1x1(x, w, b):
    return jnp.einsum("nhwi,io->nhwo", x, w, precision=lax.Precision.HIGHEST) + b


def ref_forward(x_nchw, p):
    x = jnp.transpose(x_nchw, (0, 2, 3, 1))
    e1 = _ref_block(x, p["enc1"])
    p1 = _ref_maxpool(e1)
    e2 = _ref_block(p1, p["enc2"])
    p2 = _ref_maxpool(e2)
    b = _ref_block(p2, p["bottleneck"])
    d2 = _ref_deconv(b, p["up2_w"], p["up2_b"])
    d2 = jnp.concatenate([d2, e2], axis=-1)
    d2 = _ref_block(d2, p["dec2"])
    pooled = jnp.broadcast_to(jnp.mean(d2, axis=0, keepdims=True), d2.shape)
    d2 = _ref_conv1x1(jnp.concatenate([d2, pooled], axis=-1), p["fuse_w"], p["fuse_b"])
    d1 = _ref_deconv(d2, p["up1_w"], p["up1_b"])
    d1 = jnp.concatenate([d1, e1], axis=-1)
    d1 = _ref_block(d1, p["dec1"])
    out = _ref_conv1x1(d1, p["out_w"], p["out_b"])
    return jnp.transpose(out, (0, 3, 1, 2))


# ------------------------------------------------------------------ main
if __name__ == "__main__":
    key = jax.random.PRNGKey(0)
    k_x, k_p = jax.random.split(key)

    # stack of 2 images, 3 channels, 16x16 (NCHW, as the PyTorch module expects)
    x = jax.random.normal(k_x, (2, 3, 16, 16), jnp.float32)
    params = init_params(k_p, in_ch=3, C=8)   # base_channels=8 (small test config)

    fwd = jax.jit(collaborative_unet_forward)
    out = jax.block_until_ready(fwd(x, params))

    assert out.shape == (2, 3, 16, 16), out.shape

    ref = ref_forward(x, params)
    max_err = float(jnp.max(jnp.abs(out - ref)))
    assert max_err < 2e-3, f"max abs error vs reference: {max_err}"

    print("KERNEL_OK")
</pallas_src>

<mosaic_0001>
module attributes {stable_mosaic.version = 11 : i64} {
  func.func @_unet_kernel(%arg0: memref<8x512xf32, #tpu.memory_space<vmem>>, %arg1: memref<8x72xf32, #tpu.memory_space<vmem>>, %arg2: memref<8x1xf32, #tpu.memory_space<vmem>>, %arg3: memref<8x72xf32, #tpu.memory_space<vmem>>, %arg4: memref<8x1xf32, #tpu.memory_space<vmem>>, %arg5: memref<16x72xf32, #tpu.memory_space<vmem>>, %arg6: memref<16x1xf32, #tpu.memory_space<vmem>>, %arg7: memref<16x144xf32, #tpu.memory_space<vmem>>, %arg8: memref<16x1xf32, #tpu.memory_space<vmem>>, %arg9: memref<32x144xf32, #tpu.memory_space<vmem>>, %arg10: memref<32x1xf32, #tpu.memory_space<vmem>>, %arg11: memref<32x288xf32, #tpu.memory_space<vmem>>, %arg12: memref<32x1xf32, #tpu.memory_space<vmem>>, %arg13: memref<4x16x32xf32, #tpu.memory_space<vmem>>, %arg14: memref<16x1xf32, #tpu.memory_space<vmem>>, %arg15: memref<16x144xf32, #tpu.memory_space<vmem>>, %arg16: memref<16x144xf32, #tpu.memory_space<vmem>>, %arg17: memref<16x1xf32, #tpu.memory_space<vmem>>, %arg18: memref<16x144xf32, #tpu.memory_space<vmem>>, %arg19: memref<16x1xf32, #tpu.memory_space<vmem>>, %arg20: memref<8x16xf32, #tpu.memory_space<vmem>>, %arg21: memref<8x16xf32, #tpu.memory_space<vmem>>, %arg22: memref<8x1xf32, #tpu.memory_space<vmem>>, %arg23: memref<4x8x8xf32, #tpu.memory_space<vmem>>, %arg24: memref<8x1xf32, #tpu.memory_space<vmem>>, %arg25: memref<8x72xf32, #tpu.memory_space<vmem>>, %arg26: memref<8x72xf32, #tpu.memory_space<vmem>>, %arg27: memref<8x1xf32, #tpu.memory_space<vmem>>, %arg28: memref<8x72xf32, #tpu.memory_space<vmem>>, %arg29: memref<8x1xf32, #tpu.memory_space<vmem>>, %arg30: memref<3x8xf32, #tpu.memory_space<vmem>>, %arg31: memref<3x1xf32, #tpu.memory_space<vmem>>, %arg32: memref<9x512xf32, #tpu.memory_space<vmem>>, %arg33: memref<9x128xf32, #tpu.memory_space<vmem>>, %arg34: memref<9x32xf32, #tpu.memory_space<vmem>>, %arg35: memref<512x128xf32, #tpu.memory_space<vmem>>, %arg36: memref<128x32xf32, #tpu.memory_space<vmem>>, %arg37: memref<4x32x128xf32, #tpu.memory_space<vmem>>, %arg38: memref<4x128x512xf32, #tpu.memory_space<vmem>>, %arg39: memref<3x512xf32, #tpu.memory_space<vmem>>) attributes {dimension_semantics = [], scalar_prefetch = 0 : i64, scratch_operands = 0 : i64, tpu.core_type = #tpu.core_type<tc>} {
    %c0 = arith.constant 0 : index
    %c0_0 = arith.constant 0 : index
    %0 = vector.load %arg0[%c0, %c0_0] : memref<8x512xf32, #tpu.memory_space<vmem>>, vector<8x512xf32>
    %c0_1 = arith.constant 0 : index
    %c0_2 = arith.constant 0 : index
    %1 = vector.load %arg32[%c0_1, %c0_2] : memref<9x512xf32, #tpu.memory_space<vmem>>, vector<9x512xf32>
    %c0_3 = arith.constant 0 : index
    %c0_4 = arith.constant 0 : index
    %2 = vector.load %arg33[%c0_3, %c0_4] : memref<9x128xf32, #tpu.memory_space<vmem>>, vector<9x128xf32>
    %c0_5 = arith.constant 0 : index
    %c0_6 = arith.constant 0 : index
    %3 = vector.load %arg34[%c0_5, %c0_6] : memref<9x32xf32, #tpu.memory_space<vmem>>, vector<9x32xf32>
    %c0_7 = arith.constant 0 : index
    %c0_8 = arith.constant 0 : index
    %4 = vector.load %arg1[%c0_7, %c0_8] : memref<8x72xf32, #tpu.memory_space<vmem>>, vector<8x72xf32>
    %c0_9 = arith.constant 0 : index
    %c0_10 = arith.constant 0 : index
    %5 = vector.load %arg2[%c0_9, %c0_10] : memref<8x1xf32, #tpu.memory_space<vmem>>, vector<8x1xf32>
    %cst = arith.constant 0.000000e+00 : f32
    %6 = vector.broadcast %cst : f32 to vector<8x17xf32>
    %7 = vector.extract_strided_slice %0 {offsets = [0, 0], sizes = [8, 495], strides = [1, 1]} : vector<8x512xf32> to vector<8x495xf32>
    %8 = tpu.concatenate %6, %7 in 1 : vector<8x17xf32>, vector<8x495xf32> -> vector<8x512xf32>
    %9 = vector.extract_strided_slice %1 {offsets = [0, 0], sizes = [1, 512], strides = [1, 1]} : vector<9x512xf32> to vector<1x512xf32>
    %10 = vector.broadcast %9 : vector<1x512xf32> to vector<8x512xf32>
    %11 = arith.mulf %8, %10 : vector<8x512xf32>
    %cst_11 = arith.constant 0.000000e+00 : f32
    %12 = vector.broadcast %cst_11 : f32 to vector<8x16xf32>
    %13 = vector.extract_strided_slice %0 {offsets = [0, 0], sizes = [8, 496], strides = [1, 1]} : vector<8x512xf32> to vector<8x496xf32>
    %14 = tpu.concatenate %12, %13 in 1 : vector<8x16xf32>, vector<8x496xf32> -> vector<8x512xf32>
    %15 = vector.extract_strided_slice %1 {offsets = [1, 0], sizes = [1, 512], strides = [1, 1]} : vector<9x512xf32> to vector<1x512xf32>
    %16 = vector.broadcast %15 : vector<1x512xf32> to vector<8x512xf32>
    %17 = arith.mulf %14, %16 : vector<8x512xf32>
    %cst_12 = arith.constant 0.000000e+00 : f32
    %18 = vector.broadcast %cst_12 : f32 to vector<8x15xf32>
    %19 = vector.extract_strided_slice %0 {offsets = [0, 0], sizes = [8, 497], strides = [1, 1]} : vector<8x512xf32> to vector<8x497xf32>
    %20 = tpu.concatenate %18, %19 in 1 : vector<8x15xf32>, vector<8x497xf32> -> vector<8x512xf32>
    %21 = vector.extract_strided_slice %1 {offsets = [2, 0], sizes = [1, 512], strides = [1, 1]} : vector<9x512xf32> to vector<1x512xf32>
    %22 = vector.broadcast %21 : vector<1x512xf32> to vector<8x512xf32>
    %23 = arith.mulf %20, %22 : vector<8x512xf32>
    %cst_13 = arith.constant 0.000000e+00 : f32
    %24 = vector.broadcast %cst_13 : f32 to vector<8x1xf32>
    %25 = vector.extract_strided_slice %0 {offsets = [0, 0], sizes = [8, 511], strides = [1, 1]} : vector<8x512xf32> to vector<8x511xf32>
    %26 = tpu.concatenate %24, %25 in 1 : vector<8x1xf32>, vector<8x511xf32> -> vector<8x512xf32>
    %27 = vector.extract_strided_slice %1 {offsets = [3, 0], sizes = [1, 512], strides = [1, 1]} : vector<9x512xf32> to vector<1x512xf32>
    %28 = vector.broadcast %27 : vector<1x512xf32> to vector<8x512xf32>
    %29 = arith.mulf %26, %28 : vector<8x512xf32>
    %30 = vector.extract_strided_slice %1 {offsets = [4, 0], sizes = [1, 512], strides = [1, 1]} : vector<9x512xf32> to vector<1x512xf32>
    %31 = vector.broadcast %30 : vector<1x512xf32> to vector<8x512xf32>
    %32 = arith.mulf %0, %31 : vector<8x512xf32>
    %33 = vector.extract_strided_slice %0 {offsets = [0, 1], sizes = [8, 511], strides = [1, 1]} : vector<8x512xf32> to vector<8x511xf32>
    %cst_14 = arith.constant 0.000000e+00 : f32
    %34 = vector.broadcast %cst_14 : f32 to vector<8x1xf32>
    %35 = tpu.concatenate %33, %34 in 1 : vector<8x511xf32>, vector<8x1xf32> -> vector<8x512xf32>
    %36 = vector.extract_strided_slice %1 {offsets = [5, 0], sizes = [1, 512], strides = [1, 1]} : vector<9x512xf32> to vector<1x512xf32>
    %37 = vector.broadcast %36 : vector<1x512xf32> to vector<8x512xf32>
    %38 = arith.mulf %35, %37 : vector<8x512xf32>
    %39 = vector.extract_strided_slice %0 {offsets = [0, 15], sizes = [8, 497], strides = [1, 1]} : vector<8x512xf32> to vector<8x497xf32>
    %cst_15 = arith.constant 0.000000e+00 : f32
    %40 = vector.broadcast %cst_15 : f32 to vector<8x15xf32>
    %41 = tpu.concatenate %39, %40 in 1 : vector<8x497xf32>, vector<8x15xf32> -> vector<8x512xf32>
    %42 = vector.extract_strided_slice %1 {offsets = [6, 0], sizes = [1, 512], strides = [1, 1]} : vector<9x512xf32> to vector<1x512xf32>
    %43 = vector.broadcast %42 : vector<1x512xf32> to vector<8x512xf32>
    %44 = arith.mulf %41, %43 : vector<8x512xf32>
    %45 = vector.extract_strided_slice %0 {offsets = [0, 16], sizes = [8, 496], strides = [1, 1]} : vector<8x512xf32> to vector<8x496xf32>
    %cst_16 = arith.constant 0.000000e+00 : f32
    %46 = vector.broadcast %cst_16 : f32 to vector<8x16xf32>
    %47 = tpu.concatenate %45, %46 in 1 : vector<8x496xf32>, vector<8x16xf32> -> vector<8x512xf32>
    %48 = vector.extract_strided_slice %1 {offsets = [7, 0], sizes = [1, 512], strides = [1, 1]} : vector<9x512xf32> to vector<1x512xf32>
    %49 = vector.broadcast %48 : vector<1x512xf32> to vector<8x512xf32>
    %50 = arith.mulf %47, %49 : vector<8x512xf32>
    %51 = vector.extract_strided_slice %0 {offsets = [0, 17], sizes = [8, 495], strides = [1, 1]} : vector<8x512xf32> to vector<8x495xf32>
    %cst_17 = arith.constant 0.000000e+00 : f32
    %52 = vector.broadcast %cst_17 : f32 to vector<8x17xf32>
    %53 = tpu.concatenate %51, %52 in 1 : vector<8x495xf32>, vector<8x17xf32> -> vector<8x512xf32>
    %54 = vector.extract_strided_slice %1 {offsets = [8, 0], sizes = [1, 512], strides = [1, 1]} : vector<9x512xf32> to vector<1x512xf32>
    %55 = vector.broadcast %54 : vector<1x512xf32> to vector<8x512xf32>
    %56 = arith.mulf %53, %55 : vector<8x512xf32>
    %57 = tpu.concatenate %11, %17, %23, %29, %32, %38, %44, %50, %56 in 0 : vector<8x512xf32>, vector<8x512xf32>, vector<8x512xf32>, vector<8x512xf32>, vector<8x512xf32>, vector<8x512xf32>, vector<8x512xf32>, vector<8x512xf32>, vector<8x512xf32> -> vector<72x512xf32>
    %cst_18 = arith.constant dense<0.000000e+00> : vector<8x512xf32>
    %58 = tpu.matmul %4, %57, %cst_18 {dimension_numbers = #tpu.dot_dimension_numbers<[1], [0], [0], [1], [0, 0, 1, 1], [], []>} : vector<8x72xf32>, vector<72x512xf32>, vector<8x512xf32> -> vector<8x512xf32>
    %59 = vector.broadcast %5 : vector<8x1xf32> to vector<8x512xf32>
    %60 = arith.addf %58, %59 : vector<8x512xf32>
    %cst_19 = arith.constant 0.000000e+00 : f32
    %61 = vector.broadcast %cst_19 : f32 to vector<8x512xf32>
    %62 = arith.maximumf %60, %61 : vector<8x512xf32>
    %c0_20 = arith.constant 0 : index
    %c0_21 = arith.constant 0 : index
    %63 = vector.load %arg3[%c0_20, %c0_21] : memref<8x72xf32, #tpu.memory_space<vmem>>, vector<8x72xf32>
    %c0_22 = arith.constant 0 : index
    %c0_23 = arith.constant 0 : index
    %64 = vector.load %arg4[%c0_22, %c0_23] : memref<8x1xf32, #tpu.memory_space<vmem>>, vector<8x1xf32>
    %cst_24 = arith.constant 0.000000e+00 : f32
    %65 = vector.broadcast %cst_24 : f32 to vector<8x17xf32>
    %66 = vector.extract_strided_slice %62 {offsets = [0, 0], sizes = [8, 495], strides = [1, 1]} : vector<8x512xf32> to vector<8x495xf32>
    %67 = tpu.concatenate %65, %66 in 1 : vector<8x17xf32>, vector<8x495xf32> -> vector<8x512xf32>
    %68 = vector.extract_strided_slice %1 {offsets = [0, 0], sizes = [1, 512], strides = [1, 1]} : vector<9x512xf32> to vector<1x512xf32>
    %69 = vector.broadcast %68 : vector<1x512xf32> to vector<8x512xf32>
    %70 = arith.mulf %67, %69 : vector<8x512xf32>
    %cst_25 = arith.constant 0.000000e+00 : f32
    %71 = vector.broadcast %cst_25 : f32 to vector<8x16xf32>
    %72 = vector.extract_strided_slice %62 {offsets = [0, 0], sizes = [8, 496], strides = [1, 1]} : vector<8x512xf32> to vector<8x496xf32>
    %73 = tpu.concatenate %71, %72 in 1 : vector<8x16xf32>, vector<8x496xf32> -> vector<8x512xf32>
    %74 = vector.extract_strided_slice %1 {offsets = [1, 0], sizes = [1, 512], strides = [1, 1]} : vector<9x512xf32> to vector<1x512xf32>
    %75 = vector.broadcast %74 : vector<1x512xf32> to vector<8x512xf32>
    %76 = arith.mulf %73, %75 : vector<8x512xf32>
    %cst_26 = arith.constant 0.000000e+00 : f32
    %77 = vector.broadcast %cst_26 : f32 to vector<8x15xf32>
    %78 = vector.extract_strided_slice %62 {offsets = [0, 0], sizes = [8, 497], strides = [1, 1]} : vector<8x512xf32> to vector<8x497xf32>
    %79 = tpu.concatenate %77, %78 in 1 : vector<8x15xf32>, vector<8x497xf32> -> vector<8x512xf32>
    %80 = vector.extract_strided_slice %1 {offsets = [2, 0], sizes = [1, 512], strides = [1, 1]} : vector<9x512xf32> to vector<1x512xf32>
    %81 = vector.broadcast %80 : vector<1x512xf32> to vector<8x512xf32>
    %82 = arith.mulf %79, %81 : vector<8x512xf32>
    %cst_27 = arith.constant 0.000000e+00 : f32
    %83 = vector.broadcast %cst_27 : f32 to vector<8x1xf32>
    %84 = vector.extract_strided_slice %62 {offsets = [0, 0], sizes = [8, 511], strides = [1, 1]} : vector<8x512xf32> to vector<8x511xf32>
    %85 = tpu.concatenate %83, %84 in 1 : vector<8x1xf32>, vector<8x511xf32> -> vector<8x512xf32>
    %86 = vector.extract_strided_slice %1 {offsets = [3, 0], sizes = [1, 512], strides = [1, 1]} : vector<9x512xf32> to vector<1x512xf32>
    %87 = vector.broadcast %86 : vector<1x512xf32> to vector<8x512xf32>
    %88 = arith.mulf %85, %87 : vector<8x512xf32>
    %89 = vector.extract_strided_slice %1 {offsets = [4, 0], sizes = [1, 512], strides = [1, 1]} : vector<9x512xf32> to vector<1x512xf32>
    %90 = vector.broadcast %89 : vector<1x512xf32> to vector<8x512xf32>
    %91 = arith.mulf %62, %90 : vector<8x512xf32>
    %92 = vector.extract_strided_slice %62 {offsets = [0, 1], sizes = [8, 511], strides = [1, 1]} : vector<8x512xf32> to vector<8x511xf32>
    %cst_28 = arith.constant 0.000000e+00 : f32
    %93 = vector.broadcast %cst_28 : f32 to vector<8x1xf32>
    %94 = tpu.concatenate %92, %93 in 1 : vector<8x511xf32>, vector<8x1xf32> -> vector<8x512xf32>
    %95 = vector.extract_strided_slice %1 {offsets = [5, 0], sizes = [1, 512], strides = [1, 1]} : vector<9x512xf32> to vector<1x512xf32>
    %96 = vector.broadcast %95 : vector<1x512xf32> to vector<8x512xf32>
    %97 = arith.mulf %94, %96 : vector<8x512xf32>
    %98 = vector.extract_strided_slice %62 {offsets = [0, 15], sizes = [8, 497], strides = [1, 1]} : vector<8x512xf32> to vector<8x497xf32>
    %cst_29 = arith.constant 0.000000e+00 : f32
    %99 = vector.broadcast %cst_29 : f32 to vector<8x15xf32>
    %100 = tpu.concatenate %98, %99 in 1 : vector<8x497xf32>, vector<8x15xf32> -> vector<8x512xf32>
    %101 = vector.extract_strided_slice %1 {offsets = [6, 0], sizes = [1, 512], strides = [1, 1]} : vector<9x512xf32> to vector<1x512xf32>
    %102 = vector.broadcast %101 : vector<1x512xf32> to vector<8x512xf32>
    %103 = arith.mulf %100, %102 : vector<8x512xf32>
    %104 = vector.extract_strided_slice %62 {offsets = [0, 16], sizes = [8, 496], strides = [1, 1]} : vector<8x512xf32> to vector<8x496xf32>
    %cst_30 = arith.constant 0.000000e+00 : f32
    %105 = vector.broadcast %cst_30 : f32 to vector<8x16xf32>
    %106 = tpu.concatenate %104, %105 in 1 : vector<8x496xf32>, vector<8x16xf32> -> vector<8x512xf32>
    %107 = vector.extract_strided_slice %1 {offsets = [7, 0], sizes = [1, 512], strides = [1, 1]} : vector<9x512xf32> to vector<1x512xf32>
    %108 = vector.broadcast %107 : vector<1x512xf32> to vector<8x512xf32>
    %109 = arith.mulf %106, %108 : vector<8x512xf32>
    %110 = vector.extract_strided_slice %62 {offsets = [0, 17], sizes = [8, 495], strides = [1, 1]} : vector<8x512xf32> to vector<8x495xf32>
    %cst_31 = arith.constant 0.000000e+00 : f32
    %111 = vector.broadcast %cst_31 : f32 to vector<8x17xf32>
    %112 = tpu.concatenate %110, %111 in 1 : vector<8x495xf32>, vector<8x17xf32> -> vector<8x512xf32>
    %113 = vector.extract_strided_slice %1 {offsets = [8, 0], sizes = [1, 512], strides = [1, 1]} : vector<9x512xf32> to vector<1x512xf32>
    %114 = vector.broadcast %113 : vector<1x512xf32> to vector<8x512xf32>
    %115 = arith.mulf %112, %114 : vector<8x512xf32>
    %116 = tpu.concatenate %70, %76, %82, %88, %91, %97, %103, %109, %115 in 0 : vector<8x512xf32>, vector<8x512xf32>, vector<8x512xf32>, vector<8x512xf32>, vector<8x512xf32>, vector<8x512xf32>, vector<8x512xf32>, vector<8x512xf32>, vector<8x512xf32> -> vector<72x512xf32>
    %cst_32 = arith.constant dense<0.000000e+00> : vector<8x512xf32>
    %117 = tpu.matmul %63, %116, %cst_32 {dimension_numbers = #tpu.dot_dimension_numbers<[1], [0], [0], [1], [0, 0, 1, 1], [], []>} : vector<8x72xf32>, vector<72x512xf32>, vector<8x512xf32> -> vector<8x512xf32>
    %118 = vector.broadcast %64 : vector<8x1xf32> to vector<8x512xf32>
    %119 = arith.addf %117, %118 : vector<8x512xf32>
    %cst_33 = arith.constant 0.000000e+00 : f32
    %120 = vector.broadcast %cst_33 : f32 to vector<8x512xf32>
    %121 = arith.maximumf %119, %120 : vector<8x512xf32>
    %c0_34 = arith.constant 0 : index
    %c0_35 = arith.constant 0 : index
    %122 = vector.load %arg35[%c0_34, %c0_35] : memref<512x128xf32, #tpu.memory_space<vmem>>, vector<512x128xf32>
    %123 = vector.extract_strided_slice %121 {offsets = [0, 1], sizes = [8, 511], strides = [1, 1]} : vector<8x512xf32> to vector<8x511xf32>
    %cst_36 = arith.constant 0.000000e+00 : f32
    %124 = vector.broadcast %cst_36 : f32 to vector<8x1xf32>
    %125 = tpu.concatenate %123, %124 in 1 : vector<8x511xf32>, vector<8x1xf32> -> vector<8x512xf32>
    %126 = arith.maximumf %121, %125 : vector<8x512xf32>
    %127 = vector.extract_strided_slice %126 {offsets = [0, 16], sizes = [8, 496], strides = [1, 1]} : vector<8x512xf32> to vector<8x496xf32>
    %cst_37 = arith.constant 0.000000e+00 : f32
    %128 = vector.broadcast %cst_37 : f32 to vector<8x16xf32>
    %129 = tpu.concatenate %127, %128 in 1 : vector<8x496xf32>, vector<8x16xf32> -> vector<8x512xf32>
    %130 = arith.maximumf %126, %129 : vector<8x512xf32>
    %cst_38 = arith.constant dense<0.000000e+00> : vector<8x128xf32>
    %131 = tpu.matmul %130, %122, %cst_38 {dimension_numbers = #tpu.dot_dimension_numbers<[1], [0], [0], [1], [0, 0, 1, 1], [], []>} : vector<8x512xf32>, vector<512x128xf32>, vector<8x128xf32> -> vector<8x128xf32>
    %c0_39 = arith.constant 0 : index
    %c0_40 = arith.constant 0 : index
    %132 = vector.load %arg5[%c0_39, %c0_40] : memref<16x72xf32, #tpu.memory_space<vmem>>, vector<16x72xf32>
    %c0_41 = arith.constant 0 : index
    %c0_42 = arith.constant 0 : index
    %133 = vector.load %arg6[%c0_41, %c0_42] : memref<16x1xf32, #tpu.memory_space<vmem>>, vector<16x1xf32>
    %cst_43 = arith.constant 0.000000e+00 : f32
    %134 = vector.broadcast %cst_43 : f32 to vector<8x9xf32>
    %135 = vector.extract_strided_slice %131 {offsets = [0, 0], sizes = [8, 119], strides = [1, 1]} : vector<8x128xf32> to vector<8x119xf32>
    %136 = tpu.concatenate %134, %135 in 1 : vector<8x9xf32>, vector<8x119xf32> -> vector<8x128xf32>
    %137 = vector.extract_strided_slice %2 {offsets = [0, 0], sizes = [1, 128], strides = [1, 1]} : vector<9x128xf32> to vector<1x128xf32>
    %138 = vector.broadcast %137 : vector<1x128xf32> to vector<8x128xf32>
    %139 = arith.mulf %136, %138 : vector<8x128xf32>
    %cst_44 = arith.constant 0.000000e+00 : f32
    %140 = vector.broadcast %cst_44 : f32 to vector<8x8xf32>
    %141 = vector.extract_strided_slice %131 {offsets = [0, 0], sizes = [8, 120], strides = [1, 1]} : vector<8x128xf32> to vector<8x120xf32>
    %142 = tpu.concatenate %140, %141 in 1 : vector<8x8xf32>, vector<8x120xf32> -> vector<8x128xf32>
    %143 = vector.extract_strided_slice %2 {offsets = [1, 0], sizes = [1, 128], strides = [1, 1]} : vector<9x128xf32> to vector<1x128xf32>
    %144 = vector.broadcast %143 : vector<1x128xf32> to vector<8x128xf32>
    %145 = arith.mulf %142, %144 : vector<8x128xf32>
    %cst_45 = arith.constant 0.000000e+00 : f32
    %146 = vector.broadcast %cst_45 : f32 to vector<8x7xf32>
    %147 = vector.extract_strided_slice %131 {offsets = [0, 0], sizes = [8, 121], strides = [1, 1]} : vector<8x128xf32> to vector<8x121xf32>
    %148 = tpu.concatenate %146, %147 in 1 : vector<8x7xf32>, vector<8x121xf32> -> vector<8x128xf32>
    %149 = vector.extract_strided_slice %2 {offsets = [2, 0], sizes = [1, 128], strides = [1, 1]} : vector<9x128xf32> to vector<1x128xf32>
    %150 = vector.broadcast %149 : vector<1x128xf32> to vector<8x128xf32>
    %151 = arith.mulf %148, %150 : vector<8x128xf32>
    %cst_46 = arith.constant 0.000000e+00 : f32
    %152 = vector.broadcast %cst_46 : f32 to vector<8x1xf32>
    %153 = vector.extract_strided_slice %131 {offsets = [0, 0], sizes = [8, 127], strides = [1, 1]} : vector<8x128xf32> to vector<8x127xf32>
    %154 = tpu.concatenate %152, %153 in 1 : vector<8x1xf32>, vector<8x127xf32> -> vector<8x128xf32>
    %155 = vector.extract_strided_slice %2 {offsets = [3, 0], sizes = [1, 128], strides = [1, 1]} : vector<9x128xf32> to vector<1x128xf32>
    %156 = vector.broadcast %155 : vector<1x128xf32> to vector<8x128xf32>
    %157 = arith.mulf %154, %156 : vector<8x128xf32>
    %158 = vector.extract_strided_slice %2 {offsets = [4, 0], sizes = [1, 128], strides = [1, 1]} : vector<9x128xf32> to vector<1x128xf32>
    %159 = vector.broadcast %158 : vector<1x128xf32> to vector<8x128xf32>
    %160 = arith.mulf %131, %159 : vector<8x128xf32>
    %161 = vector.extract_strided_slice %131 {offsets = [0, 1], sizes = [8, 127], strides = [1, 1]} : vector<8x128xf32> to vector<8x127xf32>
    %cst_47 = arith.constant 0.000000e+00 : f32
    %162 = vector.broadcast %cst_47 : f32 to vector<8x1xf32>
    %163 = tpu.concatenate %161, %162 in 1 : vector<8x127xf32>, vector<8x1xf32> -> vector<8x128xf32>
    %164 = vector.extract_strided_slice %2 {offsets = [5, 0], sizes = [1, 128], strides = [1, 1]} : vector<9x128xf32> to vector<1x128xf32>
    %165 = vector.broadcast %164 : vector<1x128xf32> to vector<8x128xf32>
    %166 = arith.mulf %163, %165 : vector<8x128xf32>
    %167 = vector.extract_strided_slice %131 {offsets = [0, 7], sizes = [8, 121], strides = [1, 1]} : vector<8x128xf32> to vector<8x121xf32>
    %cst_48 = arith.constant 0.000000e+00 : f32
    %168 = vector.broadcast %cst_48 : f32 to vector<8x7xf32>
    %169 = tpu.concatenate %167, %168 in 1 : vector<8x121xf32>, vector<8x7xf32> -> vector<8x128xf32>
    %170 = vector.extract_strided_slice %2 {offsets = [6, 0], sizes = [1, 128], strides = [1, 1]} : vector<9x128xf32> to vector<1x128xf32>
    %171 = vector.broadcast %170 : vector<1x128xf32> to vector<8x128xf32>
    %172 = arith.mulf %169, %171 : vector<8x128xf32>
    %173 = vector.extract_strided_slice %131 {offsets = [0, 8], sizes = [8, 120], strides = [1, 1]} : vector<8x128xf32> to vector<8x120xf32>
    %cst_49 = arith.constant 0.000000e+00 : f32
    %174 = vector.broadcast %cst_49 : f32 to vector<8x8xf32>
    %175 = tpu.concatenate %173, %174 in 1 : vector<8x120xf32>, vector<8x8xf32> -> vector<8x128xf32>
    %176 = vector.extract_strided_slice %2 {offsets = [7, 0], sizes = [1, 128], strides = [1, 1]} : vector<9x128xf32> to vector<1x128xf32>
    %177 = vector.broadcast %176 : vector<1x128xf32> to vector<8x128xf32>
    %178 = arith.mulf %175, %177 : vector<8x128xf32>
    %179 = vector.extract_strided_slice %131 {offsets = [0, 9], sizes = [8, 119], strides = [1, 1]} : vector<8x128xf32> to vector<8x119xf32>
    %cst_50 = arith.constant 0.000000e+00 : f32
    %180 = vector.broadcast %cst_50 : f32 to vector<8x9xf32>
    %181 = tpu.concatenate %179, %180 in 1 : vector<8x119xf32>, vector<8x9xf32> -> vector<8x128xf32>
    %182 = vector.extract_strided_slice %2 {offsets = [8, 0], sizes = [1, 128], strides = [1, 1]} : vector<9x128xf32> to vector<1x128xf32>
    %183 = vector.broadcast %182 : vector<1x128xf32> to vector<8x128xf32>
    %184 = arith.mulf %181, %183 : vector<8x128xf32>
    %185 = tpu.concatenate %139, %145, %151, %157, %160, %166, %172, %178, %184 in 0 : vector<8x128xf32>, vector<8x128xf32>, vector<8x128xf32>, vector<8x128xf32>, vector<8x128xf32>, vector<8x128xf32>, vector<8x128xf32>, vector<8x128xf32>, vector<8x128xf32> -> vector<72x128xf32>
    %cst_51 = arith.constant dense<0.000000e+00> : vector<16x128xf32>
    %186 = tpu.matmul %132, %185, %cst_51 {dimension_numbers = #tpu.dot_dimension_numbers<[1], [0], [0], [1], [0, 0, 1, 1], [], []>} : vector<16x72xf32>, vector<72x128xf32>, vector<16x128xf32> -> vector<16x128xf32>
    %187 = vector.broadcast %133 : vector<16x1xf32> to vector<16x128xf32>
    %188 = arith.addf %186, %187 : vector<16x128xf32>
    %cst_52 = arith.constant 0.000000e+00 : f32
    %189 = vector.broadcast %cst_52 : f32 to vector<16x128xf32>
    %190 = arith.maximumf %188, %189 : vector<16x128xf32>
    %c0_53 = arith.constant 0 : index
    %c0_54 = arith.constant 0 : index
    %191 = vector.load %arg7[%c0_53, %c0_54] : memref<16x144xf32, #tpu.memory_space<vmem>>, vector<16x144xf32>
    %c0_55 = arith.constant 0 : index
    %c0_56 = arith.constant 0 : index
    %192 = vector.load %arg8[%c0_55, %c0_56] : memref<16x1xf32, #tpu.memory_space<vmem>>, vector<16x1xf32>
    %cst_57 = arith.constant 0.000000e+00 : f32
    %193 = vector.broadcast %cst_57 : f32 to vector<16x9xf32>
    %194 = vector.extract_strided_slice %190 {offsets = [0, 0], sizes = [16, 119], strides = [1, 1]} : vector<16x128xf32> to vector<16x119xf32>
    %195 = tpu.concatenate %193, %194 in 1 : vector<16x9xf32>, vector<16x119xf32> -> vector<16x128xf32>
    %196 = vector.extract_strided_slice %2 {offsets = [0, 0], sizes = [1, 128], strides = [1, 1]} : vector<9x128xf32> to vector<1x128xf32>
    %197 = vector.broadcast %196 : vector<1x128xf32> to vector<16x128xf32>
    %198 = arith.mulf %195, %197 : vector<16x128xf32>
    %cst_58 = arith.constant 0.000000e+00 : f32
    %199 = vector.broadcast %cst_58 : f32 to vector<16x8xf32>
    %200 = vector.extract_strided_slice %190 {offsets = [0, 0], sizes = [16, 120], strides = [1, 1]} : vector<16x128xf32> to vector<16x120xf32>
    %201 = tpu.concatenate %199, %200 in 1 : vector<16x8xf32>, vector<16x120xf32> -> vector<16x128xf32>
    %202 = vector.extract_strided_slice %2 {offsets = [1, 0], sizes = [1, 128], strides = [1, 1]} : vector<9x128xf32> to vector<1x128xf32>
    %203 = vector.broadcast %202 : vector<1x128xf32> to vector<16x128xf32>
    %204 = arith.mulf %201, %203 : vector<16x128xf32>
    %cst_59 = arith.constant 0.000000e+00 : f32
    %205 = vector.broadcast %cst_59 : f32 to vector<16x7xf32>
    %206 = vector.extract_strided_slice %190 {offsets = [0, 0], sizes = [16, 121], strides = [1, 1]} : vector<16x128xf32> to vector<16x121xf32>
    %207 = tpu.concatenate %205, %206 in 1 : vector<16x7xf32>, vector<16x121xf32> -> vector<16x128xf32>
    %208 = vector.extract_strided_slice %2 {offsets = [2, 0], sizes = [1, 128], strides = [1, 1]} : vector<9x128xf32> to vector<1x128xf32>
    %209 = vector.broadcast %208 : vector<1x128xf32> to vector<16x128xf32>
    %210 = arith.mulf %207, %209 : vector<16x128xf32>
    %cst_60 = arith.constant 0.000000e+00 : f32
    %211 = vector.broadcast %cst_60 : f32 to vector<16x1xf32>
    %212 = vector.extract_strided_slice %190 {offsets = [0, 0], sizes = [16, 127], strides = [1, 1]} : vector<16x128xf32> to vector<16x127xf32>
    %213 = tpu.concatenate %211, %212 in 1 : vector<16x1xf32>, vector<16x127xf32> -> vector<16x128xf32>
    %214 = vector.extract_strided_slice %2 {offsets = [3, 0], sizes = [1, 128], strides = [1, 1]} : vector<9x128xf32> to vector<1x128xf32>
    %215 = vector.broadcast %214 : vector<1x128xf32> to vector<16x128xf32>
    %216 = arith.mulf %213, %215 : vector<16x128xf32>
    %217 = vector.extract_strided_slice %2 {offsets = [4, 0], sizes = [1, 128], strides = [1, 1]} : vector<9x128xf32> to vector<1x128xf32>
    %218 = vector.broadcast %217 : vector<1x128xf32> to vector<16x128xf32>
    %219 = arith.mulf %190, %218 : vector<16x128xf32>
    %220 = vector.extract_strided_slice %190 {offsets = [0, 1], sizes = [16, 127], strides = [1, 1]} : vector<16x128xf32> to vector<16x127xf32>
    %cst_61 = arith.constant 0.000000e+00 : f32
    %221 = vector.broadcast %cst_61 : f32 to vector<16x1xf32>
    %222 = tpu.concatenate %220, %221 in 1 : vector<16x127xf32>, vector<16x1xf32> -> vector<16x128xf32>
    %223 = vector.extract_strided_slice %2 {offsets = [5, 0], sizes = [1, 128], strides = [1, 1]} : vector<9x128xf32> to vector<1x128xf32>
    %224 = vector.broadcast %223 : vector<1x128xf32> to vector<16x128xf32>
    %225 = arith.mulf %222, %224 : vector<16x128xf32>
    %226 = vector.extract_strided_slice %190 {offsets = [0, 7], sizes = [16, 121], strides = [1, 1]} : vector<16x128xf32> to vector<16x121xf32>
    %cst_62 = arith.constant 0.000000e+00 : f32
    %227 = vector.broadcast %cst_62 : f32 to vector<16x7xf32>
    %228 = tpu.concatenate %226, %227 in 1 : vector<16x121xf32>, vector<16x7xf32> -> vector<16x128xf32>
    %229 = vector.extract_strided_slice %2 {offsets = [6, 0], sizes = [1, 128], strides = [1, 1]} : vector<9x128xf32> to vector<1x128xf32>
    %230 = vector.broadcast %229 : vector<1x128xf32> to vector<16x128xf32>
    %231 = arith.mulf %228, %230 : vector<16x128xf32>
    %232 = vector.extract_strided_slice %190 {offsets = [0, 8], sizes = [16, 120], strides = [1, 1]} : vector<16x128xf32> to vector<16x120xf32>
    %cst_63 = arith.constant 0.000000e+00 : f32
    %233 = vector.broadcast %cst_63 : f32 to vector<16x8xf32>
    %234 = tpu.concatenate %232, %233 in 1 : vector<16x120xf32>, vector<16x8xf32> -> vector<16x128xf32>
    %235 = vector.extract_strided_slice %2 {offsets = [7, 0], sizes = [1, 128], strides = [1, 1]} : vector<9x128xf32> to vector<1x128xf32>
    %236 = vector.broadcast %235 : vector<1x128xf32> to vector<16x128xf32>
    %237 = arith.mulf %234, %236 : vector<16x128xf32>
    %238 = vector.extract_strided_slice %190 {offsets = [0, 9], sizes = [16, 119], strides = [1, 1]} : vector<16x128xf32> to vector<16x119xf32>
    %cst_64 = arith.constant 0.000000e+00 : f32
    %239 = vector.broadcast %cst_64 : f32 to vector<16x9xf32>
    %240 = tpu.concatenate %238, %239 in 1 : vector<16x119xf32>, vector<16x9xf32> -> vector<16x128xf32>
    %241 = vector.extract_strided_slice %2 {offsets = [8, 0], sizes = [1, 128], strides = [1, 1]} : vector<9x128xf32> to vector<1x128xf32>
    %242 = vector.broadcast %241 : vector<1x128xf32> to vector<16x128xf32>
    %243 = arith.mulf %240, %242 : vector<16x128xf32>
    %244 = tpu.concatenate %198, %204, %210, %216, %219, %225, %231, %237, %243 in 0 : vector<16x128xf32>, vector<16x128xf32>, vector<16x128xf32>, vector<16x128xf32>, vector<16x128xf32>, vector<16x128xf32>, vector<16x128xf32>, vector<16x128xf32>, vector<16x128xf32> -> vector<144x128xf32>
    %cst_65 = arith.constant dense<0.000000e+00> : vector<16x128xf32>
    %245 = tpu.matmul %191, %244, %cst_65 {dimension_numbers = #tpu.dot_dimension_numbers<[1], [0], [0], [1], [0, 0, 1, 1], [], []>} : vector<16x144xf32>, vector<144x128xf32>, vector<16x128xf32> -> vector<16x128xf32>
    %246 = vector.broadcast %192 : vector<16x1xf32> to vector<16x128xf32>
    %247 = arith.addf %245, %246 : vector<16x128xf32>
    %cst_66 = arith.constant 0.000000e+00 : f32
    %248 = vector.broadcast %cst_66 : f32 to vector<16x128xf32>
    %249 = arith.maximumf %247, %248 : vector<16x128xf32>
    %c0_67 = arith.constant 0 : index
    %c0_68 = arith.constant 0 : index
    %250 = vector.load %arg36[%c0_67, %c0_68] : memref<128x32xf32, #tpu.memory_space<vmem>>, vector<128x32xf32>
    %251 = vector.extract_strided_slice %249 {offsets = [0, 1], sizes = [16, 127], strides = [1, 1]} : vector<16x128xf32> to vector<16x127xf32>
    %cst_69 = arith.constant 0.000000e+00 : f32
    %252 = vector.broadcast %cst_69 : f32 to vector<16x1xf32>
    %253 = tpu.concatenate %251, %252 in 1 : vector<16x127xf32>, vector<16x1xf32> -> vector<16x128xf32>
    %254 = arith.maximumf %249, %253 : vector<16x128xf32>
    %255 = vector.extract_strided_slice %254 {offsets = [0, 8], sizes = [16, 120], strides = [1, 1]} : vector<16x128xf32> to vector<16x120xf32>
    %cst_70 = arith.constant 0.000000e+00 : f32
    %256 = vector.broadcast %cst_70 : f32 to vector<16x8xf32>
    %257 = tpu.concatenate %255, %256 in 1 : vector<16x120xf32>, vector<16x8xf32> -> vector<16x128xf32>
    %258 = arith.maximumf %254, %257 : vector<16x128xf32>
    %cst_71 = arith.constant dense<0.000000e+00> : vector<16x32xf32>
    %259 = tpu.matmul %258, %250, %cst_71 {dimension_numbers = #tpu.dot_dimension_numbers<[1], [0], [0], [1], [0, 0, 1, 1], [], []>} : vector<16x128xf32>, vector<128x32xf32>, vector<16x32xf32> -> vector<16x32xf32>
    %c0_72 = arith.constant 0 : index
    %c0_73 = arith.constant 0 : index
    %260 = vector.load %arg9[%c0_72, %c0_73] : memref<32x144xf32, #tpu.memory_space<vmem>>, vector<32x144xf32>
    %c0_74 = arith.constant 0 : index
    %c0_75 = arith.constant 0 : index
    %261 = vector.load %arg10[%c0_74, %c0_75] : memref<32x1xf32, #tpu.memory_space<vmem>>, vector<32x1xf32>
    %cst_76 = arith.constant 0.000000e+00 : f32
    %262 = vector.broadcast %cst_76 : f32 to vector<16x5xf32>
    %263 = vector.extract_strided_slice %259 {offsets = [0, 0], sizes = [16, 27], strides = [1, 1]} : vector<16x32xf32> to vector<16x27xf32>
    %264 = tpu.concatenate %262, %263 in 1 : vector<16x5xf32>, vector<16x27xf32> -> vector<16x32xf32>
    %265 = vector.extract_strided_slice %3 {offsets = [0, 0], sizes = [1, 32], strides = [1, 1]} : vector<9x32xf32> to vector<1x32xf32>
    %266 = vector.broadcast %265 : vector<1x32xf32> to vector<16x32xf32>
    %267 = arith.mulf %264, %266 : vector<16x32xf32>
    %cst_77 = arith.constant 0.000000e+00 : f32
    %268 = vector.broadcast %cst_77 : f32 to vector<16x4xf32>
    %269 = vector.extract_strided_slice %259 {offsets = [0, 0], sizes = [16, 28], strides = [1, 1]} : vector<16x32xf32> to vector<16x28xf32>
    %270 = tpu.concatenate %268, %269 in 1 : vector<16x4xf32>, vector<16x28xf32> -> vector<16x32xf32>
    %271 = vector.extract_strided_slice %3 {offsets = [1, 0], sizes = [1, 32], strides = [1, 1]} : vector<9x32xf32> to vector<1x32xf32>
    %272 = vector.broadcast %271 : vector<1x32xf32> to vector<16x32xf32>
    %273 = arith.mulf %270, %272 : vector<16x32xf32>
    %cst_78 = arith.constant 0.000000e+00 : f32
    %274 = vector.broadcast %cst_78 : f32 to vector<16x3xf32>
    %275 = vector.extract_strided_slice %259 {offsets = [0, 0], sizes = [16, 29], strides = [1, 1]} : vector<16x32xf32> to vector<16x29xf32>
    %276 = tpu.concatenate %274, %275 in 1 : vector<16x3xf32>, vector<16x29xf32> -> vector<16x32xf32>
    %277 = vector.extract_strided_slice %3 {offsets = [2, 0], sizes = [1, 32], strides = [1, 1]} : vector<9x32xf32> to vector<1x32xf32>
    %278 = vector.broadcast %277 : vector<1x32xf32> to vector<16x32xf32>
    %279 = arith.mulf %276, %278 : vector<16x32xf32>
    %cst_79 = arith.constant 0.000000e+00 : f32
    %280 = vector.broadcast %cst_79 : f32 to vector<16x1xf32>
    %281 = vector.extract_strided_slice %259 {offsets = [0, 0], sizes = [16, 31], strides = [1, 1]} : vector<16x32xf32> to vector<16x31xf32>
    %282 = tpu.concatenate %280, %281 in 1 : vector<16x1xf32>, vector<16x31xf32> -> vector<16x32xf32>
    %283 = vector.extract_strided_slice %3 {offsets = [3, 0], sizes = [1, 32], strides = [1, 1]} : vector<9x32xf32> to vector<1x32xf32>
    %284 = vector.broadcast %283 : vector<1x32xf32> to vector<16x32xf32>
    %285 = arith.mulf %282, %284 : vector<16x32xf32>
    %286 = vector.extract_strided_slice %3 {offsets = [4, 0], sizes = [1, 32], strides = [1, 1]} : vector<9x32xf32> to vector<1x32xf32>
    %287 = vector.broadcast %286 : vector<1x32xf32> to vector<16x32xf32>
    %288 = arith.mulf %259, %287 : vector<16x32xf32>
    %289 = vector.extract_strided_slice %259 {offsets = [0, 1], sizes = [16, 31], strides = [1, 1]} : vector<16x32xf32> to vector<16x31xf32>
    %cst_80 = arith.constant 0.000000e+00 : f32
    %290 = vector.broadcast %cst_80 : f32 to vector<16x1xf32>
    %291 = tpu.concatenate %289, %290 in 1 : vector<16x31xf32>, vector<16x1xf32> -> vector<16x32xf32>
    %292 = vector.extract_strided_slice %3 {offsets = [5, 0], sizes = [1, 32], strides = [1, 1]} : vector<9x32xf32> to vector<1x32xf32>
    %293 = vector.broadcast %292 : vector<1x32xf32> to vector<16x32xf32>
    %294 = arith.mulf %291, %293 : vector<16x32xf32>
    %295 = vector.extract_strided_slice %259 {offsets = [0, 3], sizes = [16, 29], strides = [1, 1]} : vector<16x32xf32> to vector<16x29xf32>
    %cst_81 = arith.constant 0.000000e+00 : f32
    %296 = vector.broadcast %cst_81 : f32 to vector<16x3xf32>
    %297 = tpu.concatenate %295, %296 in 1 : vector<16x29xf32>, vector<16x3xf32> -> vector<16x32xf32>
    %298 = vector.extract_strided_slice %3 {offsets = [6, 0], sizes = [1, 32], strides = [1, 1]} : vector<9x32xf32> to vector<1x32xf32>
    %299 = vector.broadcast %298 : vector<1x32xf32> to vector<16x32xf32>
    %300 = arith.mulf %297, %299 : vector<16x32xf32>
    %301 = vector.extract_strided_slice %259 {offsets = [0, 4], sizes = [16, 28], strides = [1, 1]} : vector<16x32xf32> to vector<16x28xf32>
    %cst_82 = arith.constant 0.000000e+00 : f32
    %302 = vector.broadcast %cst_82 : f32 to vector<16x4xf32>
    %303 = tpu.concatenate %301, %302 in 1 : vector<16x28xf32>, vector<16x4xf32> -> vector<16x32xf32>
    %304 = vector.extract_strided_slice %3 {offsets = [7, 0], sizes = [1, 32], strides = [1, 1]} : vector<9x32xf32> to vector<1x32xf32>
    %305 = vector.broadcast %304 : vector<1x32xf32> to vector<16x32xf32>
    %306 = arith.mulf %303, %305 : vector<16x32xf32>
    %307 = vector.extract_strided_slice %259 {offsets = [0, 5], sizes = [16, 27], strides = [1, 1]} : vector<16x32xf32> to vector<16x27xf32>
    %cst_83 = arith.constant 0.000000e+00 : f32
    %308 = vector.broadcast %cst_83 : f32 to vector<16x5xf32>
    %309 = tpu.concatenate %307, %308 in 1 : vector<16x27xf32>, vector<16x5xf32> -> vector<16x32xf32>
    %310 = vector.extract_strided_slice %3 {offsets = [8, 0], sizes = [1, 32], strides = [1, 1]} : vector<9x32xf32> to vector<1x32xf32>
    %311 = vector.broadcast %310 : vector<1x32xf32> to vector<16x32xf32>
    %312 = arith.mulf %309, %311 : vector<16x32xf32>
    %313 = tpu.concatenate %267, %273, %279, %285, %288, %294, %300, %306, %312 in 0 : vector<16x32xf32>, vector<16x32xf32>, vector<16x32xf32>, vector<16x32xf32>, vector<16x32xf32>, vector<16x32xf32>, vector<16x32xf32>, vector<16x32xf32>, vector<16x32xf32> -> vector<144x32xf32>
    %cst_84 = arith.constant dense<0.000000e+00> : vector<32x32xf32>
    %314 = tpu.matmul %260, %313, %cst_84 {dimension_numbers = #tpu.dot_dimension_numbers<[1], [0], [0], [1], [0, 0, 1, 1], [], []>} : vector<32x144xf32>, vector<144x32xf32>, vector<32x32xf32> -> vector<32x32xf32>
    %315 = vector.broadcast %261 : vector<32x1xf32> to vector<32x32xf32>
    %316 = arith.addf %314, %315 : vector<32x32xf32>
    %cst_85 = arith.constant 0.000000e+00 : f32
    %317 = vector.broadcast %cst_85 : f32 to vector<32x32xf32>
    %318 = arith.maximumf %316, %317 : vector<32x32xf32>
    %c0_86 = arith.constant 0 : index
    %c0_87 = arith.constant 0 : index
    %319 = vector.load %arg11[%c0_86, %c0_87] : memref<32x288xf32, #tpu.memory_space<vmem>>, vector<32x288xf32>
    %c0_88 = arith.constant 0 : index
    %c0_89 = arith.constant 0 : index
    %320 = vector.load %arg12[%c0_88, %c0_89] : memref<32x1xf32, #tpu.memory_space<vmem>>, vector<32x1xf32>
    %cst_90 = arith.constant 0.000000e+00 : f32
    %321 = vector.broadcast %cst_90 : f32 to vector<32x5xf32>
    %322 = vector.extract_strided_slice %318 {offsets = [0, 0], sizes = [32, 27], strides = [1, 1]} : vector<32x32xf32> to vector<32x27xf32>
    %323 = tpu.concatenate %321, %322 in 1 : vector<32x5xf32>, vector<32x27xf32> -> vector<32x32xf32>
    %324 = vector.extract_strided_slice %3 {offsets = [0, 0], sizes = [1, 32], strides = [1, 1]} : vector<9x32xf32> to vector<1x32xf32>
    %325 = vector.broadcast %324 : vector<1x32xf32> to vector<32x32xf32>
    %326 = arith.mulf %323, %325 : vector<32x32xf32>
    %cst_91 = arith.constant 0.000000e+00 : f32
    %327 = vector.broadcast %cst_91 : f32 to vector<32x4xf32>
    %328 = vector.extract_strided_slice %318 {offsets = [0, 0], sizes = [32, 28], strides = [1, 1]} : vector<32x32xf32> to vector<32x28xf32>
    %329 = tpu.concatenate %327, %328 in 1 : vector<32x4xf32>, vector<32x28xf32> -> vector<32x32xf32>
    %330 = vector.extract_strided_slice %3 {offsets = [1, 0], sizes = [1, 32], strides = [1, 1]} : vector<9x32xf32> to vector<1x32xf32>
    %331 = vector.broadcast %330 : vector<1x32xf32> to vector<32x32xf32>
    %332 = arith.mulf %329, %331 : vector<32x32xf32>
    %cst_92 = arith.constant 0.000000e+00 : f32
    %333 = vector.broadcast %cst_92 : f32 to vector<32x3xf32>
    %334 = vector.extract_strided_slice %318 {offsets = [0, 0], sizes = [32, 29], strides = [1, 1]} : vector<32x32xf32> to vector<32x29xf32>
    %335 = tpu.concatenate %333, %334 in 1 : vector<32x3xf32>, vector<32x29xf32> -> vector<32x32xf32>
    %336 = vector.extract_strided_slice %3 {offsets = [2, 0], sizes = [1, 32], strides = [1, 1]} : vector<9x32xf32> to vector<1x32xf32>
    %337 = vector.broadcast %336 : vector<1x32xf32> to vector<32x32xf32>
    %338 = arith.mulf %335, %337 : vector<32x32xf32>
    %cst_93 = arith.constant 0.000000e+00 : f32
    %339 = vector.broadcast %cst_93 : f32 to vector<32x1xf32>
    %340 = vector.extract_strided_slice %318 {offsets = [0, 0], sizes = [32, 31], strides = [1, 1]} : vector<32x32xf32> to vector<32x31xf32>
    %341 = tpu.concatenate %339, %340 in 1 : vector<32x1xf32>, vector<32x31xf32> -> vector<32x32xf32>
    %342 = vector.extract_strided_slice %3 {offsets = [3, 0], sizes = [1, 32], strides = [1, 1]} : vector<9x32xf32> to vector<1x32xf32>
    %343 = vector.broadcast %342 : vector<1x32xf32> to vector<32x32xf32>
    %344 = arith.mulf %341, %343 : vector<32x32xf32>
    %345 = vector.extract_strided_slice %3 {offsets = [4, 0], sizes = [1, 32], strides = [1, 1]} : vector<9x32xf32> to vector<1x32xf32>
    %346 = vector.broadcast %345 : vector<1x32xf32> to vector<32x32xf32>
    %347 = arith.mulf %318, %346 : vector<32x32xf32>
    %348 = vector.extract_strided_slice %318 {offsets = [0, 1], sizes = [32, 31], strides = [1, 1]} : vector<32x32xf32> to vector<32x31xf32>
    %cst_94 = arith.constant 0.000000e+00 : f32
    %349 = vector.broadcast %cst_94 : f32 to vector<32x1xf32>
    %350 = tpu.concatenate %348, %349 in 1 : vector<32x31xf32>, vector<32x1xf32> -> vector<32x32xf32>
    %351 = vector.extract_strided_slice %3 {offsets = [5, 0], sizes = [1, 32], strides = [1, 1]} : vector<9x32xf32> to vector<1x32xf32>
    %352 = vector.broadcast %351 : vector<1x32xf32> to vector<32x32xf32>
    %353 = arith.mulf %350, %352 : vector<32x32xf32>
    %354 = vector.extract_strided_slice %318 {offsets = [0, 3], sizes = [32, 29], strides = [1, 1]} : vector<32x32xf32> to vector<32x29xf32>
    %cst_95 = arith.constant 0.000000e+00 : f32
    %355 = vector.broadcast %cst_95 : f32 to vector<32x3xf32>
    %356 = tpu.concatenate %354, %355 in 1 : vector<32x29xf32>, vector<32x3xf32> -> vector<32x32xf32>
    %357 = vector.extract_strided_slice %3 {offsets = [6, 0], sizes = [1, 32], strides = [1, 1]} : vector<9x32xf32> to vector<1x32xf32>
    %358 = vector.broadcast %357 : vector<1x32xf32> to vector<32x32xf32>
    %359 = arith.mulf %356, %358 : vector<32x32xf32>
    %360 = vector.extract_strided_slice %318 {offsets = [0, 4], sizes = [32, 28], strides = [1, 1]} : vector<32x32xf32> to vector<32x28xf32>
    %cst_96 = arith.constant 0.000000e+00 : f32
    %361 = vector.broadcast %cst_96 : f32 to vector<32x4xf32>
    %362 = tpu.concatenate %360, %361 in 1 : vector<32x28xf32>, vector<32x4xf32> -> vector<32x32xf32>
    %363 = vector.extract_strided_slice %3 {offsets = [7, 0], sizes = [1, 32], strides = [1, 1]} : vector<9x32xf32> to vector<1x32xf32>
    %364 = vector.broadcast %363 : vector<1x32xf32> to vector<32x32xf32>
    %365 = arith.mulf %362, %364 : vector<32x32xf32>
    %366 = vector.extract_strided_slice %318 {offsets = [0, 5], sizes = [32, 27], strides = [1, 1]} : vector<32x32xf32> to vector<32x27xf32>
    %cst_97 = arith.constant 0.000000e+00 : f32
    %367 = vector.broadcast %cst_97 : f32 to vector<32x5xf32>
    %368 = tpu.concatenate %366, %367 in 1 : vector<32x27xf32>, vector<32x5xf32> -> vector<32x32xf32>
    %369 = vector.extract_strided_slice %3 {offsets = [8, 0], sizes = [1, 32], strides = [1, 1]} : vector<9x32xf32> to vector<1x32xf32>
    %370 = vector.broadcast %369 : vector<1x32xf32> to vector<32x32xf32>
    %371 = arith.mulf %368, %370 : vector<32x32xf32>
    %372 = tpu.concatenate %326, %332, %338, %344, %347, %353, %359, %365, %371 in 0 : vector<32x32xf32>, vector<32x32xf32>, vector<32x32xf32>, vector<32x32xf32>, vector<32x32xf32>, vector<32x32xf32>, vector<32x32xf32>, vector<32x32xf32>, vector<32x32xf32> -> vector<288x32xf32>
    %cst_98 = arith.constant dense<0.000000e+00> : vector<32x32xf32>
    %373 = tpu.matmul %319, %372, %cst_98 {dimension_numbers = #tpu.dot_dimension_numbers<[1], [0], [0], [1], [0, 0, 1, 1], [], []>} : vector<32x288xf32>, vector<288x32xf32>, vector<32x32xf32> -> vector<32x32xf32>
    %374 = vector.broadcast %320 : vector<32x1xf32> to vector<32x32xf32>
    %375 = arith.addf %373, %374 : vector<32x32xf32>
    %cst_99 = arith.constant 0.000000e+00 : f32
    %376 = vector.broadcast %cst_99 : f32 to vector<32x32xf32>
    %377 = arith.maximumf %375, %376 : vector<32x32xf32>
    %c0_100 = arith.constant 0 : index
    %c0_101 = arith.constant 0 : index
    %378 = vector.load %arg14[%c0_100, %c0_101] : memref<16x1xf32, #tpu.memory_space<vmem>>, vector<16x1xf32>
    %c0_102 = arith.constant 0 : index
    %c0_103 = arith.constant 0 : index
    %c0_104 = arith.constant 0 : index
    %379 = vector.load %arg13[%c0_102, %c0_103, %c0_104] : memref<4x16x32xf32, #tpu.memory_space<vmem>>, vector<1x16x32xf32>
    %380 = vector.shape_cast %379 : vector<1x16x32xf32> to vector<16x32xf32>
    %cst_105 = arith.constant dense<0.000000e+00> : vector<16x32xf32>
    %381 = tpu.matmul %380, %377, %cst_105 {dimension_numbers = #tpu.dot_dimension_numbers<[1], [0], [0], [1], [0, 0, 1, 1], [], []>} : vector<16x32xf32>, vector<32x32xf32>, vector<16x32xf32> -> vector<16x32xf32>
    %c0_106 = arith.constant 0 : index
    %c0_107 = arith.constant 0 : index
    %c0_108 = arith.constant 0 : index
    %382 = vector.load %arg37[%c0_106, %c0_107, %c0_108] : memref<4x32x128xf32, #tpu.memory_space<vmem>>, vector<1x32x128xf32>
    %383 = vector.shape_cast %382 : vector<1x32x128xf32> to vector<32x128xf32>
    %cst_109 = arith.constant dense<0.000000e+00> : vector<16x128xf32>
    %384 = tpu.matmul %381, %383, %cst_109 {dimension_numbers = #tpu.dot_dimension_numbers<[1], [0], [0], [1], [0, 0, 1, 1], [], []>} : vector<16x32xf32>, vector<32x128xf32>, vector<16x128xf32> -> vector<16x128xf32>
    %c1 = arith.constant 1 : index
    %c0_110 = arith.constant 0 : index
    %c0_111 = arith.constant 0 : index
    %385 = vector.load %arg13[%c1, %c0_110, %c0_111] : memref<4x16x32xf32, #tpu.memory_space<vmem>>, vector<1x16x32xf32>
    %386 = vector.shape_cast %385 : vector<1x16x32xf32> to vector<16x32xf32>
    %cst_112 = arith.constant dense<0.000000e+00> : vector<16x32xf32>
    %387 = tpu.matmul %386, %377, %cst_112 {dimension_numbers = #tpu.dot_dimension_numbers<[1], [0], [0], [1], [0, 0, 1, 1], [], []>} : vector<16x32xf32>, vector<32x32xf32>, vector<16x32xf32> -> vector<16x32xf32>
    %c1_113 = arith.constant 1 : index
    %c0_114 = arith.constant 0 : index
    %c0_115 = arith.constant 0 : index
    %388 = vector.load %arg37[%c1_113, %c0_114, %c0_115] : memref<4x32x128xf32, #tpu.memory_space<vmem>>, vector<1x32x128xf32>
    %389 = vector.shape_cast %388 : vector<1x32x128xf32> to vector<32x128xf32>
    %cst_116 = arith.constant dense<0.000000e+00> : vector<16x128xf32>
    %390 = tpu.matmul %387, %389, %cst_116 {dimension_numbers = #tpu.dot_dimension_numbers<[1], [0], [0], [1], [0, 0, 1, 1], [], []>} : vector<16x32xf32>, vector<32x128xf32>, vector<16x128xf32> -> vector<16x128xf32>
    %391 = arith.addf %384, %390 : vector<16x128xf32>
    %c2 = arith.constant 2 : index
    %c0_117 = arith.constant 0 : index
    %c0_118 = arith.constant 0 : index
    %392 = vector.load %arg13[%c2, %c0_117, %c0_118] : memref<4x16x32xf32, #tpu.memory_space<vmem>>, vector<1x16x32xf32>
    %393 = vector.shape_cast %392 : vector<1x16x32xf32> to vector<16x32xf32>
    %cst_119 = arith.constant dense<0.000000e+00> : vector<16x32xf32>
    %394 = tpu.matmul %393, %377, %cst_119 {dimension_numbers = #tpu.dot_dimension_numbers<[1], [0], [0], [1], [0, 0, 1, 1], [], []>} : vector<16x32xf32>, vector<32x32xf32>, vector<16x32xf32> -> vector<16x32xf32>
    %c2_120 = arith.constant 2 : index
    %c0_121 = arith.constant 0 : index
    %c0_122 = arith.constant 0 : index
    %395 = vector.load %arg37[%c2_120, %c0_121, %c0_122] : memref<4x32x128xf32, #tpu.memory_space<vmem>>, vector<1x32x128xf32>
    %396 = vector.shape_cast %395 : vector<1x32x128xf32> to vector<32x128xf32>
    %cst_123 = arith.constant dense<0.000000e+00> : vector<16x128xf32>
    %397 = tpu.matmul %394, %396, %cst_123 {dimension_numbers = #tpu.dot_dimension_numbers<[1], [0], [0], [1], [0, 0, 1, 1], [], []>} : vector<16x32xf32>, vector<32x128xf32>, vector<16x128xf32> -> vector<16x128xf32>
    %398 = arith.addf %391, %397 : vector<16x128xf32>
    %c3 = arith.constant 3 : index
    %c0_124 = arith.constant 0 : index
    %c0_125 = arith.constant 0 : index
    %399 = vector.load %arg13[%c3, %c0_124, %c0_125] : memref<4x16x32xf32, #tpu.memory_space<vmem>>, vector<1x16x32xf32>
    %400 = vector.shape_cast %399 : vector<1x16x32xf32> to vector<16x32xf32>
    %cst_126 = arith.constant dense<0.000000e+00> : vector<16x32xf32>
    %401 = tpu.matmul %400, %377, %cst_126 {dimension_numbers = #tpu.dot_dimension_numbers<[1], [0], [0], [1], [0, 0, 1, 1], [], []>} : vector<16x32xf32>, vector<32x32xf32>, vector<16x32xf32> -> vector<16x32xf32>
    %c3_127 = arith.constant 3 : index
    %c0_128 = arith.constant 0 : index
    %c0_129 = arith.constant 0 : index
    %402 = vector.load %arg37[%c3_127, %c0_128, %c0_129] : memref<4x32x128xf32, #tpu.memory_space<vmem>>, vector<1x32x128xf32>
    %403 = vector.shape_cast %402 : vector<1x32x128xf32> to vector<32x128xf32>
    %cst_130 = arith.constant dense<0.000000e+00> : vector<16x128xf32>
    %404 = tpu.matmul %401, %403, %cst_130 {dimension_numbers = #tpu.dot_dimension_numbers<[1], [0], [0], [1], [0, 0, 1, 1], [], []>} : vector<16x32xf32>, vector<32x128xf32>, vector<16x128xf32> -> vector<16x128xf32>
    %405 = arith.addf %398, %404 : vector<16x128xf32>
    %406 = vector.broadcast %378 : vector<16x1xf32> to vector<16x128xf32>
    %407 = arith.addf %405, %406 : vector<16x128xf32>
    %c0_131 = arith.constant 0 : index
    %c0_132 = arith.constant 0 : index
    %408 = vector.load %arg15[%c0_131, %c0_132] : memref<16x144xf32, #tpu.memory_space<vmem>>, vector<16x144xf32>
    %c0_133 = arith.constant 0 : index
    %c0_134 = arith.constant 0 : index
    %409 = vector.load %arg16[%c0_133, %c0_134] : memref<16x144xf32, #tpu.memory_space<vmem>>, vector<16x144xf32>
    %c0_135 = arith.constant 0 : index
    %c0_136 = arith.constant 0 : index
    %410 = vector.load %arg17[%c0_135, %c0_136] : memref<16x1xf32, #tpu.memory_space<vmem>>, vector<16x1xf32>
    %cst_137 = arith.constant 0.000000e+00 : f32
    %411 = vector.broadcast %cst_137 : f32 to vector<16x9xf32>
    %412 = vector.extract_strided_slice %407 {offsets = [0, 0], sizes = [16, 119], strides = [1, 1]} : vector<16x128xf32> to vector<16x119xf32>
    %413 = tpu.concatenate %411, %412 in 1 : vector<16x9xf32>, vector<16x119xf32> -> vector<16x128xf32>
    %414 = vector.extract_strided_slice %2 {offsets = [0, 0], sizes = [1, 128], strides = [1, 1]} : vector<9x128xf32> to vector<1x128xf32>
    %415 = vector.broadcast %414 : vector<1x128xf32> to vector<16x128xf32>
    %416 = arith.mulf %413, %415 : vector<16x128xf32>
    %cst_138 = arith.constant 0.000000e+00 : f32
    %417 = vector.broadcast %cst_138 : f32 to vector<16x8xf32>
    %418 = vector.extract_strided_slice %407 {offsets = [0, 0], sizes = [16, 120], strides = [1, 1]} : vector<16x128xf32> to vector<16x120xf32>
    %419 = tpu.concatenate %417, %418 in 1 : vector<16x8xf32>, vector<16x120xf32> -> vector<16x128xf32>
    %420 = vector.extract_strided_slice %2 {offsets = [1, 0], sizes = [1, 128], strides = [1, 1]} : vector<9x128xf32> to vector<1x128xf32>
    %421 = vector.broadcast %420 : vector<1x128xf32> to vector<16x128xf32>
    %422 = arith.mulf %419, %421 : vector<16x128xf32>
    %cst_139 = arith.constant 0.000000e+00 : f32
    %423 = vector.broadcast %cst_139 : f32 to vector<16x7xf32>
    %424 = vector.extract_strided_slice %407 {offsets = [0, 0], sizes = [16, 121], strides = [1, 1]} : vector<16x128xf32> to vector<16x121xf32>
    %425 = tpu.concatenate %423, %424 in 1 : vector<16x7xf32>, vector<16x121xf32> -> vector<16x128xf32>
    %426 = vector.extract_strided_slice %2 {offsets = [2, 0], sizes = [1, 128], strides = [1, 1]} : vector<9x128xf32> to vector<1x128xf32>
    %427 = vector.broadcast %426 : vector<1x128xf32> to vector<16x128xf32>
    %428 = arith.mulf %425, %427 : vector<16x128xf32>
    %cst_140 = arith.constant 0.000000e+00 : f32
    %429 = vector.broadcast %cst_140 : f32 to vector<16x1xf32>
    %430 = vector.extract_strided_slice %407 {offsets = [0, 0], sizes = [16, 127], strides = [1, 1]} : vector<16x128xf32> to vector<16x127xf32>
    %431 = tpu.concatenate %429, %430 in 1 : vector<16x1xf32>, vector<16x127xf32> -> vector<16x128xf32>
    %432 = vector.extract_strided_slice %2 {offsets = [3, 0], sizes = [1, 128], strides = [1, 1]} : vector<9x128xf32> to vector<1x128xf32>
    %433 = vector.broadcast %432 : vector<1x128xf32> to vector<16x128xf32>
    %434 = arith.mulf %431, %433 : vector<16x128xf32>
    %435 = vector.extract_strided_slice %2 {offsets = [4, 0], sizes = [1, 128], strides = [1, 1]} : vector<9x128xf32> to vector<1x128xf32>
    %436 = vector.broadcast %435 : vector<1x128xf32> to vector<16x128xf32>
    %437 = arith.mulf %407, %436 : vector<16x128xf32>
    %438 = vector.extract_strided_slice %407 {offsets = [0, 1], sizes = [16, 127], strides = [1, 1]} : vector<16x128xf32> to vector<16x127xf32>
    %cst_141 = arith.constant 0.000000e+00 : f32
    %439 = vector.broadcast %cst_141 : f32 to vector<16x1xf32>
    %440 = tpu.concatenate %438, %439 in 1 : vector<16x127xf32>, vector<16x1xf32> -> vector<16x128xf32>
    %441 = vector.extract_strided_slice %2 {offsets = [5, 0], sizes = [1, 128], strides = [1, 1]} : vector<9x128xf32> to vector<1x128xf32>
    %442 = vector.broadcast %441 : vector<1x128xf32> to vector<16x128xf32>
    %443 = arith.mulf %440, %442 : vector<16x128xf32>
    %444 = vector.extract_strided_slice %407 {offsets = [0, 7], sizes = [16, 121], strides = [1, 1]} : vector<16x128xf32> to vector<16x121xf32>
    %cst_142 = arith.constant 0.000000e+00 : f32
    %445 = vector.broadcast %cst_142 : f32 to vector<16x7xf32>
    %446 = tpu.concatenate %444, %445 in 1 : vector<16x121xf32>, vector<16x7xf32> -> vector<16x128xf32>
    %447 = vector.extract_strided_slice %2 {offsets = [6, 0], sizes = [1, 128], strides = [1, 1]} : vector<9x128xf32> to vector<1x128xf32>
    %448 = vector.broadcast %447 : vector<1x128xf32> to vector<16x128xf32>
    %449 = arith.mulf %446, %448 : vector<16x128xf32>
    %450 = vector.extract_strided_slice %407 {offsets = [0, 8], sizes = [16, 120], strides = [1, 1]} : vector<16x128xf32> to vector<16x120xf32>
    %cst_143 = arith.constant 0.000000e+00 : f32
    %451 = vector.broadcast %cst_143 : f32 to vector<16x8xf32>
    %452 = tpu.concatenate %450, %451 in 1 : vector<16x120xf32>, vector<16x8xf32> -> vector<16x128xf32>
    %453 = vector.extract_strided_slice %2 {offsets = [7, 0], sizes = [1, 128], strides = [1, 1]} : vector<9x128xf32> to vector<1x128xf32>
    %454 = vector.broadcast %453 : vector<1x128xf32> to vector<16x128xf32>
    %455 = arith.mulf %452, %454 : vector<16x128xf32>
    %456 = vector.extract_strided_slice %407 {offsets = [0, 9], sizes = [16, 119], strides = [1, 1]} : vector<16x128xf32> to vector<16x119xf32>
    %cst_144 = arith.constant 0.000000e+00 : f32
    %457 = vector.broadcast %cst_144 : f32 to vector<16x9xf32>
    %458 = tpu.concatenate %456, %457 in 1 : vector<16x119xf32>, vector<16x9xf32> -> vector<16x128xf32>
    %459 = vector.extract_strided_slice %2 {offsets = [8, 0], sizes = [1, 128], strides = [1, 1]} : vector<9x128xf32> to vector<1x128xf32>
    %460 = vector.broadcast %459 : vector<1x128xf32> to vector<16x128xf32>
    %461 = arith.mulf %458, %460 : vector<16x128xf32>
    %462 = tpu.concatenate %416, %422, %428, %434, %437, %443, %449, %455, %461 in 0 : vector<16x128xf32>, vector<16x128xf32>, vector<16x128xf32>, vector<16x128xf32>, vector<16x128xf32>, vector<16x128xf32>, vector<16x128xf32>, vector<16x128xf32>, vector<16x128xf32> -> vector<144x128xf32>
    %cst_145 = arith.constant dense<0.000000e+00> : vector<16x128xf32>
    %463 = tpu.matmul %408, %462, %cst_145 {dimension_numbers = #tpu.dot_dimension_numbers<[1], [0], [0], [1], [0, 0, 1, 1], [], []>} : vector<16x144xf32>, vector<144x128xf32>, vector<16x128xf32> -> vector<16x128xf32>
    %cst_146 = arith.constant 0.000000e+00 : f32
    %464 = vector.broadcast %cst_146 : f32 to vector<16x9xf32>
    %465 = vector.extract_strided_slice %249 {offsets = [0, 0], sizes = [16, 119], strides = [1, 1]} : vector<16x128xf32> to vector<16x119xf32>
    %466 = tpu.concatenate %464, %465 in 1 : vector<16x9xf32>, vector<16x119xf32> -> vector<16x128xf32>
    %467 = vector.extract_strided_slice %2 {offsets = [0, 0], sizes = [1, 128], strides = [1, 1]} : vector<9x128xf32> to vector<1x128xf32>
    %468 = vector.broadcast %467 : vector<1x128xf32> to vector<16x128xf32>
    %469 = arith.mulf %466, %468 : vector<16x128xf32>
    %cst_147 = arith.constant 0.000000e+00 : f32
    %470 = vector.broadcast %cst_147 : f32 to vector<16x8xf32>
    %471 = vector.extract_strided_slice %249 {offsets = [0, 0], sizes = [16, 120], strides = [1, 1]} : vector<16x128xf32> to vector<16x120xf32>
    %472 = tpu.concatenate %470, %471 in 1 : vector<16x8xf32>, vector<16x120xf32> -> vector<16x128xf32>
    %473 = vector.extract_strided_slice %2 {offsets = [1, 0], sizes = [1, 128], strides = [1, 1]} : vector<9x128xf32> to vector<1x128xf32>
    %474 = vector.broadcast %473 : vector<1x128xf32> to vector<16x128xf32>
    %475 = arith.mulf %472, %474 : vector<16x128xf32>
    %cst_148 = arith.constant 0.000000e+00 : f32
    %476 = vector.broadcast %cst_148 : f32 to vector<16x7xf32>
    %477 = vector.extract_strided_slice %249 {offsets = [0, 0], sizes = [16, 121], strides = [1, 1]} : vector<16x128xf32> to vector<16x121xf32>
    %478 = tpu.concatenate %476, %477 in 1 : vector<16x7xf32>, vector<16x121xf32> -> vector<16x128xf32>
    %479 = vector.extract_strided_slice %2 {offsets = [2, 0], sizes = [1, 128], strides = [1, 1]} : vector<9x128xf32> to vector<1x128xf32>
    %480 = vector.broadcast %479 : vector<1x128xf32> to vector<16x128xf32>
    %481 = arith.mulf %478, %480 : vector<16x128xf32>
    %cst_149 = arith.constant 0.000000e+00 : f32
    %482 = vector.broadcast %cst_149 : f32 to vector<16x1xf32>
    %483 = vector.extract_strided_slice %249 {offsets = [0, 0], sizes = [16, 127], strides = [1, 1]} : vector<16x128xf32> to vector<16x127xf32>
    %484 = tpu.concatenate %482, %483 in 1 : vector<16x1xf32>, vector<16x127xf32> -> vector<16x128xf32>
    %485 = vector.extract_strided_slice %2 {offsets = [3, 0], sizes = [1, 128], strides = [1, 1]} : vector<9x128xf32> to vector<1x128xf32>
    %486 = vector.broadcast %485 : vector<1x128xf32> to vector<16x128xf32>
    %487 = arith.mulf %484, %486 : vector<16x128xf32>
    %488 = vector.extract_strided_slice %2 {offsets = [4, 0], sizes = [1, 128], strides = [1, 1]} : vector<9x128xf32> to vector<1x128xf32>
    %489 = vector.broadcast %488 : vector<1x128xf32> to vector<16x128xf32>
    %490 = arith.mulf %249, %489 : vector<16x128xf32>
    %491 = vector.extract_strided_slice %249 {offsets = [0, 1], sizes = [16, 127], strides = [1, 1]} : vector<16x128xf32> to vector<16x127xf32>
    %cst_150 = arith.constant 0.000000e+00 : f32
    %492 = vector.broadcast %cst_150 : f32 to vector<16x1xf32>
    %493 = tpu.concatenate %491, %492 in 1 : vector<16x127xf32>, vector<16x1xf32> -> vector<16x128xf32>
    %494 = vector.extract_strided_slice %2 {offsets = [5, 0], sizes = [1, 128], strides = [1, 1]} : vector<9x128xf32> to vector<1x128xf32>
    %495 = vector.broadcast %494 : vector<1x128xf32> to vector<16x128xf32>
    %496 = arith.mulf %493, %495 : vector<16x128xf32>
    %497 = vector.extract_strided_slice %249 {offsets = [0, 7], sizes = [16, 121], strides = [1, 1]} : vector<16x128xf32> to vector<16x121xf32>
    %cst_151 = arith.constant 0.000000e+00 : f32
    %498 = vector.broadcast %cst_151 : f32 to vector<16x7xf32>
    %499 = tpu.concatenate %497, %498 in 1 : vector<16x121xf32>, vector<16x7xf32> -> vector<16x128xf32>
    %500 = vector.extract_strided_slice %2 {offsets = [6, 0], sizes = [1, 128], strides = [1, 1]} : vector<9x128xf32> to vector<1x128xf32>
    %501 = vector.broadcast %500 : vector<1x128xf32> to vector<16x128xf32>
    %502 = arith.mulf %499, %501 : vector<16x128xf32>
    %503 = vector.extract_strided_slice %249 {offsets = [0, 8], sizes = [16, 120], strides = [1, 1]} : vector<16x128xf32> to vector<16x120xf32>
    %cst_152 = arith.constant 0.000000e+00 : f32
    %504 = vector.broadcast %cst_152 : f32 to vector<16x8xf32>
    %505 = tpu.concatenate %503, %504 in 1 : vector<16x120xf32>, vector<16x8xf32> -> vector<16x128xf32>
    %506 = vector.extract_strided_slice %2 {offsets = [7, 0], sizes = [1, 128], strides = [1, 1]} : vector<9x128xf32> to vector<1x128xf32>
    %507 = vector.broadcast %506 : vector<1x128xf32> to vector<16x128xf32>
    %508 = arith.mulf %505, %507 : vector<16x128xf32>
    %509 = vector.extract_strided_slice %249 {offsets = [0, 9], sizes = [16, 119], strides = [1, 1]} : vector<16x128xf32> to vector<16x119xf32>
    %cst_153 = arith.constant 0.000000e+00 : f32
    %510 = vector.broadcast %cst_153 : f32 to vector<16x9xf32>
    %511 = tpu.concatenate %509, %510 in 1 : vector<16x119xf32>, vector<16x9xf32> -> vector<16x128xf32>
    %512 = vector.extract_strided_slice %2 {offsets = [8, 0], sizes = [1, 128], strides = [1, 1]} : vector<9x128xf32> to vector<1x128xf32>
    %513 = vector.broadcast %512 : vector<1x128xf32> to vector<16x128xf32>
    %514 = arith.mulf %511, %513 : vector<16x128xf32>
    %515 = tpu.concatenate %469, %475, %481, %487, %490, %496, %502, %508, %514 in 0 : vector<16x128xf32>, vector<16x128xf32>, vector<16x128xf32>, vector<16x128xf32>, vector<16x128xf32>, vector<16x128xf32>, vector<16x128xf32>, vector<16x128xf32>, vector<16x128xf32> -> vector<144x128xf32>
    %cst_154 = arith.constant dense<0.000000e+00> : vector<16x128xf32>
    %516 = tpu.matmul %409, %515, %cst_154 {dimension_numbers = #tpu.dot_dimension_numbers<[1], [0], [0], [1], [0, 0, 1, 1], [], []>} : vector<16x144xf32>, vector<144x128xf32>, vector<16x128xf32> -> vector<16x128xf32>
    %517 = arith.addf %463, %516 : vector<16x128xf32>
    %518 = vector.broadcast %410 : vector<16x1xf32> to vector<16x128xf32>
    %519 = arith.addf %517, %518 : vector<16x128xf32>
    %cst_155 = arith.constant 0.000000e+00 : f32
    %520 = vector.broadcast %cst_155 : f32 to vector<16x128xf32>
    %521 = arith.maximumf %519, %520 : vector<16x128xf32>
    %c0_156 = arith.constant 0 : index
    %c0_157 = arith.constant 0 : index
    %522 = vector.load %arg18[%c0_156, %c0_157] : memref<16x144xf32, #tpu.memory_space<vmem>>, vector<16x144xf32>
    %c0_158 = arith.constant 0 : index
    %c0_159 = arith.constant 0 : index
    %523 = vector.load %arg19[%c0_158, %c0_159] : memref<16x1xf32, #tpu.memory_space<vmem>>, vector<16x1xf32>
    %cst_160 = arith.constant 0.000000e+00 : f32
    %524 = vector.broadcast %cst_160 : f32 to vector<16x9xf32>
    %525 = vector.extract_strided_slice %521 {offsets = [0, 0], sizes = [16, 119], strides = [1, 1]} : vector<16x128xf32> to vector<16x119xf32>
    %526 = tpu.concatenate %524, %525 in 1 : vector<16x9xf32>, vector<16x119xf32> -> vector<16x128xf32>
    %527 = vector.extract_strided_slice %2 {offsets = [0, 0], sizes = [1, 128], strides = [1, 1]} : vector<9x128xf32> to vector<1x128xf32>
    %528 = vector.broadcast %527 : vector<1x128xf32> to vector<16x128xf32>
    %529 = arith.mulf %526, %528 : vector<16x128xf32>
    %cst_161 = arith.constant 0.000000e+00 : f32
    %530 = vector.broadcast %cst_161 : f32 to vector<16x8xf32>
    %531 = vector.extract_strided_slice %521 {offsets = [0, 0], sizes = [16, 120], strides = [1, 1]} : vector<16x128xf32> to vector<16x120xf32>
    %532 = tpu.concatenate %530, %531 in 1 : vector<16x8xf32>, vector<16x120xf32> -> vector<16x128xf32>
    %533 = vector.extract_strided_slice %2 {offsets = [1, 0], sizes = [1, 128], strides = [1, 1]} : vector<9x128xf32> to vector<1x128xf32>
    %534 = vector.broadcast %533 : vector<1x128xf32> to vector<16x128xf32>
    %535 = arith.mulf %532, %534 : vector<16x128xf32>
    %cst_162 = arith.constant 0.000000e+00 : f32
    %536 = vector.broadcast %cst_162 : f32 to vector<16x7xf32>
    %537 = vector.extract_strided_slice %521 {offsets = [0, 0], sizes = [16, 121], strides = [1, 1]} : vector<16x128xf32> to vector<16x121xf32>
    %538 = tpu.concatenate %536, %537 in 1 : vector<16x7xf32>, vector<16x121xf32> -> vector<16x128xf32>
    %539 = vector.extract_strided_slice %2 {offsets = [2, 0], sizes = [1, 128], strides = [1, 1]} : vector<9x128xf32> to vector<1x128xf32>
    %540 = vector.broadcast %539 : vector<1x128xf32> to vector<16x128xf32>
    %541 = arith.mulf %538, %540 : vector<16x128xf32>
    %cst_163 = arith.constant 0.000000e+00 : f32
    %542 = vector.broadcast %cst_163 : f32 to vector<16x1xf32>
    %543 = vector.extract_strided_slice %521 {offsets = [0, 0], sizes = [16, 127], strides = [1, 1]} : vector<16x128xf32> to vector<16x127xf32>
    %544 = tpu.concatenate %542, %543 in 1 : vector<16x1xf32>, vector<16x127xf32> -> vector<16x128xf32>
    %545 = vector.extract_strided_slice %2 {offsets = [3, 0], sizes = [1, 128], strides = [1, 1]} : vector<9x128xf32> to vector<1x128xf32>
    %546 = vector.broadcast %545 : vector<1x128xf32> to vector<16x128xf32>
    %547 = arith.mulf %544, %546 : vector<16x128xf32>
    %548 = vector.extract_strided_slice %2 {offsets = [4, 0], sizes = [1, 128], strides = [1, 1]} : vector<9x128xf32> to vector<1x128xf32>
    %549 = vector.broadcast %548 : vector<1x128xf32> to vector<16x128xf32>
    %550 = arith.mulf %521, %549 : vector<16x128xf32>
    %551 = vector.extract_strided_slice %521 {offsets = [0, 1], sizes = [16, 127], strides = [1, 1]} : vector<16x128xf32> to vector<16x127xf32>
    %cst_164 = arith.constant 0.000000e+00 : f32
    %552 = vector.broadcast %cst_164 : f32 to vector<16x1xf32>
    %553 = tpu.concatenate %551, %552 in 1 : vector<16x127xf32>, vector<16x1xf32> -> vector<16x128xf32>
    %554 = vector.extract_strided_slice %2 {offsets = [5, 0], sizes = [1, 128], strides = [1, 1]} : vector<9x128xf32> to vector<1x128xf32>
    %555 = vector.broadcast %554 : vector<1x128xf32> to vector<16x128xf32>
    %556 = arith.mulf %553, %555 : vector<16x128xf32>
    %557 = vector.extract_strided_slice %521 {offsets = [0, 7], sizes = [16, 121], strides = [1, 1]} : vector<16x128xf32> to vector<16x121xf32>
    %cst_165 = arith.constant 0.000000e+00 : f32
    %558 = vector.broadcast %cst_165 : f32 to vector<16x7xf32>
    %559 = tpu.concatenate %557, %558 in 1 : vector<16x121xf32>, vector<16x7xf32> -> vector<16x128xf32>
    %560 = vector.extract_strided_slice %2 {offsets = [6, 0], sizes = [1, 128], strides = [1, 1]} : vector<9x128xf32> to vector<1x128xf32>
    %561 = vector.broadcast %560 : vector<1x128xf32> to vector<16x128xf32>
    %562 = arith.mulf %559, %561 : vector<16x128xf32>
    %563 = vector.extract_strided_slice %521 {offsets = [0, 8], sizes = [16, 120], strides = [1, 1]} : vector<16x128xf32> to vector<16x120xf32>
    %cst_166 = arith.constant 0.000000e+00 : f32
    %564 = vector.broadcast %cst_166 : f32 to vector<16x8xf32>
    %565 = tpu.concatenate %563, %564 in 1 : vector<16x120xf32>, vector<16x8xf32> -> vector<16x128xf32>
    %566 = vector.extract_strided_slice %2 {offsets = [7, 0], sizes = [1, 128], strides = [1, 1]} : vector<9x128xf32> to vector<1x128xf32>
    %567 = vector.broadcast %566 : vector<1x128xf32> to vector<16x128xf32>
    %568 = arith.mulf %565, %567 : vector<16x128xf32>
    %569 = vector.extract_strided_slice %521 {offsets = [0, 9], sizes = [16, 119], strides = [1, 1]} : vector<16x128xf32> to vector<16x119xf32>
    %cst_167 = arith.constant 0.000000e+00 : f32
    %570 = vector.broadcast %cst_167 : f32 to vector<16x9xf32>
    %571 = tpu.concatenate %569, %570 in 1 : vector<16x119xf32>, vector<16x9xf32> -> vector<16x128xf32>
    %572 = vector.extract_strided_slice %2 {offsets = [8, 0], sizes = [1, 128], strides = [1, 1]} : vector<9x128xf32> to vector<1x128xf32>
    %573 = vector.broadcast %572 : vector<1x128xf32> to vector<16x128xf32>
    %574 = arith.mulf %571, %573 : vector<16x128xf32>
    %575 = tpu.concatenate %529, %535, %541, %547, %550, %556, %562, %568, %574 in 0 : vector<16x128xf32>, vector<16x128xf32>, vector<16x128xf32>, vector<16x128xf32>, vector<16x128xf32>, vector<16x128xf32>, vector<16x128xf32>, vector<16x128xf32>, vector<16x128xf32> -> vector<144x128xf32>
    %cst_168 = arith.constant dense<0.000000e+00> : vector<16x128xf32>
    %576 = tpu.matmul %522, %575, %cst_168 {dimension_numbers = #tpu.dot_dimension_numbers<[1], [0], [0], [1], [0, 0, 1, 1], [], []>} : vector<16x144xf32>, vector<144x128xf32>, vector<16x128xf32> -> vector<16x128xf32>
    %577 = vector.broadcast %523 : vector<16x1xf32> to vector<16x128xf32>
    %578 = arith.addf %576, %577 : vector<16x128xf32>
    %cst_169 = arith.constant 0.000000e+00 : f32
    %579 = vector.broadcast %cst_169 : f32 to vector<16x128xf32>
    %580 = arith.maximumf %578, %579 : vector<16x128xf32>
    %581 = vector.extract_strided_slice %580 {offsets = [0, 0], sizes = [16, 64], strides = [1, 1]} : vector<16x128xf32> to vector<16x64xf32>
    %582 = vector.extract_strided_slice %580 {offsets = [0, 64], sizes = [16, 64], strides = [1, 1]} : vector<16x128xf32> to vector<16x64xf32>
    %583 = arith.addf %581, %582 : vector<16x64xf32>
    %cst_170 = arith.constant 5.000000e-01 : f32
    %584 = vector.broadcast %cst_170 : f32 to vector<16x64xf32>
    %585 = arith.mulf %583, %584 : vector<16x64xf32>
    %c0_171 = arith.constant 0 : index
    %c0_172 = arith.constant 0 : index
    %586 = vector.load %arg21[%c0_171, %c0_172] : memref<8x16xf32, #tpu.memory_space<vmem>>, vector<8x16xf32>
    %cst_173 = arith.constant dense<0.000000e+00> : vector<8x64xf32>
    %587 = tpu.matmul %586, %585, %cst_173 {dimension_numbers = #tpu.dot_dimension_numbers<[1], [0], [0], [1], [0, 0, 1, 1], [], []>} : vector<8x16xf32>, vector<16x64xf32>, vector<8x64xf32> -> vector<8x64xf32>
    %c0_174 = arith.constant 0 : index
    %c0_175 = arith.constant 0 : index
    %588 = vector.load %arg20[%c0_174, %c0_175] : memref<8x16xf32, #tpu.memory_space<vmem>>, vector<8x16xf32>
    %cst_176 = arith.constant dense<0.000000e+00> : vector<8x128xf32>
    %589 = tpu.matmul %588, %580, %cst_176 {dimension_numbers = #tpu.dot_dimension_numbers<[1], [0], [0], [1], [0, 0, 1, 1], [], []>} : vector<8x16xf32>, vector<16x128xf32>, vector<8x128xf32> -> vector<8x128xf32>
    %c0_177 = arith.constant 0 : index
    %c0_178 = arith.constant 0 : index
    %590 = vector.load %arg22[%c0_177, %c0_178] : memref<8x1xf32, #tpu.memory_space<vmem>>, vector<8x1xf32>
    %591 = vector.broadcast %590 : vector<8x1xf32> to vector<8x128xf32>
    %592 = arith.addf %589, %591 : vector<8x128xf32>
    %593 = tpu.concatenate %587, %587 in 1 : vector<8x64xf32>, vector<8x64xf32> -> vector<8x128xf32>
    %594 = arith.addf %592, %593 : vector<8x128xf32>
    %c0_179 = arith.constant 0 : index
    %c0_180 = arith.constant 0 : index
    %595 = vector.load %arg24[%c0_179, %c0_180] : memref<8x1xf32, #tpu.memory_space<vmem>>, vector<8x1xf32>
    %c0_181 = arith.constant 0 : index
    %c0_182 = arith.constant 0 : index
    %c0_183 = arith.constant 0 : index
    %596 = vector.load %arg23[%c0_181, %c0_182, %c0_183] : memref<4x8x8xf32, #tpu.memory_space<vmem>>, vector<1x8x8xf32>
    %597 = vector.shape_cast %596 : vector<1x8x8xf32> to vector<8x8xf32>
    %cst_184 = arith.constant dense<0.000000e+00> : vector<8x128xf32>
    %598 = tpu.matmul %597, %594, %cst_184 {dimension_numbers = #tpu.dot_dimension_numbers<[1], [0], [0], [1], [0, 0, 1, 1], [], []>} : vector<8x8xf32>, vector<8x128xf32>, vector<8x128xf32> -> vector<8x128xf32>
    %c0_185 = arith.constant 0 : index
    %c0_186 = arith.constant 0 : index
    %c0_187 = arith.constant 0 : index
    %599 = vector.load %arg38[%c0_185, %c0_186, %c0_187] : memref<4x128x512xf32, #tpu.memory_space<vmem>>, vector<1x128x512xf32>
    %600 = vector.shape_cast %599 : vector<1x128x512xf32> to vector<128x512xf32>
    %cst_188 = arith.constant dense<0.000000e+00> : vector<8x512xf32>
    %601 = tpu.matmul %598, %600, %cst_188 {dimension_numbers = #tpu.dot_dimension_numbers<[1], [0], [0], [1], [0, 0, 1, 1], [], []>} : vector<8x128xf32>, vector<128x512xf32>, vector<8x512xf32> -> vector<8x512xf32>
    %c1_189 = arith.constant 1 : index
    %c0_190 = arith.constant 0 : index
    %c0_191 = arith.constant 0 : index
    %602 = vector.load %arg23[%c1_189, %c0_190, %c0_191] : memref<4x8x8xf32, #tpu.memory_space<vmem>>, vector<1x8x8xf32>
    %603 = vector.shape_cast %602 : vector<1x8x8xf32> to vector<8x8xf32>
    %cst_192 = arith.constant dense<0.000000e+00> : vector<8x128xf32>
    %604 = tpu.matmul %603, %594, %cst_192 {dimension_numbers = #tpu.dot_dimension_numbers<[1], [0], [0], [1], [0, 0, 1, 1], [], []>} : vector<8x8xf32>, vector<8x128xf32>, vector<8x128xf32> -> vector<8x128xf32>
    %c1_193 = arith.constant 1 : index
    %c0_194 = arith.constant 0 : index
    %c0_195 = arith.constant 0 : index
    %605 = vector.load %arg38[%c1_193, %c0_194, %c0_195] : memref<4x128x512xf32, #tpu.memory_space<vmem>>, vector<1x128x512xf32>
    %606 = vector.shape_cast %605 : vector<1x128x512xf32> to vector<128x512xf32>
    %cst_196 = arith.constant dense<0.000000e+00> : vector<8x512xf32>
    %607 = tpu.matmul %604, %606, %cst_196 {dimension_numbers = #tpu.dot_dimension_numbers<[1], [0], [0], [1], [0, 0, 1, 1], [], []>} : vector<8x128xf32>, vector<128x512xf32>, vector<8x512xf32> -> vector<8x512xf32>
    %608 = arith.addf %601, %607 : vector<8x512xf32>
    %c2_197 = arith.constant 2 : index
    %c0_198 = arith.constant 0 : index
    %c0_199 = arith.constant 0 : index
    %609 = vector.load %arg23[%c2_197, %c0_198, %c0_199] : memref<4x8x8xf32, #tpu.memory_space<vmem>>, vector<1x8x8xf32>
    %610 = vector.shape_cast %609 : vector<1x8x8xf32> to vector<8x8xf32>
    %cst_200 = arith.constant dense<0.000000e+00> : vector<8x128xf32>
    %611 = tpu.matmul %610, %594, %cst_200 {dimension_numbers = #tpu.dot_dimension_numbers<[1], [0], [0], [1], [0, 0, 1, 1], [], []>} : vector<8x8xf32>, vector<8x128xf32>, vector<8x128xf32> -> vector<8x128xf32>
    %c2_201 = arith.constant 2 : index
    %c0_202 = arith.constant 0 : index
    %c0_203 = arith.constant 0 : index
    %612 = vector.load %arg38[%c2_201, %c0_202, %c0_203] : memref<4x128x512xf32, #tpu.memory_space<vmem>>, vector<1x128x512xf32>
    %613 = vector.shape_cast %612 : vector<1x128x512xf32> to vector<128x512xf32>
    %cst_204 = arith.constant dense<0.000000e+00> : vector<8x512xf32>
    %614 = tpu.matmul %611, %613, %cst_204 {dimension_numbers = #tpu.dot_dimension_numbers<[1], [0], [0], [1], [0, 0, 1, 1], [], []>} : vector<8x128xf32>, vector<128x512xf32>, vector<8x512xf32> -> vector<8x512xf32>
    %615 = arith.addf %608, %614 : vector<8x512xf32>
    %c3_205 = arith.constant 3 : index
    %c0_206 = arith.constant 0 : index
    %c0_207 = arith.constant 0 : index
    %616 = vector.load %arg23[%c3_205, %c0_206, %c0_207] : memref<4x8x8xf32, #tpu.memory_space<vmem>>, vector<1x8x8xf32>
    %617 = vector.shape_cast %616 : vector<1x8x8xf32> to vector<8x8xf32>
    %cst_208 = arith.constant dense<0.000000e+00> : vector<8x128xf32>
    %618 = tpu.matmul %617, %594, %cst_208 {dimension_numbers = #tpu.dot_dimension_numbers<[1], [0], [0], [1], [0, 0, 1, 1], [], []>} : vector<8x8xf32>, vector<8x128xf32>, vector<8x128xf32> -> vector<8x128xf32>
    %c3_209 = arith.constant 3 : index
    %c0_210 = arith.constant 0 : index
    %c0_211 = arith.constant 0 : index
    %619 = vector.load %arg38[%c3_209, %c0_210, %c0_211] : memref<4x128x512xf32, #tpu.memory_space<vmem>>, vector<1x128x512xf32>
    %620 = vector.shape_cast %619 : vector<1x128x512xf32> to vector<128x512xf32>
    %cst_212 = arith.constant dense<0.000000e+00> : vector<8x512xf32>
    %621 = tpu.matmul %618, %620, %cst_212 {dimension_numbers = #tpu.dot_dimension_numbers<[1], [0], [0], [1], [0, 0, 1, 1], [], []>} : vector<8x128xf32>, vector<128x512xf32>, vector<8x512xf32> -> vector<8x512xf32>
    %622 = arith.addf %615, %621 : vector<8x512xf32>
    %623 = vector.broadcast %595 : vector<8x1xf32> to vector<8x512xf32>
    %624 = arith.addf %622, %623 : vector<8x512xf32>
    %c0_213 = arith.constant 0 : index
    %c0_214 = arith.constant 0 : index
    %625 = vector.load %arg25[%c0_213, %c0_214] : memref<8x72xf32, #tpu.memory_space<vmem>>, vector<8x72xf32>
    %c0_215 = arith.constant 0 : index
    %c0_216 = arith.constant 0 : index
    %626 = vector.load %arg26[%c0_215, %c0_216] : memref<8x72xf32, #tpu.memory_space<vmem>>, vector<8x72xf32>
    %c0_217 = arith.constant 0 : index
    %c0_218 = arith.constant 0 : index
    %627 = vector.load %arg27[%c0_217, %c0_218] : memref<8x1xf32, #tpu.memory_space<vmem>>, vector<8x1xf32>
    %cst_219 = arith.constant 0.000000e+00 : f32
    %628 = vector.broadcast %cst_219 : f32 to vector<8x17xf32>
    %629 = vector.extract_strided_slice %624 {offsets = [0, 0], sizes = [8, 495], strides = [1, 1]} : vector<8x512xf32> to vector<8x495xf32>
    %630 = tpu.concatenate %628, %629 in 1 : vector<8x17xf32>, vector<8x495xf32> -> vector<8x512xf32>
    %631 = vector.extract_strided_slice %1 {offsets = [0, 0], sizes = [1, 512], strides = [1, 1]} : vector<9x512xf32> to vector<1x512xf32>
    %632 = vector.broadcast %631 : vector<1x512xf32> to vector<8x512xf32>
    %633 = arith.mulf %630, %632 : vector<8x512xf32>
    %cst_220 = arith.constant 0.000000e+00 : f32
    %634 = vector.broadcast %cst_220 : f32 to vector<8x16xf32>
    %635 = vector.extract_strided_slice %624 {offsets = [0, 0], sizes = [8, 496], strides = [1, 1]} : vector<8x512xf32> to vector<8x496xf32>
    %636 = tpu.concatenate %634, %635 in 1 : vector<8x16xf32>, vector<8x496xf32> -> vector<8x512xf32>
    %637 = vector.extract_strided_slice %1 {offsets = [1, 0], sizes = [1, 512], strides = [1, 1]} : vector<9x512xf32> to vector<1x512xf32>
    %638 = vector.broadcast %637 : vector<1x512xf32> to vector<8x512xf32>
    %639 = arith.mulf %636, %638 : vector<8x512xf32>
    %cst_221 = arith.constant 0.000000e+00 : f32
    %640 = vector.broadcast %cst_221 : f32 to vector<8x15xf32>
    %641 = vector.extract_strided_slice %624 {offsets = [0, 0], sizes = [8, 497], strides = [1, 1]} : vector<8x512xf32> to vector<8x497xf32>
    %642 = tpu.concatenate %640, %641 in 1 : vector<8x15xf32>, vector<8x497xf32> -> vector<8x512xf32>
    %643 = vector.extract_strided_slice %1 {offsets = [2, 0], sizes = [1, 512], strides = [1, 1]} : vector<9x512xf32> to vector<1x512xf32>
    %644 = vector.broadcast %643 : vector<1x512xf32> to vector<8x512xf32>
    %645 = arith.mulf %642, %644 : vector<8x512xf32>
    %cst_222 = arith.constant 0.000000e+00 : f32
    %646 = vector.broadcast %cst_222 : f32 to vector<8x1xf32>
    %647 = vector.extract_strided_slice %624 {offsets = [0, 0], sizes = [8, 511], strides = [1, 1]} : vector<8x512xf32> to vector<8x511xf32>
    %648 = tpu.concatenate %646, %647 in 1 : vector<8x1xf32>, vector<8x511xf32> -> vector<8x512xf32>
    %649 = vector.extract_strided_slice %1 {offsets = [3, 0], sizes = [1, 512], strides = [1, 1]} : vector<9x512xf32> to vector<1x512xf32>
    %650 = vector.broadcast %649 : vector<1x512xf32> to vector<8x512xf32>
    %651 = arith.mulf %648, %650 : vector<8x512xf32>
    %652 = vector.extract_strided_slice %1 {offsets = [4, 0], sizes = [1, 512], strides = [1, 1]} : vector<9x512xf32> to vector<1x512xf32>
    %653 = vector.broadcast %652 : vector<1x512xf32> to vector<8x512xf32>
    %654 = arith.mulf %624, %653 : vector<8x512xf32>
    %655 = vector.extract_strided_slice %624 {offsets = [0, 1], sizes = [8, 511], strides = [1, 1]} : vector<8x512xf32> to vector<8x511xf32>
    %cst_223 = arith.constant 0.000000e+00 : f32
    %656 = vector.broadcast %cst_223 : f32 to vector<8x1xf32>
    %657 = tpu.concatenate %655, %656 in 1 : vector<8x511xf32>, vector<8x1xf32> -> vector<8x512xf32>
    %658 = vector.extract_strided_slice %1 {offsets = [5, 0], sizes = [1, 512], strides = [1, 1]} : vector<9x512xf32> to vector<1x512xf32>
    %659 = vector.broadcast %658 : vector<1x512xf32> to vector<8x512xf32>
    %660 = arith.mulf %657, %659 : vector<8x512xf32>
    %661 = vector.extract_strided_slice %624 {offsets = [0, 15], sizes = [8, 497], strides = [1, 1]} : vector<8x512xf32> to vector<8x497xf32>
    %cst_224 = arith.constant 0.000000e+00 : f32
    %662 = vector.broadcast %cst_224 : f32 to vector<8x15xf32>
    %663 = tpu.concatenate %661, %662 in 1 : vector<8x497xf32>, vector<8x15xf32> -> vector<8x512xf32>
    %664 = vector.extract_strided_slice %1 {offsets = [6, 0], sizes = [1, 512], strides = [1, 1]} : vector<9x512xf32> to vector<1x512xf32>
    %665 = vector.broadcast %664 : vector<1x512xf32> to vector<8x512xf32>
    %666 = arith.mulf %663, %665 : vector<8x512xf32>
    %667 = vector.extract_strided_slice %624 {offsets = [0, 16], sizes = [8, 496], strides = [1, 1]} : vector<8x512xf32> to vector<8x496xf32>
    %cst_225 = arith.constant 0.000000e+00 : f32
    %668 = vector.broadcast %cst_225 : f32 to vector<8x16xf32>
    %669 = tpu.concatenate %667, %668 in 1 : vector<8x496xf32>, vector<8x16xf32> -> vector<8x512xf32>
    %670 = vector.extract_strided_slice %1 {offsets = [7, 0], sizes = [1, 512], strides = [1, 1]} : vector<9x512xf32> to vector<1x512xf32>
    %671 = vector.broadcast %670 : vector<1x512xf32> to vector<8x512xf32>
    %672 = arith.mulf %669, %671 : vector<8x512xf32>
    %673 = vector.extract_strided_slice %624 {offsets = [0, 17], sizes = [8, 495], strides = [1, 1]} : vector<8x512xf32> to vector<8x495xf32>
    %cst_226 = arith.constant 0.000000e+00 : f32
    %674 = vector.broadcast %cst_226 : f32 to vector<8x17xf32>
    %675 = tpu.concatenate %673, %674 in 1 : vector<8x495xf32>, vector<8x17xf32> -> vector<8x512xf32>
    %676 = vector.extract_strided_slice %1 {offsets = [8, 0], sizes = [1, 512], strides = [1, 1]} : vector<9x512xf32> to vector<1x512xf32>
    %677 = vector.broadcast %676 : vector<1x512xf32> to vector<8x512xf32>
    %678 = arith.mulf %675, %677 : vector<8x512xf32>
    %679 = tpu.concatenate %633, %639, %645, %651, %654, %660, %666, %672, %678 in 0 : vector<8x512xf32>, vector<8x512xf32>, vector<8x512xf32>, vector<8x512xf32>, vector<8x512xf32>, vector<8x512xf32>, vector<8x512xf32>, vector<8x512xf32>, vector<8x512xf32> -> vector<72x512xf32>
    %cst_227 = arith.constant dense<0.000000e+00> : vector<8x512xf32>
    %680 = tpu.matmul %625, %679, %cst_227 {dimension_numbers = #tpu.dot_dimension_numbers<[1], [0], [0], [1], [0, 0, 1, 1], [], []>} : vector<8x72xf32>, vector<72x512xf32>, vector<8x512xf32> -> vector<8x512xf32>
    %cst_228 = arith.constant 0.000000e+00 : f32
    %681 = vector.broadcast %cst_228 : f32 to vector<8x17xf32>
    %682 = vector.extract_strided_slice %121 {offsets = [0, 0], sizes = [8, 495], strides = [1, 1]} : vector<8x512xf32> to vector<8x495xf32>
    %683 = tpu.concatenate %681, %682 in 1 : vector<8x17xf32>, vector<8x495xf32> -> vector<8x512xf32>
    %684 = vector.extract_strided_slice %1 {offsets = [0, 0], sizes = [1, 512], strides = [1, 1]} : vector<9x512xf32> to vector<1x512xf32>
    %685 = vector.broadcast %684 : vector<1x512xf32> to vector<8x512xf32>
    %686 = arith.mulf %683, %685 : vector<8x512xf32>
    %cst_229 = arith.constant 0.000000e+00 : f32
    %687 = vector.broadcast %cst_229 : f32 to vector<8x16xf32>
    %688 = vector.extract_strided_slice %121 {offsets = [0, 0], sizes = [8, 496], strides = [1, 1]} : vector<8x512xf32> to vector<8x496xf32>
    %689 = tpu.concatenate %687, %688 in 1 : vector<8x16xf32>, vector<8x496xf32> -> vector<8x512xf32>
    %690 = vector.extract_strided_slice %1 {offsets = [1, 0], sizes = [1, 512], strides = [1, 1]} : vector<9x512xf32> to vector<1x512xf32>
    %691 = vector.broadcast %690 : vector<1x512xf32> to vector<8x512xf32>
    %692 = arith.mulf %689, %691 : vector<8x512xf32>
    %cst_230 = arith.constant 0.000000e+00 : f32
    %693 = vector.broadcast %cst_230 : f32 to vector<8x15xf32>
    %694 = vector.extract_strided_slice %121 {offsets = [0, 0], sizes = [8, 497], strides = [1, 1]} : vector<8x512xf32> to vector<8x497xf32>
    %695 = tpu.concatenate %693, %694 in 1 : vector<8x15xf32>, vector<8x497xf32> -> vector<8x512xf32>
    %696 = vector.extract_strided_slice %1 {offsets = [2, 0], sizes = [1, 512], strides = [1, 1]} : vector<9x512xf32> to vector<1x512xf32>
    %697 = vector.broadcast %696 : vector<1x512xf32> to vector<8x512xf32>
    %698 = arith.mulf %695, %697 : vector<8x512xf32>
    %cst_231 = arith.constant 0.000000e+00 : f32
    %699 = vector.broadcast %cst_231 : f32 to vector<8x1xf32>
    %700 = vector.extract_strided_slice %121 {offsets = [0, 0], sizes = [8, 511], strides = [1, 1]} : vector<8x512xf32> to vector<8x511xf32>
    %701 = tpu.concatenate %699, %700 in 1 : vector<8x1xf32>, vector<8x511xf32> -> vector<8x512xf32>
    %702 = vector.extract_strided_slice %1 {offsets = [3, 0], sizes = [1, 512], strides = [1, 1]} : vector<9x512xf32> to vector<1x512xf32>
    %703 = vector.broadcast %702 : vector<1x512xf32> to vector<8x512xf32>
    %704 = arith.mulf %701, %703 : vector<8x512xf32>
    %705 = vector.extract_strided_slice %1 {offsets = [4, 0], sizes = [1, 512], strides = [1, 1]} : vector<9x512xf32> to vector<1x512xf32>
    %706 = vector.broadcast %705 : vector<1x512xf32> to vector<8x512xf32>
    %707 = arith.mulf %121, %706 : vector<8x512xf32>
    %708 = vector.extract_strided_slice %121 {offsets = [0, 1], sizes = [8, 511], strides = [1, 1]} : vector<8x512xf32> to vector<8x511xf32>
    %cst_232 = arith.constant 0.000000e+00 : f32
    %709 = vector.broadcast %cst_232 : f32 to vector<8x1xf32>
    %710 = tpu.concatenate %708, %709 in 1 : vector<8x511xf32>, vector<8x1xf32> -> vector<8x512xf32>
    %711 = vector.extract_strided_slice %1 {offsets = [5, 0], sizes = [1, 512], strides = [1, 1]} : vector<9x512xf32> to vector<1x512xf32>
    %712 = vector.broadcast %711 : vector<1x512xf32> to vector<8x512xf32>
    %713 = arith.mulf %710, %712 : vector<8x512xf32>
    %714 = vector.extract_strided_slice %121 {offsets = [0, 15], sizes = [8, 497], strides = [1, 1]} : vector<8x512xf32> to vector<8x497xf32>
    %cst_233 = arith.constant 0.000000e+00 : f32
    %715 = vector.broadcast %cst_233 : f32 to vector<8x15xf32>
    %716 = tpu.concatenate %714, %715 in 1 : vector<8x497xf32>, vector<8x15xf32> -> vector<8x512xf32>
    %717 = vector.extract_strided_slice %1 {offsets = [6, 0], sizes = [1, 512], strides = [1, 1]} : vector<9x512xf32> to vector<1x512xf32>
    %718 = vector.broadcast %717 : vector<1x512xf32> to vector<8x512xf32>
    %719 = arith.mulf %716, %718 : vector<8x512xf32>
    %720 = vector.extract_strided_slice %121 {offsets = [0, 16], sizes = [8, 496], strides = [1, 1]} : vector<8x512xf32> to vector<8x496xf32>
    %cst_234 = arith.constant 0.000000e+00 : f32
    %721 = vector.broadcast %cst_234 : f32 to vector<8x16xf32>
    %722 = tpu.concatenate %720, %721 in 1 : vector<8x496xf32>, vector<8x16xf32> -> vector<8x512xf32>
    %723 = vector.extract_strided_slice %1 {offsets = [7, 0], sizes = [1, 512], strides = [1, 1]} : vector<9x512xf32> to vector<1x512xf32>
    %724 = vector.broadcast %723 : vector<1x512xf32> to vector<8x512xf32>
    %725 = arith.mulf %722, %724 : vector<8x512xf32>
    %726 = vector.extract_strided_slice %121 {offsets = [0, 17], sizes = [8, 495], strides = [1, 1]} : vector<8x512xf32> to vector<8x495xf32>
    %cst_235 = arith.constant 0.000000e+00 : f32
    %727 = vector.broadcast %cst_235 : f32 to vector<8x17xf32>
    %728 = tpu.concatenate %726, %727 in 1 : vector<8x495xf32>, vector<8x17xf32> -> vector<8x512xf32>
    %729 = vector.extract_strided_slice %1 {offsets = [8, 0], sizes = [1, 512], strides = [1, 1]} : vector<9x512xf32> to vector<1x512xf32>
    %730 = vector.broadcast %729 : vector<1x512xf32> to vector<8x512xf32>
    %731 = arith.mulf %728, %730 : vector<8x512xf32>
    %732 = tpu.concatenate %686, %692, %698, %704, %707, %713, %719, %725, %731 in 0 : vector<8x512xf32>, vector<8x512xf32>, vector<8x512xf32>, vector<8x512xf32>, vector<8x512xf32>, vector<8x512xf32>, vector<8x512xf32>, vector<8x512xf32>, vector<8x512xf32> -> vector<72x512xf32>
    %cst_236 = arith.constant dense<0.000000e+00> : vector<8x512xf32>
    %733 = tpu.matmul %626, %732, %cst_236 {dimension_numbers = #tpu.dot_dimension_numbers<[1], [0], [0], [1], [0, 0, 1, 1], [], []>} : vector<8x72xf32>, vector<72x512xf32>, vector<8x512xf32> -> vector<8x512xf32>
    %734 = arith.addf %680, %733 : vector<8x512xf32>
    %735 = vector.broadcast %627 : vector<8x1xf32> to vector<8x512xf32>
    %736 = arith.addf %734, %735 : vector<8x512xf32>
    %cst_237 = arith.constant 0.000000e+00 : f32
    %737 = vector.broadcast %cst_237 : f32 to vector<8x512xf32>
    %738 = arith.maximumf %736, %737 : vector<8x512xf32>
    %c0_238 = arith.constant 0 : index
    %c0_239 = arith.constant 0 : index
    %739 = vector.load %arg28[%c0_238, %c0_239] : memref<8x72xf32, #tpu.memory_space<vmem>>, vector<8x72xf32>
    %c0_240 = arith.constant 0 : index
    %c0_241 = arith.constant 0 : index
    %740 = vector.load %arg29[%c0_240, %c0_241] : memref<8x1xf32, #tpu.memory_space<vmem>>, vector<8x1xf32>
    %cst_242 = arith.constant 0.000000e+00 : f32
    %741 = vector.broadcast %cst_242 : f32 to vector<8x17xf32>
    %742 = vector.extract_strided_slice %738 {offsets = [0, 0], sizes = [8, 495], strides = [1, 1]} : vector<8x512xf32> to vector<8x495xf32>
    %743 = tpu.concatenate %741, %742 in 1 : vector<8x17xf32>, vector<8x495xf32> -> vector<8x512xf32>
    %744 = vector.extract_strided_slice %1 {offsets = [0, 0], sizes = [1, 512], strides = [1, 1]} : vector<9x512xf32> to vector<1x512xf32>
    %745 = vector.broadcast %744 : vector<1x512xf32> to vector<8x512xf32>
    %746 = arith.mulf %743, %745 : vector<8x512xf32>
    %cst_243 = arith.constant 0.000000e+00 : f32
    %747 = vector.broadcast %cst_243 : f32 to vector<8x16xf32>
    %748 = vector.extract_strided_slice %738 {offsets = [0, 0], sizes = [8, 496], strides = [1, 1]} : vector<8x512xf32> to vector<8x496xf32>
    %749 = tpu.concatenate %747, %748 in 1 : vector<8x16xf32>, vector<8x496xf32> -> vector<8x512xf32>
    %750 = vector.extract_strided_slice %1 {offsets = [1, 0], sizes = [1, 512], strides = [1, 1]} : vector<9x512xf32> to vector<1x512xf32>
    %751 = vector.broadcast %750 : vector<1x512xf32> to vector<8x512xf32>
    %752 = arith.mulf %749, %751 : vector<8x512xf32>
    %cst_244 = arith.constant 0.000000e+00 : f32
    %753 = vector.broadcast %cst_244 : f32 to vector<8x15xf32>
    %754 = vector.extract_strided_slice %738 {offsets = [0, 0], sizes = [8, 497], strides = [1, 1]} : vector<8x512xf32> to vector<8x497xf32>
    %755 = tpu.concatenate %753, %754 in 1 : vector<8x15xf32>, vector<8x497xf32> -> vector<8x512xf32>
    %756 = vector.extract_strided_slice %1 {offsets = [2, 0], sizes = [1, 512], strides = [1, 1]} : vector<9x512xf32> to vector<1x512xf32>
    %757 = vector.broadcast %756 : vector<1x512xf32> to vector<8x512xf32>
    %758 = arith.mulf %755, %757 : vector<8x512xf32>
    %cst_245 = arith.constant 0.000000e+00 : f32
    %759 = vector.broadcast %cst_245 : f32 to vector<8x1xf32>
    %760 = vector.extract_strided_slice %738 {offsets = [0, 0], sizes = [8, 511], strides = [1, 1]} : vector<8x512xf32> to vector<8x511xf32>
    %761 = tpu.concatenate %759, %760 in 1 : vector<8x1xf32>, vector<8x511xf32> -> vector<8x512xf32>
    %762 = vector.extract_strided_slice %1 {offsets = [3, 0], sizes = [1, 512], strides = [1, 1]} : vector<9x512xf32> to vector<1x512xf32>
    %763 = vector.broadcast %762 : vector<1x512xf32> to vector<8x512xf32>
    %764 = arith.mulf %761, %763 : vector<8x512xf32>
    %765 = vector.extract_strided_slice %1 {offsets = [4, 0], sizes = [1, 512], strides = [1, 1]} : vector<9x512xf32> to vector<1x512xf32>
    %766 = vector.broadcast %765 : vector<1x512xf32> to vector<8x512xf32>
    %767 = arith.mulf %738, %766 : vector<8x512xf32>
    %768 = vector.extract_strided_slice %738 {offsets = [0, 1], sizes = [8, 511], strides = [1, 1]} : vector<8x512xf32> to vector<8x511xf32>
    %cst_246 = arith.constant 0.000000e+00 : f32
    %769 = vector.broadcast %cst_246 : f32 to vector<8x1xf32>
    %770 = tpu.concatenate %768, %769 in 1 : vector<8x511xf32>, vector<8x1xf32> -> vector<8x512xf32>
    %771 = vector.extract_strided_slice %1 {offsets = [5, 0], sizes = [1, 512], strides = [1, 1]} : vector<9x512xf32> to vector<1x512xf32>
    %772 = vector.broadcast %771 : vector<1x512xf32> to vector<8x512xf32>
    %773 = arith.mulf %770, %772 : vector<8x512xf32>
    %774 = vector.extract_strided_slice %738 {offsets = [0, 15], sizes = [8, 497], strides = [1, 1]} : vector<8x512xf32> to vector<8x497xf32>
    %cst_247 = arith.constant 0.000000e+00 : f32
    %775 = vector.broadcast %cst_247 : f32 to vector<8x15xf32>
    %776 = tpu.concatenate %774, %775 in 1 : vector<8x497xf32>, vector<8x15xf32> -> vector<8x512xf32>
    %777 = vector.extract_strided_slice %1 {offsets = [6, 0], sizes = [1, 512], strides = [1, 1]} : vector<9x512xf32> to vector<1x512xf32>
    %778 = vector.broadcast %777 : vector<1x512xf32> to vector<8x512xf32>
    %779 = arith.mulf %776, %778 : vector<8x512xf32>
    %780 = vector.extract_strided_slice %738 {offsets = [0, 16], sizes = [8, 496], strides = [1, 1]} : vector<8x512xf32> to vector<8x496xf32>
    %cst_248 = arith.constant 0.000000e+00 : f32
    %781 = vector.broadcast %cst_248 : f32 to vector<8x16xf32>
    %782 = tpu.concatenate %780, %781 in 1 : vector<8x496xf32>, vector<8x16xf32> -> vector<8x512xf32>
    %783 = vector.extract_strided_slice %1 {offsets = [7, 0], sizes = [1, 512], strides = [1, 1]} : vector<9x512xf32> to vector<1x512xf32>
    %784 = vector.broadcast %783 : vector<1x512xf32> to vector<8x512xf32>
    %785 = arith.mulf %782, %784 : vector<8x512xf32>
    %786 = vector.extract_strided_slice %738 {offsets = [0, 17], sizes = [8, 495], strides = [1, 1]} : vector<8x512xf32> to vector<8x495xf32>
    %cst_249 = arith.constant 0.000000e+00 : f32
    %787 = vector.broadcast %cst_249 : f32 to vector<8x17xf32>
    %788 = tpu.concatenate %786, %787 in 1 : vector<8x495xf32>, vector<8x17xf32> -> vector<8x512xf32>
    %789 = vector.extract_strided_slice %1 {offsets = [8, 0], sizes = [1, 512], strides = [1, 1]} : vector<9x512xf32> to vector<1x512xf32>
    %790 = vector.broadcast %789 : vector<1x512xf32> to vector<8x512xf32>
    %791 = arith.mulf %788, %790 : vector<8x512xf32>
    %792 = tpu.concatenate %746, %752, %758, %764, %767, %773, %779, %785, %791 in 0 : vector<8x512xf32>, vector<8x512xf32>, vector<8x512xf32>, vector<8x512xf32>, vector<8x512xf32>, vector<8x512xf32>, vector<8x512xf32>, vector<8x512xf32>, vector<8x512xf32> -> vector<72x512xf32>
    %cst_250 = arith.constant dense<0.000000e+00> : vector<8x512xf32>
    %793 = tpu.matmul %739, %792, %cst_250 {dimension_numbers = #tpu.dot_dimension_numbers<[1], [0], [0], [1], [0, 0, 1, 1], [], []>} : vector<8x72xf32>, vector<72x512xf32>, vector<8x512xf32> -> vector<8x512xf32>
    %794 = vector.broadcast %740 : vector<8x1xf32> to vector<8x512xf32>
    %795 = arith.addf %793, %794 : vector<8x512xf32>
    %cst_251 = arith.constant 0.000000e+00 : f32
    %796 = vector.broadcast %cst_251 : f32 to vector<8x512xf32>
    %797 = arith.maximumf %795, %796 : vector<8x512xf32>
    %c0_252 = arith.constant 0 : index
    %c0_253 = arith.constant 0 : index
    %798 = vector.load %arg30[%c0_252, %c0_253] : memref<3x8xf32, #tpu.memory_space<vmem>>, vector<3x8xf32>
    %cst_254 = arith.constant dense<0.000000e+00> : vector<3x512xf32>
    %799 = tpu.matmul %798, %797, %cst_254 {dimension_numbers = #tpu.dot_dimension_numbers<[1], [0], [0], [1], [0, 0, 1, 1], [], []>} : vector<3x8xf32>, vector<8x512xf32>, vector<3x512xf32> -> vector<3x512xf32>
    %c0_255 = arith.constant 0 : index
    %c0_256 = arith.constant 0 : index
    %800 = vector.load %arg31[%c0_255, %c0_256] : memref<3x1xf32, #tpu.memory_space<vmem>>, vector<3x1xf32>
    %801 = vector.broadcast %800 : vector<3x1xf32> to vector<3x512xf32>
    %802 = arith.addf %799, %801 : vector<3x512xf32>
    %c0_257 = arith.constant 0 : index
    %c0_258 = arith.constant 0 : index
    %803 = vector.load %arg39[%c0_257, %c0_258] : memref<3x512xf32, #tpu.memory_space<vmem>>, vector<3x512xf32>
    tpu.vector_store %arg39[%c0_257, %c0_258], %802 {strides = array<i32>} : memref<3x512xf32, #tpu.memory_space<vmem>>, vector<3x512xf32>,
    return
  }
}

</mosaic_0001>

<bundles_post_ra>
// kernel: collaborative_unet_forward.1
= control target key start
LH: loop header
LB: loop body
LE: loop exit
PB: predicated region body
PF: predicated region fallthrough
CT: control target
= control target key end

     0   :  { %s6803_s6 = smov 111   ;;  %s6804_s7 = smov 112   ;;  %v9304_v4 = vmov 0.0   ;;  %v6811_v5 = vmov 0   ;;  %v201_v7 = vlaneseq  ;;  %vm9347_vm0 = vcmask 908288   ;;  %s9303_s0 = inlined_call_operand.smem [shape: u32[40], index: -1, kind: input, shape index: {}] }
   0x1   :  { %s1_s5 = sld [smem:[%s9303_s0]]   ;;  %s6805_s8 = smov 113   ;;  %573 = vmatprep.mubr.f32.mxu0 %v9304_v4  ;;  %644 = vmatprep.mubr.f32.mxu1 %v9304_v4  ;;  %vm9346_vm1 = vcmask 916480   ;;  %vm9345_vm2 = vcmask 924672   ;;  %vm9352_vm3 = vcmask 1039360   ;;  %vm303_vm4 = vcmask 7168  }
   0x2   :  { %s6806_s9 = smov 127   ;;  %s6807_s10 = smov 1   ;;  %6781 = vset.pattern.permute.xlu0 %v6811_v5  ;;  %6792 = vset.pattern.permute.xlu1 %v6811_v5  ;;  %v6946_v8 = vshrl.u32 %v201_v7, 7  ;;  %vm9344_vm5 = vcmask 121856   ;;  %vm229_vm6 = vcmask 130048   ;;  %vm9341_vm7 = vcmask 138240  }
   0x3   :  { %s6808_s11 = smov 15   ;;  %s6810_s12 = smov 16   ;;  %vm9340_vm8 = vcmask 588800   ;;  %vm1302_vm9 = vcmask 982016   ;;  %vm1312_vm10 = vcmask 973824   ;;  %vm1292_vm11 = vcmask 990208  }
   0x4   :  { %s6812_s13 = smov 2   ;;  %s6813_s17 = smov 17   ;;  %v6957_v15 = vsub.s32 7, %v6946_v8  ;;  %v6989_v34 = vsub.s32 6, %v6946_v8  ;;  %v7029_v55 = vsub.s32 5, %v6946_v8  ;;  %v7032_v58 = vsub.s32 4, %v6946_v8 }
   0x5   :  { %s6014_s16 = sld [smem:[%s9303_s0 + %s6812_s13]]   ;;  %s6814_s18 = smov 32   ;;  %vm1259_vm12 = vcmask 56320   ;;  %vm1249_vm13 = vcmask 64512   ;;  %vm1239_vm14 = vcmask 72704   ;;  %vm1825_vm15 = vcmask 228352  }
   0x6   :  { %s6944_s21 = sld [smem:[%s9303_s0 + %s6814_s18]]   ;;  %9379 = vst [vmem:[#allocation2_spill] sm:$0xff] %v6957_v15  ;;  %9380 = vst [vmem:[#allocation3_spill] sm:$0xff] %v6989_v34  ;;  %s6815_s25 = smov 4  }
   0x7   :  { %v6864_v0 = vld [vmem:[%s1_s5 + $0x18] sm:$0xff]  ;;  %v6866_v1 = vld [vmem:[%s1_s5 + $0x8] sm:$0xff]  ;;  %v6872_v2 = vld [vmem:[%s1_s5 + $0x10] sm:$0xff]  ;;  %9383 = vst [vmem:[#allocation6_spill] sm:$0xff] %v7029_v55  ;;  %s6013_s24 = sld [smem:[%s9303_s0 + %s6807_s10]]   ;;  %s6816_s29 = smov 3  }
   0x8   :  { %469 = vrot.lane.b32.xlu1 %v6864_v0, %s6803_s6  ;;  %465 = vrot.lane.b32.xlu0 %v6866_v1, %s6803_s6  ;;  %v6874_v3 = vld [vmem:[%s1_s5] sm:$0xff]  ;;  %9384 = vst [vmem:[#allocation7_spill] sm:$0xff] %v7032_v58  ;;  %s6016_s28 = sld [smem:[%s9303_s0 + %s6815_s25]]   ;;  %s6817_s3 = smov 35  }
   0x9   :  { %s6015_s2 = sld [smem:[%s9303_s0 + %s6816_s29]]   ;;  %s6818_s14 = smov 120  }
   0xa   :  { %s7383_s13 = sld [smem:[%s9303_s0 + %s6817_s3]]   ;;  %s6819_s15 = smov 119  }
   0xb   :  { %v179_v6 = vld [vmem:[%s6014_s16] sm:$0xff]  ;;  %s6820_s16 = smov 5   ;;  %s6821_s22 = smov 121  }
   0xc   :  { %467 = vrot.lane.b32.xlu0 %v6872_v2, %s6803_s6  ;;  %463 = vrot.lane.b32.xlu1 %v6874_v3, %s6803_s6  ;;  %v6949_v9 = vld [vmem:[%s6944_s21 + $0x38] ss:$0 sm:$0xff]  ;;  %v6954_v14 = vld [vmem:[%s6944_s21 + $0x28] ss:$0 sm:$0xff]  ;;  %s7496_s20 = sld [smem:[%s9303_s0 + %s6820_s16]]   ;;  %s6822_s23 = smov 6  }
   0xd   :  { %v6960_v16 = vld [vmem:[%s6944_s21 + $0x30] ss:$0 sm:$0xff]  ;;  %v6963_v17 = vld [vmem:[%s6944_s21 + $0x20] ss:$0 sm:$0xff]  ;;  %v6966_v18 = vld [vmem:[%s6944_s21 + $0x8] sm:$0xff]  ;;  %s6018_s27 = sld [smem:[%s9303_s0 + %s6822_s23]]   ;;  %s6824_s30 = smov 9  }
   0xe   :  { %v6976_v27 = vrot.slane %v6966_v18, %v6957_v15  ;;  %v6979_v28 = vld [vmem:[%s6944_s21] sm:$0xff]  ;;  %v6982_v29 = vld [vmem:[%s6944_s21 + $0x18] sm:$0xff]  ;;  %v6985_v30 = vld [vmem:[%s6944_s21 + $0x10] sm:$0xff]  ;;  %v7012_v47 = vrot.slane %v6966_v18, %v6989_v34  ;;  %s6825_s1 = smov 8   ;;  %s6827_s26 = smov 36  }
   0xf   :  { %v6994_v36 = vrot.slane %v6979_v28, %v6957_v15  ;;  %v6998_v37 = vrot.slane %v6982_v29, %v6957_v15  ;;  %v7002_v38 = vrot.slane %v6985_v30, %v6957_v15  ;;  %v7017_v51 = vrot.slane %v6979_v28, %v6989_v34  ;;  %s7648_s3 = sld [smem:[%s9303_s0 + %s6827_s26]]   ;;  %s6828_s4 = smov 124  }
  0x10   :  { %428 = vrot.lane.b32.xlu0 %v6866_v1, %s6804_s7  ;;  %430 = vrot.lane.b32.xlu1 %v6872_v2, %s6804_s7  ;;  %v7022_v53 = vrot.slane %v6982_v29, %v6989_v34  ;;  %v7026_v54 = vrot.slane %v6985_v30, %v6989_v34  ;;  %s6830_s23 = smov 10  }
  0x11   :  { %9381 = vst [vmem:[#allocation4_spill] sm:$0xff] %v6998_v37  ;;  %9382 = vst [vmem:[#allocation5_spill] sm:$0xff] %v7002_v38 }
  0x14   :  { %432 = vrot.lane.b32.xlu0 %v6864_v0, %s6804_s7  ;;  %426 = vrot.lane.b32.xlu1 %v6874_v3, %s6804_s7 }
  0x18   :  { %391 = vrot.lane.b32.xlu0 %v6866_v1, %s6805_s8  ;;  %393 = vrot.lane.b32.xlu1 %v6872_v2, %s6805_s8 }
  0x1c   :  { %395 = vrot.lane.b32.xlu0 %v6864_v0, %s6805_s8  ;;  %389 = vrot.lane.b32.xlu1 %v6874_v3, %s6805_s8 }
  0x20   :  { %354 = vrot.lane.b32.xlu0 %v6866_v1, %s6806_s9  ;;  %356 = vrot.lane.b32.xlu1 %v6872_v2, %s6806_s9 }
  0x24   :  { %358 = vrot.lane.b32.xlu0 %v6864_v0, %s6806_s9  ;;  %352 = vrot.lane.b32.xlu1 %v6874_v3, %s6806_s9 }
  0x28   :  { %295 = vrot.lane.b32.xlu0 %v6874_v3, %s6807_s10  ;;  %297 = vrot.lane.b32.xlu1 %v6866_v1, %s6807_s10 }
  0x2c   :  { %299 = vrot.lane.b32.xlu0 %v6872_v2, %s6807_s10  ;;  %301 = vrot.lane.b32.xlu1 %v6864_v0, %s6807_s10 }
  0x30   :  { %258 = vrot.lane.b32.xlu0 %v6874_v3, %s6808_s11  ;;  %260 = vrot.lane.b32.xlu1 %v6866_v1, %s6808_s11 }
  0x34   :  { %262 = vrot.lane.b32.xlu0 %v6872_v2, %s6808_s11  ;;  %264 = vrot.lane.b32.xlu1 %v6864_v0, %s6808_s11 }
  0x38   :  { %221 = vrot.lane.b32.xlu0 %v6874_v3, %s6810_s12  ;;  %223 = vrot.lane.b32.xlu1 %v6866_v1, %s6810_s12 }
  0x3c   :  { %225 = vrot.lane.b32.xlu0 %v6872_v2, %s6810_s12  ;;  %227 = vrot.lane.b32.xlu1 %v6864_v0, %s6810_s12 }
  0x40   :  { %184 = vrot.lane.b32.xlu0 %v6874_v3, %s6813_s17  ;;  %186 = vrot.lane.b32.xlu1 %v6866_v1, %s6813_s17 }
  0x44   :  { %188 = vrot.lane.b32.xlu0 %v6872_v2, %s6813_s17  ;;  %190 = vrot.lane.b32.xlu1 %v6864_v0, %s6813_s17 }
  0x48   :  { %502 = vperm.xlu0 %6781, %v179_v6   ;;  %v7042_v6 = vrot.slane %v6966_v18, %v7029_v55 }
  0x7a   :  { %v470_v10 = vpop.permute.xlu1 %469  ;;  %v466_v11 = vpop.permute.xlu0 %465 }
  0x7b   :  { %v479_v12 = vsel %vm9347_vm0, %v470_v10, 0.0 }
  0x7c   :  { %v499_v13 = vmul.f32 %v6949_v9, %v479_v12  ;;  %v7049_v12 = vsub.s32 3, %v6946_v8 }
  0x7e   :  { %594 = vmatprep.subr.mxu1 %v499_v13  ;;  %v468_v19 = vpop.permute.xlu0 %467  ;;  %v464_v20 = vpop.permute.xlu1 %463  ;;  %9385 = vst [vmem:[#allocation8_spill] sm:$0xff] %v7049_v12 }
  0x7f   :  { %v472_v21 = vsel %vm9347_vm0, %v464_v20, %v466_v11  ;;  %v473_v22 = vsel %vm9347_vm0, %v466_v11, %v468_v19  ;;  %v474_v23 = vsel %vm9347_vm0, %v468_v19, %v470_v10  ;;  %v7046_v11 = vrot.slane %v6966_v18, %v7032_v58 }
  0x80   :  { %v497_v24 = vmul.f32 %v6954_v14, %v473_v22  ;;  %v498_v25 = vmul.f32 %v6960_v16, %v474_v23  ;;  %v496_v26 = vmul.f32 %v6963_v17, %v472_v21  ;;  %v7054_v19 = vrot.slane %v6979_v28, %v7029_v55 }
  0x81   :  { %v7058_v20 = vrot.slane %v6979_v28, %v7032_v58  ;;  %v7063_v22 = vrot.slane %v6982_v29, %v7029_v55  ;;  %v7067_v23 = vrot.slane %v6985_v30, %v7029_v55 }
  0x82   :  { %523 = vmatprep.subr.mxu0 %v497_v24  ;;  %595 = vmatpush1.msra.mxu1 %v498_v25  ;;  %v429_v31 = vpop.permute.xlu0 %428  ;;  %v431_v32 = vpop.permute.xlu1 %430  ;;  %9386 = vst [vmem:[#allocation9_spill] sm:$0xff] %v7054_v19  ;;  %v7071_v24 = vrot.slane %v6982_v29, %v7032_v58  ;;  %v7075_v25 = vrot.slane %v6985_v30, %v7032_v58 }
  0x83   :  { %v436_v33 = vsel %vm9346_vm1, %v429_v31, %v431_v32  ;;  %524 = vmatpush1.msra.mxu0 %v496_v26  ;;  %9387 = vst [vmem:[#allocation10_spill] sm:$0xff] %v7063_v22  ;;  %9388 = vst [vmem:[#allocation11_spill] sm:$0xff] %v7067_v23 }
  0x84   :  { %v460_v35 = vmul.f32 %v6976_v27, %v436_v33  ;;  %9389 = vst [vmem:[#allocation12_spill] sm:$0xff] %v7071_v24  ;;  %9390 = vst [vmem:[#allocation13_spill] sm:$0xff] %v7075_v25  ;;  %v7081_v33 = vrot.slane %v6966_v18, %v7049_v12 }
  0x86   :  { %v433_v39 = vpop.permute.xlu0 %432  ;;  %525 = vmatprep.subr.mxu0 %v460_v35  ;;  %v427_v40 = vpop.permute.xlu1 %426  ;;  %9391 = vst [vmem:[#allocation14_spill] sm:$0xff] %v7081_v33  ;;  %v7085_v35 = vrot.slane %v6979_v28, %v7049_v12 }
  0x87   :  { %v437_v41 = vsel %vm9346_vm1, %v431_v32, %v433_v39  ;;  %v442_v42 = vsel %vm9346_vm1, %v433_v39, 0.0  ;;  %v435_v43 = vsel %vm9346_vm1, %v427_v40, %v429_v31  ;;  %v349_v32 = vmul.f32 %v7046_v11, %v6866_v1 }
  0x88   :  { %v459_v44 = vmul.f32 %v6994_v36, %v435_v43  ;;  %v462_v45 = vmul.f32 %v6998_v37, %v442_v42  ;;  %v461_v46 = vmul.f32 %v7002_v38, %v437_v41  ;;  %9392 = vst [vmem:[#allocation15_spill] sm:$0xff] %v7085_v35  ;;  %v348_v42 = vmul.f32 %v7058_v20, %v6874_v3 }
  0x8a   :  { %596 = vmatprep.subr.mxu1 %v462_v45  ;;  %v392_v48 = vpop.permute.xlu0 %391  ;;  %526 = vmatpush1.msra.mxu0 %v459_v44  ;;  %v394_v49 = vpop.permute.xlu1 %393  ;;  %v351_v45 = vmul.f32 %v7071_v24, %v6864_v0 }
  0x8b   :  { %v399_v50 = vsel %vm9345_vm2, %v392_v48, %v394_v49  ;;  %597 = vmatpush1.msra.mxu1 %v461_v46  ;;  %v350_v46 = vmul.f32 %v7075_v25, %v6872_v2  ;;  %v7109_v2 = vrot.slane %v6985_v30, %v7049_v12 }
  0x8c   :  { %v423_v52 = vmul.f32 %v7012_v47, %v399_v50 }
  0x8d   :  { %9394 = vst [vmem:[#allocation17_spill] sm:$0xff] %v7109_v2 }
  0x8e   :  { %v396_v56 = vpop.permute.xlu0 %395  ;;  %527 = vmatprep.subr.mxu0 %v423_v52  ;;  %v390_v57 = vpop.permute.xlu1 %389  ;;  %v7103_v52 = vrot.slane %v6982_v29, %v7049_v12 }
  0x8f   :  { %v400_v59 = vsel %vm9345_vm2, %v394_v49, %v396_v56  ;;  %v405_v60 = vsel %vm9345_vm2, %v396_v56, 0.0  ;;  %v398_v61 = vsel %vm9345_vm2, %v390_v57, %v392_v48  ;;  %v7112_v57 = vsub.s32 2, %v6946_v8 }
  0x90   :  { %v422_v62 = vmul.f32 %v7017_v51, %v398_v61  ;;  %v425_v63 = vmul.f32 %v7022_v53, %v405_v60  ;;  %v424_v5 = vmul.f32 %v7026_v54, %v400_v59  ;;  %9393 = vst [vmem:[#allocation16_spill] sm:$0xff] %v7103_v52 }
  0x91   :  { %9395 = vst [vmem:[#allocation18_spill] sm:$0xff] %v7112_v57 }
  0x92   :  { %v355_v7 = vpop.permute.xlu0 %354  ;;  %528 = vmatpush1.msra.mxu0 %v422_v62  ;;  %598 = vmatprep.subr.mxu1 %v425_v63  ;;  %v357_v10 = vpop.permute.xlu1 %356 }
  0x93   :  { %v362_v13 = vsel %vm9352_vm3, %v355_v7, %v357_v10  ;;  %599 = vmatpush1.msra.mxu1 %v424_v5 }
  0x94   :  { %v386_v21 = vmul.f32 %v7042_v6, %v362_v13 }
  0x96   :  { %v359_v26 = vpop.permute.xlu0 %358  ;;  %529 = vmatprep.subr.mxu0 %v386_v21  ;;  %v353_v31 = vpop.permute.xlu1 %352 }
  0x97   :  { %v363_v39 = vsel %vm9352_vm3, %v357_v10, %v359_v26  ;;  %v368_v40 = vsel %vm9352_vm3, %v359_v26, 0.0  ;;  %v361_v41 = vsel %vm9352_vm3, %v353_v31, %v355_v7  ;;  %v7120_v7 = vrot.slane %v6966_v18, %v7112_v57 }
  0x98   :  { %v385_v43 = vmul.f32 %v7054_v19, %v361_v41  ;;  %v388_v1 = vmul.f32 %v7063_v22, %v368_v40  ;;  %v387_v44 = vmul.f32 %v7067_v23, %v363_v39  ;;  %v7124_v10 = vrot.slane %v6979_v28, %v7112_v57 }
  0x99   :  { %9396 = vst [vmem:[#allocation19_spill] sm:$0xff] %v7120_v7  ;;  %v7136_v41 = vrot.slane %v6985_v30, %v7112_v57 }
  0x9a   :  { %v296_v48 = vpop.permute.xlu0 %295  ;;  %530 = vmatpush1.msra.mxu0 %v385_v43  ;;  %600 = vmatprep.subr.mxu1 %v388_v1  ;;  %v298_v49 = vpop.permute.xlu1 %297  ;;  %9397 = vst [vmem:[#allocation20_spill] sm:$0xff] %v7124_v10 }
  0x9b   :  { %v311_v50 = vsel %vm303_vm4, 0.0, %v296_v48  ;;  %v304_v3 = vsel %vm303_vm4, %v296_v48, %v298_v49  ;;  %601 = vmatpush1.msra.mxu1 %v387_v44  ;;  %531 = vmatprep.subr.mxu0 %v349_v32  ;;  %v7130_v32 = vrot.slane %v6982_v29, %v7112_v57  ;;  %9399 = vst [vmem:[#allocation22_spill] sm:$0xff] %v7136_v41 }
  0x9c   :  { %532 = vmatpush1.msra.mxu0 %v348_v42  ;;  %v329_v0 = vmul.f32 %v7081_v33, %v304_v3  ;;  %v328_v56 = vmul.f32 %v7085_v35, %v311_v50  ;;  %602 = vmatprep.subr.mxu1 %v351_v45  ;;  %v7139_v42 = vsub.s32 1, %v6946_v8 }
  0x9d   :  { %603 = vmatpush1.msra.mxu1 %v350_v46  ;;  %9398 = vst [vmem:[#allocation21_spill] sm:$0xff] %v7130_v32 }
  0x9e   :  { %v300_v59 = vpop.permute.xlu0 %299  ;;  %v302_v60 = vpop.permute.xlu1 %301  ;;  %533 = vmatprep.subr.mxu0 %v329_v0  ;;  %9400 = vst [vmem:[#allocation23_spill] sm:$0xff] %v7139_v42  ;;  %v7151_v50 = vrot.slane %v6979_v28, %v7139_v42 }
  0x9f   :  { %v305_v61 = vsel %vm303_vm4, %v298_v49, %v300_v59  ;;  %v306_v62 = vsel %vm303_vm4, %v300_v59, %v302_v60  ;;  %534 = vmatpush1.msra.mxu0 %v328_v56  ;;  %v7147_v49 = vrot.slane %v6966_v18, %v7139_v42  ;;  %v7157_v60 = vrot.slane %v6982_v29, %v7139_v42 }
  0xa0   :  { %v331_v63 = vmul.f32 %v7103_v52, %v306_v62  ;;  %v330_v5 = vmul.f32 %v7109_v2, %v305_v61  ;;  %9402 = vst [vmem:[#allocation25_spill] sm:$0xff] %v7151_v50 }
  0xa1   :  { %9401 = vst [vmem:[#allocation24_spill] sm:$0xff] %v7147_v49  ;;  %9403 = vst [vmem:[#allocation26_spill] sm:$0xff] %v7157_v60 }
  0xa2   :  { %v259_v13 = vpop.permute.xlu0 %258  ;;  %604 = vmatprep.subr.mxu1 %v331_v63  ;;  %v261_v21 = vpop.permute.xlu1 %260  ;;  %v7163_v63 = vrot.slane %v6985_v30, %v7139_v42 }
  0xa3   :  { %v274_v26 = vsel %vm9344_vm5, 0.0, %v259_v13  ;;  %v267_v31 = vsel %vm9344_vm5, %v259_v13, %v261_v21  ;;  %605 = vmatpush1.msra.mxu1 %v330_v5  ;;  %v7166_v5 = vsub.s32 0, %v6946_v8 }
  0xa4   :  { %v292_v39 = vmul.f32 %v7120_v7, %v267_v31  ;;  %v291_v40 = vmul.f32 %v7124_v10, %v274_v26  ;;  %9404 = vst [vmem:[#allocation27_spill] sm:$0xff] %v7163_v63 }
  0xa5   :  { %9405 = vst [vmem:[#allocation28_spill] sm:$0xff] %v7166_v5  ;;  %v7178_v8 = vrot.slane %v6966_v18, %v7166_v5 }
  0xa6   :  { %v263_v43 = vpop.permute.xlu0 %262  ;;  %v265_v1 = vpop.permute.xlu1 %264  ;;  %535 = vmatprep.subr.mxu0 %v292_v39 }
  0xa7   :  { %v268_v44 = vsel %vm9344_vm5, %v261_v21, %v263_v43  ;;  %v269_v45 = vsel %vm9344_vm5, %v263_v43, %v265_v1  ;;  %536 = vmatpush1.msra.mxu0 %v291_v40  ;;  %9406 = vst [vmem:[#allocation29_spill] sm:$0xff] %v7178_v8  ;;  %v7182_v43 = vrot.slane %v6979_v28, %v7166_v5 }
  0xa8   :  { %v294_v46 = vmul.f32 %v7130_v32, %v269_v45  ;;  %v293_v48 = vmul.f32 %v7136_v41, %v268_v44  ;;  %v7194_v28 = vrot.slane %v6985_v30, %v7166_v5 }
  0xa9   :  { %9407 = vst [vmem:[#allocation30_spill] sm:$0xff] %v7182_v43 }
  0xaa   :  { %v222_v3 = vpop.permute.xlu0 %221  ;;  %606 = vmatprep.subr.mxu1 %v294_v46  ;;  %v224_v0 = vpop.permute.xlu1 %223  ;;  %9409 = vst [vmem:[#allocation32_spill] sm:$0xff] %v7194_v28 }
  0xab   :  { %v237_v56 = vsel %vm229_vm6, 0.0, %v222_v3  ;;  %v230_v59 = vsel %vm229_vm6, %v222_v3, %v224_v0  ;;  %607 = vmatpush1.msra.mxu1 %v293_v48  ;;  %v7188_v48 = vrot.slane %v6982_v29, %v7166_v5 }
  0xac   :  { %v255_v61 = vmul.f32 %v7147_v49, %v230_v59  ;;  %v254_v62 = vmul.f32 %v7151_v50, %v237_v56 }
  0xad   :  { %9408 = vst [vmem:[#allocation31_spill] sm:$0xff] %v7188_v48 }
  0xae   :  { %v226_v13 = vpop.permute.xlu0 %225  ;;  %v228_v21 = vpop.permute.xlu1 %227  ;;  %537 = vmatprep.subr.mxu0 %v255_v61 }
  0xaf   :  { %v231_v26 = vsel %vm229_vm6, %v224_v0, %v226_v13  ;;  %v232_v31 = vsel %vm229_vm6, %v226_v13, %v228_v21  ;;  %538 = vmatpush1.msra.mxu0 %v254_v62  ;;  %v178_v0 = vld [vmem:[%s6013_s24] sm:$0xff]  ;;  %s6020_s24 = sld [smem:[%s9303_s0 + %s6825_s1]]  }
  0xb0   :  { %v257_v39 = vmul.f32 %v7157_v60, %v232_v31  ;;  %v256_v40 = vmul.f32 %v7163_v63, %v231_v26 }
  0xb2   :  { %v185_v1 = vpop.permute.xlu0 %184  ;;  %608 = vmatprep.subr.mxu1 %v257_v39  ;;  %v187_v44 = vpop.permute.xlu1 %186 }
  0xb3   :  { %v200_v45 = vsel %vm9341_vm7, 0.0, %v185_v1  ;;  %v193_v46 = vsel %vm9341_vm7, %v185_v1, %v187_v44  ;;  %609 = vmatpush1.msra.mxu1 %v256_v40 }
  0xb4   :  { %v218_v3 = vmul.f32 %v7178_v8, %v193_v46  ;;  %v217_v18 = vmul.f32 %v7182_v43, %v200_v45 }
  0xb6   :  { %v189_v56 = vpop.permute.xlu0 %188  ;;  %v191_v59 = vpop.permute.xlu1 %190  ;;  %539 = vmatprep.subr.mxu0 %v218_v3 }
  0xb7   :  { %v194_v61 = vsel %vm9341_vm7, %v187_v44, %v189_v56  ;;  %v195_v62 = vsel %vm9341_vm7, %v189_v56, %v191_v59  ;;  %540 = vmatpush1.msra.mxu0 %v217_v18  ;;  %v656_v56 = vld [vmem:[%s6016_s28] sm:$0xff]  ;;  %s6823_s28 = smov 7  }
  0xb8   :  { %v220_v29 = vmul.f32 %v7188_v48, %v195_v62  ;;  %6056 = vmatmul.mubr.msk.f32.vlgmr.msra.gmra.mxu0 %vm9340_vm8, %v178_v0  ;;  %v219_v13 = vmul.f32 %v7194_v28, %v194_v61  ;;  %s7575_s19 = sld [smem:[%s9303_s0 + %s6823_s28]]  }
  0xb9   :  { %897 = vmatprep.mubr.f32.mxu0 %v9304_v4 }
  0xba   :  { %610 = vmatprep.subr.mxu1 %v220_v29 }
  0xbb   :  { %611 = vmatpush1.msra.mxu1 %v219_v13 }
  0xbc   :  { %6057 = vmatmul.mubr.msk.f32.vlgmr.msra.gmra.mxu1 %vm9340_vm8, %v178_v0 }
  0xbd   :  { %968 = vmatprep.mubr.f32.mxu1 %v9304_v4 }
  0xc3   :  { %v503_v30 = vpop.permute.xlu0 %502 }
 0x178   :  { %v575_v21 = vpop.f32.mrf.mxu0 }
 0x179   :  { %v576_v26 = vadd.f32 %v575_v21, %v503_v30 }
 0x17a   :  { %v577_v46 = vpop.f32.mrf.mxu0 }
 0x17b   :  { %v7204_v31 = vmax.f32 %v576_v26, 0.0  ;;  %v578_v3 = vadd.f32 %v577_v46, %v503_v30 }
 0x17c   :  { %v646_v39 = vpop.f32.mrf.mxu1 }
 0x17d   :  { %v647_v40 = vadd.f32 %v646_v39, %v503_v30  ;;  %721 = vrot.lane.b32.xlu0 %v7204_v31, %s6807_s10  ;;  %v7232_v0 = vmax.f32 %v578_v3, 0.0 }
 0x17e   :  { %v648_v44 = vpop.f32.mrf.mxu1 }
 0x17f   :  { %v7208_v1 = vmax.f32 %v647_v40, 0.0  ;;  %v649_v45 = vadd.f32 %v648_v44, %v503_v30 }
 0x181   :  { %809 = vrot.lane.b32.xlu1 %v7208_v1, %s6803_s6  ;;  %725 = vrot.lane.b32.xlu0 %v7208_v1, %s6807_s10  ;;  %v7226_v18 = vmax.f32 %v649_v45, 0.0 }
 0x185   :  { %701 = vrot.lane.b32.xlu0 %v7204_v31, %s6808_s11  ;;  %805 = vrot.lane.b32.xlu1 %v7204_v31, %s6803_s6 }
 0x189   :  { %705 = vrot.lane.b32.xlu0 %v7208_v1, %s6808_s11  ;;  %789 = vrot.lane.b32.xlu1 %v7208_v1, %s6804_s7 }
 0x18d   :  { %681 = vrot.lane.b32.xlu0 %v7204_v31, %s6810_s12  ;;  %785 = vrot.lane.b32.xlu1 %v7204_v31, %s6804_s7 }
 0x191   :  { %811 = vrot.lane.b32.xlu0 %v7226_v18, %s6803_s6  ;;  %769 = vrot.lane.b32.xlu1 %v7208_v1, %s6805_s8 }
 0x195   :  { %787 = vrot.lane.b32.xlu0 %v7232_v0, %s6804_s7  ;;  %765 = vrot.lane.b32.xlu1 %v7204_v31, %s6805_s8 }
 0x199   :  { %791 = vrot.lane.b32.xlu0 %v7226_v18, %s6804_s7  ;;  %749 = vrot.lane.b32.xlu1 %v7208_v1, %s6806_s9 }
 0x19d   :  { %767 = vrot.lane.b32.xlu0 %v7232_v0, %s6805_s8  ;;  %745 = vrot.lane.b32.xlu1 %v7204_v31, %s6806_s9 }
 0x1a1   :  { %771 = vrot.lane.b32.xlu0 %v7226_v18, %s6805_s8  ;;  %807 = vrot.lane.b32.xlu1 %v7232_v0, %s6803_s6 }
 0x1a5   :  { %747 = vrot.lane.b32.xlu0 %v7232_v0, %s6806_s9  ;;  %723 = vrot.lane.b32.xlu1 %v7232_v0, %s6807_s10 }
 0x1a9   :  { %751 = vrot.lane.b32.xlu0 %v7226_v18, %s6806_s9  ;;  %727 = vrot.lane.b32.xlu1 %v7226_v18, %s6807_s10 }
 0x1ad   :  { %685 = vrot.lane.b32.xlu0 %v7208_v1, %s6810_s12  ;;  %703 = vrot.lane.b32.xlu1 %v7232_v0, %s6808_s11 }
 0x1b1   :  { %661 = vrot.lane.b32.xlu0 %v7204_v31, %s6813_s17  ;;  %707 = vrot.lane.b32.xlu1 %v7226_v18, %s6808_s11 }
 0x1b5   :  { %665 = vrot.lane.b32.xlu0 %v7208_v1, %s6813_s17  ;;  %683 = vrot.lane.b32.xlu1 %v7232_v0, %s6810_s12 }
 0x1b9   :  { %827 = vperm.xlu0 %6781, %v656_v56   ;;  %687 = vrot.lane.b32.xlu1 %v7226_v18, %s6810_s12 }
 0x1bd   :  { %663 = vrot.lane.b32.xlu1 %v7232_v0, %s6813_s17 }
 0x1c1   :  { %667 = vrot.lane.b32.xlu1 %v7226_v18, %s6813_s17 }
 0x1ef   :  { %v7280_v59 = vpop.permute.xlu0 %721 }
 0x1f3   :  { %v810_v61 = vpop.permute.xlu1 %809  ;;  %v7282_v62 = vpop.permute.xlu0 %725 }
 0x1f7   :  { %v7284_v29 = vpop.permute.xlu0 %701  ;;  %v806_v13 = vpop.permute.xlu1 %805 }
 0x1fb   :  { %v7286_v30 = vpop.permute.xlu0 %705  ;;  %v790_v21 = vpop.permute.xlu1 %789 }
 0x1ff   :  { %v7288_v26 = vpop.permute.xlu0 %681  ;;  %v786_v39 = vpop.permute.xlu1 %785 }
 0x203   :  { %v812_v40 = vpop.permute.xlu0 %811  ;;  %v770_v44 = vpop.permute.xlu1 %769 }
 0x204   :  { %v815_v45 = vsel %vm9347_vm0, %v810_v61, %v812_v40  ;;  %v820_v46 = vsel %vm9347_vm0, %v812_v40, 0.0 }
 0x205   :  { %v823_v3 = vmul.f32 %v6960_v16, %v815_v45  ;;  %v824_v56 = vmul.f32 %v6949_v9, %v820_v46 }
 0x207   :  { %918 = vmatprep.subr.mxu1 %v824_v56  ;;  %v788_v4 = vpop.permute.xlu0 %787  ;;  %v766_v5 = vpop.permute.xlu1 %765 }
 0x208   :  { %919 = vmatpush1.msra.mxu1 %v823_v3  ;;  %v793_v9 = vsel %vm9346_vm1, %v786_v39, %v788_v4  ;;  %v794_v16 = vsel %vm9346_vm1, %v788_v4, %v790_v21 }
 0x20b   :  { %v792_v42 = vpop.permute.xlu0 %791  ;;  %v750_v57 = vpop.permute.xlu1 %749 }
 0x20c   :  { %v795_v12 = vsel %vm9346_vm1, %v790_v21, %v792_v42  ;;  %v800_v58 = vsel %vm9346_vm1, %v792_v42, 0.0 }
 0x20d   :  { %v803_v55 = vmul.f32 %v795_v12, %v7002_v38  ;;  %v804_v34 = vmul.f32 %v800_v58, %v6998_v37 }
 0x20f   :  { %920 = vmatprep.subr.mxu1 %v804_v34  ;;  %v768_v40 = vpop.permute.xlu0 %767  ;;  %v746_v15 = vpop.permute.xlu1 %745 }
 0x210   :  { %921 = vmatpush1.msra.mxu1 %v803_v55  ;;  %v774_v4 = vsel %vm9345_vm2, %v768_v40, %v770_v44  ;;  %v773_v21 = vsel %vm9345_vm2, %v766_v5, %v768_v40 }
 0x213   :  { %v772_v45 = vpop.permute.xlu0 %771  ;;  %v808_v46 = vpop.permute.xlu1 %807 }
 0x214   :  { %v775_v3 = vsel %vm9345_vm2, %v770_v44, %v772_v45  ;;  %v780_v56 = vsel %vm9345_vm2, %v772_v45, 0.0  ;;  %v813_v42 = vsel %vm9347_vm0, %v806_v13, %v808_v46  ;;  %v814_v12 = vsel %vm9347_vm0, %v808_v46, %v810_v61 }
 0x215   :  { %v783_v58 = vmul.f32 %v775_v3, %v7026_v54  ;;  %v821_v34 = vmul.f32 %v6963_v17, %v813_v42  ;;  %v822_v55 = vmul.f32 %v6954_v14, %v814_v12  ;;  %v784_v39 = vmul.f32 %v780_v56, %v7022_v53 }
 0x216   :  { %v802_v13 = vmul.f32 %v794_v16, %v6976_v27  ;;  %v801_v61 = vmul.f32 %v793_v9, %v6994_v36  ;;  %v782_v14 = vmul.f32 %v774_v4, %v7012_v47  ;;  %v781_v44 = vmul.f32 %v773_v21, %v7017_v51 }
 0x217   :  { %v748_v38 = vpop.permute.xlu0 %747  ;;  %847 = vmatprep.subr.mxu0 %v822_v55  ;;  %922 = vmatprep.subr.mxu1 %v784_v39  ;;  %v724_v45 = vpop.permute.xlu1 %723  ;;  %v742_v12 = vmul.f32 %v7232_v0, %v7046_v11  ;;  %v716_v55 = vsel %vm9344_vm5, 0.0, %v7284_v29  ;;  %v744_v4 = vmul.f32 %v7226_v18, %v7071_v24  ;;  %vm1745_vm2 = vcmask 31744  }
 0x218   :  { %v754_v46 = vsel %vm9352_vm3, %v748_v38, %v750_v57  ;;  %848 = vmatpush1.msra.mxu0 %v821_v34  ;;  %v753_v17 = vsel %vm9352_vm3, %v746_v15, %v748_v38  ;;  %923 = vmatpush1.msra.mxu1 %v783_v58  ;;  %v729_v9 = vsel %vm303_vm4, %v7280_v59, %v724_v45  ;;  %v736_v38 = vsel %vm303_vm4, 0.0, %v7280_v59 }
 0x219   :  { %849 = vmatprep.subr.mxu0 %v802_v13  ;;  %v762_v3 = vmul.f32 %v754_v46, %v7042_v6  ;;  %v761_v16 = vmul.f32 %v753_v17, %v7054_v19  ;;  %v730_v59 = vsel %vm303_vm4, %v724_v45, %v7282_v62  ;;  %v738_v0 = vmul.f32 %v729_v9, %v7081_v33 }
 0x21a   :  { %850 = vmatpush1.msra.mxu0 %v801_v61  ;;  %v737_v21 = vmul.f32 %v736_v38, %v7085_v35  ;;  %v717_v61 = vmul.f32 %v716_v55, %v7124_v10  ;;  %v739_v18 = vmul.f32 %v730_v59, %v7109_v2  ;;  %vm1840_vm0 = vcmask 220160  }
 0x21b   :  { %v752_v5 = vpop.permute.xlu0 %751  ;;  %851 = vmatprep.subr.mxu0 %v782_v14  ;;  %v728_v40 = vpop.permute.xlu1 %727 }
 0x21c   :  { %v755_v56 = vsel %vm9352_vm3, %v750_v57, %v752_v5  ;;  %v760_v15 = vsel %vm9352_vm3, %v752_v5, 0.0  ;;  %852 = vmatpush1.msra.mxu0 %v781_v44  ;;  %v731_v34 = vsel %vm303_vm4, %v7282_v62, %v728_v40  ;;  %v741_v57 = vmul.f32 %v7204_v31, %v7058_v20 }
 0x21d   :  { %v763_v42 = vmul.f32 %v755_v56, %v7067_v23  ;;  %853 = vmatprep.subr.mxu0 %v762_v3  ;;  %v764_v58 = vmul.f32 %v760_v15, %v7063_v22  ;;  %v743_v31 = vmul.f32 %v7208_v1, %v7075_v25  ;;  %v740_v62 = vmul.f32 %v731_v34, %v7103_v52 }
 0x21e   :  { %854 = vmatpush1.msra.mxu0 %v761_v16  ;;  %v696_v5 = vsel %vm229_vm6, 0.0, %v7288_v26 }
 0x21f   :  { %855 = vmatprep.subr.mxu0 %v742_v12  ;;  %924 = vmatprep.subr.mxu1 %v764_v58  ;;  %v704_v39 = vpop.permute.xlu1 %703  ;;  %v686_v14 = vpop.permute.xlu0 %685 }
 0x220   :  { %v709_v13 = vsel %vm9344_vm5, %v7284_v29, %v704_v39  ;;  %856 = vmatpush1.msra.mxu0 %v741_v57  ;;  %925 = vmatpush1.msra.mxu1 %v763_v42  ;;  %v710_v29 = vsel %vm9344_vm5, %v704_v39, %v7286_v30  ;;  %v655_v39 = vld [vmem:[%s6015_s2] sm:$0xff]  ;;  %s6826_s2 = smov 33  }
 0x221   :  { %857 = vmatprep.subr.mxu0 %v738_v0  ;;  %926 = vmatprep.subr.mxu1 %v744_v4  ;;  %v718_v45 = vmul.f32 %v709_v13, %v7120_v7  ;;  %v719_v44 = vmul.f32 %v710_v29, %v7136_v41  ;;  %s7512_s5 = sld [smem:[%s9303_s0 + %s6826_s2]]   ;;  %s6831_s2 = smov 123  }
 0x222   :  { %858 = vmatpush1.msra.mxu0 %v737_v21  ;;  %927 = vmatpush1.msra.mxu1 %v743_v31 }
 0x223   :  { %928 = vmatprep.subr.mxu1 %v740_v62  ;;  %v708_v46 = vpop.permute.xlu1 %707  ;;  %859 = vmatprep.subr.mxu0 %v718_v45  ;;  %v662_v15 = vpop.permute.xlu0 %661 }
 0x224   :  { %v711_v1 = vsel %vm9344_vm5, %v7286_v30, %v708_v46  ;;  %860 = vmatpush1.msra.mxu0 %v717_v61  ;;  %929 = vmatpush1.msra.mxu1 %v739_v18  ;;  %v697_v30 = vmul.f32 %v696_v5, %v7151_v50  ;;  %v676_v12 = vsel %vm9341_vm7, 0.0, %v662_v15  ;;  %vm1760_vm5 = vcmask 23552  }
 0x225   :  { %v720_v17 = vmul.f32 %v711_v1, %v7130_v32  ;;  %v677_v55 = vmul.f32 %v676_v12, %v7182_v43  ;;  %v1025_v12 = vld [vmem:[%s7383_s13 + $0x170] sm:$0xff] }
 0x227   :  { %930 = vmatprep.subr.mxu1 %v720_v17  ;;  %v684_v40 = vpop.permute.xlu1 %683  ;;  %v666_v59 = vpop.permute.xlu0 %665 }
 0x228   :  { %v689_v3 = vsel %vm229_vm6, %v7288_v26, %v684_v40  ;;  %931 = vmatpush1.msra.mxu1 %v719_v44  ;;  %v690_v9 = vsel %vm229_vm6, %v684_v40, %v686_v14 }
 0x229   :  { %v698_v16 = vmul.f32 %v689_v3, %v7147_v49  ;;  %v699_v42 = vmul.f32 %v690_v9, %v7163_v63  ;;  %v1042_v9 = vld [vmem:[%s7383_s13 + $0x1f8] sm:$0xff]  ;;  %v1232_v63 = vld [vmem:[%s7496_s20 + $0x8] sm:$0xff] }
 0x22b   :  { %v688_v56 = vpop.permute.xlu1 %687  ;;  %861 = vmatprep.subr.mxu0 %v698_v16  ;;  %v1010_v16 = vld [vmem:[%s7383_s13 + $0xf8] sm:$0xff] }
 0x22c   :  { %v691_v38 = vsel %vm229_vm6, %v686_v14, %v688_v56  ;;  %862 = vmatpush1.msra.mxu0 %v697_v30  ;;  %v994_v30 = vld [vmem:[%s7383_s13 + $0x78] sm:$0xff]  ;;  %v1009_v56 = vld [vmem:[%s7383_s13 + $0xf0] sm:$0xff] }
 0x22d   :  { %v700_v26 = vmul.f32 %v691_v38, %v7157_v60  ;;  %v993_v38 = vld [vmem:[%s7383_s13 + $0x70] sm:$0xff] }
 0x22f   :  { %932 = vmatprep.subr.mxu1 %v700_v26  ;;  %v664_v58 = vpop.permute.xlu1 %663  ;;  %v1041_v26 = vld [vmem:[%s7383_s13 + $0x1f0] sm:$0xff] }
 0x230   :  { %v669_v34 = vsel %vm9341_vm7, %v662_v15, %v664_v58  ;;  %933 = vmatpush1.msra.mxu1 %v699_v42  ;;  %v670_v0 = vsel %vm9341_vm7, %v664_v58, %v666_v59  ;;  %v1026_v15 = vld [vmem:[%s7383_s13 + $0x178] sm:$0xff]  ;;  %v1008_v42 = vld [vmem:[%s7383_s13 + $0xe8] sm:$0xff] }
 0x231   :  { %v678_v57 = vmul.f32 %v669_v34, %v7178_v8  ;;  %v679_v31 = vmul.f32 %v670_v0, %v7194_v28  ;;  %v992_v58 = vld [vmem:[%s7383_s13 + $0x68] sm:$0xff]  ;;  %v1006_v0 = vld [vmem:[%s7383_s13 + $0xd8] sm:$0xff]  ;;  %v9422_v8 = vld [vmem:[#allocation28_spill] sm:$0xff] }
 0x232   :  { %v1040_v34 = vld [vmem:[%s7383_s13 + $0x1e8] sm:$0xff] }
 0x233   :  { %v668_v4 = vpop.permute.xlu1 %667  ;;  %863 = vmatprep.subr.mxu0 %v678_v57  ;;  %v1007_v57 = vld [vmem:[%s7383_s13 + $0xe0] sm:$0xff]  ;;  %v9421_v28 = vld [vmem:[#allocation23_spill] sm:$0xff] }
 0x234   :  { %v671_v21 = vsel %vm9341_vm7, %v666_v59, %v668_v4  ;;  %864 = vmatpush1.msra.mxu0 %v677_v55  ;;  %v828_v45 = vpop.permute.xlu0 %827  ;;  %v1024_v55 = vld [vmem:[%s7383_s13 + $0x168] sm:$0xff]  ;;  %v991_v59 = vld [vmem:[%s7383_s13 + $0x60] sm:$0xff]  ;;  %vm1795_vm7 = vcmask 252928  }
 0x235   :  { %v680_v13 = vmul.f32 %v671_v21, %v7188_v48  ;;  %6058 = vmatmul.mubr.msk.f32.vlgmr.msra.gmra.mxu0 %vm9340_vm8, %v655_v39  ;;  %6323 = vmatprep.subr.mxu0 %v1010_v16  ;;  %v1023_v4 = vld [vmem:[%s7383_s13 + $0x160] sm:$0xff]  ;;  %v990_v21 = vld [vmem:[%s7383_s13 + $0x58] sm:$0xff] }
 0x236   :  { %6324 = vmatpush3.msra.mxu0 %v994_v30  ;;  %v987_v16 = vld [vmem:[%s7383_s13 + $0x40] sm:$0xff] }
 0x237   :  { %934 = vmatprep.subr.mxu1 %v680_v13  ;;  %6325 = vmatprep.subr.mxu0 %v1009_v56  ;;  %v1038_v13 = vld [vmem:[%s7383_s13 + $0x1d8] sm:$0xff]  ;;  %v1035_v30 = vld [vmem:[%s7383_s13 + $0x1c0] sm:$0xff] }
 0x238   :  { %935 = vmatpush1.msra.mxu1 %v679_v31  ;;  %6326 = vmatpush3.msra.mxu0 %v993_v38  ;;  %v1005_v31 = vld [vmem:[%s7383_s13 + $0xd0] sm:$0xff]  ;;  %v1019_v56 = vld [vmem:[%s7383_s13 + $0x140] sm:$0xff]  ;;  %v1034_v38 = vld [vmem:[%s7383_s13 + $0x1b8] sm:$0xff] }
 0x239   :  { %6059 = vmatmul.mubr.msk.f32.vlgmr.msra.gmra.mxu1 %vm9340_vm8, %v655_v39  ;;  %6358 = vmatprep.subr.mxu1 %v1042_v9  ;;  %v1039_v39 = vld [vmem:[%s7383_s13 + $0x1e0] sm:$0xff]  ;;  %v1002_v9 = vld [vmem:[%s7383_s13 + $0xb8] sm:$0xff] }
 0x23a   :  { %6359 = vmatpush3.msra.mxu1 %v1026_v15  ;;  %6327 = vmatprep.subr.mxu0 %v1008_v42  ;;  %v986_v15 = vld [vmem:[%s7383_s13 + $0x38] sm:$0xff] }
 0x23b   :  { %6360 = vmatprep.subr.mxu1 %v1041_v26  ;;  %6328 = vmatpush3.msra.mxu0 %v992_v58  ;;  %v1001_v26 = vld [vmem:[%s7383_s13 + $0xb0] sm:$0xff]  ;;  %v1018_v42 = vld [vmem:[%s7383_s13 + $0x138] sm:$0xff] }
 0x23c   :  { %6361 = vmatpush3.msra.mxu1 %v1025_v12  ;;  %6329 = vmatprep.subr.mxu0 %v1007_v57  ;;  %v985_v12 = vld [vmem:[%s7383_s13 + $0x30] sm:$0xff] }
 0x23d   :  { %6362 = vmatprep.subr.mxu1 %v1040_v34  ;;  %6330 = vmatpush3.msra.mxu0 %v991_v59  ;;  %v1033_v58 = vld [vmem:[%s7383_s13 + $0x1b0] sm:$0xff]  ;;  %v1000_v34 = vld [vmem:[%s7383_s13 + $0xa8] sm:$0xff] }
 0x23e   :  { %6363 = vmatpush3.msra.mxu1 %v1024_v55  ;;  %6331 = vmatprep.subr.mxu0 %v1006_v0  ;;  %v1017_v57 = vld [vmem:[%s7383_s13 + $0x130] sm:$0xff]  ;;  %v984_v55 = vld [vmem:[%s7383_s13 + $0x28] sm:$0xff] }
 0x23f   :  { %6364 = vmatprep.subr.mxu1 %v1039_v39  ;;  %6332 = vmatpush3.msra.mxu0 %v990_v21  ;;  %v1032_v59 = vld [vmem:[%s7383_s13 + $0x1a8] sm:$0xff]  ;;  %v999_v39 = vld [vmem:[%s7383_s13 + $0xa0] sm:$0xff] }
 0x240   :  { %6365 = vmatpush3.msra.mxu1 %v1023_v4  ;;  %6333 = vmatprep.subr.mxu0 %v1005_v31  ;;  %v1016_v0 = vld [vmem:[%s7383_s13 + $0x128] sm:$0xff]  ;;  %v983_v4 = vld [vmem:[%s7383_s13 + $0x20] sm:$0xff] }
 0x241   :  { %6366 = vmatprep.subr.mxu1 %v1038_v13  ;;  %v1031_v21 = vld [vmem:[%s7383_s13 + $0x1a0] sm:$0xff]  ;;  %v998_v13 = vld [vmem:[%s7383_s13 + $0x98] sm:$0xff] }
 0x242   :  { %v1015_v31 = vld [vmem:[%s7383_s13 + $0x120] sm:$0xff] }
 0x2f5   :  { %v899_v62 = vpop.f32.mrf.mxu0 }
 0x2f6   :  { %v900_v14 = vadd.f32 %v899_v62, %v828_v45  ;;  %v1022_v62 = vld [vmem:[%s7383_s13 + $0x158] sm:$0xff] }
 0x2f7   :  { %v901_v61 = vpop.f32.mrf.mxu0  ;;  %6367 = vmatpush3.msra.mxu1 %v1022_v62  ;;  %v982_v62 = vld [vmem:[%s7383_s13 + $0x18] sm:$0xff] }
 0x2f8   :  { %v902_v18 = vadd.f32 %v901_v61, %v828_v45  ;;  %v7393_v3 = vmax.f32 %v900_v14, 0.0  ;;  %v1037_v61 = vld [vmem:[%s7383_s13 + $0x1d0] sm:$0xff]  ;;  %v1003_v14 = vld [vmem:[%s7383_s13 + $0xc0] sm:$0xff] }
 0x2f9   :  { %v970_v29 = vpop.f32.mrf.mxu1  ;;  %6368 = vmatprep.subr.mxu1 %v1037_v61  ;;  %v997_v61 = vld [vmem:[%s7383_s13 + $0x90] sm:$0xff] }
 0x2fa   :  { %v7378_v46 = vmax.f32 %v902_v18, 0.0  ;;  %v971_v1 = vadd.f32 %v970_v29, %v828_v45  ;;  %v1004_v18 = vld [vmem:[%s7383_s13 + $0xc8] sm:$0xff]  ;;  %v1021_v29 = vld [vmem:[%s7383_s13 + $0x150] sm:$0xff] }
 0x2fb   :  { %v972_v17 = vpop.f32.mrf.mxu1  ;;  %6369 = vmatpush3.msra.mxu1 %v1021_v29  ;;  %v981_v29 = vld [vmem:[%s7383_s13 + $0x10] sm:$0xff] }
 0x2fc   :  { %v7385_v44 = vmax.f32 %v971_v1, 0.0  ;;  %v973_v5 = vadd.f32 %v972_v17, %v828_v45  ;;  %1049 = vrot.lane.b32.xlu1 %v7378_v46, %s6806_s9  ;;  %v989_v45 = vld [vmem:[%s7383_s13 + $0x50] sm:$0xff]  ;;  %v988_v1 = vld [vmem:[%s7383_s13 + $0x48] sm:$0xff] }
 0x2fd   :  { %v1036_v17 = vld [vmem:[%s7383_s13 + $0x1c8] sm:$0xff]  ;;  %6334 = vmatpush3.msra.mxu0 %v989_v45  ;;  %v1030_v45 = vld [vmem:[%s7383_s13 + $0x198] sm:$0xff] }
 0x2fe   :  { %v7389_v40 = vmax.f32 %v973_v5, 0.0  ;;  %1051 = vrot.lane.b32.xlu0 %v7385_v44, %s6806_s9  ;;  %v1020_v5 = vld [vmem:[%s7383_s13 + $0x148] sm:$0xff]  ;;  %6335 = vmatprep.subr.mxu0 %v1004_v18  ;;  %v1014_v18 = vld [vmem:[%s7383_s13 + $0x118] sm:$0xff] }
 0x2ff   :  { %6336 = vmatpush3.msra.mxu0 %v988_v1  ;;  %6370 = vmatprep.subr.mxu1 %v1036_v17  ;;  %v1029_v1 = vld [vmem:[%s7383_s13 + $0x190] sm:$0xff] }
 0x300   :  { %1053 = vrot.lane.b32.xlu1 %v7389_v40, %s6806_s9  ;;  %6337 = vmatprep.subr.mxu0 %v1003_v14  ;;  %v996_v14 = vld [vmem:[%s7383_s13 + $0x88] sm:$0xff] }
 0x301   :  { %6371 = vmatpush3.msra.mxu1 %v1020_v5  ;;  %6338 = vmatpush3.msra.mxu0 %v987_v16  ;;  %v1013_v5 = vld [vmem:[%s7383_s13 + $0x110] sm:$0xff]  ;;  %v980_v16 = vld [vmem:[%s7383_s13 + $0x8] sm:$0xff] }
 0x302   :  { %1047 = vrot.lane.b32.xlu0 %v7393_v3, %s6806_s9  ;;  %6372 = vmatprep.subr.mxu1 %v1035_v30  ;;  %v1028_v30 = vld [vmem:[%s7383_s13 + $0x188] sm:$0xff] }
 0x303   :  { %6339 = vmatprep.subr.mxu0 %v1002_v9  ;;  %6373 = vmatpush3.msra.mxu1 %v1019_v56  ;;  %v995_v9 = vld [vmem:[%s7383_s13 + $0x80] sm:$0xff] }
 0x304   :  { %6340 = vmatpush3.msra.mxu0 %v986_v15  ;;  %6374 = vmatprep.subr.mxu1 %v1034_v38  ;;  %v1012_v15 = vld [vmem:[%s7383_s13 + $0x108] sm:$0xff]  ;;  %v979_v38 = vld [vmem:[%s7383_s13] sm:$0xff] }
 0x305   :  { %6341 = vmatprep.subr.mxu0 %v1001_v26  ;;  %6375 = vmatpush3.msra.mxu1 %v1018_v42  ;;  %v1027_v26 = vld [vmem:[%s7383_s13 + $0x180] sm:$0xff] }
 0x306   :  { %6342 = vmatpush3.msra.mxu0 %v985_v12  ;;  %6376 = vmatprep.subr.mxu1 %v1033_v58  ;;  %v1011_v58 = vld [vmem:[%s7383_s13 + $0x100] sm:$0xff]  ;;  %s6829_s13 = smov 125  }
 0x307   :  { %6343 = vmatprep.subr.mxu0 %v1000_v34  ;;  %6377 = vmatpush3.msra.mxu1 %v1017_v57 }
 0x308   :  { %6344 = vmatpush3.msra.mxu0 %v984_v55  ;;  %6378 = vmatprep.subr.mxu1 %v1032_v59 }
 0x309   :  { %6345 = vmatprep.subr.mxu0 %v999_v39  ;;  %6379 = vmatpush3.msra.mxu1 %v1016_v0  ;;  %v9413_v0 = vmov 0.0  }
 0x30a   :  { %6346 = vmatpush3.msra.mxu0 %v983_v4  ;;  %6380 = vmatprep.subr.mxu1 %v1031_v21 }
 0x30b   :  { %6347 = vmatprep.subr.mxu0 %v998_v13  ;;  %6381 = vmatpush3.msra.mxu1 %v1015_v31 }
 0x30c   :  { %6348 = vmatpush3.msra.mxu0 %v982_v62  ;;  %6382 = vmatprep.subr.mxu1 %v1030_v45 }
 0x30d   :  { %6349 = vmatprep.subr.mxu0 %v997_v61  ;;  %6383 = vmatpush3.msra.mxu1 %v1014_v18 }
 0x30e   :  { %6350 = vmatpush3.msra.mxu0 %v981_v29  ;;  %6384 = vmatprep.subr.mxu1 %v1029_v1 }
 0x30f   :  { %6351 = vmatprep.subr.mxu0 %v996_v14  ;;  %6385 = vmatpush3.msra.mxu1 %v1013_v5 }
 0x310   :  { %6352 = vmatpush3.msra.mxu0 %v980_v16  ;;  %6386 = vmatprep.subr.mxu1 %v1028_v30 }
 0x311   :  { %6353 = vmatprep.subr.mxu0 %v995_v9  ;;  %6387 = vmatpush3.msra.mxu1 %v1012_v15 }
 0x312   :  { %6354 = vmatpush3.msra.mxu0 %v979_v38  ;;  %6388 = vmatprep.subr.mxu1 %v1027_v26 }
 0x313   :  { %6389 = vmatpush3.msra.mxu1 %v1011_v58 }
 0x314   :  { %1518 = vmatprep.subr.mxu1 %v9413_v0 }
 0x36e   :  { %v1050_v17 = vpop.permute.xlu1 %1049 }
 0x370   :  { %v1052_v56 = vpop.permute.xlu0 %1051 }
 0x371   :  { %v7463_v42 = vsel %vm9352_vm3, %v1050_v17, %v1052_v56 }
 0x372   :  { %9410 = vst [vmem:[#allocation33_spill] sm:$0xff] %v7463_v42  ;;  %v1054_v12 = vpop.permute.xlu1 %1053  ;;  %v1064_v55 = vmax.f32 %v7378_v46, %v7463_v42 }
 0x373   :  { %v7467_v34 = vsel %vm9352_vm3, %v1052_v56, %v1054_v12  ;;  %v7470_v57 = vsel %vm9352_vm3, %v1054_v12, 0.0 }
 0x374   :  { %9411 = vst [vmem:[#allocation34_spill] sm:$0xff] %v7467_v34  ;;  %9412 = vst [vmem:[#allocation35_spill] sm:$0xff] %v7470_v57  ;;  %v1065_v59 = vmax.f32 %v7385_v44, %v7467_v34  ;;  %v1048_v39 = vpop.permute.xlu0 %1047  ;;  %v1066_v21 = vmax.f32 %v7389_v40, %v7470_v57 }
 0x375   :  { %v7478_v4 = vsel %vm9352_vm3, %v1048_v39, %v1050_v17 }
 0x376   :  { %9414 = vst [vmem:[#allocation36_spill] sm:$0xff] %v7478_v4  ;;  %v1063_v13 = vmax.f32 %v7393_v3, %v7478_v4  ;;  %v6782_v31 = vpack.i.bf16 %v1065_v59, %v1064_v55 }
 0x378   :  { %6783 = vrot.lane.b32.xlu1 %v6782_v31, %s6804_s7  ;;  %v6787_v62 = vpack.i.bf16 %v1063_v13, %v1066_v21 }
 0x37a   :  { %6788 = vrot.lane.b32.xlu0 %v6787_v62, %s6804_s7 }
 0x3ea   :  { %v6784_v45 = vpop.permute.xlu1 %6783 }
 0x3eb   :  { %v6786_v61 = vunpack.i.h.bf16 %v6784_v45  ;;  %v6785_v18 = vunpack.i.l.bf16 %v6784_v45  ;;  %v174_v45 = vld [vmem:[%s7512_s5] sm:$0xff] }
 0x3ec   :  { %v6789_v29 = vpop.permute.xlu0 %6788  ;;  %v7549_v43 = vrot.slane %v174_v45, %v9421_v28 }
 0x3ed   :  { %v6791_v1 = vunpack.i.h.bf16 %v6789_v29  ;;  %v6790_v14 = vunpack.i.l.bf16 %v6789_v29  ;;  %v1080_v17 = vsel %vm9346_vm1, %v6785_v18, %v6786_v61 }
 0x3ee   :  { %v1088_v5 = vmax.f32 %v1064_v55, %v1080_v17 }
 0x3ef   :  { %v1079_v16 = vsel %vm9346_vm1, %v6791_v1, %v6785_v18  ;;  %v1081_v30 = vsel %vm9346_vm1, %v6786_v61, %v6790_v14  ;;  %v1086_v9 = vsel %vm9346_vm1, %v6790_v14, 0.0  ;;  %v7516_v61 = vld [vmem:[%s7512_s5 + $0x8] ss:$0 sm:$0xff]  ;;  %v9415_v18 = vld [vmem:[#allocation2_spill] sm:$0xff]  ;;  %vm1730_vm1 = vcmask 39936  }
 0x3f0   :  { %1155 = vmatprep.mubr.f32.mxu0 %v1088_v5  ;;  %v1087_v56 = vmax.f32 %v1063_v13, %v1079_v16  ;;  %v1090_v15 = vmax.f32 %v1066_v21, %v1086_v9  ;;  %v1089_v38 = vmax.f32 %v1065_v59, %v1081_v30  ;;  %v1231_v59 = vld [vmem:[%s7496_s20] sm:$0xff]  ;;  %v1234_v13 = vld [vmem:[%s6018_s27 + $0x8] sm:$0xff]  ;;  %v7519_v29 = vrot.slane %v174_v45, %v9415_v18  ;;  %s7711_s20 = sld [smem:[%s9303_s0 + %s6824_s30]]  }
 0x3f1   :  { %v1233_v21 = vld [vmem:[%s6018_s27] sm:$0xff]  ;;  %v9416_v30 = vld [vmem:[#allocation3_spill] sm:$0xff]  ;;  %s6022_s27 = sld [smem:[%s9303_s0 + %s6830_s23]]  }
 0x3f2   :  { %1156 = vmatmul.mubr.f32.vlgmr.msra.gmra.mxu0 %v1087_v56  ;;  %1225 = vmatprep.mubr.f32.mxu1 %v1090_v15  ;;  %v7525_v9 = vrot.slane %v174_v45, %v9416_v30  ;;  %v9417_v15 = vld [vmem:[#allocation6_spill] sm:$0xff] }
 0x3f3   :  { %1226 = vmatmul.mubr.f32.vlgmr.msra.gmra.mxu1 %v1089_v38  ;;  %6554 = vmatprep.mubr.msk.f32.mxu0 %vm9340_vm8, %v1231_v59  ;;  %v7529_v38 = vrot.slane %v174_v45, %v9417_v15 }
 0x4b2   :  { %v6355_v26 = vpop.f32.mrf.mxu0 }
 0x4b3   :  { %v6390_v12 = vpop.f32.mrf.mxu1 }
 0x4b4   :  { %v6356_v58 = vpop.f32.mrf.mxu0 }
 0x4b5   :  { %v6357_v39 = vadd.f32 %v6356_v58, %v6355_v26  ;;  %v6391_v31 = vpop.f32.mrf.mxu1 }
 0x4b6   :  { %v6392_v62 = vadd.f32 %v6391_v31, %v6390_v12 }
 0x4b8   :  { %v1228_v55 = vadd.f32 %v6392_v62, %v6357_v39  ;;  %v9418_v62 = vld [vmem:[#allocation7_spill] sm:$0xff] }
 0x4b9   :  { %v7535_v59 = vrot.slane %v174_v45, %v9418_v62 }
 0x4ba   :  { %1299 = vrot.lane.b32.xlu0 %v1228_v55, %s6818_s14  ;;  %1309 = vrot.lane.b32.xlu1 %v1228_v55, %s6819_s15 }
 0x4be   :  { %1280 = vrot.lane.b32.xlu0 %v1228_v55, %s6806_s9  ;;  %1289 = vrot.lane.b32.xlu1 %v1228_v55, %s6821_s22 }
 0x4c2   :  { %1256 = vrot.lane.b32.xlu0 %v1228_v55, %s6823_s28  ;;  %1266 = vrot.lane.b32.xlu1 %v1228_v55, %s6807_s10 }
 0x4c6   :  { %1236 = vrot.lane.b32.xlu0 %v1228_v55, %s6824_s30  ;;  %1246 = vrot.lane.b32.xlu1 %v1228_v55, %s6825_s1 }
 0x4ca   :  { %1321 = vperm.xlu0 %6781, %v1233_v21   ;;  %1326 = vperm.xlu1 %6792, %v1234_v13  }
 0x52c   :  { %v1300_v1 = vpop.permute.xlu0 %1299  ;;  %v1310_v14 = vpop.permute.xlu1 %1309 }
 0x52d   :  { %v1303_v17 = vsel %vm1302_vm9, %v1300_v1, 0.0  ;;  %v1313_v5 = vsel %vm1312_vm10, %v1310_v14, 0.0  ;;  %v9419_v1 = vld [vmem:[#allocation8_spill] sm:$0xff] }
 0x52e   :  { %v1318_v16 = vmul.f32 %v7516_v61, %v1313_v5  ;;  %v1308_v56 = vmul.f32 %v7519_v29, %v1303_v17  ;;  %v7539_v14 = vrot.slane %v174_v45, %v9419_v1 }
 0x530   :  { %v1281_v26 = vpop.permute.xlu0 %1280  ;;  %6536 = vmatprep.subr.mxu0 %v1318_v16  ;;  %v1290_v12 = vpop.permute.xlu1 %1289 }
 0x531   :  { %v1283_v58 = vsel %vm9352_vm3, %v1281_v26, 0.0  ;;  %v1293_v39 = vsel %vm1292_vm11, %v1290_v12, 0.0  ;;  %6537 = vmatpush3.msra.mxu0 %v1318_v16  ;;  %v9420_v16 = vld [vmem:[#allocation18_spill] sm:$0xff]  ;;  %v1279_v12 = vmul.f32 %v7535_v59, %v1228_v55  ;;  %v7554_v55 = vrot.slane %v174_v45, %v9422_v8 }
 0x532   :  { %v1298_v31 = vmul.f32 %v7525_v9, %v1293_v39  ;;  %6538 = vmatprep.subr.mxu0 %v1308_v56  ;;  %v1288_v21 = vmul.f32 %v7529_v38, %v1283_v58  ;;  %v7543_v26 = vrot.slane %v174_v45, %v9420_v16 }
 0x533   :  { %6539 = vmatpush3.msra.mxu0 %v1308_v56 }
 0x534   :  { %v1257_v13 = vpop.permute.xlu0 %1256  ;;  %6540 = vmatprep.subr.mxu0 %v1298_v31  ;;  %v1267_v17 = vpop.permute.xlu1 %1266 }
 0x535   :  { %v1269_v5 = vsel %vm303_vm4, 0.0, %v1267_v17  ;;  %6541 = vmatpush3.msra.mxu0 %v1298_v31  ;;  %v1260_v56 = vsel %vm1259_vm12, 0.0, %v1257_v13 }
 0x536   :  { %6542 = vmatprep.subr.mxu0 %v1288_v21  ;;  %v1274_v58 = vmul.f32 %v7539_v14, %v1269_v5  ;;  %v1265_v48 = vmul.f32 %v7543_v26, %v1260_v56 }
 0x537   :  { %6543 = vmatpush3.msra.mxu0 %v1288_v21 }
 0x538   :  { %v1237_v39 = vpop.permute.xlu0 %1236  ;;  %v1247_v17 = vpop.permute.xlu1 %1246  ;;  %6544 = vmatprep.subr.mxu0 %v1279_v12 }
 0x539   :  { %v1250_v31 = vsel %vm1249_vm13, 0.0, %v1247_v17  ;;  %6545 = vmatpush3.msra.mxu0 %v1279_v12  ;;  %v1240_v21 = vsel %vm1239_vm14, 0.0, %v1237_v39 }
 0x53a   :  { %6546 = vmatprep.subr.mxu0 %v1274_v58  ;;  %v1255_v13 = vmul.f32 %v7549_v43, %v1250_v31  ;;  %v1245_v5 = vmul.f32 %v7554_v55, %v1240_v21 }
 0x53b   :  { %6547 = vmatpush3.msra.mxu0 %v1274_v58 }
 0x53c   :  { %6548 = vmatprep.subr.mxu0 %v1265_v48 }
 0x53d   :  { %6549 = vmatpush3.msra.mxu0 %v1265_v48  ;;  %v1417_v48 = vld [vmem:[%s6020_s24 + $0x8] sm:$0xff] }
 0x53e   :  { %6550 = vmatprep.subr.mxu0 %v1255_v13 }
 0x53f   :  { %6551 = vmatpush3.msra.mxu0 %v1255_v13 }
 0x540   :  { %6552 = vmatprep.subr.mxu0 %v1245_v5 }
 0x541   :  { %6553 = vmatpush3.msra.mxu0 %v1245_v5 }
 0x542   :  { %6555 = vmatmul.mubr.msk.f32.vlgmr.msra.gmra.mxu0 %vm9340_vm8, %v1232_v63  ;;  %v1416_v63 = vld [vmem:[%s6020_s24] sm:$0xff]  ;;  %vm1810_vm8 = vcmask 236544   ;;  %s6837_s24 = smov 37  }
 0x543   :  { %s8041_s26 = sld [smem:[%s9303_s0 + %s6837_s24]]   ;;  %s6839_s24 = smov 18  }
 0x545   :  { %v1327_v12 = vpop.permute.xlu1 %1326  ;;  %v1322_v17 = vpop.permute.xlu0 %1321 }
 0x602   :  { %v6556_v45 = vpop.f32.mrf.mxu0 }
 0x603   :  { %v1407_v56 = vadd.f32 %v6556_v45, %v1327_v12 }
 0x604   :  { %v1401_v50 = vpop.f32.mrf.mxu0 }
 0x605   :  { %v1411_v39 = vmax.f32 %v1407_v56, 0.0  ;;  %v1402_v58 = vadd.f32 %v1401_v50, %v1322_v17  ;;  %v1413_v50 = vld [vmem:[%s7575_s19 + $0x8] sm:$0xff] }
 0x606   :  { %6063 = vmatprep.mubr.msk.f32.mxu1 %vm229_vm6, %v1413_v50 }
 0x607   :  { %v1410_v60 = vmax.f32 %v1402_v58, 0.0  ;;  %1484 = vrot.lane.b32.xlu1 %v1411_v39, %s6818_s14 }
 0x609   :  { %1482 = vrot.lane.b32.xlu0 %v1410_v60, %s6818_s14 }
 0x60b   :  { %1474 = vrot.lane.b32.xlu1 %v1411_v39, %s6821_s22 }
 0x60d   :  { %1472 = vrot.lane.b32.xlu0 %v1410_v60, %s6821_s22 }
 0x60f   :  { %1464 = vrot.lane.b32.xlu1 %v1411_v39, %s6806_s9 }
 0x611   :  { %1462 = vrot.lane.b32.xlu0 %v1410_v60, %s6806_s9 }
 0x613   :  { %1452 = vrot.lane.b32.xlu1 %v1411_v39, %s6807_s10 }
 0x615   :  { %1450 = vrot.lane.b32.xlu0 %v1410_v60, %s6807_s10 }
 0x617   :  { %1442 = vrot.lane.b32.xlu1 %v1411_v39, %s6823_s28 }
 0x619   :  { %1440 = vrot.lane.b32.xlu0 %v1410_v60, %s6823_s28 }
 0x61b   :  { %1432 = vrot.lane.b32.xlu1 %v1411_v39, %s6825_s1 }
 0x61d   :  { %1430 = vrot.lane.b32.xlu0 %v1410_v60, %s6825_s1 }
 0x61f   :  { %1422 = vrot.lane.b32.xlu1 %v1411_v39, %s6824_s30 }
 0x621   :  { %1420 = vrot.lane.b32.xlu0 %v1410_v60, %s6824_s30 }
 0x623   :  { %1494 = vrot.lane.b32.xlu1 %v1411_v39, %s6819_s15 }
 0x625   :  { %1492 = vrot.lane.b32.xlu0 %v1410_v60, %s6819_s15 }
 0x627   :  { %1504 = vperm.xlu1 %6792, %v1416_v63  }
 0x629   :  { %1509 = vperm.xlu0 %6781, %v1417_v48  }
 0x679   :  { %v1485_v31 = vpop.permute.xlu1 %1484 }
 0x67a   :  { %v1489_v21 = vsel %vm1302_vm9, %v1485_v31, 0.0 }
 0x67b   :  { %v1491_v13 = vmul.f32 %v1489_v21, %v7519_v29  ;;  %v1483_v5 = vpop.permute.xlu0 %1482 }
 0x67c   :  { %v1488_v12 = vsel %vm1302_vm9, %v1483_v5, 0.0 }
 0x67d   :  { %v1490_v45 = vmul.f32 %v1488_v12, %v7519_v29  ;;  %1519 = vmatpush1.msra.mxu1 %v1491_v13  ;;  %v1475_v56 = vpop.permute.xlu1 %1474 }
 0x67e   :  { %v1479_v17 = vsel %vm1292_vm11, %v1475_v56, 0.0  ;;  %1520 = vmatprep.subr.mxu1 %v9413_v0 }
 0x67f   :  { %v1481_v58 = vmul.f32 %v1479_v17, %v7525_v9  ;;  %1521 = vmatpush1.msra.mxu1 %v1490_v45  ;;  %v1473_v50 = vpop.permute.xlu0 %1472 }
 0x680   :  { %v1478_v63 = vsel %vm1292_vm11, %v1473_v50, 0.0  ;;  %1522 = vmatprep.subr.mxu1 %v9413_v0 }
 0x681   :  { %v1480_v48 = vmul.f32 %v1478_v63, %v7525_v9  ;;  %v1465_v31 = vpop.permute.xlu1 %1464  ;;  %1523 = vmatpush1.msra.mxu1 %v1481_v58  ;;  %v1461_v58 = vmul.f32 %v1411_v39, %v7535_v59 }
 0x682   :  { %v1469_v21 = vsel %vm9352_vm3, %v1465_v31, 0.0  ;;  %1524 = vmatprep.subr.mxu1 %v9413_v0 }
 0x683   :  { %v1471_v13 = vmul.f32 %v1469_v21, %v7529_v38  ;;  %1525 = vmatpush1.msra.mxu1 %v1480_v48  ;;  %v1463_v5 = vpop.permute.xlu0 %1462  ;;  %v1460_v48 = vmul.f32 %v1410_v60, %v7535_v59 }
 0x684   :  { %v1468_v12 = vsel %vm9352_vm3, %v1463_v5, 0.0  ;;  %1526 = vmatprep.subr.mxu1 %v9413_v0 }
 0x685   :  { %v1470_v45 = vmul.f32 %v1468_v12, %v7529_v38  ;;  %v1453_v56 = vpop.permute.xlu1 %1452  ;;  %1527 = vmatpush1.msra.mxu1 %v1471_v13 }
 0x686   :  { %1528 = vmatprep.subr.mxu1 %v9413_v0  ;;  %v1457_v50 = vsel %vm303_vm4, 0.0, %v1453_v56 }
 0x687   :  { %1529 = vmatpush1.msra.mxu1 %v1470_v45  ;;  %v1451_v17 = vpop.permute.xlu0 %1450  ;;  %v1459_v21 = vmul.f32 %v1457_v50, %v7539_v14 }
 0x688   :  { %1530 = vmatprep.subr.mxu1 %v9413_v0  ;;  %v1456_v31 = vsel %vm303_vm4, 0.0, %v1451_v17 }
 0x689   :  { %v1443_v63 = vpop.permute.xlu1 %1442  ;;  %1531 = vmatpush1.msra.mxu1 %v1461_v58  ;;  %v1458_v39 = vmul.f32 %v1456_v31, %v7539_v14 }
 0x68a   :  { %1532 = vmatprep.subr.mxu1 %v9413_v0  ;;  %v1447_v5 = vsel %vm1259_vm12, 0.0, %v1443_v63 }
 0x68b   :  { %v1441_v13 = vpop.permute.xlu0 %1440  ;;  %1533 = vmatpush1.msra.mxu1 %v1460_v48  ;;  %v1449_v60 = vmul.f32 %v1447_v5, %v7543_v26 }
 0x68c   :  { %1534 = vmatprep.subr.mxu1 %v9413_v0  ;;  %v1446_v45 = vsel %vm1259_vm12, 0.0, %v1441_v13 }
 0x68d   :  { %v1433_v12 = vpop.permute.xlu1 %1432  ;;  %1535 = vmatpush1.msra.mxu1 %v1459_v21  ;;  %v1448_v58 = vmul.f32 %v1446_v45, %v7543_v26 }
 0x68e   :  { %1536 = vmatprep.subr.mxu1 %v9413_v0  ;;  %v1437_v17 = vsel %vm1249_vm13, 0.0, %v1433_v12 }
 0x68f   :  { %v1431_v56 = vpop.permute.xlu0 %1430  ;;  %1537 = vmatpush1.msra.mxu1 %v1458_v39  ;;  %v1439_v48 = vmul.f32 %v1437_v17, %v7549_v43 }
 0x690   :  { %1538 = vmatprep.subr.mxu1 %v9413_v0  ;;  %v1436_v63 = vsel %vm1249_vm13, 0.0, %v1431_v56 }
 0x691   :  { %v1423_v50 = vpop.permute.xlu1 %1422  ;;  %1539 = vmatpush1.msra.mxu1 %v1449_v60  ;;  %v1438_v13 = vmul.f32 %v1436_v63, %v7549_v43  ;;  %v1412_v63 = vld [vmem:[%s7575_s19] sm:$0xff] }
 0x692   :  { %1540 = vmatprep.subr.mxu1 %v9413_v0  ;;  %v1427_v21 = vsel %vm1239_vm14, 0.0, %v1423_v50 }
 0x693   :  { %v1421_v31 = vpop.permute.xlu0 %1420  ;;  %1541 = vmatpush1.msra.mxu1 %v1448_v58  ;;  %v1429_v12 = vmul.f32 %v1427_v21, %v7554_v55 }
 0x694   :  { %1542 = vmatprep.subr.mxu1 %v9413_v0  ;;  %v1426_v39 = vsel %vm1239_vm14, 0.0, %v1421_v31  ;;  %v1414_v31 = vld [vmem:[%s7575_s19 + $0x10] sm:$0xff] }
 0x695   :  { %v1495_v5 = vpop.permute.xlu1 %1494  ;;  %1543 = vmatpush1.msra.mxu1 %v1439_v48  ;;  %v1428_v56 = vmul.f32 %v1426_v39, %v7554_v55  ;;  %v1415_v48 = vld [vmem:[%s7575_s19 + $0x18] sm:$0xff] }
 0x696   :  { %1544 = vmatprep.subr.mxu1 %v9413_v0  ;;  %v1499_v60 = vsel %vm1312_vm10, %v1495_v5, 0.0 }
 0x697   :  { %v1493_v45 = vpop.permute.xlu0 %1492  ;;  %1545 = vmatpush1.msra.mxu1 %v1438_v13  ;;  %v1501_v58 = vmul.f32 %v7516_v61, %v1499_v60 }
 0x698   :  { %1546 = vmatprep.subr.mxu1 %v9413_v0  ;;  %v1498_v17 = vsel %vm1312_vm10, %v1493_v45, 0.0 }
 0x699   :  { %1547 = vmatpush1.msra.mxu1 %v1429_v12  ;;  %v1500_v50 = vmul.f32 %v7516_v61, %v1498_v17 }
 0x69a   :  { %1548 = vmatprep.subr.mxu1 %v9413_v0 }
 0x69b   :  { %1549 = vmatpush1.msra.mxu1 %v1428_v56 }
 0x69c   :  { %1578 = vmatprep.subr.mxu1 %v9413_v0 }
 0x69d   :  { %1579 = vmatpush2.msra.mxu1 %v1501_v58  ;;  %v1610_v58 = vld [vmem:[%s7648_s3 + $0x78] sm:$0xff] }
 0x69e   :  { %1580 = vmatprep.subr.mxu1 %v9413_v0  ;;  %6557 = vmatprep.subr.mxu0 %v1610_v58 }
 0x69f   :  { %1581 = vmatpush2.msra.mxu1 %v1500_v50  ;;  %v1609_v50 = vld [vmem:[%s7648_s3 + $0x70] sm:$0xff]  ;;  %6558 = vmatpush3.msra.mxu0 %v1610_v58 }
 0x6a0   :  { %1583 = vmatmul.mubr.f32.vlgmr.msra.gmra.mxu1 %v1412_v63  ;;  %1881 = vmatprep.subr.mxu1 %v9413_v0  ;;  %v1608_v63 = vld [vmem:[%s7648_s3 + $0x68] sm:$0xff]  ;;  %v1597_v58 = vld [vmem:[%s7648_s3 + $0x10] sm:$0xff] }
 0x6a1   :  { %6064 = vmatprep.mubr.msk.f32.mxu1 %vm229_vm6, %v1415_v48  ;;  %6559 = vmatprep.subr.mxu0 %v1609_v50  ;;  %v1607_v48 = vld [vmem:[%s7648_s3 + $0x60] sm:$0xff] }
 0x6a2   :  { %v1505_v21 = vpop.permute.xlu1 %1504  ;;  %6560 = vmatpush3.msra.mxu0 %v1609_v50  ;;  %v1596_v50 = vld [vmem:[%s7648_s3 + $0x8] sm:$0xff] }
 0x6a3   :  { %6561 = vmatprep.subr.mxu0 %v1608_v63 }
 0x6a4   :  { %1588 = vmatmul.mubr.f32.gmra.mxu1 %v1414_v31  ;;  %v1510_v12 = vpop.permute.xlu0 %1509  ;;  %6562 = vmatpush3.msra.mxu0 %v1608_v63  ;;  %v1606_v31 = vld [vmem:[%s7648_s3 + $0x58] sm:$0xff] }
 0x6a5   :  { %6563 = vmatprep.subr.mxu0 %v1607_v48 }
 0x6a6   :  { %6564 = vmatpush3.msra.mxu0 %v1607_v48  ;;  %v1595_v48 = vld [vmem:[%s7648_s3] sm:$0xff] }
 0x6a7   :  { %6565 = vmatprep.subr.mxu0 %v1606_v31 }
 0x6a8   :  { %6566 = vmatpush3.msra.mxu0 %v1606_v31 }
 0x760   :  { %v1584_v13 = vpop.f32.mrf.mxu1 }
 0x761   :  { %v1585_v5 = vadd.f32 %v1584_v13, %v1505_v21  ;;  %v1605_v21 = vld [vmem:[%s7648_s3 + $0x50] sm:$0xff]  ;;  %v1604_v13 = vld [vmem:[%s7648_s3 + $0x48] sm:$0xff] }
 0x762   :  { %v1586_v39 = vpop.f32.mrf.mxu1  ;;  %6567 = vmatprep.subr.mxu0 %v1605_v21 }
 0x763   :  { %v7650_v61 = vmax.f32 %v1585_v5, 0.0  ;;  %6568 = vmatpush3.msra.mxu0 %v1605_v21  ;;  %v1603_v5 = vld [vmem:[%s7648_s3 + $0x40] sm:$0xff]  ;;  %v1602_v39 = vld [vmem:[%s7648_s3 + $0x38] sm:$0xff] }
 0x764   :  { %v1589_v45 = vpop.f32.mrf.mxu1  ;;  %6569 = vmatprep.subr.mxu0 %v1604_v13 }
 0x765   :  { %v1590_v60 = vadd.f32 %v1589_v45, %v1510_v12  ;;  %1613 = vrot.lane.b32.xlu1 %v7650_v61, %s6806_s9  ;;  %6570 = vmatpush3.msra.mxu0 %v1604_v13  ;;  %v1601_v12 = vld [vmem:[%s7648_s3 + $0x30] sm:$0xff]  ;;  %v1600_v45 = vld [vmem:[%s7648_s3 + $0x28] sm:$0xff] }
 0x766   :  { %v1591_v56 = vpop.f32.mrf.mxu1  ;;  %6571 = vmatprep.subr.mxu0 %v1603_v5 }
 0x767   :  { %v7654_v17 = vmax.f32 %v1590_v60, 0.0  ;;  %6572 = vmatpush3.msra.mxu0 %v1603_v5  ;;  %v1599_v60 = vld [vmem:[%s7648_s3 + $0x20] sm:$0xff]  ;;  %v1598_v56 = vld [vmem:[%s7648_s3 + $0x18] sm:$0xff]  ;;  %s6832_s3 = smov 34  }
 0x768   :  { %6573 = vmatprep.subr.mxu0 %v1602_v39  ;;  %s7737_s23 = sld [smem:[%s9303_s0 + %s6832_s3]]   ;;  %s6849_s3 = smov 27  }
 0x769   :  { %1615 = vrot.lane.b32.xlu0 %v7654_v17, %s6806_s9  ;;  %6574 = vmatpush3.msra.mxu0 %v1602_v39 }
 0x76a   :  { %6575 = vmatprep.subr.mxu0 %v1601_v12 }
 0x76b   :  { %6576 = vmatpush3.msra.mxu0 %v1601_v12 }
 0x76c   :  { %6577 = vmatprep.subr.mxu0 %v1600_v45 }
 0x76d   :  { %6578 = vmatpush3.msra.mxu0 %v1600_v45 }
 0x76e   :  { %6579 = vmatprep.subr.mxu0 %v1599_v60 }
 0x76f   :  { %6580 = vmatpush3.msra.mxu0 %v1599_v60 }
 0x770   :  { %6581 = vmatprep.subr.mxu0 %v1598_v56 }
 0x771   :  { %6582 = vmatpush3.msra.mxu0 %v1598_v56 }
 0x772   :  { %6583 = vmatprep.subr.mxu0 %v1597_v58 }
 0x773   :  { %6584 = vmatpush3.msra.mxu0 %v1597_v58 }
 0x774   :  { %6585 = vmatprep.subr.mxu0 %v1596_v50 }
 0x775   :  { %6586 = vmatpush3.msra.mxu0 %v1596_v50 }
 0x776   :  { %6587 = vmatprep.subr.mxu0 %v1595_v48 }
 0x777   :  { %6588 = vmatpush3.msra.mxu0 %v1595_v48 }
 0x7d7   :  { %v1614_v63 = vpop.permute.xlu1 %1613 }
 0x7d8   :  { %v7675_v31 = vsel %vm9352_vm3, %v1614_v63, 0.0 }
 0x7d9   :  { %v1621_v5 = vmax.f32 %v7650_v61, %v7675_v31 }
 0x7db   :  { %v1616_v21 = vpop.permute.xlu0 %1615 }
 0x7dc   :  { %v7678_v13 = vsel %vm9352_vm3, %v1616_v21, 0.0  ;;  %vm2174_vm3 = vcmask 261120  }
 0x7dd   :  { %v1622_v39 = vmax.f32 %v7654_v17, %v7678_v13 }
 0x7df   :  { %v6793_v12 = vpack.i.bf16 %v1622_v39, %v1621_v5 }
 0x7e1   :  { %6794 = vrot.lane.b32.xlu1 %v6793_v12, %s6818_s14  ;;  %v1720_v12 = vld [vmem:[%s6022_s27 + $0x10] sm:$0xff] }
 0x853   :  { %v6795_v45 = vpop.permute.xlu1 %6794 }
 0x854   :  { %v6797_v60 = vunpack.i.h.bf16 %v6795_v45  ;;  %v6796_v56 = vunpack.i.l.bf16 %v6795_v45  ;;  %v1719_v45 = vld [vmem:[%s6022_s27 + $0x8] sm:$0xff] }
 0x856   :  { %v1632_v58 = vsel %vm1302_vm9, %v6797_v60, 0.0  ;;  %v1631_v50 = vsel %vm1302_vm9, %v6796_v56, 0.0  ;;  %v1718_v60 = vld [vmem:[%s6022_s27] sm:$0xff] }
 0x857   :  { %v1634_v63 = vmax.f32 %v1622_v39, %v1632_v58  ;;  %v1633_v48 = vmax.f32 %v1621_v5, %v1631_v50  ;;  %v1711_v5 = vld [vmem:[%s7711_s20 + $0x8] sm:$0xff]  ;;  %v1721_v39 = vld [vmem:[%s6022_s27 + $0x18] sm:$0xff]  ;;  %v7740_v56 = vld [vmem:[%s7737_s23] sm:$0xff] }
 0x858   :  { %6066 = vmatprep.mubr.msk.f32.mxu1 %vm229_vm6, %v1711_v5  ;;  %v7744_v58 = vrot.slane %v7740_v56, %v9415_v18  ;;  %v7759_v41 = vrot.slane %v7740_v56, %v9417_v15  ;;  %v7769_v15 = vrot.slane %v7740_v56, %v9418_v62 }
 0x859   :  { %6589 = vmatprep.mubr.f32.mxu0 %v1633_v48 }
 0x85a   :  { %6590 = vmatmul.mubr.f32.vlgmr.msra.gmra.mxu0 %v1634_v63 }
 0x91a   :  { %v7687_v21 = vpop.f32.mrf.mxu0 }
 0x91b   :  { %1821 = vrot.lane.b32.xlu0 %v7687_v21, %s6828_s4  ;;  %v1788_v62 = vmul.f32 %v7687_v21, %v7769_v15 }
 0x91c   :  { %v7691_v49 = vpop.f32.mrf.mxu0 }
 0x91d   :  { %1819 = vrot.lane.b32.xlu1 %v7691_v49, %s6828_s4 }
 0x91f   :  { %1806 = vrot.lane.b32.xlu0 %v7687_v21, %s6829_s13 }
 0x921   :  { %1804 = vrot.lane.b32.xlu1 %v7691_v49, %s6829_s13 }
 0x923   :  { %1791 = vrot.lane.b32.xlu0 %v7687_v21, %s6806_s9 }
 0x925   :  { %1789 = vrot.lane.b32.xlu1 %v7691_v49, %s6806_s9 }
 0x927   :  { %1771 = vrot.lane.b32.xlu0 %v7687_v21, %s6807_s10 }
 0x929   :  { %1769 = vrot.lane.b32.xlu1 %v7691_v49, %s6807_s10 }
 0x92b   :  { %1756 = vrot.lane.b32.xlu0 %v7687_v21, %s6816_s29 }
 0x92d   :  { %1754 = vrot.lane.b32.xlu1 %v7691_v49, %s6816_s29 }
 0x92f   :  { %1741 = vrot.lane.b32.xlu0 %v7687_v21, %s6815_s25 }
 0x931   :  { %1739 = vrot.lane.b32.xlu1 %v7691_v49, %s6815_s25 }
 0x933   :  { %1726 = vrot.lane.b32.xlu0 %v7687_v21, %s6820_s16 }
 0x935   :  { %1724 = vrot.lane.b32.xlu1 %v7691_v49, %s6820_s16 }
 0x937   :  { %1836 = vrot.lane.b32.xlu0 %v7687_v21, %s6831_s2 }
 0x939   :  { %1834 = vrot.lane.b32.xlu1 %v7691_v49, %s6831_s2 }
 0x93b   :  { %1866 = vperm.xlu0 %6781, %v1721_v39   ;;  %v7750_v39 = vrot.slane %v7740_v56, %v9416_v30 }
 0x93d   :  { %1861 = vperm.xlu1 %6792, %v1720_v12  }
 0x93f   :  { %1856 = vperm.xlu0 %6781, %v1719_v45  }
 0x941   :  { %1851 = vperm.xlu1 %6792, %v1718_v60  }
 0x98d   :  { %v1822_v50 = vpop.permute.xlu0 %1821 }
 0x98e   :  { %v1827_v63 = vsel %vm1825_vm15, %v1822_v50, 0.0 }
 0x98f   :  { %v1833_v48 = vmul.f32 %v7744_v58, %v1827_v63  ;;  %v1820_v5 = vpop.permute.xlu1 %1819 }
 0x990   :  { %v1826_v12 = vsel %vm1825_vm15, %v1820_v5, 0.0 }
 0x991   :  { %v1832_v45 = vmul.f32 %v7744_v58, %v1826_v12  ;;  %1882 = vmatpush1.msra.mxu1 %v1833_v48  ;;  %v1807_v60 = vpop.permute.xlu0 %1806 }
 0x992   :  { %v1812_v18 = vsel %vm1810_vm8, %v1807_v60, 0.0  ;;  %1883 = vmatprep.subr.mxu1 %v9413_v0 }
 0x993   :  { %v1818_v50 = vmul.f32 %v7750_v39, %v1812_v18  ;;  %1884 = vmatpush1.msra.mxu1 %v1832_v45  ;;  %v1805_v63 = vpop.permute.xlu1 %1804 }
 0x994   :  { %v1811_v30 = vsel %vm1810_vm8, %v1805_v63, 0.0  ;;  %1885 = vmatprep.subr.mxu1 %v9413_v0 }
 0x995   :  { %v1817_v48 = vmul.f32 %v7750_v39, %v1811_v30  ;;  %v1792_v5 = vpop.permute.xlu0 %1791  ;;  %1886 = vmatpush1.msra.mxu1 %v1818_v50  ;;  %v7777_v50 = vrot.slane %v7740_v56, %v9419_v1 }
 0x996   :  { %v1797_v12 = vsel %vm1795_vm7, %v1792_v5, 0.0  ;;  %1887 = vmatprep.subr.mxu1 %v9413_v0 }
 0x997   :  { %v1803_v45 = vmul.f32 %v7759_v41, %v1797_v12  ;;  %1888 = vmatpush1.msra.mxu1 %v1817_v48  ;;  %v1790_v60 = vpop.permute.xlu1 %1789 }
 0x998   :  { %v1796_v18 = vsel %vm1795_vm7, %v1790_v60, 0.0  ;;  %1889 = vmatprep.subr.mxu1 %v9413_v0 }
 0x999   :  { %v1802_v63 = vmul.f32 %v7759_v41, %v1796_v18  ;;  %v1772_v30 = vpop.permute.xlu0 %1771  ;;  %1890 = vmatpush1.msra.mxu1 %v1803_v45  ;;  %v1787_v45 = vmul.f32 %v7769_v15, %v7691_v49  ;;  %v7790_v18 = vrot.slane %v7740_v56, %v9420_v16  ;;  %v7800_v16 = vrot.slane %v7740_v56, %v9421_v28 }
 0x99a   :  { %1891 = vmatprep.subr.mxu1 %v9413_v0  ;;  %v1776_v5 = vsel %vm303_vm4, 0.0, %v1772_v30  ;;  %v7810_v28 = vrot.slane %v7740_v56, %v9422_v8  ;;  %v7819_v56 = vld [vmem:[%s7737_s23 + $0x8] ss:$0 sm:$0xff]  ;;  %s6850_s23 = smov 25  }
 0x99b   :  { %1892 = vmatpush1.msra.mxu1 %v1802_v63  ;;  %v1770_v48 = vpop.permute.xlu1 %1769  ;;  %v1782_v1 = vmul.f32 %v7777_v50, %v1776_v5 }
 0x99c   :  { %1893 = vmatprep.subr.mxu1 %v9413_v0  ;;  %v1775_v60 = vsel %vm303_vm4, 0.0, %v1770_v48 }
 0x99d   :  { %v1757_v12 = vpop.permute.xlu0 %1756  ;;  %1894 = vmatpush1.msra.mxu1 %v1788_v62  ;;  %v1781_v30 = vmul.f32 %v7777_v50, %v1775_v60 }
 0x99e   :  { %1895 = vmatprep.subr.mxu1 %v9413_v0  ;;  %v1762_v63 = vsel %vm1760_vm5, 0.0, %v1757_v12 }
 0x99f   :  { %v1755_v21 = vpop.permute.xlu1 %1754  ;;  %1896 = vmatpush1.msra.mxu1 %v1787_v45  ;;  %v1768_v62 = vmul.f32 %v7790_v18, %v1762_v63 }
 0x9a0   :  { %1897 = vmatprep.subr.mxu1 %v9413_v0  ;;  %v1761_v48 = vsel %vm1760_vm5, 0.0, %v1755_v21 }
 0x9a1   :  { %v1742_v49 = vpop.permute.xlu0 %1741  ;;  %1898 = vmatpush1.msra.mxu1 %v1782_v1  ;;  %v1767_v45 = vmul.f32 %v7790_v18, %v1761_v48 }
 0x9a2   :  { %1899 = vmatprep.subr.mxu1 %v9413_v0  ;;  %v1747_v12 = vsel %vm1745_vm2, 0.0, %v1742_v49 }
 0x9a3   :  { %v1740_v5 = vpop.permute.xlu1 %1739  ;;  %1900 = vmatpush1.msra.mxu1 %v1781_v30  ;;  %v1753_v21 = vmul.f32 %v7800_v16, %v1747_v12 }
 0x9a4   :  { %1901 = vmatprep.subr.mxu1 %v9413_v0  ;;  %v1746_v1 = vsel %vm1745_vm2, 0.0, %v1740_v5 }
 0x9a5   :  { %v1727_v60 = vpop.permute.xlu0 %1726  ;;  %1902 = vmatpush1.msra.mxu1 %v1768_v62  ;;  %v1752_v49 = vmul.f32 %v7800_v16, %v1746_v1 }
 0x9a6   :  { %1903 = vmatprep.subr.mxu1 %v9413_v0  ;;  %v1732_v30 = vsel %vm1730_vm1, 0.0, %v1727_v60 }
 0x9a7   :  { %v1725_v63 = vpop.permute.xlu1 %1724  ;;  %1904 = vmatpush1.msra.mxu1 %v1767_v45  ;;  %v1738_v5 = vmul.f32 %v7810_v28, %v1732_v30  ;;  %v1713_v30 = vld [vmem:[%s7711_s20 + $0x18] sm:$0xff] }
 0x9a8   :  { %1905 = vmatprep.subr.mxu1 %v9413_v0  ;;  %v1731_v62 = vsel %vm1730_vm1, 0.0, %v1725_v63  ;;  %v1710_v63 = vld [vmem:[%s7711_s20] sm:$0xff] }
 0x9a9   :  { %v1837_v48 = vpop.permute.xlu0 %1836  ;;  %1906 = vmatpush1.msra.mxu1 %v1753_v21  ;;  %v1737_v45 = vmul.f32 %v7810_v28, %v1731_v62  ;;  %v1714_v62 = vld [vmem:[%s7711_s20 + $0x20] sm:$0xff] }
 0x9aa   :  { %1907 = vmatprep.subr.mxu1 %v9413_v0  ;;  %v1842_v12 = vsel %vm1840_vm0, %v1837_v48, 0.0  ;;  %v1715_v48 = vld [vmem:[%s7711_s20 + $0x28] sm:$0xff] }
 0x9ab   :  { %v1835_v8 = vpop.permute.xlu1 %1834  ;;  %1908 = vmatpush1.msra.mxu1 %v1752_v49  ;;  %v1848_v1 = vmul.f32 %v7819_v56, %v1842_v12  ;;  %v1712_v49 = vld [vmem:[%s7711_s20 + $0x10] sm:$0xff] }
 0x9ac   :  { %1909 = vmatprep.subr.mxu1 %v9413_v0  ;;  %v1841_v60 = vsel %vm1840_vm0, %v1835_v8, 0.0  ;;  %v1716_v8 = vld [vmem:[%s7711_s20 + $0x30] sm:$0xff] }
 0x9ad   :  { %1910 = vmatpush1.msra.mxu1 %v1738_v5  ;;  %v1847_v21 = vmul.f32 %v7819_v56, %v1841_v60  ;;  %v1717_v5 = vld [vmem:[%s7711_s20 + $0x38] sm:$0xff] }
 0x9ae   :  { %1911 = vmatprep.subr.mxu1 %v9413_v0 }
 0x9af   :  { %1912 = vmatpush1.msra.mxu1 %v1737_v45 }
 0x9b0   :  { %1941 = vmatprep.subr.mxu1 %v9413_v0 }
 0x9b1   :  { %1942 = vmatpush2.msra.mxu1 %v1848_v1 }
 0x9b2   :  { %1943 = vmatprep.subr.mxu1 %v9413_v0 }
 0x9b3   :  { %1944 = vmatpush2.msra.mxu1 %v1847_v21 }
 0x9b4   :  { %1946 = vmatmul.mubr.f32.vlgmr.msra.gmra.mxu1 %v1710_v63 }
 0x9b5   :  { %6067 = vmatprep.mubr.msk.f32.mxu1 %vm229_vm6, %v1713_v30 }
 0x9b6   :  { %v1867_v45 = vpop.permute.xlu0 %1866 }
 0x9b8   :  { %1951 = vmatmul.mubr.f32.gmra.mxu1 %v1712_v49  ;;  %v1862_v12 = vpop.permute.xlu1 %1861 }
 0x9b9   :  { %6068 = vmatprep.mubr.msk.f32.mxu1 %vm229_vm6, %v1715_v48 }
 0x9ba   :  { %v1857_v30 = vpop.permute.xlu0 %1856 }
 0x9bc   :  { %1956 = vmatmul.mubr.f32.gmra.mxu1 %v1714_v62  ;;  %v1852_v60 = vpop.permute.xlu1 %1851 }
 0x9bd   :  { %6069 = vmatprep.mubr.msk.f32.mxu1 %vm229_vm6, %v1717_v5 }
 0x9c0   :  { %1961 = vmatmul.mubr.f32.gmra.mxu1 %v1716_v8 }
 0xa74   :  { %v1947_v1 = vpop.f32.mrf.mxu1 }
 0xa75   :  { %v1948_v21 = vadd.f32 %v1947_v1, %v1852_v60 }
 0xa76   :  { %v1949_v63 = vpop.f32.mrf.mxu1 }
 0xa77   :  { %v7840_v32 = vmax.f32 %v1948_v21, 0.0 }
 0xa78   :  { %v1952_v7 = vpop.f32.mrf.mxu1 }
 0xa79   :  { %v1953_v49 = vadd.f32 %v1952_v7, %v1857_v30  ;;  %2050 = vrot.lane.b32.xlu1 %v7840_v32, %s6807_s10  ;;  %2114 = vrot.lane.b32.xlu0 %v7840_v32, %s6828_s4 }
 0xa7a   :  { %v1954_v48 = vpop.f32.mrf.mxu1 }
 0xa7b   :  { %v7846_v62 = vmax.f32 %v1953_v49, 0.0 }
 0xa7c   :  { %v1957_v5 = vpop.f32.mrf.mxu1 }
 0xa7d   :  { %2052 = vrot.lane.b32.xlu1 %v7846_v62, %s6807_s10  ;;  %2116 = vrot.lane.b32.xlu0 %v7846_v62, %s6828_s4  ;;  %v1958_v60 = vadd.f32 %v1957_v5, %v1862_v12 }
 0xa7e   :  { %v1959_v8 = vpop.f32.mrf.mxu1 }
 0xa7f   :  { %v7856_v21 = vmax.f32 %v1958_v60, 0.0 }
 0xa80   :  { %v1962_v1 = vpop.f32.mrf.mxu1 }
 0xa81   :  { %2032 = vrot.lane.b32.xlu1 %v7846_v62, %s6816_s29  ;;  %2096 = vrot.lane.b32.xlu0 %v7846_v62, %s6829_s13  ;;  %v1963_v63 = vadd.f32 %v1962_v1, %v1867_v45 }
 0xa82   :  { %v1964_v7 = vpop.f32.mrf.mxu1 }
 0xa83   :  { %v7866_v12 = vmax.f32 %v1963_v63, 0.0 }
 0xa85   :  { %2054 = vrot.lane.b32.xlu1 %v7856_v21, %s6807_s10  ;;  %2118 = vrot.lane.b32.xlu0 %v7856_v21, %s6828_s4 }
 0xa89   :  { %2034 = vrot.lane.b32.xlu1 %v7856_v21, %s6816_s29  ;;  %2098 = vrot.lane.b32.xlu0 %v7856_v21, %s6829_s13 }
 0xa8d   :  { %2056 = vrot.lane.b32.xlu1 %v7866_v12, %s6807_s10  ;;  %2120 = vrot.lane.b32.xlu0 %v7866_v12, %s6828_s4  ;;  %s6833_s4 = smov 11  }
 0xa91   :  { %2030 = vrot.lane.b32.xlu1 %v7840_v32, %s6816_s29  ;;  %2094 = vrot.lane.b32.xlu0 %v7840_v32, %s6829_s13 }
 0xa95   :  { %2036 = vrot.lane.b32.xlu1 %v7866_v12, %s6816_s29  ;;  %2100 = vrot.lane.b32.xlu0 %v7866_v12, %s6829_s13  ;;  %s7891_s29 = sld [smem:[%s9303_s0 + %s6833_s4]]   ;;  %s6834_s13 = smov 12  }
 0xa96   :  { %s6024_s27 = sld [smem:[%s9303_s0 + %s6834_s13]]   ;;  %s6854_s13 = smov 30  }
 0xa97   :  { %s8210_s4 = sld [smem:[%s9303_s0 + %s6808_s11]]  }
 0xa99   :  { %2014 = vrot.lane.b32.xlu1 %v7856_v21, %s6815_s25  ;;  %2078 = vrot.lane.b32.xlu0 %v7856_v21, %s6806_s9 }
 0xa9b   :  { %v1971_v45 = vld [vmem:[%s7891_s29 + $0x8] sm:$0xff]  ;;  %v1972_v30 = vld [vmem:[%s7891_s29 + $0x10] sm:$0xff] }
 0xa9c   :  { %2251 = vmatprep.mubr.f32.mxu0 %v1971_v45  ;;  %6600 = vmatprep.mubr.msk.f32.mxu1 %vm2174_vm3, %v1972_v30  ;;  %v1984_v49 = vld [vmem:[%s6024_s27 + $0x10] sm:$0xff]  ;;  %v1985_v48 = vld [vmem:[%s6024_s27 + $0x18] sm:$0xff]  ;;  %v1982_v5 = vld [vmem:[%s6024_s27] sm:$0xff] }
 0xa9d   :  { %2016 = vrot.lane.b32.xlu1 %v7866_v12, %s6815_s25  ;;  %2080 = vrot.lane.b32.xlu0 %v7866_v12, %s6806_s9  ;;  %v1983_v8 = vld [vmem:[%s6024_s27 + $0x8] sm:$0xff]  ;;  %s6843_s27 = smov 24  }
 0xa9e   :  { %s6036_s18 = sld [smem:[%s9303_s0 + %s6843_s27]]  }
 0xaa1   :  { %2012 = vrot.lane.b32.xlu1 %v7846_v62, %s6815_s25  ;;  %2076 = vrot.lane.b32.xlu0 %v7846_v62, %s6806_s9 }
 0xaa5   :  { %2010 = vrot.lane.b32.xlu1 %v7840_v32, %s6815_s25  ;;  %2074 = vrot.lane.b32.xlu0 %v7840_v32, %s6806_s9  ;;  %s6842_s25 = smov 64  }
 0xaa9   :  { %1994 = vrot.lane.b32.xlu1 %v7856_v21, %s6820_s16  ;;  %1996 = vrot.lane.b32.xlu0 %v7866_v12, %s6820_s16 }
 0xaad   :  { %1990 = vrot.lane.b32.xlu1 %v7840_v32, %s6820_s16  ;;  %1992 = vrot.lane.b32.xlu0 %v7846_v62, %s6820_s16  ;;  %s6835_s16 = smov 14  }
 0xaae   :  { %s6026_s19 = sld [smem:[%s9303_s0 + %s6835_s16]]  }
 0xaaf   :  { %s6029_s16 = sld [smem:[%s9303_s0 + %s6813_s17]]  }
 0xab1   :  { %2138 = vrot.lane.b32.xlu1 %v7856_v21, %s6831_s2  ;;  %2140 = vrot.lane.b32.xlu0 %v7866_v12, %s6831_s2 }
 0xab4   :  { %v2361_v60 = vld [vmem:[%s6026_s19] sm:$0xff]  ;;  %v2362_v1 = vld [vmem:[%s6026_s19 + $0x8] sm:$0xff]  ;;  %s8204_s19 = sld [smem:[%s9303_s0 + %s6810_s12]]  }
 0xab5   :  { %2134 = vrot.lane.b32.xlu1 %v7840_v32, %s6831_s2  ;;  %2136 = vrot.lane.b32.xlu0 %v7846_v62, %s6831_s2  ;;  %s6836_s2 = smov 13  }
 0xab6   :  { %s8030_s20 = sld [smem:[%s9303_s0 + %s6836_s2]]  }
 0xab7   :  { %s6039_s2 = sld [smem:[%s9303_s0 + %s6849_s3]]  }
 0xab9   :  { %2166 = vperm.xlu1 %6792, %v1984_v49   ;;  %2171 = vperm.xlu0 %6781, %v1985_v48  }
 0xabd   :  { %2156 = vperm.xlu1 %6792, %v1982_v5   ;;  %2161 = vperm.xlu0 %6781, %v1983_v8  }
 0xac1   :  { %3047 = vperm.xlu1 %6792, %v2361_v60   ;;  %3052 = vperm.xlu0 %6781, %v2362_v1  }
 0xac5   :  { %3207 = vrot.lane.b32.xlu1 %v7654_v17, %s6818_s14 }
 0xac9   :  { %3205 = vrot.lane.b32.xlu1 %v7650_v61, %s6818_s14 }
 0xacd   :  { %3197 = vrot.lane.b32.xlu1 %v7654_v17, %s6821_s22 }
 0xad1   :  { %3195 = vrot.lane.b32.xlu1 %v7650_v61, %s6821_s22 }
 0xad5   :  { %3183 = vrot.lane.b32.xlu1 %v7654_v17, %s6807_s10 }
 0xad9   :  { %3181 = vrot.lane.b32.xlu1 %v7650_v61, %s6807_s10 }
 0xadd   :  { %3173 = vrot.lane.b32.xlu1 %v7654_v17, %s6823_s28 }
 0xae1   :  { %3171 = vrot.lane.b32.xlu1 %v7650_v61, %s6823_s28 }
 0xaeb   :  { %v2051_v7 = vpop.permute.xlu1 %2050  ;;  %v2115_v63 = vpop.permute.xlu0 %2114 }
 0xaef   :  { %v2053_v45 = vpop.permute.xlu1 %2052  ;;  %v2117_v30 = vpop.permute.xlu0 %2116 }
 0xaf0   :  { %v2127_v34 = vsel %vm1825_vm15, %v2117_v30, 0.0  ;;  %v2063_v23 = vsel %vm303_vm4, 0.0, %v2053_v45 }
 0xaf3   :  { %v2033_v49 = vpop.permute.xlu1 %2032  ;;  %v2097_v48 = vpop.permute.xlu0 %2096 }
 0xaf7   :  { %v2055_v5 = vpop.permute.xlu1 %2054  ;;  %v2119_v8 = vpop.permute.xlu0 %2118 }
 0xaf8   :  { %v2128_v10 = vsel %vm1825_vm15, %v2119_v8, 0.0  ;;  %v2064_v35 = vsel %vm303_vm4, 0.0, %v2055_v5  ;;  %v2126_v8 = vsel %vm1825_vm15, %v2115_v63, 0.0 }
 0xaf9   :  { %v2132_v57 = vmul.f32 %v2128_v10, %v7744_v58  ;;  %v2130_v45 = vmul.f32 %v2126_v8, %v7744_v58 }
 0xafb   :  { %v2035_v60 = vpop.permute.xlu1 %2034  ;;  %v2099_v1 = vpop.permute.xlu0 %2098 }
 0xafc   :  { %v2108_v63 = vsel %vm1810_vm8, %v2099_v1, 0.0 }
 0xaff   :  { %v2057_v2 = vpop.permute.xlu1 %2056  ;;  %v2121_v52 = vpop.permute.xlu0 %2120 }
 0xb00   :  { %v2065_v33 = vsel %vm303_vm4, 0.0, %v2057_v2  ;;  %v2129_v24 = vsel %vm1825_vm15, %v2121_v52, 0.0  ;;  %v2068_v2 = vmul.f32 %v2064_v35, %v7777_v50  ;;  %v2062_v52 = vsel %vm303_vm4, 0.0, %v2051_v7 }
 0xb01   :  { %v2069_v4 = vmul.f32 %v2065_v33, %v7777_v50  ;;  %v2133_v19 = vmul.f32 %v2129_v24, %v7744_v58  ;;  %v2131_v33 = vmul.f32 %v2127_v34, %v7744_v58  ;;  %v2067_v24 = vmul.f32 %v2063_v23, %v7777_v50 }
 0xb02   :  { %v2044_v34 = vsel %vm1760_vm5, 0.0, %v2035_v60  ;;  %v2107_v58 = vsel %vm1810_vm8, %v2097_v48, 0.0  ;;  %v2043_v7 = vsel %vm1760_vm5, 0.0, %v2033_v49 }
 0xb03   :  { %v2031_v22 = vpop.permute.xlu1 %2030  ;;  %6422 = vmatprep.subr.mxu0 %v2133_v19  ;;  %v2095_v42 = vpop.permute.xlu0 %2094  ;;  %v2066_v19 = vmul.f32 %v2062_v52, %v7777_v50  ;;  %v2112_v50 = vmul.f32 %v2108_v63, %v7750_v39  ;;  %v2048_v8 = vmul.f32 %v2044_v34, %v7790_v18  ;;  %v2111_v60 = vmul.f32 %v2107_v58, %v7750_v39 }
 0xb04   :  { %6423 = vmatpush3.msra.mxu0 %v2069_v4  ;;  %v2042_v52 = vsel %vm1760_vm5, 0.0, %v2031_v22  ;;  %v2047_v48 = vmul.f32 %v2043_v7, %v7790_v18 }
 0xb05   :  { %6424 = vmatprep.subr.mxu0 %v2132_v57 }
 0xb06   :  { %6425 = vmatpush3.msra.mxu0 %v2068_v2  ;;  %v2106_v2 = vsel %vm1810_vm8, %v2095_v42, 0.0 }
 0xb07   :  { %v2037_v30 = vpop.permute.xlu1 %2036  ;;  %6426 = vmatprep.subr.mxu0 %v2131_v33  ;;  %v2101_v10 = vpop.permute.xlu0 %2100  ;;  %v2110_v49 = vmul.f32 %v2106_v2, %v7750_v39 }
 0xb08   :  { %v2045_v35 = vsel %vm1760_vm5, 0.0, %v2037_v30  ;;  %v2109_v4 = vsel %vm1810_vm8, %v2101_v10, 0.0  ;;  %6427 = vmatpush3.msra.mxu0 %v2067_v24  ;;  %vm6841_vm5 = vmmov 0   ;;  %vm9427_vm8 = vcmask 908288  }
 0xb09   :  { %v2049_v57 = vmul.f32 %v2045_v35, %v7790_v18  ;;  %v2113_v23 = vmul.f32 %v2109_v4, %v7750_v39  ;;  %6428 = vmatprep.subr.mxu0 %v2130_v45  ;;  %v2046_v45 = vmul.f32 %v2042_v52, %v7790_v18 }
 0xb0a   :  { %6429 = vmatpush3.msra.mxu0 %v2066_v19 }
 0xb0b   :  { %v2015_v5 = vpop.permute.xlu1 %2014  ;;  %6430 = vmatprep.subr.mxu0 %v2113_v23  ;;  %v2079_v1 = vpop.permute.xlu0 %2078 }
 0xb0c   :  { %6431 = vmatpush3.msra.mxu0 %v2049_v57  ;;  %v2088_v30 = vsel %vm1795_vm7, %v2079_v1, 0.0  ;;  %v2024_v22 = vsel %vm1745_vm2, 0.0, %v2015_v5 }
 0xb0d   :  { %6432 = vmatprep.subr.mxu0 %v2112_v50  ;;  %v2092_v39 = vmul.f32 %v2088_v30, %v7759_v41  ;;  %v2028_v4 = vmul.f32 %v2024_v22, %v7800_v16 }
 0xb0e   :  { %6433 = vmatpush3.msra.mxu0 %v2048_v8 }
 0xb0f   :  { %v2017_v33 = vpop.permute.xlu1 %2016  ;;  %6434 = vmatprep.subr.mxu0 %v2111_v60  ;;  %v2081_v24 = vpop.permute.xlu0 %2080 }
 0xb10   :  { %v2025_v42 = vsel %vm1745_vm2, 0.0, %v2017_v33  ;;  %v2089_v10 = vsel %vm1795_vm7, %v2081_v24, 0.0  ;;  %6435 = vmatpush3.msra.mxu0 %v2047_v48  ;;  %v2073_v48 = vmul.f32 %v7866_v12, %v7769_v15 }
 0xb11   :  { %v2029_v19 = vmul.f32 %v2025_v42, %v7800_v16  ;;  %v2093_v63 = vmul.f32 %v2089_v10, %v7759_v41  ;;  %6436 = vmatprep.subr.mxu0 %v2110_v49  ;;  %v2071_v10 = vmul.f32 %v7846_v62, %v7769_v15  ;;  %v1974_v62 = vld [vmem:[%s7891_s29 + $0x20] sm:$0xff] }
 0xb12   :  { %6437 = vmatpush3.msra.mxu0 %v2046_v45  ;;  %v2072_v45 = vmul.f32 %v7856_v21, %v7769_v15  ;;  %v2070_v21 = vmul.f32 %v7840_v32, %v7769_v15 }
 0xb13   :  { %v2013_v35 = vpop.permute.xlu1 %2012  ;;  %6438 = vmatprep.subr.mxu0 %v2093_v63  ;;  %v2077_v18 = vpop.permute.xlu0 %2076 }
 0xb14   :  { %v2023_v34 = vsel %vm1745_vm2, 0.0, %v2013_v35  ;;  %v2087_v57 = vsel %vm1795_vm7, %v2077_v18, 0.0  ;;  %6439 = vmatpush3.msra.mxu0 %v2029_v19  ;;  %v1970_v35 = vld [vmem:[%s7891_s29] sm:$0xff] }
 0xb15   :  { %v2027_v23 = vmul.f32 %v2023_v34, %v7800_v16  ;;  %v2091_v58 = vmul.f32 %v2087_v57, %v7759_v41  ;;  %6440 = vmatprep.subr.mxu0 %v2092_v39  ;;  %v1973_v57 = vld [vmem:[%s7891_s29 + $0x18] sm:$0xff] }
 0xb16   :  { %6441 = vmatpush3.msra.mxu0 %v2028_v4 }
 0xb17   :  { %v2011_v7 = vpop.permute.xlu1 %2010  ;;  %6442 = vmatprep.subr.mxu0 %v2091_v58  ;;  %v2075_v50 = vpop.permute.xlu0 %2074 }
 0xb18   :  { %v2022_v5 = vsel %vm1745_vm2, 0.0, %v2011_v7  ;;  %v2086_v1 = vsel %vm1795_vm7, %v2075_v50, 0.0  ;;  %6443 = vmatpush3.msra.mxu0 %v2027_v23  ;;  %v1977_v7 = vld [vmem:[%s7891_s29 + $0x38] sm:$0xff]  ;;  %vm3754_vm7 = vcmask 523264  }
 0xb19   :  { %v2026_v8 = vmul.f32 %v2022_v5, %v7800_v16  ;;  %v2090_v2 = vmul.f32 %v2086_v1, %v7759_v41  ;;  %v1976_v1 = vld [vmem:[%s7891_s29 + $0x30] sm:$0xff] }
 0xb1b   :  { %v1995_v60 = vpop.permute.xlu1 %1994  ;;  %6444 = vmatprep.subr.mxu0 %v2090_v2  ;;  %v1997_v52 = vpop.permute.xlu0 %1996  ;;  %v1980_v2 = vld [vmem:[%s7891_s29 + $0x50] sm:$0xff] }
 0xb1c   :  { %v2004_v49 = vsel %vm1730_vm1, 0.0, %v1995_v60  ;;  %v2005_v33 = vsel %vm1730_vm1, 0.0, %v1997_v52  ;;  %6445 = vmatpush3.msra.mxu0 %v2026_v8  ;;  %v1975_v8 = vld [vmem:[%s7891_s29 + $0x28] sm:$0xff]  ;;  %v1978_v60 = vld [vmem:[%s7891_s29 + $0x40] sm:$0xff] }
 0xb1d   :  { %v2009_v24 = vmul.f32 %v2005_v33, %v7810_v28  ;;  %6446 = vmatprep.subr.mxu0 %v2073_v48  ;;  %v2008_v16 = vmul.f32 %v2004_v49, %v7810_v28  ;;  %v1979_v52 = vld [vmem:[%s7891_s29 + $0x48] sm:$0xff]  ;;  %v1981_v48 = vld [vmem:[%s7891_s29 + $0x58] sm:$0xff]  ;;  %v6076_v49 = vld [vmem:[%s8030_s20 + $0x10] sm:$0xff] }
 0xb1f   :  { %v1991_v41 = vpop.permute.xlu1 %1990  ;;  %6447 = vmatpush3.msra.mxu0 %v2009_v24  ;;  %v1993_v30 = vpop.permute.xlu0 %1992 }
 0xb20   :  { %v2002_v42 = vsel %vm1730_vm1, 0.0, %v1991_v41  ;;  %v2003_v12 = vsel %vm1730_vm1, 0.0, %v1993_v30  ;;  %6448 = vmatprep.subr.mxu0 %v2072_v45 }
 0xb21   :  { %v2007_v22 = vmul.f32 %v2003_v12, %v7810_v28  ;;  %6449 = vmatpush3.msra.mxu0 %v2008_v16  ;;  %v2006_v19 = vmul.f32 %v2002_v42, %v7810_v28 }
 0xb22   :  { %6450 = vmatprep.subr.mxu0 %v2071_v10 }
 0xb23   :  { %v2139_v63 = vpop.permute.xlu1 %2138  ;;  %6451 = vmatpush3.msra.mxu0 %v2007_v22  ;;  %v2141_v39 = vpop.permute.xlu0 %2140 }
 0xb24   :  { %v2148_v18 = vsel %vm1840_vm0, %v2139_v63, 0.0  ;;  %v2149_v4 = vsel %vm1840_vm0, %v2141_v39, 0.0  ;;  %6452 = vmatprep.subr.mxu0 %v2070_v21 }
 0xb25   :  { %v2153_v34 = vmul.f32 %v7819_v56, %v2149_v4  ;;  %6453 = vmatpush3.msra.mxu0 %v2006_v19  ;;  %v2152_v32 = vmul.f32 %v7819_v56, %v2148_v18 }
 0xb26   :  { %2252 = vmatmul.mubr.f32.vlgmr.msra.gmra.mxu0 %v1970_v35 }
 0xb27   :  { %v2135_v15 = vpop.permute.xlu1 %2134  ;;  %6592 = vmatprep.subr.mxu1 %v2153_v34  ;;  %v2137_v28 = vpop.permute.xlu0 %2136  ;;  %2256 = vmatprep.mubr.f32.mxu0 %v1974_v62 }
 0xb28   :  { %v2146_v23 = vsel %vm1840_vm0, %v2135_v15, 0.0  ;;  %v2147_v58 = vsel %vm1840_vm0, %v2137_v28, 0.0  ;;  %6593 = vmatpush3.msra.mxu1 %v2153_v34  ;;  %vm9423_vm0 = vcmask 1039360  }
 0xb29   :  { %v2151_v50 = vmul.f32 %v7819_v56, %v2147_v58  ;;  %6594 = vmatprep.subr.mxu1 %v2152_v32  ;;  %v2150_v5 = vmul.f32 %v7819_v56, %v2146_v23  ;;  %v2363_v56 = vld [vmem:[%s8030_s20] sm:$0xff]  ;;  %vm9424_vm1 = vmmov %vm9423_vm0 }
 0xb2a   :  { %2257 = vmatmul.mubr.f32.gmra.mxu0 %v1973_v57  ;;  %6595 = vmatpush3.msra.mxu1 %v2152_v32  ;;  %vm9425_vm2 = vmmov %vm9423_vm0 }
 0xb2b   :  { %6596 = vmatprep.subr.mxu1 %v2151_v50  ;;  %2261 = vmatprep.mubr.f32.mxu0 %v1977_v7 }
 0xb2c   :  { %6597 = vmatpush3.msra.mxu1 %v2151_v50 }
 0xb2d   :  { %6598 = vmatprep.subr.mxu1 %v2150_v5 }
 0xb2e   :  { %2262 = vmatmul.mubr.f32.gmra.mxu0 %v1976_v1  ;;  %6599 = vmatpush3.msra.mxu1 %v2150_v5 }
 0xb2f   :  { %6601 = vmatmul.mubr.msk.f32.vlgmr.msra.gmra.mxu1 %vm2174_vm3, %v1975_v8  ;;  %2266 = vmatprep.mubr.f32.mxu0 %v1980_v2 }
 0xb30   :  { %6603 = vmatprep.mubr.msk.f32.mxu1 %vm2174_vm3, %v1978_v60 }
 0xb32   :  { %2267 = vmatmul.mubr.f32.gmra.mxu0 %v1979_v52  ;;  %v2364_v52 = vld [vmem:[%s8030_s20 + $0x8] sm:$0xff] }
 0xb33   :  { %6604 = vmatmul.mubr.msk.f32.gmra.mxu1 %vm2174_vm3, %v1981_v48  ;;  %6625 = vmatprep.mubr.msk.f32.mxu0 %vm2174_vm3, %v6076_v49  ;;  %v6077_v48 = vld [vmem:[%s8030_s20 + $0x18] sm:$0xff] }
 0xb34   :  { %6614 = vmatprep.mubr.msk.f32.mxu1 %vm2174_vm3, %v2363_v56  ;;  %v2172_v42 = vpop.permute.xlu0 %2171  ;;  %v2167_v39 = vpop.permute.xlu1 %2166  ;;  %v6083_v56 = vld [vmem:[%s8041_s26 + $0x38] sm:$0xff] }
 0xb35   :  { %v2449_v49 = vld [vmem:[%s8041_s26 + $0x18] sm:$0xff] }
 0xb38   :  { %v2162_v62 = vpop.permute.xlu0 %2161  ;;  %v2157_v58 = vpop.permute.xlu1 %2156 }
 0xbe6   :  { %v6454_v33 = vpop.f32.mrf.mxu0 }
 0xbe8   :  { %v6455_v24 = vpop.f32.mrf.mxu0 }
 0xbe9   :  { %v6456_v32 = vadd.f32 %v6455_v24, %v6454_v33  ;;  %v6082_v33 = vld [vmem:[%s8041_s26 + $0x30] sm:$0xff] }
 0xbea   :  { %v6457_v45 = vpop.f32.mrf.mxu0  ;;  %v2448_v24 = vld [vmem:[%s8041_s26 + $0x10] sm:$0xff] }
 0xbeb   :  { %v2254_v50 = vadd.f32 %v6456_v32, %v2157_v58 }
 0xbec   :  { %v6458_v16 = vpop.f32.mrf.mxu0 }
 0xbed   :  { %v6459_v19 = vadd.f32 %v6458_v16, %v6457_v45  ;;  %v6081_v45 = vld [vmem:[%s8041_s26 + $0x28] sm:$0xff]  ;;  %v6080_v16 = vld [vmem:[%s8041_s26 + $0x20] sm:$0xff] }
 0xbee   :  { %v6460_v41 = vpop.f32.mrf.mxu0 }
 0xbef   :  { %v6602_v30 = vpop.f32.mrf.mxu1  ;;  %v2259_v15 = vadd.f32 %v6459_v19, %v2162_v62 }
 0xbf0   :  { %v6461_v12 = vpop.f32.mrf.mxu0 }
 0xbf1   :  { %v6462_v10 = vadd.f32 %v6461_v12, %v6460_v41  ;;  %v2338_v22 = vpop.f32.mrf.mxu1  ;;  %v2344_v7 = vadd.f32 %v6602_v30, %v2259_v15  ;;  %v2447_v41 = vld [vmem:[%s8041_s26 + $0x8] sm:$0xff]  ;;  %v2446_v30 = vld [vmem:[%s8041_s26] sm:$0xff]  ;;  %v6099_v15 = vld [vmem:[%s8030_s20 + $0x38] sm:$0xff] }
 0xbf2   :  { %v6463_v21 = vpop.f32.mrf.mxu0  ;;  %v2339_v1 = vadd.f32 %v2338_v22, %v2254_v50 }
 0xbf3   :  { %v6605_v63 = vpop.f32.mrf.mxu1  ;;  %v2264_v4 = vadd.f32 %v6462_v10, %v2167_v39  ;;  %v8049_v2 = vmax.f32 %v2344_v7, 0.0  ;;  %v6088_v39 = vld [vmem:[%s8030_s20 + $0x20] sm:$0xff] }
 0xbf4   :  { %v6464_v35 = vpop.f32.mrf.mxu0  ;;  %v8055_v60 = vmax.f32 %v2339_v1, 0.0 }
 0xbf5   :  { %v6465_v18 = vadd.f32 %v6464_v35, %v6463_v21  ;;  %v2348_v34 = vpop.f32.mrf.mxu1 }
 0xbf6   :  { %v2349_v23 = vadd.f32 %v2348_v34, %v2264_v4  ;;  %v6098_v4 = vld [vmem:[%s8030_s20 + $0x30] sm:$0xff] }
 0xbf7   :  { %v2269_v28 = vadd.f32 %v6465_v18, %v2172_v42  ;;  %v8078_v42 = vpop.permute.xlu1 %3047  ;;  %v6089_v18 = vld [vmem:[%s8030_s20 + $0x28] sm:$0xff] }
 0xbf8   :  { %v8043_v8 = vmax.f32 %v2349_v23, 0.0 }
 0xbf9   :  { %v2354_v57 = vadd.f32 %v6605_v63, %v2269_v28 }
 0xbfb   :  { %v8036_v5 = vmax.f32 %v2354_v57, 0.0  ;;  %v3208_v12 = vpop.permute.xlu1 %3207 }
 0xbfc   :  { %v3212_v34 = vsel %vm1302_vm9, %v3208_v12, 0.0  ;;  %v6094_v12 = vld [vmem:[%s8041_s26 + $0x50] sm:$0xff] }
 0xbfd   :  { %6606 = vmatprep.subr.mxu1 %v8036_v5  ;;  %6617 = vmatprep.subr.mxu0 %v8036_v5  ;;  %v3214_v57 = vmul.f32 %v3212_v34, %v7519_v29 }
 0xbfe   :  { %6607 = vmatpush3.msra.mxu1 %v8036_v5  ;;  %6618 = vmatpush3.msra.mxu0 %v8036_v5 }
 0xbff   :  { %6608 = vmatprep.subr.mxu1 %v8043_v8  ;;  %6619 = vmatprep.subr.mxu0 %v8043_v8  ;;  %v3206_v10 = vpop.permute.xlu1 %3205 }
 0xc00   :  { %6609 = vmatpush3.msra.mxu1 %v8043_v8  ;;  %6620 = vmatpush3.msra.mxu0 %v8043_v8  ;;  %v3211_v28 = vsel %vm1302_vm9, %v3206_v10, 0.0  ;;  %v6093_v10 = vld [vmem:[%s8041_s26 + $0x48] sm:$0xff] }
 0xc01   :  { %6610 = vmatprep.subr.mxu1 %v8049_v2  ;;  %6621 = vmatprep.subr.mxu0 %v8049_v2  ;;  %v3213_v58 = vmul.f32 %v3211_v28, %v7519_v29 }
 0xc02   :  { %6611 = vmatpush3.msra.mxu1 %v8049_v2  ;;  %6622 = vmatpush3.msra.mxu0 %v8049_v2 }
 0xc03   :  { %6612 = vmatprep.subr.mxu1 %v8055_v60  ;;  %6623 = vmatprep.subr.mxu0 %v8055_v60  ;;  %v3198_v35 = vpop.permute.xlu1 %3197 }
 0xc04   :  { %6613 = vmatpush3.msra.mxu1 %v8055_v60  ;;  %6624 = vmatpush3.msra.mxu0 %v8055_v60  ;;  %v3202_v23 = vsel %vm1292_vm11, %v3198_v35, 0.0 }
 0xc05   :  { %6615 = vmatmul.mubr.msk.f32.vlgmr.msra.gmra.mxu1 %vm2174_vm3, %v2364_v52  ;;  %6626 = vmatmul.mubr.msk.f32.vlgmr.msra.gmra.mxu0 %vm2174_vm3, %v6077_v48  ;;  %v3204_v50 = vmul.f32 %v3202_v23, %v7525_v9  ;;  %v3192_v52 = vmul.f32 %v7654_v17, %v7535_v59 }
 0xc06   :  { %6628 = vmatprep.subr.mxu1 %v6083_v56  ;;  %6639 = vmatprep.subr.mxu0 %v2449_v49 }
 0xc07   :  { %6629 = vmatpush3.msra.mxu1 %v6083_v56  ;;  %6640 = vmatpush3.msra.mxu0 %v2449_v49  ;;  %v3196_v62 = vpop.permute.xlu1 %3195 }
 0xc08   :  { %6630 = vmatprep.subr.mxu1 %v6082_v33  ;;  %6641 = vmatprep.subr.mxu0 %v2448_v24  ;;  %v3201_v7 = vsel %vm1292_vm11, %v3196_v62, 0.0  ;;  %v6102_v62 = vld [vmem:[%s8041_s26 + $0x60] sm:$0xff] }
 0xc09   :  { %6631 = vmatpush3.msra.mxu1 %v6082_v33  ;;  %6642 = vmatpush3.msra.mxu0 %v2448_v24  ;;  %v3203_v1 = vmul.f32 %v3201_v7, %v7525_v9 }
 0xc0a   :  { %6632 = vmatprep.subr.mxu1 %v6081_v45  ;;  %6643 = vmatprep.subr.mxu0 %v2447_v41 }
 0xc0b   :  { %6633 = vmatpush3.msra.mxu1 %v6081_v45  ;;  %6644 = vmatpush3.msra.mxu0 %v2447_v41  ;;  %v3184_v32 = vpop.permute.xlu1 %3183 }
 0xc0c   :  { %6634 = vmatprep.subr.mxu1 %v6080_v16  ;;  %6645 = vmatprep.subr.mxu0 %v2446_v30  ;;  %v3188_v48 = vsel %vm303_vm4, 0.0, %v3184_v32 }
 0xc0d   :  { %6635 = vmatpush3.msra.mxu1 %v6080_v16  ;;  %6646 = vmatpush3.msra.mxu0 %v2446_v30  ;;  %v6095_v30 = vld [vmem:[%s8041_s26 + $0x58] sm:$0xff] }
 0xc0e   :  { %6650 = vmatprep.subr.mxu1 %v8036_v5  ;;  %6661 = vmatprep.subr.mxu0 %v6095_v30 }
 0xcc5   :  { %v6616_v22 = vpop.f32.mrf.mxu1  ;;  %v6627_v21 = vpop.f32.mrf.mxu0 }
 0xcc7   :  { %v2437_v19 = vpop.f32.mrf.mxu1  ;;  %v2525_v63 = vpop.f32.mrf.mxu0 }
 0xcc8   :  { %6636 = vmatprep.mubr.msk.f32.mxu1 %vm2174_vm3, %v2525_v63  ;;  %6647 = vmatprep.mubr.msk.f32.mxu0 %vm2174_vm3, %v2437_v19 }
 0xcc9   :  { %6637 = vmatmul.mubr.msk.f32.vlgmr.msra.gmra.mxu1 %vm2174_vm3, %v6627_v21  ;;  %6648 = vmatmul.mubr.msk.f32.vlgmr.msra.gmra.mxu0 %vm2174_vm3, %v6616_v22  ;;  %v6092_v22 = vld [vmem:[%s8041_s26 + $0x40] sm:$0xff]  ;;  %v6105_v21 = vld [vmem:[%s8041_s26 + $0x78] sm:$0xff] }
 0xcca   :  { %6651 = vmatpush3.msra.mxu1 %v8036_v5  ;;  %6658 = vmatprep.mubr.msk.f32.mxu1 %vm2174_vm3, %v6088_v39 }
 0xccb   :  { %6652 = vmatprep.subr.mxu1 %v8043_v8  ;;  %6662 = vmatpush3.msra.mxu0 %v6095_v30 }
 0xccc   :  { %6653 = vmatpush3.msra.mxu1 %v8043_v8  ;;  %6663 = vmatprep.subr.mxu0 %v6094_v12 }
 0xccd   :  { %6654 = vmatprep.subr.mxu1 %v8049_v2  ;;  %6664 = vmatpush3.msra.mxu0 %v6094_v12 }
 0xcce   :  { %6655 = vmatpush3.msra.mxu1 %v8049_v2  ;;  %6665 = vmatprep.subr.mxu0 %v6093_v10 }
 0xccf   :  { %6656 = vmatprep.subr.mxu1 %v8055_v60  ;;  %6666 = vmatpush3.msra.mxu0 %v6093_v10 }
 0xcd0   :  { %6657 = vmatpush3.msra.mxu1 %v8055_v60  ;;  %6667 = vmatprep.subr.mxu0 %v6092_v22 }
 0xcd1   :  { %6659 = vmatmul.mubr.msk.f32.vlgmr.msra.gmra.mxu1 %vm2174_vm3, %v6089_v18  ;;  %6672 = vmatprep.subr.mxu1 %v8036_v5  ;;  %v6104_v18 = vld [vmem:[%s8041_s26 + $0x70] sm:$0xff] }
 0xcd2   :  { %6673 = vmatpush3.msra.mxu1 %v8036_v5  ;;  %6680 = vmatprep.mubr.msk.f32.mxu1 %vm2174_vm3, %v6098_v4  ;;  %v3182_v5 = vpop.permute.xlu1 %3181  ;;  %v6103_v4 = vld [vmem:[%s8041_s26 + $0x68] sm:$0xff]  ;;  %s8334_s26 = sld [smem:[%s9303_s0 + %s6839_s24]]   ;;  %s6846_s24 = smov 38  }
 0xcd3   :  { %6674 = vmatprep.subr.mxu1 %v8043_v8  ;;  %v3187_v56 = vsel %vm303_vm4, 0.0, %v3182_v5  ;;  %6668 = vmatpush3.msra.mxu0 %v6092_v22 }
 0xcd4   :  { %6675 = vmatpush3.msra.mxu1 %v8043_v8  ;;  %v3194_v8 = vmul.f32 %v7678_v13, %v7529_v38  ;;  %v3191_v13 = vmul.f32 %v7650_v61, %v7535_v59  ;;  %v3189_v24 = vmul.f32 %v3187_v56, %v7539_v14  ;;  %6683 = vmatprep.subr.mxu0 %v6105_v21  ;;  %v3066_v56 = vld [vmem:[%s6029_s16 + $0x8] sm:$0xff] }
 0xcd5   :  { %6676 = vmatprep.subr.mxu1 %v8049_v2 }
 0xcd6   :  { %6677 = vmatpush3.msra.mxu1 %v8049_v2  ;;  %v3193_v2 = vmul.f32 %v7675_v31, %v7529_v38  ;;  %v3190_v31 = vmul.f32 %v3188_v48, %v7539_v14 }
 0xcd7   :  { %6678 = vmatprep.subr.mxu1 %v8055_v60 }
 0xcd8   :  { %6679 = vmatpush3.msra.mxu1 %v8055_v60  ;;  %v3174_v60 = vpop.permute.xlu1 %3173 }
 0xcd9   :  { %6681 = vmatmul.mubr.msk.f32.vlgmr.msra.gmra.mxu1 %vm2174_vm3, %v6099_v15  ;;  %3231 = vmatprep.subr.mxu1 %v9413_v0  ;;  %v3178_v33 = vsel %vm1259_vm12, 0.0, %v3174_v60 }
 0xcda   :  { %3232 = vmatpush1.msra.mxu1 %v3214_v57  ;;  %v3180_v16 = vmul.f32 %v3178_v33, %v7543_v26 }
 0xcdb   :  { %3233 = vmatprep.subr.mxu1 %v9413_v0 }
 0xcdc   :  { %3234 = vmatpush1.msra.mxu1 %v3213_v58  ;;  %v3172_v49 = vpop.permute.xlu1 %3171 }
 0xcdd   :  { %3235 = vmatprep.subr.mxu1 %v9413_v0  ;;  %v3177_v45 = vsel %vm1259_vm12, 0.0, %v3172_v49 }
 0xcde   :  { %3236 = vmatpush1.msra.mxu1 %v3204_v50  ;;  %v3179_v41 = vmul.f32 %v3177_v45, %v7543_v26 }
 0xcdf   :  { %3237 = vmatprep.subr.mxu1 %v9413_v0 }
 0xce0   :  { %3238 = vmatpush1.msra.mxu1 %v3203_v1 }
 0xce1   :  { %3239 = vmatprep.subr.mxu1 %v9413_v0 }
 0xce2   :  { %3240 = vmatpush1.msra.mxu1 %v3194_v8 }
 0xce3   :  { %3241 = vmatprep.subr.mxu1 %v9413_v0 }
 0xce4   :  { %3242 = vmatpush1.msra.mxu1 %v3193_v2  ;;  %v3053_v2 = vpop.permute.xlu0 %3052 }
 0xce5   :  { %3243 = vmatprep.subr.mxu1 %v9413_v0 }
 0xce6   :  { %3244 = vmatpush1.msra.mxu1 %v3192_v52 }
 0xce7   :  { %3245 = vmatprep.subr.mxu1 %v9413_v0 }
 0xce8   :  { %3246 = vmatpush1.msra.mxu1 %v3191_v13 }
 0xce9   :  { %3247 = vmatprep.subr.mxu1 %v9413_v0 }
 0xcea   :  { %3248 = vmatpush1.msra.mxu1 %v3190_v31 }
 0xceb   :  { %3249 = vmatprep.subr.mxu1 %v9413_v0 }
 0xcec   :  { %3250 = vmatpush1.msra.mxu1 %v3189_v24 }
 0xced   :  { %3251 = vmatprep.subr.mxu1 %v9413_v0 }
 0xcee   :  { %3252 = vmatpush1.msra.mxu1 %v3180_v16 }
 0xcef   :  { %3253 = vmatprep.subr.mxu1 %v9413_v0 }
 0xcf0   :  { %3254 = vmatpush1.msra.mxu1 %v3179_v41 }
 0xcf1   :  { %3255 = vmatprep.subr.mxu1 %v9413_v0 }
 0xd89   :  { %v6638_v19 = vpop.f32.mrf.mxu1  ;;  %v6649_v15 = vpop.f32.mrf.mxu0 }
 0xd8a   :  { %v2698_v23 = vadd.f32 %v6649_v15, %v6638_v19 }
 0xd8b   :  { %v2611_v63 = vpop.f32.mrf.mxu1  ;;  %v2692_v28 = vpop.f32.mrf.mxu0 }
 0xd8c   :  { %v2693_v7 = vadd.f32 %v2692_v28, %v2611_v63 }
 0xd91   :  { %v6660_v39 = vpop.f32.mrf.mxu1 }
 0xd93   :  { %v2776_v35 = vpop.f32.mrf.mxu1 }
 0xd94   :  { %6669 = vmatprep.mubr.msk.f32.mxu0 %vm2174_vm3, %v2776_v35 }
 0xd95   :  { %6670 = vmatmul.mubr.msk.f32.vlgmr.msra.gmra.mxu0 %vm2174_vm3, %v6660_v39 }
 0xd96   :  { %6684 = vmatpush3.msra.mxu0 %v6105_v21 }
 0xd97   :  { %6685 = vmatprep.subr.mxu0 %v6104_v18 }
 0xd98   :  { %6686 = vmatpush3.msra.mxu0 %v6104_v18 }
 0xd99   :  { %v6682_v34 = vpop.f32.mrf.mxu1  ;;  %6687 = vmatprep.subr.mxu0 %v6103_v4 }
 0xd9a   :  { %6688 = vmatpush3.msra.mxu0 %v6103_v4 }
 0xd9b   :  { %v2948_v32 = vpop.f32.mrf.mxu1  ;;  %6689 = vmatprep.subr.mxu0 %v6102_v62 }
 0xd9c   :  { %6690 = vmatpush3.msra.mxu0 %v6102_v62  ;;  %6691 = vmatprep.mubr.msk.f32.mxu0 %vm2174_vm3, %v2948_v32 }
 0xd9d   :  { %6692 = vmatmul.mubr.msk.f32.vlgmr.msra.gmra.mxu0 %vm2174_vm3, %v6682_v34  ;;  %3312 = vmatprep.subr.mxu0 %v9413_v0  ;;  %vm9426_vm3 = vmmov %vm9423_vm0 }
 0xe55   :  { %v6671_v57 = vpop.f32.mrf.mxu0 }
 0xe56   :  { %v2872_v50 = vadd.f32 %v6671_v57, %v2698_v23  ;;  %v8243_v57 = vld [vmem:[%s7512_s5 + $0x8] ss:$0 sm:$0xff]  ;;  %s9083_s5 = sld [smem:[%s9303_s0 + %s6850_s23]]  }
 0xe57   :  { %v2862_v58 = vpop.f32.mrf.mxu0 }
 0xe58   :  { %v2871_v1 = vadd.f32 %v2862_v58, %v2693_v7 }
 0xe5d   :  { %v6693_v5 = vpop.f32.mrf.mxu0 }
 0xe5e   :  { %v3044_v8 = vadd.f32 %v6693_v5, %v2872_v50 }
 0xe5f   :  { %v3034_v60 = vpop.f32.mrf.mxu0 }
 0xe60   :  { %v8157_v52 = vadd.f32 %v3053_v2, %v3044_v8  ;;  %v3043_v48 = vadd.f32 %v3034_v60, %v2871_v1 }
 0xe62   :  { %v8160_v13 = vadd.f32 %v8078_v42, %v3043_v48  ;;  %3133 = vrot.lane.b32.xlu0 %v8157_v52, %s6818_s14  ;;  %v3065_v42 = vld [vmem:[%s6029_s16] sm:$0xff] }
 0xe64   :  { %3111 = vrot.lane.b32.xlu1 %v8160_v13, %s6806_s9 }
 0xe66   :  { %3123 = vrot.lane.b32.xlu0 %v8157_v52, %s6821_s22 }
 0xe68   :  { %3163 = vrot.lane.b32.xlu1 %v7654_v17, %s6825_s1 }
 0xe6a   :  { %3113 = vrot.lane.b32.xlu0 %v8157_v52, %s6806_s9 }
 0xe6c   :  { %3161 = vrot.lane.b32.xlu1 %v7650_v61, %s6825_s1 }
 0xe6e   :  { %3101 = vrot.lane.b32.xlu0 %v8157_v52, %s6807_s10 }
 0xe70   :  { %3153 = vrot.lane.b32.xlu1 %v7654_v17, %s6824_s30 }
 0xe72   :  { %3091 = vrot.lane.b32.xlu0 %v8157_v52, %s6823_s28 }
 0xe74   :  { %3151 = vrot.lane.b32.xlu1 %v7650_v61, %s6824_s30 }
 0xe76   :  { %3081 = vrot.lane.b32.xlu0 %v8157_v52, %s6825_s1 }
 0xe78   :  { %3217 = vrot.lane.b32.xlu1 %v7654_v17, %s6819_s15  ;;  %v3058_v17 = vld [vmem:[%s8210_s4 + $0x8] sm:$0xff] }
 0xe79   :  { %6110 = vmatprep.mubr.msk.f32.mxu0 %vm229_vm6, %v3058_v17 }
 0xe7a   :  { %3131 = vrot.lane.b32.xlu0 %v8160_v13, %s6818_s14 }
 0xe7c   :  { %3215 = vrot.lane.b32.xlu1 %v7650_v61, %s6819_s15  ;;  %v3062_v61 = vld [vmem:[%s8204_s19 + $0x8] sm:$0xff] }
 0xe7d   :  { %6108 = vmatprep.mubr.msk.f32.mxu1 %vm229_vm6, %v3062_v61 }
 0xe7e   :  { %3121 = vrot.lane.b32.xlu0 %v8160_v13, %s6821_s22 }
 0xe80   :  { %3389 = vperm.xlu1 %6792, %v3065_v42   ;;  %v3061_v42 = vld [vmem:[%s8204_s19] sm:$0xff] }
 0xe82   :  { %3071 = vrot.lane.b32.xlu0 %v8157_v52, %s6824_s30 }
 0xe86   :  { %3143 = vrot.lane.b32.xlu0 %v8157_v52, %s6819_s15 }
 0xe8a   :  { %3099 = vrot.lane.b32.xlu0 %v8160_v13, %s6807_s10 }
 0xe8e   :  { %3089 = vrot.lane.b32.xlu0 %v8160_v13, %s6823_s28 }
 0xe92   :  { %3079 = vrot.lane.b32.xlu0 %v8160_v13, %s6825_s1 }
 0xe96   :  { %3069 = vrot.lane.b32.xlu0 %v8160_v13, %s6824_s30 }
 0xe9a   :  { %3141 = vrot.lane.b32.xlu0 %v8160_v13, %s6819_s15 }
 0xe9e   :  { %3394 = vperm.xlu0 %6781, %v3066_v56   ;;  %v3064_v56 = vld [vmem:[%s8204_s19 + $0x18] sm:$0xff] }
 0xed4   :  { %v3134_v31 = vpop.permute.xlu0 %3133 }
 0xed5   :  { %v3138_v49 = vsel %vm1302_vm9, %v3134_v31, 0.0 }
 0xed6   :  { %v3140_v33 = vmul.f32 %v3138_v49, %v7519_v29  ;;  %v3112_v24 = vpop.permute.xlu1 %3111 }
 0xed7   :  { %v3117_v49 = vsel %vm9424_vm1, %v3112_v24, 0.0  ;;  %vm9435_vm1 = vcmask 924672  }
 0xed8   :  { %3313 = vmatpush1.msra.mxu0 %v3140_v33  ;;  %v3124_v45 = vpop.permute.xlu0 %3123 }
 0xed9   :  { %3314 = vmatprep.subr.mxu0 %v9413_v0  ;;  %v3128_v7 = vsel %vm1292_vm11, %v3124_v45, 0.0 }
 0xeda   :  { %v3164_v16 = vpop.permute.xlu1 %3163  ;;  %v3130_v2 = vmul.f32 %v3128_v7, %v7525_v9 }
 0xedb   :  { %v3168_v41 = vsel %vm1249_vm13, 0.0, %v3164_v16  ;;  %v3063_v16 = vld [vmem:[%s8204_s19 + $0x10] sm:$0xff]  ;;  %s6844_s19 = smov 21  }
 0xedc   :  { %v3170_v30 = vmul.f32 %v3168_v41, %v7549_v43  ;;  %v3114_v12 = vpop.permute.xlu0 %3113  ;;  %v3119_v41 = vmul.f32 %v3117_v49, %v7529_v38 }
 0xedd   :  { %v3118_v61 = vsel %vm9423_vm0, %v3114_v12, 0.0 }
 0xede   :  { %v3162_v10 = vpop.permute.xlu1 %3161  ;;  %3256 = vmatpush1.msra.mxu1 %v3170_v30  ;;  %v3120_v33 = vmul.f32 %v3118_v61, %v7529_v38  ;;  %v3110_v30 = vmul.f32 %v8157_v52, %v7535_v59  ;;  %v3059_v61 = vld [vmem:[%s8210_s4 + $0x10] sm:$0xff] }
 0xedf   :  { %v3167_v22 = vsel %vm1249_vm13, 0.0, %v3162_v10  ;;  %3257 = vmatprep.subr.mxu1 %v9413_v0  ;;  %v3109_v10 = vmul.f32 %v8160_v13, %v7535_v59 }
 0xee0   :  { %v3169_v21 = vmul.f32 %v3167_v22, %v7549_v43  ;;  %v3102_v19 = vpop.permute.xlu0 %3101 }
 0xee1   :  { %v3106_v12 = vsel %vm303_vm4, 0.0, %v3102_v19 }
 0xee2   :  { %v3154_v63 = vpop.permute.xlu1 %3153  ;;  %3258 = vmatpush1.msra.mxu1 %v3169_v21  ;;  %v3108_v22 = vmul.f32 %v3106_v12, %v7539_v14 }
 0xee3   :  { %v3158_v39 = vsel %vm1239_vm14, 0.0, %v3154_v63  ;;  %3259 = vmatprep.subr.mxu1 %v9413_v0 }
 0xee4   :  { %v3160_v35 = vmul.f32 %v3158_v39, %v7554_v55  ;;  %v3092_v18 = vpop.permute.xlu0 %3091 }
 0xee5   :  { %v3096_v63 = vsel %vm1259_vm12, 0.0, %v3092_v18 }
 0xee6   :  { %v3152_v4 = vpop.permute.xlu1 %3151  ;;  %3260 = vmatpush1.msra.mxu1 %v3160_v35  ;;  %v3098_v19 = vmul.f32 %v3096_v63, %v7543_v26 }
 0xee7   :  { %v3157_v62 = vsel %vm1239_vm14, 0.0, %v3152_v4  ;;  %3261 = vmatprep.subr.mxu1 %v9413_v0 }
 0xee8   :  { %v3159_v34 = vmul.f32 %v3157_v62, %v7554_v55  ;;  %v3082_v32 = vpop.permute.xlu0 %3081 }
 0xee9   :  { %v3086_v35 = vsel %vm1249_vm13, 0.0, %v3082_v32 }
 0xeea   :  { %v3218_v15 = vpop.permute.xlu1 %3217  ;;  %3262 = vmatpush1.msra.mxu1 %v3159_v34  ;;  %v3088_v62 = vmul.f32 %v3086_v35, %v7549_v43 }
 0xeeb   :  { %v3222_v28 = vsel %vm1312_vm10, %v3218_v15, 0.0  ;;  %3291 = vmatprep.subr.mxu1 %v9413_v0 }
 0xeec   :  { %v3224_v23 = vmul.f32 %v8243_v57, %v3222_v28  ;;  %v3132_v58 = vpop.permute.xlu0 %3131 }
 0xeed   :  { %v3137_v50 = vsel %vm1302_vm9, %v3132_v58, 0.0 }
 0xeee   :  { %v3139_v5 = vmul.f32 %v3137_v50, %v7519_v29  ;;  %v3216_v1 = vpop.permute.xlu1 %3215  ;;  %3292 = vmatpush2.msra.mxu1 %v3224_v23 }
 0xeef   :  { %v3221_v8 = vsel %vm1312_vm10, %v3216_v1, 0.0  ;;  %3293 = vmatprep.subr.mxu1 %v9413_v0 }
 0xef0   :  { %v3223_v60 = vmul.f32 %v8243_v57, %v3221_v8  ;;  %3315 = vmatpush1.msra.mxu0 %v3139_v5  ;;  %v3122_v48 = vpop.permute.xlu0 %3121 }
 0xef1   :  { %v3127_v17 = vsel %vm1292_vm11, %v3122_v48, 0.0  ;;  %3316 = vmatprep.subr.mxu0 %v9413_v0  ;;  %v3057_v48 = vld [vmem:[%s8210_s4] sm:$0xff] }
 0xef2   :  { %v3129_v31 = vmul.f32 %v3127_v17, %v7525_v9  ;;  %3294 = vmatpush2.msra.mxu1 %v3223_v60  ;;  %3317 = vmatpush1.msra.mxu0 %v3130_v2 }
 0xef3   :  { %3318 = vmatprep.subr.mxu0 %v9413_v0  ;;  %3296 = vmatmul.mubr.f32.vlgmr.msra.gmra.mxu1 %v3061_v42  ;;  %v3060_v42 = vld [vmem:[%s8210_s4 + $0x18] sm:$0xff]  ;;  %s6033_s4 = sld [smem:[%s9303_s0 + %s6844_s19]]  }
 0xef4   :  { %3319 = vmatpush1.msra.mxu0 %v3129_v31  ;;  %v3072_v45 = vpop.permute.xlu0 %3071  ;;  %6109 = vmatprep.mubr.msk.f32.mxu1 %vm229_vm6, %v3064_v56 }
 0xef5   :  { %3320 = vmatprep.subr.mxu0 %v9413_v0  ;;  %3507 = vmatprep.subr.mxu1 %v9413_v0  ;;  %v3076_v15 = vsel %vm1239_vm14, 0.0, %v3072_v45 }
 0xef6   :  { %3321 = vmatpush1.msra.mxu0 %v3120_v33  ;;  %v3078_v23 = vmul.f32 %v3076_v15, %v7554_v55 }
 0xef7   :  { %3322 = vmatprep.subr.mxu0 %v9413_v0  ;;  %3301 = vmatmul.mubr.f32.gmra.mxu1 %v3063_v16 }
 0xef8   :  { %3323 = vmatpush1.msra.mxu0 %v3119_v41  ;;  %v3144_v24 = vpop.permute.xlu0 %3143 }
 0xef9   :  { %3324 = vmatprep.subr.mxu0 %v9413_v0  ;;  %v3148_v7 = vsel %vm1312_vm10, %v3144_v24, 0.0 }
 0xefa   :  { %3325 = vmatpush1.msra.mxu0 %v3110_v30  ;;  %v3150_v1 = vmul.f32 %v8243_v57, %v3148_v7 }
 0xefb   :  { %3326 = vmatprep.subr.mxu0 %v9413_v0  ;;  %v3390_v16 = vpop.permute.xlu1 %3389 }
 0xefc   :  { %v3100_v21 = vpop.permute.xlu0 %3099  ;;  %3327 = vmatpush1.msra.mxu0 %v3109_v10 }
 0xefd   :  { %v3105_v39 = vsel %vm303_vm4, 0.0, %v3100_v21  ;;  %3328 = vmatprep.subr.mxu0 %v9413_v0 }
 0xefe   :  { %v3107_v52 = vmul.f32 %v3105_v39, %v7539_v14  ;;  %3329 = vmatpush1.msra.mxu0 %v3108_v22 }
 0xeff   :  { %3330 = vmatprep.subr.mxu0 %v9413_v0 }
 0xf00   :  { %v3090_v13 = vpop.permute.xlu0 %3089  ;;  %3331 = vmatpush1.msra.mxu0 %v3107_v52  ;;  %v3402_v52 = vld [vmem:[%s8334_s26 + $0x8] sm:$0xff] }
 0xf01   :  { %v3095_v4 = vsel %vm1259_vm12, 0.0, %v3090_v13  ;;  %3332 = vmatprep.subr.mxu0 %v9413_v0  ;;  %6112 = vmatprep.mubr.msk.f32.mxu1 %vm229_vm6, %v3402_v52 }
 0xf02   :  { %v3097_v18 = vmul.f32 %v3095_v4, %v7543_v26  ;;  %3333 = vmatpush1.msra.mxu0 %v3098_v19 }
 0xf03   :  { %3334 = vmatprep.subr.mxu0 %v9413_v0 }
 0xf04   :  { %v3080_v34 = vpop.permute.xlu0 %3079  ;;  %3335 = vmatpush1.msra.mxu0 %v3097_v18 }
 0xf05   :  { %v3085_v28 = vsel %vm1249_vm13, 0.0, %v3080_v34  ;;  %3336 = vmatprep.subr.mxu0 %v9413_v0 }
 0xf06   :  { %v3087_v32 = vmul.f32 %v3085_v28, %v7549_v43  ;;  %3337 = vmatpush1.msra.mxu0 %v3088_v62 }
 0xf07   :  { %3338 = vmatprep.subr.mxu0 %v9413_v0 }
 0xf08   :  { %v3070_v58 = vpop.permute.xlu0 %3069  ;;  %3339 = vmatpush1.msra.mxu0 %v3087_v32 }
 0xf09   :  { %v3075_v50 = vsel %vm1239_vm14, 0.0, %v3070_v58  ;;  %3340 = vmatprep.subr.mxu0 %v9413_v0 }
 0xf0a   :  { %v3077_v5 = vmul.f32 %v3075_v50, %v7554_v55  ;;  %3341 = vmatpush1.msra.mxu0 %v3078_v23 }
 0xf0b   :  { %3342 = vmatprep.subr.mxu0 %v9413_v0 }
 0xf0c   :  { %v3142_v8 = vpop.permute.xlu0 %3141  ;;  %3343 = vmatpush1.msra.mxu0 %v3077_v5 }
 0xf0d   :  { %v3147_v2 = vsel %vm1312_vm10, %v3142_v8, 0.0  ;;  %3372 = vmatprep.subr.mxu0 %v9413_v0 }
 0xf0e   :  { %v3149_v60 = vmul.f32 %v8243_v57, %v3147_v2  ;;  %3373 = vmatpush2.msra.mxu0 %v3150_v1 }
 0xf0f   :  { %3374 = vmatprep.subr.mxu0 %v9413_v0 }
 0xf10   :  { %3375 = vmatpush2.msra.mxu0 %v3149_v60 }
 0xf11   :  { %3377 = vmatmul.mubr.f32.vlgmr.msra.gmra.mxu0 %v3057_v48  ;;  %6694 = vmatprep.subr.mxu0 %v9413_v0 }
 0xf12   :  { %6111 = vmatprep.mubr.msk.f32.mxu0 %vm229_vm6, %v3060_v42 }
 0xf15   :  { %3382 = vmatmul.mubr.f32.gmra.mxu0 %v3059_v61 }
 0xf16   :  { %6698 = vmatprep.mubr.msk.f32.mxu0 %vm6841_vm5, %v9413_v0 }
 0xf19   :  { %v3395_v22 = vpop.permute.xlu0 %3394 }
 0xfb3   :  { %v3297_v17 = vpop.f32.mrf.mxu1 }
 0xfb5   :  { %v3299_v56 = vpop.f32.mrf.mxu1 }
 0xfb7   :  { %v3302_v31 = vpop.f32.mrf.mxu1 }
 0xfb9   :  { %v3304_v49 = vpop.f32.mrf.mxu1 }
 0xfd1   :  { %v3378_v33 = vpop.f32.mrf.mxu0 }
 0xfd2   :  { %v3379_v45 = vadd.f32 %v3378_v33, %v3297_v17 }
 0xfd3   :  { %v3380_v41 = vpop.f32.mrf.mxu0 }
 0xfd4   :  { %v3397_v24 = vadd.f32 %v3390_v16, %v3379_v45 }
 0xfd5   :  { %v3383_v30 = vpop.f32.mrf.mxu0 }
 0xfd6   :  { %v8309_v12 = vmax.f32 %v3397_v24, 0.0  ;;  %v3384_v10 = vadd.f32 %v3383_v30, %v3302_v31 }
 0xfd7   :  { %v3385_v21 = vpop.f32.mrf.mxu0 }
 0xfd8   :  { %v3398_v63 = vadd.f32 %v3395_v22, %v3384_v10  ;;  %3471 = vrot.lane.b32.xlu1 %v8309_v12, %s6818_s14  ;;  %v3449_v31 = vmul.f32 %v8309_v12, %v7535_v59 }
 0xfda   :  { %v3400_v39 = vmax.f32 %v3398_v63, 0.0 }
 0xfdc   :  { %3461 = vrot.lane.b32.xlu1 %v8309_v12, %s6821_s22  ;;  %3473 = vrot.lane.b32.xlu0 %v3400_v39, %s6818_s14  ;;  %s6838_s14 = smov 19  }
 0xfe0   :  { %3451 = vrot.lane.b32.xlu1 %v8309_v12, %s6806_s9  ;;  %3463 = vrot.lane.b32.xlu0 %v3400_v39, %s6821_s22  ;;  %s6031_s22 = sld [smem:[%s9303_s0 + %s6838_s14]]   ;;  %s6845_s14 = smov 20  }
 0xfe4   :  { %3439 = vrot.lane.b32.xlu1 %v8309_v12, %s6807_s10  ;;  %3453 = vrot.lane.b32.xlu0 %v3400_v39, %s6806_s9 }
 0xfe6   :  { %v3405_v19 = vld [vmem:[%s6031_s22] sm:$0xff]  ;;  %v3406_v13 = vld [vmem:[%s6031_s22 + $0x8] sm:$0xff]  ;;  %s6032_s22 = sld [smem:[%s9303_s0 + %s6845_s14]]  }
 0xfe8   :  { %3429 = vrot.lane.b32.xlu1 %v8309_v12, %s6823_s28  ;;  %3441 = vrot.lane.b32.xlu0 %v3400_v39, %s6807_s10 }
 0xfec   :  { %3419 = vrot.lane.b32.xlu1 %v8309_v12, %s6825_s1  ;;  %3431 = vrot.lane.b32.xlu0 %v3400_v39, %s6823_s28  ;;  %s6042_s28 = sld [smem:[%s9303_s0 + %s6854_s13]]  }
 0xff0   :  { %3409 = vrot.lane.b32.xlu1 %v8309_v12, %s6824_s30  ;;  %3421 = vrot.lane.b32.xlu0 %v3400_v39, %s6825_s1 }
 0xff4   :  { %3481 = vrot.lane.b32.xlu1 %v8309_v12, %s6819_s15  ;;  %3411 = vrot.lane.b32.xlu0 %v3400_v39, %s6824_s30  ;;  %s6855_s30 = smov 39  }
 0xff8   :  { %3493 = vperm.xlu1 %6792, %v3405_v19   ;;  %3483 = vrot.lane.b32.xlu0 %v3400_v39, %s6819_s15  ;;  %s6840_s15 = smov 22  }
 0xff9   :  { %s6034_s1 = sld [smem:[%s9303_s0 + %s6840_s15]]   ;;  %s6847_s15 = smov 23  }
 0xffc   :  { %3498 = vperm.xlu0 %6781, %v3406_v13  }
0x104a   :  { %v3472_v35 = vpop.permute.xlu1 %3471 }
0x104b   :  { %v3477_v62 = vsel %vm1302_vm9, %v3472_v35, 0.0 }
0x104c   :  { %v3479_v28 = vmul.f32 %v3477_v62, %v7519_v29 }
0x104e   :  { %v3462_v4 = vpop.permute.xlu1 %3461  ;;  %v3474_v18 = vpop.permute.xlu0 %3473 }
0x104f   :  { %v3478_v34 = vsel %vm1302_vm9, %v3474_v18, 0.0  ;;  %v3467_v58 = vsel %vm1292_vm11, %v3462_v4, 0.0  ;;  %vm9428_vm9 = vmmov %vm9427_vm8 }
0x1050   :  { %v3480_v15 = vmul.f32 %v3478_v34, %v7519_v29  ;;  %v3469_v5 = vmul.f32 %v3467_v58, %v7525_v9  ;;  %v3401_v34 = vld [vmem:[%s8334_s26] sm:$0xff] }
0x1052   :  { %v3452_v32 = vpop.permute.xlu1 %3451  ;;  %3508 = vmatpush1.msra.mxu1 %v3480_v15  ;;  %v3464_v23 = vpop.permute.xlu0 %3463  ;;  %v3404_v15 = vld [vmem:[%s8334_s26 + $0x18] sm:$0xff] }
0x1053   :  { %v3468_v7 = vsel %vm1292_vm11, %v3464_v23, 0.0  ;;  %3509 = vmatprep.subr.mxu1 %v9413_v0  ;;  %v3457_v29 = vsel %vm9425_vm2, %v3452_v32, 0.0  ;;  %vm9430_vm11 = vcmask 916480   ;;  %vm9436_vm2 = vmmov %vm9435_vm1 }
0x1054   :  { %v3470_v50 = vmul.f32 %v3468_v7, %v7525_v9  ;;  %3510 = vmatpush1.msra.mxu1 %v3479_v28  ;;  %v3459_v48 = vmul.f32 %v3457_v29, %v7529_v38  ;;  %v3450_v9 = vmul.f32 %v3400_v39, %v7535_v59  ;;  %v3671_v29 = vld [vmem:[%s6034_s1] sm:$0xff]  ;;  %s8526_s1 = sld [smem:[%s9303_s0 + %s6847_s15]]   ;;  %vm9433_vm15 = vmmov %vm9430_vm11 }
0x1055   :  { %3511 = vmatprep.subr.mxu1 %v9413_v0  ;;  %vm9434_vm0 = vmmov %vm9430_vm11 }
0x1056   :  { %v3440_v1 = vpop.permute.xlu1 %3439  ;;  %3512 = vmatpush1.msra.mxu1 %v3470_v50  ;;  %v3454_v8 = vpop.permute.xlu0 %3453 }
0x1057   :  { %v3458_v2 = vsel %vm9426_vm3, %v3454_v8, 0.0  ;;  %3513 = vmatprep.subr.mxu1 %v9413_v0  ;;  %v3445_v49 = vsel %vm303_vm4, 0.0, %v3440_v1  ;;  %vm9437_vm3 = vmmov %vm9435_vm1 }
0x1058   :  { %v3460_v60 = vmul.f32 %v3458_v2, %v7529_v38  ;;  %3514 = vmatpush1.msra.mxu1 %v3469_v5  ;;  %v3447_v16 = vmul.f32 %v3445_v49, %v7539_v14  ;;  %v3757_v2 = vld [vmem:[%s6036_s18] sm:$0xff] }
0x1059   :  { %3515 = vmatprep.subr.mxu1 %v9413_v0 }
0x105a   :  { %v3430_v42 = vpop.permute.xlu1 %3429  ;;  %3516 = vmatpush1.msra.mxu1 %v3460_v60  ;;  %v3442_v61 = vpop.permute.xlu0 %3441 }
0x105b   :  { %3517 = vmatprep.subr.mxu1 %v9413_v0  ;;  %v3446_v17 = vsel %vm303_vm4, 0.0, %v3442_v61  ;;  %v3435_v24 = vsel %vm1259_vm12, 0.0, %v3430_v42 }
0x105c   :  { %3518 = vmatpush1.msra.mxu1 %v3459_v48  ;;  %v3448_v38 = vmul.f32 %v3446_v17, %v7539_v14  ;;  %v3437_v12 = vmul.f32 %v3435_v24, %v7543_v26 }
0x105d   :  { %3519 = vmatprep.subr.mxu1 %v9413_v0 }
0x105e   :  { %v3432_v56 = vpop.permute.xlu0 %3431  ;;  %3520 = vmatpush1.msra.mxu1 %v3450_v9  ;;  %v3420_v33 = vpop.permute.xlu1 %3419 }
0x105f   :  { %3521 = vmatprep.subr.mxu1 %v9413_v0  ;;  %v3436_v45 = vsel %vm1259_vm12, 0.0, %v3432_v56  ;;  %v3425_v14 = vsel %vm1249_vm13, 0.0, %v3420_v33  ;;  %v3596_v56 = vld [vmem:[%s6033_s4] sm:$0xff]  ;;  %vm9431_vm12 = vmmov %vm9427_vm8 }
0x1060   :  { %3522 = vmatpush1.msra.mxu1 %v3449_v31  ;;  %v3438_v59 = vmul.f32 %v3436_v45, %v7543_v26  ;;  %v3427_v39 = vmul.f32 %v3425_v14, %v7549_v43  ;;  %v3670_v31 = vld [vmem:[%s6032_s22] sm:$0xff] }
0x1061   :  { %3523 = vmatprep.subr.mxu1 %v9413_v0 }
0x1062   :  { %v3422_v41 = vpop.permute.xlu0 %3421  ;;  %3524 = vmatpush1.msra.mxu1 %v3448_v38  ;;  %v3410_v10 = vpop.permute.xlu1 %3409 }
0x1063   :  { %3525 = vmatprep.subr.mxu1 %v9413_v0  ;;  %v3426_v30 = vsel %vm1249_vm13, 0.0, %v3422_v41  ;;  %v3415_v26 = vsel %vm1239_vm14, 0.0, %v3410_v10 }
0x1064   :  { %3526 = vmatpush1.msra.mxu1 %v3447_v16  ;;  %v3428_v21 = vmul.f32 %v3426_v30, %v7549_v43  ;;  %v3417_v4 = vmul.f32 %v3415_v26, %v7554_v55 }
0x1065   :  { %3527 = vmatprep.subr.mxu1 %v9413_v0 }
0x1066   :  { %v3412_v22 = vpop.permute.xlu0 %3411  ;;  %3528 = vmatpush1.msra.mxu1 %v3438_v59  ;;  %v3482_v19 = vpop.permute.xlu1 %3481 }
0x1067   :  { %3529 = vmatprep.subr.mxu1 %v9413_v0  ;;  %v3416_v63 = vsel %vm1239_vm14, 0.0, %v3412_v22  ;;  %v3487_v43 = vsel %vm1312_vm10, %v3482_v19, 0.0  ;;  %vm9432_vm14 = vmmov %vm9430_vm11 }
0x1068   :  { %3530 = vmatpush1.msra.mxu1 %v3437_v12  ;;  %v3418_v13 = vmul.f32 %v3416_v63, %v7554_v55  ;;  %v3489_v62 = vmul.f32 %v8243_v57, %v3487_v43  ;;  %v3403_v55 = vld [vmem:[%s8334_s26 + $0x10] sm:$0xff]  ;;  %s8487_s26 = sld [smem:[%s9303_s0 + %s6846_s24]]  }
0x1069   :  { %3531 = vmatprep.subr.mxu1 %v9413_v0 }
0x106a   :  { %v3484_v52 = vpop.permute.xlu0 %3483  ;;  %3532 = vmatpush1.msra.mxu1 %v3428_v21 }
0x106b   :  { %3533 = vmatprep.subr.mxu1 %v9413_v0  ;;  %v3488_v35 = vsel %vm1312_vm10, %v3484_v52, 0.0  ;;  %vm9429_vm10 = vmmov %vm9427_vm8 }
0x106c   :  { %3534 = vmatpush1.msra.mxu1 %v3427_v39  ;;  %v3490_v18 = vmul.f32 %v8243_v57, %v3488_v35 }
0x106d   :  { %3535 = vmatprep.subr.mxu1 %v9413_v0 }
0x106e   :  { %3536 = vmatpush1.msra.mxu1 %v3418_v13  ;;  %v6182_v16 = vld [vmem:[%s8487_s26 + $0x3f8] sm:$0xff]  ;;  %v6181_v41 = vld [vmem:[%s8487_s26 + $0x3f0] sm:$0xff] }
0x106f   :  { %3537 = vmatprep.subr.mxu1 %v9413_v0  ;;  %v6178_v24 = vld [vmem:[%s8487_s26 + $0x3d8] sm:$0xff]  ;;  %v6177_v59 = vld [vmem:[%s8487_s26 + $0x3d0] sm:$0xff] }
0x1070   :  { %3538 = vmatpush1.msra.mxu1 %v3417_v4  ;;  %v6174_v30 = vld [vmem:[%s8487_s26 + $0x3b8] sm:$0xff]  ;;  %v6173_v12 = vld [vmem:[%s8487_s26 + $0x3b0] sm:$0xff] }
0x1071   :  { %3567 = vmatprep.subr.mxu1 %v9413_v0  ;;  %v6170_v10 = vld [vmem:[%s8487_s26 + $0x398] sm:$0xff]  ;;  %v6169_v22 = vld [vmem:[%s8487_s26 + $0x390] sm:$0xff] }
0x1072   :  { %3568 = vmatpush2.msra.mxu1 %v3490_v18  ;;  %v6166_v14 = vld [vmem:[%s8487_s26 + $0x378] sm:$0xff]  ;;  %v6165_v21 = vld [vmem:[%s8487_s26 + $0x370] sm:$0xff] }
0x1073   :  { %3569 = vmatprep.subr.mxu1 %v9413_v0  ;;  %v3494_v28 = vpop.permute.xlu1 %3493  ;;  %v6162_v63 = vld [vmem:[%s8487_s26 + $0x358] sm:$0xff]  ;;  %v6161_v39 = vld [vmem:[%s8487_s26 + $0x350] sm:$0xff] }
0x1074   :  { %3570 = vmatpush2.msra.mxu1 %v3489_v62  ;;  %v6158_v52 = vld [vmem:[%s8487_s26 + $0x338] sm:$0xff]  ;;  %v6157_v26 = vld [vmem:[%s8487_s26 + $0x330] sm:$0xff] }
0x1075   :  { %3572 = vmatmul.mubr.f32.vlgmr.msra.gmra.mxu1 %v3401_v34  ;;  %4107 = vmatprep.subr.mxu1 %v6182_v16  ;;  %v6154_v19 = vld [vmem:[%s8487_s26 + $0x318] sm:$0xff]  ;;  %v6153_v13 = vld [vmem:[%s8487_s26 + $0x310] sm:$0xff]  ;;  %v6155_v16 = vld [vmem:[%s8487_s26 + $0x320] sm:$0xff] }
0x1076   :  { %6113 = vmatprep.mubr.msk.f32.mxu1 %vm229_vm6, %v3404_v15  ;;  %4108 = vmatpush1.msra.mxu1 %v6181_v41  ;;  %v6150_v35 = vld [vmem:[%s8487_s26 + $0x2f8] sm:$0xff]  ;;  %v6149_v4 = vld [vmem:[%s8487_s26 + $0x2f0] sm:$0xff]  ;;  %v6152_v41 = vld [vmem:[%s8487_s26 + $0x308] sm:$0xff] }
0x1077   :  { %v3499_v7 = vpop.permute.xlu0 %3498  ;;  %4109 = vmatprep.subr.mxu1 %v6178_v24  ;;  %v6146_v43 = vld [vmem:[%s8487_s26 + $0x2d8] sm:$0xff]  ;;  %v6145_v18 = vld [vmem:[%s8487_s26 + $0x2d0] sm:$0xff]  ;;  %v6151_v24 = vld [vmem:[%s8487_s26 + $0x300] sm:$0xff] }
0x1078   :  { %4110 = vmatpush1.msra.mxu1 %v6177_v59  ;;  %v6142_v62 = vld [vmem:[%s8487_s26 + $0x2b8] sm:$0xff]  ;;  %v6141_v34 = vld [vmem:[%s8487_s26 + $0x2b0] sm:$0xff]  ;;  %v6148_v59 = vld [vmem:[%s8487_s26 + $0x2e8] sm:$0xff] }
0x1079   :  { %3577 = vmatmul.mubr.f32.gmra.mxu1 %v3403_v55  ;;  %4111 = vmatprep.subr.mxu1 %v6174_v30  ;;  %v6138_v15 = vld [vmem:[%s8487_s26 + $0x298] sm:$0xff]  ;;  %v6137_v55 = vld [vmem:[%s8487_s26 + $0x290] sm:$0xff]  ;;  %v6147_v30 = vld [vmem:[%s8487_s26 + $0x2e0] sm:$0xff] }
0x107a   :  { %4171 = vmatprep.mubr.f32.mxu1 %v9413_v0  ;;  %4112 = vmatpush1.msra.mxu1 %v6173_v12  ;;  %v6144_v12 = vld [vmem:[%s8487_s26 + $0x2c8] sm:$0xff] }
0x107b   :  { %4113 = vmatprep.subr.mxu1 %v6170_v10  ;;  %v6143_v10 = vld [vmem:[%s8487_s26 + $0x2c0] sm:$0xff] }
0x107c   :  { %4114 = vmatpush1.msra.mxu1 %v6169_v22  ;;  %v6140_v22 = vld [vmem:[%s8487_s26 + $0x2a8] sm:$0xff] }
0x107d   :  { %4115 = vmatprep.subr.mxu1 %v6166_v14  ;;  %v6139_v14 = vld [vmem:[%s8487_s26 + $0x2a0] sm:$0xff] }
0x107e   :  { %4116 = vmatpush1.msra.mxu1 %v6165_v21  ;;  %v6136_v21 = vld [vmem:[%s8487_s26 + $0x288] sm:$0xff] }
0x107f   :  { %4117 = vmatprep.subr.mxu1 %v6162_v63  ;;  %v6135_v63 = vld [vmem:[%s8487_s26 + $0x280] sm:$0xff] }
0x1080   :  { %4118 = vmatpush1.msra.mxu1 %v6161_v39  ;;  %v6132_v39 = vld [vmem:[%s8487_s26 + $0x268] sm:$0xff] }
0x1081   :  { %4119 = vmatprep.subr.mxu1 %v6158_v52  ;;  %v6131_v52 = vld [vmem:[%s8487_s26 + $0x260] sm:$0xff] }
0x1082   :  { %4120 = vmatpush1.msra.mxu1 %v6157_v26  ;;  %v6128_v26 = vld [vmem:[%s8487_s26 + $0x248] sm:$0xff] }
0x1083   :  { %4121 = vmatprep.subr.mxu1 %v6154_v19  ;;  %v6127_v19 = vld [vmem:[%s8487_s26 + $0x240] sm:$0xff] }
0x1084   :  { %4122 = vmatpush1.msra.mxu1 %v6153_v13  ;;  %v6124_v13 = vld [vmem:[%s8487_s26 + $0x228] sm:$0xff] }
0x1085   :  { %4123 = vmatprep.subr.mxu1 %v6150_v35  ;;  %v6126_v35 = vld [vmem:[%s8487_s26 + $0x238] sm:$0xff] }
0x1086   :  { %4124 = vmatpush1.msra.mxu1 %v6149_v4  ;;  %v6123_v4 = vld [vmem:[%s8487_s26 + $0x220] sm:$0xff] }
0x1087   :  { %4125 = vmatprep.subr.mxu1 %v6146_v43  ;;  %v6125_v43 = vld [vmem:[%s8487_s26 + $0x230] sm:$0xff] }
0x1088   :  { %4126 = vmatpush1.msra.mxu1 %v6145_v18  ;;  %v6120_v18 = vld [vmem:[%s8487_s26 + $0x208] sm:$0xff] }
0x1089   :  { %4127 = vmatprep.subr.mxu1 %v6142_v62  ;;  %v6122_v62 = vld [vmem:[%s8487_s26 + $0x218] sm:$0xff] }
0x108a   :  { %4128 = vmatpush1.msra.mxu1 %v6141_v34  ;;  %v6119_v34 = vld [vmem:[%s8487_s26 + $0x200] sm:$0xff] }
0x108b   :  { %4129 = vmatprep.subr.mxu1 %v6138_v15  ;;  %v6121_v15 = vld [vmem:[%s8487_s26 + $0x210] sm:$0xff] }
0x108c   :  { %4130 = vmatpush1.msra.mxu1 %v6137_v55  ;;  %v3893_v55 = vld [vmem:[%s8487_s26 + $0x1e8] sm:$0xff] }
0x1135   :  { %v3573_v32 = vpop.f32.mrf.mxu1 }
0x1136   :  { %v3574_v23 = vadd.f32 %v3573_v32, %v3494_v28  ;;  %v6134_v28 = vld [vmem:[%s8487_s26 + $0x278] sm:$0xff]  ;;  %v6133_v32 = vld [vmem:[%s8487_s26 + $0x270] sm:$0xff] }
0x1137   :  { %v3575_v58 = vpop.f32.mrf.mxu1  ;;  %4131 = vmatprep.subr.mxu1 %v6134_v28  ;;  %v3895_v28 = vld [vmem:[%s8487_s26 + $0x1f8] sm:$0xff] }
0x1138   :  { %v3582_v57 = vmax.f32 %v3574_v23, 0.0  ;;  %v6130_v23 = vld [vmem:[%s8487_s26 + $0x258] sm:$0xff]  ;;  %v6129_v58 = vld [vmem:[%s8487_s26 + $0x250] sm:$0xff]  ;;  %4132 = vmatpush1.msra.mxu1 %v6133_v32 }
0x1139   :  { %v3578_v50 = vpop.f32.mrf.mxu1  ;;  %4133 = vmatprep.subr.mxu1 %v6130_v23 }
0x113a   :  { %v3579_v5 = vadd.f32 %v3578_v50, %v3499_v7  ;;  %3586 = vrot.lane.b32.xlu1 %v3582_v57, %s6842_s25  ;;  %4134 = vmatpush1.msra.mxu1 %v6129_v58  ;;  %v3892_v58 = vld [vmem:[%s8487_s26 + $0x1e0] sm:$0xff] }
0x113b   :  { %v3580_v1 = vpop.f32.mrf.mxu1  ;;  %4135 = vmatprep.subr.mxu1 %v6126_v35  ;;  %v3857_v35 = vld [vmem:[%s8487_s26 + $0xc8] sm:$0xff] }
0x113c   :  { %v3583_v8 = vmax.f32 %v3579_v5, 0.0  ;;  %4136 = vmatpush1.msra.mxu1 %v6125_v43  ;;  %v3856_v43 = vld [vmem:[%s8487_s26 + $0xc0] sm:$0xff] }
0x113d   :  { %4137 = vmatprep.subr.mxu1 %v6122_v62  ;;  %v3853_v62 = vld [vmem:[%s8487_s26 + $0xa8] sm:$0xff] }
0x113e   :  { %3588 = vrot.lane.b32.xlu0 %v3583_v8, %s6842_s25  ;;  %4138 = vmatpush1.msra.mxu1 %v6121_v15  ;;  %v3852_v15 = vld [vmem:[%s8487_s26 + $0xa0] sm:$0xff] }
0x113f   :  { %4249 = vmatprep.subr.mxu1 %v3895_v28  ;;  %v3849_v28 = vld [vmem:[%s8487_s26 + $0x88] sm:$0xff] }
0x1142   :  { %3674 = vperm.xlu0 %6781, %v3671_v29   ;;  %v6180_v29 = vld [vmem:[%s8487_s26 + $0x3e8] sm:$0xff] }
0x1146   :  { %4894 = vperm.xlu0 %6781, %v3757_v2   ;;  %v6117_v2 = vld [vmem:[%s8526_s1 + $0x8] sm:$0xff] }
0x114a   :  { %5204 = vrot.lane.b32.xlu0 %v7385_v44, %s6803_s6 }
0x114e   :  { %5182 = vrot.lane.b32.xlu0 %v7378_v46, %s6804_s7 }
0x1152   :  { %5206 = vrot.lane.b32.xlu0 %v7389_v40, %s6803_s6 }
0x1156   :  { %5162 = vrot.lane.b32.xlu0 %v7378_v46, %s6805_s8 }
0x115a   :  { %5186 = vrot.lane.b32.xlu0 %v7389_v40, %s6804_s7 }
0x115e   :  { %5166 = vrot.lane.b32.xlu0 %v7389_v40, %s6805_s8 }
0x1162   :  { %5134 = vrot.lane.b32.xlu0 %v7378_v46, %s6807_s10 }
0x1166   :  { %5114 = vrot.lane.b32.xlu0 %v7378_v46, %s6808_s11 }
0x116a   :  { %5138 = vrot.lane.b32.xlu0 %v7389_v40, %s6807_s10 }
0x116e   :  { %5094 = vrot.lane.b32.xlu0 %v7378_v46, %s6810_s12 }
0x1172   :  { %5118 = vrot.lane.b32.xlu0 %v7389_v40, %s6808_s11 }
0x1176   :  { %5074 = vrot.lane.b32.xlu0 %v7378_v46, %s6813_s17 }
0x117a   :  { %5098 = vrot.lane.b32.xlu0 %v7389_v40, %s6810_s12 }
0x117e   :  { %5078 = vrot.lane.b32.xlu0 %v7389_v40, %s6813_s17 }
0x11ac   :  { %v3587_v60 = vpop.permute.xlu1 %3586 }
0x11ad   :  { %v3592_v42 = vadd.f32 %v3587_v60, %v3582_v57  ;;  %v6179_v60 = vld [vmem:[%s8487_s26 + $0x3e0] sm:$0xff] }
0x11af   :  { %v3594_v17 = vmul.f32 0.5, %v3592_v42  ;;  %v6175_v42 = vld [vmem:[%s8487_s26 + $0x3c0] sm:$0xff] }
0x11b0   :  { %v3589_v48 = vpop.permute.xlu0 %3588 }
0x11b1   :  { %v3593_v61 = vadd.f32 %v3589_v48, %v3583_v8  ;;  %v6176_v48 = vld [vmem:[%s8487_s26 + $0x3c8] sm:$0xff] }
0x11b3   :  { %v3595_v9 = vmul.f32 0.5, %v3593_v61  ;;  %v6172_v61 = vld [vmem:[%s8487_s26 + $0x3a8] sm:$0xff] }
0x11b5   :  { %6695 = vmatpush3.msra.mxu0 %v3595_v9  ;;  %v6171_v9 = vld [vmem:[%s8487_s26 + $0x3a0] sm:$0xff] }
0x11b6   :  { %6696 = vmatprep.subr.mxu0 %v9413_v0 }
0x11b7   :  { %6697 = vmatpush3.msra.mxu0 %v3594_v17  ;;  %v6168_v17 = vld [vmem:[%s8487_s26 + $0x388] sm:$0xff] }
0x11b8   :  { %6699 = vmatmul.mubr.msk.f32.vlgmr.msra.gmra.mxu0 %vm229_vm6, %v3596_v56  ;;  %6701 = vmatprep.subr.mxu0 %v9413_v0  ;;  %v6167_v56 = vld [vmem:[%s8487_s26 + $0x380] sm:$0xff] }
0x11b9   :  { %6702 = vmatpush3.msra.mxu0 %v3583_v8  ;;  %6705 = vmatprep.mubr.msk.f32.mxu0 %vm6841_vm5, %v9413_v0  ;;  %v3758_v8 = vld [vmem:[%s8526_s1] sm:$0xff] }
0x11ba   :  { %6703 = vmatprep.subr.mxu0 %v9413_v0 }
0x11bb   :  { %6704 = vmatpush3.msra.mxu0 %v3582_v57 }
0x11bc   :  { %6706 = vmatmul.mubr.msk.f32.vlgmr.msra.gmra.mxu0 %vm229_vm6, %v3670_v31  ;;  %6708 = vmatprep.subr.mxu0 %v9413_v0  ;;  %v6164_v31 = vld [vmem:[%s8487_s26 + $0x368] sm:$0xff] }
0x11bd   :  { %6710 = vmatprep.mubr.msk.f32.mxu0 %vm6841_vm5, %v9413_v0  ;;  %v3675_v57 = vpop.permute.xlu0 %3674 }
0x1278   :  { %v8456_v49 = vpop.f32.mrf.mxu0 }
0x1279   :  { %3751 = vrot.lane.b32.xlu1 %v8456_v49, %s6842_s25  ;;  %s6051_s25 = sld [smem:[%s9303_s0 + %s6855_s30]]  }
0x127a   :  { %v6700_v38 = vpop.f32.mrf.mxu0 }
0x127b   :  { %v6160_v38 = vld [vmem:[%s8487_s26 + $0x348] sm:$0xff] }
0x127c   :  { %v8460_v33 = vpop.f32.mrf.mxu0 }
0x127d   :  { %5202 = vrot.lane.b32.xlu1 %v7378_v46, %s6803_s6  ;;  %v3747_v7 = vadd.f32 %v8460_v33, %v3675_v57  ;;  %v6159_v33 = vld [vmem:[%s8487_s26 + $0x340] sm:$0xff]  ;;  %v3894_v57 = vld [vmem:[%s8487_s26 + $0x1f0] sm:$0xff] }
0x127e   :  { %v6707_v45 = vpop.f32.mrf.mxu0 }
0x127f   :  { %v6156_v45 = vld [vmem:[%s8487_s26 + $0x328] sm:$0xff] }
0x1281   :  { %5200 = vrot.lane.b32.xlu1 %v7393_v3, %s6803_s6 }
0x1285   :  { %5184 = vrot.lane.b32.xlu1 %v7385_v44, %s6804_s7 }
0x1289   :  { %5180 = vrot.lane.b32.xlu1 %v7393_v3, %s6804_s7 }
0x128d   :  { %5164 = vrot.lane.b32.xlu1 %v7385_v44, %s6805_s8 }
0x1291   :  { %5160 = vrot.lane.b32.xlu1 %v7393_v3, %s6805_s8 }
0x1295   :  { %5132 = vrot.lane.b32.xlu1 %v7393_v3, %s6807_s10 }
0x1299   :  { %5112 = vrot.lane.b32.xlu1 %v7393_v3, %s6808_s11 }
0x129d   :  { %5136 = vrot.lane.b32.xlu1 %v7385_v44, %s6807_s10 }
0x12a1   :  { %5092 = vrot.lane.b32.xlu1 %v7393_v3, %s6810_s12 }
0x12a5   :  { %5116 = vrot.lane.b32.xlu1 %v7385_v44, %s6808_s11 }
0x12a9   :  { %5072 = vrot.lane.b32.xlu1 %v7393_v3, %s6813_s17 }
0x12ad   :  { %5096 = vrot.lane.b32.xlu1 %v7385_v44, %s6810_s12 }
0x12b1   :  { %5076 = vrot.lane.b32.xlu1 %v7385_v44, %s6813_s17 }
0x12eb   :  { %v3752_v50 = vpop.permute.xlu1 %3751 }
0x12ec   :  { %v3755_v5 = vsel %vm3754_vm7, %v8456_v49, %v3752_v50  ;;  %v6163_v49 = vld [vmem:[%s8487_s26 + $0x360] sm:$0xff]  ;;  %v3889_v50 = vld [vmem:[%s8487_s26 + $0x1c8] sm:$0xff]  ;;  %vm9447_vm7 = vcmask 121856  }
0x12ed   :  { %v8530_v1 = vadd.f32 %v3755_v5, %v3747_v7  ;;  %v3891_v5 = vld [vmem:[%s8487_s26 + $0x1d8] sm:$0xff] }
0x12ef   :  { %6709 = vmatpush3.msra.mxu0 %v8530_v1 }
0x12f0   :  { %6711 = vmatmul.mubr.msk.f32.vlgmr.msra.gmra.mxu0 %vm1249_vm13, %v3758_v8  ;;  %6713 = vmatprep.subr.mxu0 %v9413_v0  ;;  %v3888_v8 = vld [vmem:[%s8487_s26 + $0x1c0] sm:$0xff] }
0x12f1   :  { %6714 = vmatpush3.msra.mxu0 %v8530_v1  ;;  %6715 = vmatprep.mubr.msk.f32.mxu0 %vm6841_vm5, %v9413_v0 }
0x12f2   :  { %4036 = vmatprep.subr.mxu0 %v6180_v29  ;;  %v3890_v29 = vld [vmem:[%s8487_s26 + $0x1d0] sm:$0xff] }
0x12f4   :  { %6716 = vmatmul.mubr.msk.f32.vlgmr.msra.gmra.mxu0 %vm1249_vm13, %v6117_v2  ;;  %v3885_v2 = vld [vmem:[%s8487_s26 + $0x1a8] sm:$0xff] }
0x12f5   :  { %4037 = vmatpush1.msra.mxu0 %v6179_v60  ;;  %4100 = vmatprep.mubr.f32.mxu0 %v9413_v0  ;;  %v3887_v60 = vld [vmem:[%s8487_s26 + $0x1b8] sm:$0xff] }
0x12f6   :  { %4038 = vmatprep.subr.mxu0 %v6176_v48 }
0x12f7   :  { %4039 = vmatpush1.msra.mxu0 %v6175_v42  ;;  %v3884_v42 = vld [vmem:[%s8487_s26 + $0x1a0] sm:$0xff] }
0x12f8   :  { %4040 = vmatprep.subr.mxu0 %v6172_v61  ;;  %v3886_v61 = vld [vmem:[%s8487_s26 + $0x1b0] sm:$0xff] }
0x12f9   :  { %4041 = vmatpush1.msra.mxu0 %v6171_v9  ;;  %v3881_v9 = vld [vmem:[%s8487_s26 + $0x188] sm:$0xff] }
0x12fa   :  { %4042 = vmatprep.subr.mxu0 %v6168_v17  ;;  %v3883_v17 = vld [vmem:[%s8487_s26 + $0x198] sm:$0xff] }
0x12fb   :  { %4043 = vmatpush1.msra.mxu0 %v6167_v56  ;;  %v3880_v56 = vld [vmem:[%s8487_s26 + $0x180] sm:$0xff] }
0x12fc   :  { %4044 = vmatprep.subr.mxu0 %v6164_v31  ;;  %v3882_v31 = vld [vmem:[%s8487_s26 + $0x190] sm:$0xff] }
0x12fd   :  { %4045 = vmatpush1.msra.mxu0 %v6163_v49  ;;  %v3877_v49 = vld [vmem:[%s8487_s26 + $0x168] sm:$0xff] }
0x12fe   :  { %4046 = vmatprep.subr.mxu0 %v6160_v38  ;;  %v3879_v38 = vld [vmem:[%s8487_s26 + $0x178] sm:$0xff] }
0x12ff   :  { %4047 = vmatpush1.msra.mxu0 %v6159_v33  ;;  %v3876_v33 = vld [vmem:[%s8487_s26 + $0x160] sm:$0xff] }
0x1300   :  { %4048 = vmatprep.subr.mxu0 %v6156_v45  ;;  %v3878_v45 = vld [vmem:[%s8487_s26 + $0x170] sm:$0xff] }
0x1301   :  { %4049 = vmatpush1.msra.mxu0 %v6155_v16  ;;  %v3873_v16 = vld [vmem:[%s8487_s26 + $0x148] sm:$0xff] }
0x1302   :  { %4050 = vmatprep.subr.mxu0 %v6152_v41  ;;  %v3875_v41 = vld [vmem:[%s8487_s26 + $0x158] sm:$0xff] }
0x1303   :  { %4051 = vmatpush1.msra.mxu0 %v6151_v24  ;;  %v3872_v24 = vld [vmem:[%s8487_s26 + $0x140] sm:$0xff] }
0x1304   :  { %4052 = vmatprep.subr.mxu0 %v6148_v59  ;;  %v3874_v59 = vld [vmem:[%s8487_s26 + $0x150] sm:$0xff] }
0x1305   :  { %4053 = vmatpush1.msra.mxu0 %v6147_v30  ;;  %v3869_v30 = vld [vmem:[%s8487_s26 + $0x128] sm:$0xff] }
0x1306   :  { %4054 = vmatprep.subr.mxu0 %v6144_v12  ;;  %v3871_v12 = vld [vmem:[%s8487_s26 + $0x138] sm:$0xff] }
0x1307   :  { %4055 = vmatpush1.msra.mxu0 %v6143_v10  ;;  %v3868_v10 = vld [vmem:[%s8487_s26 + $0x120] sm:$0xff] }
0x1308   :  { %4056 = vmatprep.subr.mxu0 %v6140_v22  ;;  %v3870_v22 = vld [vmem:[%s8487_s26 + $0x130] sm:$0xff] }
0x1309   :  { %4057 = vmatpush1.msra.mxu0 %v6139_v14  ;;  %v3865_v14 = vld [vmem:[%s8487_s26 + $0x108] sm:$0xff] }
0x130a   :  { %4058 = vmatprep.subr.mxu0 %v6136_v21  ;;  %v3867_v21 = vld [vmem:[%s8487_s26 + $0x118] sm:$0xff] }
0x130b   :  { %4059 = vmatpush1.msra.mxu0 %v6135_v63  ;;  %v3864_v63 = vld [vmem:[%s8487_s26 + $0x100] sm:$0xff] }
0x130c   :  { %4060 = vmatprep.subr.mxu0 %v6132_v39  ;;  %v3866_v39 = vld [vmem:[%s8487_s26 + $0x110] sm:$0xff] }
0x130d   :  { %4061 = vmatpush1.msra.mxu0 %v6131_v52  ;;  %v3861_v52 = vld [vmem:[%s8487_s26 + $0xe8] sm:$0xff] }
0x130e   :  { %4062 = vmatprep.subr.mxu0 %v6128_v26  ;;  %v3863_v26 = vld [vmem:[%s8487_s26 + $0xf8] sm:$0xff] }
0x130f   :  { %4063 = vmatpush1.msra.mxu0 %v6127_v19  ;;  %v3860_v19 = vld [vmem:[%s8487_s26 + $0xe0] sm:$0xff] }
0x1310   :  { %4064 = vmatprep.subr.mxu0 %v6124_v13  ;;  %v3862_v13 = vld [vmem:[%s8487_s26 + $0xf0] sm:$0xff] }
0x1311   :  { %4065 = vmatpush1.msra.mxu0 %v6123_v4  ;;  %v3859_v4 = vld [vmem:[%s8487_s26 + $0xd8] sm:$0xff] }
0x1312   :  { %4066 = vmatprep.subr.mxu0 %v6120_v18  ;;  %v3858_v18 = vld [vmem:[%s8487_s26 + $0xd0] sm:$0xff] }
0x1313   :  { %4067 = vmatpush1.msra.mxu0 %v6119_v34  ;;  %v3855_v34 = vld [vmem:[%s8487_s26 + $0xb8] sm:$0xff] }
0x1314   :  { %4178 = vmatprep.subr.mxu0 %v3893_v55  ;;  %v3854_v55 = vld [vmem:[%s8487_s26 + $0xb0] sm:$0xff] }
0x13b0   :  { %v8580_v32 = vpop.f32.mrf.mxu0 }
0x13b2   :  { %v6712_v23 = vpop.f32.mrf.mxu0 }
0x13b3   :  { %v3851_v23 = vld [vmem:[%s8487_s26 + $0x98] sm:$0xff] }
0x13b4   :  { %v3967_v7 = vpop.f32.mrf.mxu0 }
0x13b5   :  { %4101 = vmatmul.mubr.f32.vlgmr.msra.gmra.mxu0 %v3967_v7  ;;  %4172 = vmatmul.mubr.f32.vlgmr.msra.gmra.mxu1 %v3967_v7  ;;  %v3845_v7 = vld [vmem:[%s8487_s26 + $0x68] sm:$0xff] }
0x13b6   :  { %4179 = vmatpush1.msra.mxu0 %v3892_v58  ;;  %4250 = vmatpush1.msra.mxu1 %v3894_v57  ;;  %v6717_v48 = vpop.f32.mrf.mxu0  ;;  %v3848_v58 = vld [vmem:[%s8487_s26 + $0x80] sm:$0xff]  ;;  %v3850_v57 = vld [vmem:[%s8487_s26 + $0x90] sm:$0xff] }
0x13b7   :  { %4180 = vmatprep.subr.mxu0 %v3889_v50  ;;  %4251 = vmatprep.subr.mxu1 %v3891_v5  ;;  %v3847_v50 = vld [vmem:[%s8487_s26 + $0x78] sm:$0xff]  ;;  %v3844_v5 = vld [vmem:[%s8487_s26 + $0x60] sm:$0xff]  ;;  %v3842_v48 = vld [vmem:[%s8487_s26 + $0x50] sm:$0xff] }
0x13b8   :  { %4181 = vmatpush1.msra.mxu0 %v3888_v8  ;;  %4252 = vmatpush1.msra.mxu1 %v3890_v29  ;;  %v3846_v8 = vld [vmem:[%s8487_s26 + $0x70] sm:$0xff]  ;;  %v3841_v29 = vld [vmem:[%s8487_s26 + $0x48] sm:$0xff] }
0x13b9   :  { %4182 = vmatprep.subr.mxu0 %v3885_v2  ;;  %4253 = vmatprep.subr.mxu1 %v3887_v60  ;;  %v3843_v2 = vld [vmem:[%s8487_s26 + $0x58] sm:$0xff]  ;;  %v3840_v60 = vld [vmem:[%s8487_s26 + $0x40] sm:$0xff] }
0x13ba   :  { %4183 = vmatpush1.msra.mxu0 %v3884_v42  ;;  %4254 = vmatpush1.msra.mxu1 %v3886_v61  ;;  %v3837_v42 = vld [vmem:[%s8487_s26 + $0x28] sm:$0xff]  ;;  %v3839_v61 = vld [vmem:[%s8487_s26 + $0x38] sm:$0xff] }
0x13bb   :  { %4184 = vmatprep.subr.mxu0 %v3881_v9  ;;  %4255 = vmatprep.subr.mxu1 %v3883_v17  ;;  %v3836_v9 = vld [vmem:[%s8487_s26 + $0x20] sm:$0xff]  ;;  %v3838_v17 = vld [vmem:[%s8487_s26 + $0x30] sm:$0xff] }
0x13bc   :  { %4185 = vmatpush1.msra.mxu0 %v3880_v56  ;;  %4256 = vmatpush1.msra.mxu1 %v3882_v31  ;;  %v3833_v56 = vld [vmem:[%s8487_s26 + $0x8] sm:$0xff]  ;;  %v3835_v31 = vld [vmem:[%s8487_s26 + $0x18] sm:$0xff] }
0x13bd   :  { %4186 = vmatprep.subr.mxu0 %v3877_v49  ;;  %4257 = vmatprep.subr.mxu1 %v3879_v38  ;;  %v3832_v49 = vld [vmem:[%s8487_s26] sm:$0xff]  ;;  %v3834_v38 = vld [vmem:[%s8487_s26 + $0x10] sm:$0xff] }
0x13be   :  { %4187 = vmatpush1.msra.mxu0 %v3876_v33  ;;  %4258 = vmatpush1.msra.mxu1 %v3878_v45  ;;  %v6248_v33 = vld [vmem:[%s8487_s26 + $0x5f8] sm:$0xff]  ;;  %v6246_v45 = vld [vmem:[%s8487_s26 + $0x5e8] sm:$0xff] }
0x13bf   :  { %4188 = vmatprep.subr.mxu0 %v3873_v16  ;;  %4259 = vmatprep.subr.mxu1 %v3875_v41  ;;  %v6183_v16 = vld [vmem:[%s8526_s1 + $0x10] sm:$0xff] }
0x13c0   :  { %4189 = vmatpush1.msra.mxu0 %v3872_v24  ;;  %4260 = vmatpush1.msra.mxu1 %v3874_v59  ;;  %v6247_v41 = vld [vmem:[%s8487_s26 + $0x5f0] sm:$0xff]  ;;  %v6242_v24 = vld [vmem:[%s8487_s26 + $0x5c8] sm:$0xff]  ;;  %v6244_v59 = vld [vmem:[%s8487_s26 + $0x5d8] sm:$0xff] }
0x13c1   :  { %4190 = vmatprep.subr.mxu0 %v3869_v30  ;;  %4261 = vmatprep.subr.mxu1 %v3871_v12  ;;  %v6241_v30 = vld [vmem:[%s8487_s26 + $0x5c0] sm:$0xff]  ;;  %v6243_v12 = vld [vmem:[%s8487_s26 + $0x5d0] sm:$0xff] }
0x13c2   :  { %4191 = vmatpush1.msra.mxu0 %v3868_v10  ;;  %4262 = vmatpush1.msra.mxu1 %v3870_v22  ;;  %v6238_v10 = vld [vmem:[%s8487_s26 + $0x5a8] sm:$0xff]  ;;  %v6240_v22 = vld [vmem:[%s8487_s26 + $0x5b8] sm:$0xff] }
0x13c3   :  { %4192 = vmatprep.subr.mxu0 %v3865_v14  ;;  %4263 = vmatprep.subr.mxu1 %v3867_v21  ;;  %v6237_v14 = vld [vmem:[%s8487_s26 + $0x5a0] sm:$0xff]  ;;  %v6239_v21 = vld [vmem:[%s8487_s26 + $0x5b0] sm:$0xff] }
0x13c4   :  { %4193 = vmatpush1.msra.mxu0 %v3864_v63  ;;  %4264 = vmatpush1.msra.mxu1 %v3866_v39  ;;  %v6234_v63 = vld [vmem:[%s8487_s26 + $0x588] sm:$0xff]  ;;  %v6236_v39 = vld [vmem:[%s8487_s26 + $0x598] sm:$0xff] }
0x13c5   :  { %4194 = vmatprep.subr.mxu0 %v3861_v52  ;;  %4265 = vmatprep.subr.mxu1 %v3863_v26  ;;  %v6233_v52 = vld [vmem:[%s8487_s26 + $0x580] sm:$0xff]  ;;  %v6235_v26 = vld [vmem:[%s8487_s26 + $0x590] sm:$0xff] }
0x13c6   :  { %4195 = vmatpush1.msra.mxu0 %v3860_v19  ;;  %4266 = vmatpush1.msra.mxu1 %v3862_v13  ;;  %v6230_v19 = vld [vmem:[%s8487_s26 + $0x568] sm:$0xff]  ;;  %v6232_v13 = vld [vmem:[%s8487_s26 + $0x578] sm:$0xff] }
0x13c7   :  { %4196 = vmatprep.subr.mxu0 %v3857_v35  ;;  %4267 = vmatprep.subr.mxu1 %v3859_v4  ;;  %v6229_v35 = vld [vmem:[%s8487_s26 + $0x560] sm:$0xff]  ;;  %v6231_v4 = vld [vmem:[%s8487_s26 + $0x570] sm:$0xff] }
0x13c8   :  { %4197 = vmatpush1.msra.mxu0 %v3856_v43  ;;  %4268 = vmatpush1.msra.mxu1 %v3858_v18  ;;  %v6226_v43 = vld [vmem:[%s8487_s26 + $0x548] sm:$0xff]  ;;  %v6228_v18 = vld [vmem:[%s8487_s26 + $0x558] sm:$0xff] }
0x13c9   :  { %4198 = vmatprep.subr.mxu0 %v3853_v62  ;;  %4269 = vmatprep.subr.mxu1 %v3855_v34  ;;  %v6225_v62 = vld [vmem:[%s8487_s26 + $0x540] sm:$0xff]  ;;  %v6227_v34 = vld [vmem:[%s8487_s26 + $0x550] sm:$0xff] }
0x13ca   :  { %4199 = vmatpush1.msra.mxu0 %v3852_v15  ;;  %4270 = vmatpush1.msra.mxu1 %v3854_v55  ;;  %v6222_v15 = vld [vmem:[%s8487_s26 + $0x528] sm:$0xff]  ;;  %v6224_v55 = vld [vmem:[%s8487_s26 + $0x538] sm:$0xff] }
0x13cb   :  { %4200 = vmatprep.subr.mxu0 %v3849_v28  ;;  %4271 = vmatprep.subr.mxu1 %v3851_v23  ;;  %v6221_v28 = vld [vmem:[%s8487_s26 + $0x520] sm:$0xff]  ;;  %v6223_v23 = vld [vmem:[%s8487_s26 + $0x530] sm:$0xff] }
0x13cc   :  { %4201 = vmatpush1.msra.mxu0 %v3848_v58  ;;  %4272 = vmatpush1.msra.mxu1 %v3850_v57  ;;  %v6218_v58 = vld [vmem:[%s8487_s26 + $0x508] sm:$0xff]  ;;  %v6220_v57 = vld [vmem:[%s8487_s26 + $0x518] sm:$0xff] }
0x13cd   :  { %4202 = vmatprep.subr.mxu0 %v3845_v7  ;;  %4273 = vmatprep.subr.mxu1 %v3847_v50  ;;  %v6217_v7 = vld [vmem:[%s8487_s26 + $0x500] sm:$0xff]  ;;  %v6219_v50 = vld [vmem:[%s8487_s26 + $0x510] sm:$0xff] }
0x13ce   :  { %4203 = vmatpush1.msra.mxu0 %v3844_v5  ;;  %4274 = vmatpush1.msra.mxu1 %v3846_v8  ;;  %v6214_v5 = vld [vmem:[%s8487_s26 + $0x4e8] sm:$0xff]  ;;  %v6216_v8 = vld [vmem:[%s8487_s26 + $0x4f8] sm:$0xff] }
0x13cf   :  { %4204 = vmatprep.subr.mxu0 %v3841_v29  ;;  %4275 = vmatprep.subr.mxu1 %v3843_v2  ;;  %v6213_v29 = vld [vmem:[%s8487_s26 + $0x4e0] sm:$0xff]  ;;  %v6215_v2 = vld [vmem:[%s8487_s26 + $0x4f0] sm:$0xff] }
0x13d0   :  { %4205 = vmatpush1.msra.mxu0 %v3840_v60  ;;  %4276 = vmatpush1.msra.mxu1 %v3842_v48  ;;  %v6210_v60 = vld [vmem:[%s8487_s26 + $0x4c8] sm:$0xff]  ;;  %v6212_v48 = vld [vmem:[%s8487_s26 + $0x4d8] sm:$0xff] }
0x13d1   :  { %4206 = vmatprep.subr.mxu0 %v3837_v42  ;;  %4277 = vmatprep.subr.mxu1 %v3839_v61  ;;  %v6209_v42 = vld [vmem:[%s8487_s26 + $0x4c0] sm:$0xff]  ;;  %v6211_v61 = vld [vmem:[%s8487_s26 + $0x4d0] sm:$0xff] }
0x13d2   :  { %4207 = vmatpush1.msra.mxu0 %v3836_v9  ;;  %4278 = vmatpush1.msra.mxu1 %v3838_v17  ;;  %v6206_v9 = vld [vmem:[%s8487_s26 + $0x4a8] sm:$0xff]  ;;  %v6208_v17 = vld [vmem:[%s8487_s26 + $0x4b8] sm:$0xff] }
0x13d3   :  { %4208 = vmatprep.subr.mxu0 %v3833_v56  ;;  %4279 = vmatprep.subr.mxu1 %v3835_v31  ;;  %v6205_v56 = vld [vmem:[%s8487_s26 + $0x4a0] sm:$0xff]  ;;  %v6207_v31 = vld [vmem:[%s8487_s26 + $0x4b0] sm:$0xff] }
0x13d4   :  { %4209 = vmatpush1.msra.mxu0 %v3832_v49  ;;  %4242 = vmatprep.mubr.f32.mxu0 %v9413_v0  ;;  %v6202_v49 = vld [vmem:[%s8487_s26 + $0x488] sm:$0xff] }
0x13d5   :  { %4280 = vmatpush1.msra.mxu1 %v3834_v38  ;;  %4313 = vmatprep.mubr.f32.mxu1 %v9413_v0  ;;  %v6204_v38 = vld [vmem:[%s8487_s26 + $0x498] sm:$0xff] }
0x13d6   :  { %4243 = vmatmul.mubr.f32.vlgmr.msra.gmra.mxu0 %v8580_v32  ;;  %4314 = vmatmul.mubr.f32.vlgmr.msra.gmra.mxu1 %v8580_v32  ;;  %v6245_v32 = vld [vmem:[%s8487_s26 + $0x5e0] sm:$0xff] }
0x13d7   :  { %6718 = vmatprep.subr.mxu0 %v9413_v0  ;;  %6720 = vmatprep.mubr.msk.f32.mxu0 %vm6841_vm5, %v9413_v0 }
0x13d8   :  { %6719 = vmatpush3.msra.mxu0 %v8530_v1  ;;  %4531 = vmatprep.subr.mxu1 %v6248_v33  ;;  %v6201_v33 = vld [vmem:[%s8487_s26 + $0x480] sm:$0xff] }
0x13d9   :  { %4460 = vmatprep.subr.mxu0 %v6246_v45  ;;  %4595 = vmatprep.mubr.f32.mxu1 %v9413_v0  ;;  %v6203_v45 = vld [vmem:[%s8487_s26 + $0x490] sm:$0xff] }
0x13da   :  { %6721 = vmatmul.mubr.msk.f32.vlgmr.msra.gmra.mxu0 %vm1249_vm13, %v6183_v16  ;;  %4532 = vmatpush1.msra.mxu1 %v6247_v41  ;;  %v6198_v16 = vld [vmem:[%s8487_s26 + $0x468] sm:$0xff]  ;;  %v6197_v41 = vld [vmem:[%s8487_s26 + $0x460] sm:$0xff] }
0x13db   :  { %4524 = vmatprep.mubr.f32.mxu0 %v9413_v0  ;;  %4461 = vmatpush1.msra.mxu0 %v6245_v32  ;;  %v6200_v32 = vld [vmem:[%s8487_s26 + $0x478] sm:$0xff] }
0x13dc   :  { %4462 = vmatprep.subr.mxu0 %v6242_v24  ;;  %4533 = vmatprep.subr.mxu1 %v6244_v59  ;;  %v6199_v24 = vld [vmem:[%s8487_s26 + $0x470] sm:$0xff]  ;;  %v6194_v59 = vld [vmem:[%s8487_s26 + $0x448] sm:$0xff] }
0x13dd   :  { %4463 = vmatpush1.msra.mxu0 %v6241_v30  ;;  %4534 = vmatpush1.msra.mxu1 %v6243_v12  ;;  %v6196_v30 = vld [vmem:[%s8487_s26 + $0x458] sm:$0xff]  ;;  %v6193_v12 = vld [vmem:[%s8487_s26 + $0x440] sm:$0xff] }
0x13de   :  { %4464 = vmatprep.subr.mxu0 %v6238_v10  ;;  %4535 = vmatprep.subr.mxu1 %v6240_v22  ;;  %v6195_v10 = vld [vmem:[%s8487_s26 + $0x450] sm:$0xff]  ;;  %v6190_v22 = vld [vmem:[%s8487_s26 + $0x428] sm:$0xff] }
0x13df   :  { %4465 = vmatpush1.msra.mxu0 %v6237_v14  ;;  %4536 = vmatpush1.msra.mxu1 %v6239_v21  ;;  %v6192_v14 = vld [vmem:[%s8487_s26 + $0x438] sm:$0xff]  ;;  %v6189_v21 = vld [vmem:[%s8487_s26 + $0x420] sm:$0xff] }
0x13e0   :  { %4466 = vmatprep.subr.mxu0 %v6234_v63  ;;  %4537 = vmatprep.subr.mxu1 %v6236_v39  ;;  %v6191_v63 = vld [vmem:[%s8487_s26 + $0x430] sm:$0xff]  ;;  %v6186_v39 = vld [vmem:[%s8487_s26 + $0x408] sm:$0xff] }
0x13e1   :  { %4467 = vmatpush1.msra.mxu0 %v6233_v52  ;;  %4538 = vmatpush1.msra.mxu1 %v6235_v26  ;;  %v6188_v52 = vld [vmem:[%s8487_s26 + $0x418] sm:$0xff]  ;;  %v6185_v26 = vld [vmem:[%s8487_s26 + $0x400] sm:$0xff] }
0x13e2   :  { %4468 = vmatprep.subr.mxu0 %v6230_v19  ;;  %4539 = vmatprep.subr.mxu1 %v6232_v13  ;;  %v6187_v19 = vld [vmem:[%s8487_s26 + $0x410] sm:$0xff]  ;;  %v6314_v13 = vld [vmem:[%s8487_s26 + $0x7f8] sm:$0xff] }
0x13e3   :  { %4469 = vmatpush1.msra.mxu0 %v6229_v35  ;;  %4540 = vmatpush1.msra.mxu1 %v6231_v4 }
0x13e4   :  { %4470 = vmatprep.subr.mxu0 %v6226_v43  ;;  %4541 = vmatprep.subr.mxu1 %v6228_v18 }
0x13e5   :  { %4471 = vmatpush1.msra.mxu0 %v6225_v62  ;;  %4542 = vmatpush1.msra.mxu1 %v6227_v34 }
0x13e6   :  { %4472 = vmatprep.subr.mxu0 %v6222_v15  ;;  %4543 = vmatprep.subr.mxu1 %v6224_v55  ;;  %v6313_v15 = vld [vmem:[%s8487_s26 + $0x7f0] sm:$0xff] }
0x13e7   :  { %4473 = vmatpush1.msra.mxu0 %v6221_v28  ;;  %4544 = vmatpush1.msra.mxu1 %v6223_v23  ;;  %v6310_v28 = vld [vmem:[%s8487_s26 + $0x7d8] sm:$0xff]  ;;  %v6309_v23 = vld [vmem:[%s8487_s26 + $0x7d0] sm:$0xff] }
0x13e8   :  { %4474 = vmatprep.subr.mxu0 %v6218_v58  ;;  %4545 = vmatprep.subr.mxu1 %v6220_v57  ;;  %v6312_v58 = vld [vmem:[%s8487_s26 + $0x7e8] sm:$0xff]  ;;  %v6306_v57 = vld [vmem:[%s8487_s26 + $0x7b8] sm:$0xff] }
0x13e9   :  { %4475 = vmatpush1.msra.mxu0 %v6217_v7  ;;  %4546 = vmatpush1.msra.mxu1 %v6219_v50  ;;  %v6249_v7 = vld [vmem:[%s8526_s1 + $0x18] sm:$0xff] }
0x13ea   :  { %4476 = vmatprep.subr.mxu0 %v6214_v5  ;;  %4547 = vmatprep.subr.mxu1 %v6216_v8  ;;  %v6311_v5 = vld [vmem:[%s8487_s26 + $0x7e0] sm:$0xff]  ;;  %v6305_v8 = vld [vmem:[%s8487_s26 + $0x7b0] sm:$0xff] }
0x13eb   :  { %4477 = vmatpush1.msra.mxu0 %v6213_v29  ;;  %4548 = vmatpush1.msra.mxu1 %v6215_v2  ;;  %v6308_v29 = vld [vmem:[%s8487_s26 + $0x7c8] sm:$0xff]  ;;  %v6302_v2 = vld [vmem:[%s8487_s26 + $0x798] sm:$0xff] }
0x13ec   :  { %4478 = vmatprep.subr.mxu0 %v6210_v60  ;;  %4549 = vmatprep.subr.mxu1 %v6212_v48  ;;  %v6301_v60 = vld [vmem:[%s8487_s26 + $0x790] sm:$0xff]  ;;  %v6304_v48 = vld [vmem:[%s8487_s26 + $0x7a8] sm:$0xff] }
0x13ed   :  { %4479 = vmatpush1.msra.mxu0 %v6209_v42  ;;  %4550 = vmatpush1.msra.mxu1 %v6211_v61  ;;  %v6298_v42 = vld [vmem:[%s8487_s26 + $0x778] sm:$0xff]  ;;  %v8744_v61 = vpop.permute.xlu0 %4894 }
0x13ee   :  { %4480 = vmatprep.subr.mxu0 %v6206_v9  ;;  %4551 = vmatprep.subr.mxu1 %v6208_v17  ;;  %v6303_v9 = vld [vmem:[%s8487_s26 + $0x7a0] sm:$0xff]  ;;  %v6297_v17 = vld [vmem:[%s8487_s26 + $0x770] sm:$0xff] }
0x13ef   :  { %4481 = vmatpush1.msra.mxu0 %v6205_v56  ;;  %4552 = vmatpush1.msra.mxu1 %v6207_v31  ;;  %v6300_v56 = vld [vmem:[%s8487_s26 + $0x788] sm:$0xff]  ;;  %v6294_v31 = vld [vmem:[%s8487_s26 + $0x758] sm:$0xff] }
0x13f0   :  { %4482 = vmatprep.subr.mxu0 %v6202_v49  ;;  %4553 = vmatprep.subr.mxu1 %v6204_v38  ;;  %v6299_v49 = vld [vmem:[%s8487_s26 + $0x780] sm:$0xff]  ;;  %v6293_v38 = vld [vmem:[%s8487_s26 + $0x750] sm:$0xff] }
0x13f1   :  { %4483 = vmatpush1.msra.mxu0 %v6201_v33  ;;  %4554 = vmatpush1.msra.mxu1 %v6203_v45  ;;  %v6296_v33 = vld [vmem:[%s8487_s26 + $0x768] sm:$0xff]  ;;  %v6290_v45 = vld [vmem:[%s8487_s26 + $0x738] sm:$0xff] }
0x13f2   :  { %4484 = vmatprep.subr.mxu0 %v6198_v16  ;;  %4555 = vmatprep.subr.mxu1 %v6200_v32  ;;  %v6295_v16 = vld [vmem:[%s8487_s26 + $0x760] sm:$0xff]  ;;  %v6289_v32 = vld [vmem:[%s8487_s26 + $0x730] sm:$0xff] }
0x13f3   :  { %4485 = vmatpush1.msra.mxu0 %v6197_v41  ;;  %4556 = vmatpush1.msra.mxu1 %v6199_v24  ;;  %v6292_v41 = vld [vmem:[%s8487_s26 + $0x748] sm:$0xff]  ;;  %v6286_v24 = vld [vmem:[%s8487_s26 + $0x718] sm:$0xff] }
0x13f4   :  { %4486 = vmatprep.subr.mxu0 %v6194_v59  ;;  %4557 = vmatprep.subr.mxu1 %v6196_v30  ;;  %v8758_v59 = vpop.permute.xlu0 %5204  ;;  %v6291_v30 = vld [vmem:[%s8487_s26 + $0x740] sm:$0xff] }
0x13f5   :  { %4487 = vmatpush1.msra.mxu0 %v6193_v12  ;;  %4558 = vmatpush1.msra.mxu1 %v6195_v10  ;;  %v6285_v12 = vld [vmem:[%s8487_s26 + $0x710] sm:$0xff]  ;;  %v6288_v10 = vld [vmem:[%s8487_s26 + $0x728] sm:$0xff] }
0x13f6   :  { %4488 = vmatprep.subr.mxu0 %v6190_v22  ;;  %4559 = vmatprep.subr.mxu1 %v6192_v14  ;;  %v6282_v22 = vld [vmem:[%s8487_s26 + $0x6f8] sm:$0xff]  ;;  %v6287_v14 = vld [vmem:[%s8487_s26 + $0x720] sm:$0xff] }
0x13f7   :  { %4489 = vmatpush1.msra.mxu0 %v6189_v21  ;;  %4560 = vmatpush1.msra.mxu1 %v6191_v63  ;;  %v6281_v21 = vld [vmem:[%s8487_s26 + $0x6f0] sm:$0xff]  ;;  %v6284_v63 = vld [vmem:[%s8487_s26 + $0x708] sm:$0xff] }
0x13f8   :  { %4490 = vmatprep.subr.mxu0 %v6186_v39  ;;  %4561 = vmatprep.subr.mxu1 %v6188_v52  ;;  %v6278_v39 = vld [vmem:[%s8487_s26 + $0x6d8] sm:$0xff]  ;;  %v6283_v52 = vld [vmem:[%s8487_s26 + $0x700] sm:$0xff] }
0x13f9   :  { %4491 = vmatpush1.msra.mxu0 %v6185_v26  ;;  %4562 = vmatpush1.msra.mxu1 %v6187_v19  ;;  %v6277_v26 = vld [vmem:[%s8487_s26 + $0x6d0] sm:$0xff]  ;;  %v6280_v19 = vld [vmem:[%s8487_s26 + $0x6e8] sm:$0xff] }
0x13fa   :  { %6723 = vmatprep.subr.mxu0 %v9413_v0  ;;  %4817 = vmatprep.subr.mxu1 %v6314_v13  ;;  %v6274_v13 = vld [vmem:[%s8487_s26 + $0x6b8] sm:$0xff] }
0x1475   :  { %v4102_v35 = vpop.f32.mrf.mxu0 }
0x1477   :  { %v4104_v4 = vpop.f32.mrf.mxu0 }
0x1496   :  { %v4244_v43 = vpop.f32.mrf.mxu0 }
0x1497   :  { %v8722_v18 = vadd.f32 %v4244_v43, %v4102_v35  ;;  %v8772_v35 = vpop.permute.xlu0 %5182  ;;  %v6273_v43 = vld [vmem:[%s8487_s26 + $0x6b0] sm:$0xff] }
0x1498   :  { %v4246_v62 = vpop.f32.mrf.mxu0 }
0x1499   :  { %v8724_v34 = vadd.f32 %v4246_v62, %v4104_v4  ;;  %v6279_v4 = vld [vmem:[%s8487_s26 + $0x6e0] sm:$0xff]  ;;  %v6276_v62 = vld [vmem:[%s8487_s26 + $0x6c8] sm:$0xff] }
0x149a   :  { %v4391_v55 = vpop.f32.mrf.mxu0 }
0x149b   :  { %4525 = vmatmul.mubr.f32.vlgmr.msra.gmra.mxu0 %v4391_v55  ;;  %4596 = vmatmul.mubr.f32.vlgmr.msra.gmra.mxu1 %v4391_v55  ;;  %v6275_v55 = vld [vmem:[%s8487_s26 + $0x6c0] sm:$0xff] }
0x149c   :  { %6724 = vmatpush3.msra.mxu0 %v8530_v1  ;;  %4818 = vmatpush1.msra.mxu1 %v6313_v15  ;;  %v6722_v50 = vpop.f32.mrf.mxu0  ;;  %v6307_v1 = vld [vmem:[%s8487_s26 + $0x7c0] sm:$0xff]  ;;  %v6270_v15 = vld [vmem:[%s8487_s26 + $0x698] sm:$0xff] }
0x149d   :  { %4819 = vmatprep.subr.mxu1 %v6310_v28  ;;  %6725 = vmatprep.mubr.msk.f32.mxu0 %vm6841_vm5, %v9413_v0  ;;  %v6269_v28 = vld [vmem:[%s8487_s26 + $0x690] sm:$0xff]  ;;  %v6268_v50 = vld [vmem:[%s8487_s26 + $0x688] sm:$0xff]  ;;  %vm9438_vm5 = vmmov %vm9435_vm1 }
0x149e   :  { %4820 = vmatpush1.msra.mxu1 %v6309_v23  ;;  %4746 = vmatprep.subr.mxu0 %v6312_v58  ;;  %v6272_v23 = vld [vmem:[%s8487_s26 + $0x6a8] sm:$0xff]  ;;  %v6266_v58 = vld [vmem:[%s8487_s26 + $0x678] sm:$0xff] }
0x149f   :  { %4821 = vmatprep.subr.mxu1 %v6306_v57  ;;  %6726 = vmatmul.mubr.msk.f32.vlgmr.msra.gmra.mxu0 %vm1249_vm13, %v6249_v7  ;;  %v6271_v57 = vld [vmem:[%s8487_s26 + $0x6a0] sm:$0xff]  ;;  %v6265_v7 = vld [vmem:[%s8487_s26 + $0x670] sm:$0xff] }
0x14a0   :  { %4747 = vmatpush1.msra.mxu0 %v6311_v5  ;;  %4822 = vmatpush1.msra.mxu1 %v6305_v8  ;;  %v6262_v5 = vld [vmem:[%s8487_s26 + $0x658] sm:$0xff]  ;;  %v8786_v8 = vpop.permute.xlu0 %5206 }
0x14a1   :  { %4748 = vmatprep.subr.mxu0 %v6308_v29  ;;  %4823 = vmatprep.subr.mxu1 %v6302_v2  ;;  %v6267_v29 = vld [vmem:[%s8487_s26 + $0x680] sm:$0xff]  ;;  %v6261_v2 = vld [vmem:[%s8487_s26 + $0x650] sm:$0xff] }
0x14a2   :  { %4749 = vmatpush1.msra.mxu0 %v6307_v1  ;;  %4824 = vmatpush1.msra.mxu1 %v6301_v60  ;;  %v6264_v1 = vld [vmem:[%s8487_s26 + $0x668] sm:$0xff]  ;;  %v6258_v60 = vld [vmem:[%s8487_s26 + $0x638] sm:$0xff] }
0x14a3   :  { %4750 = vmatprep.subr.mxu0 %v6304_v48  ;;  %4825 = vmatprep.subr.mxu1 %v6298_v42  ;;  %v6263_v48 = vld [vmem:[%s8487_s26 + $0x660] sm:$0xff]  ;;  %v6257_v42 = vld [vmem:[%s8487_s26 + $0x630] sm:$0xff] }
0x14a4   :  { %4751 = vmatpush1.msra.mxu0 %v6303_v9  ;;  %4826 = vmatpush1.msra.mxu1 %v6297_v17  ;;  %v5215_v9 = vsel %vm9427_vm8, %v8786_v8, 0.0  ;;  %v6260_v17 = vld [vmem:[%s8487_s26 + $0x648] sm:$0xff]  ;;  %vm9451_vm8 = vmmov %vm9447_vm7 }
0x14a5   :  { %4752 = vmatprep.subr.mxu0 %v6300_v56  ;;  %4827 = vmatprep.subr.mxu1 %v6294_v31  ;;  %v6254_v56 = vld [vmem:[%s8487_s26 + $0x618] sm:$0xff]  ;;  %v5203_v31 = vpop.permute.xlu1 %5202 }
0x14a6   :  { %4753 = vmatpush1.msra.mxu0 %v6299_v49  ;;  %4828 = vmatpush1.msra.mxu1 %v6293_v38  ;;  %v6259_v49 = vld [vmem:[%s8487_s26 + $0x640] sm:$0xff]  ;;  %v6253_v38 = vld [vmem:[%s8487_s26 + $0x610] sm:$0xff] }
0x14a7   :  { %4754 = vmatprep.subr.mxu0 %v6296_v33  ;;  %4829 = vmatprep.subr.mxu1 %v6290_v45  ;;  %v6256_v33 = vld [vmem:[%s8487_s26 + $0x628] sm:$0xff]  ;;  %v8802_v45 = vld [vmem:[%s6944_s21 + $0x38] ss:$0 sm:$0xff] }
0x14a8   :  { %4755 = vmatpush1.msra.mxu0 %v6295_v16  ;;  %4830 = vmatpush1.msra.mxu1 %v6289_v32  ;;  %v5219_v16 = vmul.f32 %v8802_v45, %v5215_v9  ;;  %v6255_v32 = vld [vmem:[%s8487_s26 + $0x620] sm:$0xff] }
0x14a9   :  { %4756 = vmatprep.subr.mxu0 %v6292_v41  ;;  %4831 = vmatprep.subr.mxu1 %v6286_v24  ;;  %v5209_v41 = vsel %vm9428_vm9, %v5203_v31, %v8758_v59  ;;  %v6252_v24 = vld [vmem:[%s8487_s26 + $0x608] sm:$0xff]  ;;  %vm9452_vm9 = vmmov %vm9447_vm7 }
0x14aa   :  { %4757 = vmatpush1.msra.mxu0 %v6291_v30  ;;  %4832 = vmatpush1.msra.mxu1 %v6285_v12  ;;  %v6251_v30 = vld [vmem:[%s8487_s26 + $0x600] sm:$0xff]  ;;  %v8812_v12 = vld [vmem:[%s6944_s21 + $0x28] ss:$0 sm:$0xff] }
0x14ab   :  { %4758 = vmatprep.subr.mxu0 %v6288_v10  ;;  %4833 = vmatprep.subr.mxu1 %v6282_v22  ;;  %v5217_v10 = vmul.f32 %v8812_v12, %v5209_v41  ;;  %v5201_v22 = vpop.permute.xlu1 %5200 }
0x14ac   :  { %4759 = vmatpush1.msra.mxu0 %v6287_v14  ;;  %4834 = vmatpush1.msra.mxu1 %v6281_v21 }
0x14ad   :  { %4760 = vmatprep.subr.mxu0 %v6284_v63  ;;  %4835 = vmatprep.subr.mxu1 %v6278_v39  ;;  %v5163_v63 = vpop.permute.xlu0 %5162 }
0x14ae   :  { %4761 = vmatpush1.msra.mxu0 %v6283_v52  ;;  %4836 = vmatpush1.msra.mxu1 %v6277_v26 }
0x14af   :  { %4762 = vmatprep.subr.mxu0 %v6280_v19  ;;  %4837 = vmatprep.subr.mxu1 %v6274_v13  ;;  %v5185_v14 = vpop.permute.xlu1 %5184 }
0x14b0   :  { %4763 = vmatpush1.msra.mxu0 %v6279_v4  ;;  %4838 = vmatpush1.msra.mxu1 %v6273_v43 }
0x14b1   :  { %4764 = vmatprep.subr.mxu0 %v6276_v62  ;;  %4839 = vmatprep.subr.mxu1 %v6270_v15  ;;  %v5187_v52 = vpop.permute.xlu0 %5186 }
0x14b2   :  { %4765 = vmatpush1.msra.mxu0 %v6275_v55  ;;  %4840 = vmatpush1.msra.mxu1 %v6269_v28 }
0x14b3   :  { %4766 = vmatprep.subr.mxu0 %v6272_v23  ;;  %4841 = vmatprep.subr.mxu1 %v6266_v58  ;;  %v5181_v21 = vpop.permute.xlu1 %5180 }
0x14b4   :  { %4767 = vmatpush1.msra.mxu0 %v6271_v57  ;;  %4842 = vmatpush1.msra.mxu1 %v6265_v7  ;;  %v5210_v7 = vsel %vm9429_vm10, %v8758_v59, %v8786_v8  ;;  %v5190_v8 = vsel %vm9433_vm15, %v5185_v14, %v5187_v52  ;;  %vm9455_vm10 = vmmov %vm9447_vm7 }
0x14b5   :  { %4768 = vmatprep.subr.mxu0 %v6268_v50  ;;  %4843 = vmatprep.subr.mxu1 %v6262_v5  ;;  %v5167_v19 = vpop.permute.xlu0 %5166  ;;  %v5195_v5 = vsel %vm9430_vm11, %v5187_v52, 0.0  ;;  %vm9460_vm11 = vcmask 138240  }
0x14b6   :  { %4769 = vmatpush1.msra.mxu0 %v6267_v29  ;;  %4844 = vmatpush1.msra.mxu1 %v6261_v2  ;;  %v5208_v29 = vsel %vm9431_vm12, %v5201_v22, %v5203_v31  ;;  %v5175_v31 = vsel %vm9435_vm1, %v5167_v19, 0.0  ;;  %v5152_v22 = vmul.f32 %v7393_v3, %v7058_v20  ;;  %v5154_v3 = vmul.f32 %v7385_v44, %v7075_v25  ;;  %vm9461_vm12 = vmmov %vm9460_vm11 }
0x14b7   :  { %4770 = vmatprep.subr.mxu0 %v6264_v1  ;;  %4845 = vmatprep.subr.mxu1 %v6258_v60  ;;  %v5165_v39 = vpop.permute.xlu1 %5164  ;;  %v5189_v60 = vsel %vm9432_vm14, %v8772_v35, %v5185_v14  ;;  %v5179_v14 = vmul.f32 %v5175_v31, %v7022_v53  ;;  %v9446_v31 = vld [vmem:[#allocation36_spill] sm:$0xff]  ;;  %vm9463_vm14 = vmmov %vm9460_vm11 }
0x14b8   :  { %4771 = vmatpush1.msra.mxu0 %v6263_v48  ;;  %4846 = vmatpush1.msra.mxu1 %v6257_v42  ;;  %v8845_v42 = vld [vmem:[%s6944_s21 + $0x30] ss:$0 sm:$0xff]  ;;  %v5170_v41 = vsel %vm9437_vm3, %v5165_v39, %v5167_v19  ;;  %vm9465_vm15 = vmmov %vm9460_vm11 }
0x14b9   :  { %4772 = vmatprep.subr.mxu0 %v6260_v17  ;;  %4847 = vmatprep.subr.mxu1 %v6254_v56  ;;  %v8816_v4 = vpop.permute.xlu0 %5134  ;;  %v5218_v9 = vmul.f32 %v8845_v42, %v5210_v7  ;;  %v5188_v17 = vsel %vm9434_vm0, %v5181_v21, %v8772_v35  ;;  %vm9472_vm0 = vcmask 588800  }
0x14ba   :  { %4773 = vmatpush1.msra.mxu0 %v6259_v49  ;;  %4848 = vmatpush1.msra.mxu1 %v6253_v38  ;;  %v8859_v49 = vld [vmem:[%s6944_s21 + $0x20] ss:$0 sm:$0xff]  ;;  %s6848_s21 = smov 26   ;;  %vm9473_vm1 = vmmov %vm9472_vm0 }
0x14bb   :  { %4774 = vmatprep.subr.mxu0 %v6256_v33  ;;  %5308 = vmatprep.subr.mxu1 %v5219_v16  ;;  %v5161_v26 = vpop.permute.xlu1 %5160  ;;  %v5216_v38 = vmul.f32 %v8859_v49, %v5208_v29  ;;  %v5169_v33 = vsel %vm9436_vm2, %v5163_v63, %v5165_v39  ;;  %v5178_v39 = vmul.f32 %v5170_v41, %v7026_v54  ;;  %v9441_v29 = vld [vmem:[#allocation10_spill] sm:$0xff]  ;;  %v9449_v41 = vld [vmem:[#allocation12_spill] sm:$0xff]  ;;  %s6038_s16 = sld [smem:[%s9303_s0 + %s6848_s21]]   ;;  %vm9474_vm2 = vcmask 908288  }
0x14bc   :  { %4775 = vmatpush1.msra.mxu0 %v6255_v32  ;;  %4810 = vmatprep.mubr.f32.mxu0 %v9413_v0  ;;  %v5197_v32 = vmul.f32 %v5189_v60, %v6976_v27  ;;  %v5168_v35 = vsel %vm9438_vm5, %v5161_v26, %v5163_v63  ;;  %v5177_v21 = vmul.f32 %v5169_v33, %v7012_v47  ;;  %v9442_v60 = vld [vmem:[#allocation35_spill] sm:$0xff]  ;;  %vm9475_vm3 = vmmov %vm9474_vm2  ;;  %vm9476_vm5 = vcmask 916480  }
0x14bd   :  { %4776 = vmatprep.subr.mxu0 %v6252_v24  ;;  %4881 = vmatprep.mubr.f32.mxu1 %v9413_v0  ;;  %v8820_v62 = vpop.permute.xlu0 %5114  ;;  %v5153_v63 = vmul.f32 %v7378_v46, %v7046_v11  ;;  %v5176_v26 = vmul.f32 %v5168_v35, %v7017_v51  ;;  %v9448_v33 = vld [vmem:[#allocation15_spill] sm:$0xff]  ;;  %v5155_v35 = vmul.f32 %v7389_v40, %v9449_v41 }
0x14be   :  { %4777 = vmatpush1.msra.mxu0 %v6251_v30  ;;  %v5196_v30 = vmul.f32 %v5188_v17, %v6994_v36 }
0x14bf   :  { %5237 = vmatprep.subr.mxu0 %v5217_v10  ;;  %v5133_v13 = vpop.permute.xlu1 %5132 }
0x14c0   :  { %v5147_v19 = vsel %vm303_vm4, 0.0, %v5133_v13 }
0x14c1   :  { %v5139_v55 = vpop.permute.xlu0 %5138 }
0x14c3   :  { %v8818_v43 = vpop.permute.xlu1 %5112 }
0x14c4   :  { %v5127_v44 = vsel %vm9447_vm7, 0.0, %v8818_v43  ;;  %vm9477_vm7 = vmmov %vm9476_vm5 }
0x14c5   :  { %v8826_v23 = vpop.permute.xlu0 %5094 }
0x14c7   :  { %v8822_v15 = vpop.permute.xlu1 %5136 }
0x14c9   :  { %v8830_v57 = vpop.permute.xlu0 %5118 }
0x14cb   :  { %v8824_v28 = vpop.permute.xlu1 %5092 }
0x14cd   :  { %v8848_v59 = vpop.permute.xlu0 %5074 }
0x14cf   :  { %v8828_v58 = vpop.permute.xlu1 %5116 }
0x14d0   :  { %v5121_v40 = vsel %vm9455_vm10, %v8820_v62, %v8828_v58  ;;  %vm9480_vm10 = vcmask 1039360  }
0x14d1   :  { %v5099_v7 = vpop.permute.xlu0 %5098 }
0x14d3   :  { %v8837_v2 = vpop.permute.xlu1 %5072 }
0x14d7   :  { %v5097_v52 = vpop.permute.xlu1 %5096 }
0x155b   :  { %v4526_v50 = vpop.f32.mrf.mxu0 }
0x155c   :  { %v8840_v1 = vadd.f32 %v4526_v50, %v8722_v18  ;;  %v5199_v18 = vmul.f32 %v5195_v5, %v6998_v37  ;;  %v5140_v50 = vsel %vm303_vm4, %v5133_v13, %v8816_v4  ;;  %v9440_v5 = vld [vmem:[#allocation33_spill] sm:$0xff]  ;;  %v5142_v13 = vsel %vm303_vm4, %v8822_v15, %v5139_v55 }
0x155d   :  { %v4528_v48 = vpop.f32.mrf.mxu0  ;;  %v5157_v46 = vmul.f32 %v9440_v5, %v7042_v6  ;;  %v5122_v55 = vsel %vm9452_vm9, %v8828_v58, %v8830_v57  ;;  %v5102_v57 = vsel %vm229_vm6, %v5097_v52, %v5099_v7  ;;  %v9457_v5 = vld [vmem:[#allocation19_spill] sm:$0xff]  ;;  %v9462_v7 = vld [vmem:[#allocation24_spill] sm:$0xff] }
0x155e   :  { %v8854_v56 = vadd.f32 %v4528_v48, %v8724_v34  ;;  %v9439_v34 = vld [vmem:[#allocation5_spill] sm:$0xff]  ;;  %v5159_v48 = vmul.f32 %v9442_v60, %v9441_v29  ;;  %v5107_v60 = vsel %vm229_vm6, 0.0, %v8824_v28 }
0x155f   :  { %v4677_v16 = vpop.f32.mrf.mxu0  ;;  %v5198_v24 = vmul.f32 %v5190_v8, %v9439_v34  ;;  %v9444_v8 = vld [vmem:[#allocation34_spill] sm:$0xff] }
0x1560   :  { %4811 = vmatmul.mubr.f32.vlgmr.msra.gmra.mxu0 %v4677_v16  ;;  %4882 = vmatmul.mubr.f32.vlgmr.msra.gmra.mxu1 %v4677_v16  ;;  %v5148_v16 = vmul.f32 %v5147_v19, %v9448_v33 }
0x1561   :  { %5238 = vmatpush1.msra.mxu0 %v5216_v38  ;;  %5309 = vmatpush1.msra.mxu1 %v5218_v9  ;;  %v6727_v10 = vpop.f32.mrf.mxu0  ;;  %v9443_v9 = vld [vmem:[#allocation11_spill] sm:$0xff] }
0x1562   :  { %5239 = vmatprep.subr.mxu0 %v5197_v32  ;;  %5310 = vmatprep.subr.mxu1 %v5199_v18  ;;  %v5158_v17 = vmul.f32 %v9444_v8, %v9443_v9  ;;  %v9445_v18 = vld [vmem:[#allocation9_spill] sm:$0xff]  ;;  %v5141_v32 = vsel %vm303_vm4, %v8816_v4, %v8822_v15  ;;  %v5120_v10 = vsel %vm9451_vm8, %v8818_v43, %v8820_v62  ;;  %v9454_v4 = vld [vmem:[#allocation16_spill] sm:$0xff]  ;;  %vm9478_vm8 = vcmask 924672  }
0x1563   :  { %5240 = vmatpush1.msra.mxu0 %v5196_v30  ;;  %5311 = vmatpush1.msra.mxu1 %v5198_v24  ;;  %v5156_v38 = vmul.f32 %v9446_v31, %v9445_v18  ;;  %v9450_v24 = vld [vmem:[#allocation14_spill] sm:$0xff]  ;;  %v5151_v15 = vmul.f32 %v5142_v13, %v9454_v4  ;;  %v5100_v43 = vsel %vm229_vm6, %v8824_v28, %v8826_v23  ;;  %v9458_v62 = vld [vmem:[#allocation21_spill] sm:$0xff]  ;;  %v5087_v28 = vsel %vm9463_vm14, 0.0, %v8837_v2  ;;  %v9467_v13 = vld [vmem:[#allocation27_spill] sm:$0xff] }
0x1564   :  { %5241 = vmatprep.subr.mxu0 %v5177_v21  ;;  %5312 = vmatprep.subr.mxu1 %v5179_v14  ;;  %v5149_v30 = vmul.f32 %v5140_v50, %v9450_v24  ;;  %v9453_v14 = vld [vmem:[#allocation20_spill] sm:$0xff]  ;;  %v5079_v50 = vpop.permute.xlu0 %5078  ;;  %v5131_v58 = vmul.f32 %v5122_v55, %v9458_v62  ;;  %v9464_v31 = vld [vmem:[#allocation26_spill] sm:$0xff]  ;;  %vm9479_vm9 = vmmov %vm9478_vm8 }
0x1565   :  { %5242 = vmatpush1.msra.mxu0 %v5176_v26  ;;  %5313 = vmatpush1.msra.mxu1 %v5178_v39  ;;  %v5128_v21 = vmul.f32 %v5127_v44, %v9453_v14  ;;  %v5077_v39 = vpop.permute.xlu1 %5076  ;;  %v9456_v26 = vld [vmem:[#allocation17_spill] sm:$0xff]  ;;  %vm9483_vm14 = vmmov %vm9474_vm2 }
0x1566   :  { %5243 = vmatprep.subr.mxu0 %v5157_v46  ;;  %5314 = vmatprep.subr.mxu1 %v5159_v48  ;;  %v5150_v19 = vmul.f32 %v5141_v32, %v9456_v26  ;;  %v5129_v46 = vmul.f32 %v5120_v10, %v9457_v5  ;;  %v9459_v48 = vld [vmem:[#allocation22_spill] sm:$0xff] }
0x1567   :  { %5244 = vmatpush1.msra.mxu0 %v5156_v38  ;;  %5315 = vmatpush1.msra.mxu1 %v5158_v17  ;;  %v5130_v8 = vmul.f32 %v5121_v40, %v9459_v48  ;;  %v5109_v17 = vmul.f32 %v5100_v43, %v9462_v7  ;;  %v5111_v38 = vmul.f32 %v5102_v57, %v9464_v31 }
0x1568   :  { %5245 = vmatprep.subr.mxu0 %v5153_v63  ;;  %5316 = vmatprep.subr.mxu1 %v5155_v35  ;;  %v5101_v63 = vsel %vm229_vm6, %v8826_v23, %v5097_v52  ;;  %v5081_v23 = vsel %vm9465_vm15, %v8848_v59, %v5077_v39  ;;  %v9466_v52 = vld [vmem:[#allocation25_spill] sm:$0xff]  ;;  %vm9484_vm15 = vmmov %vm9474_vm2 }
0x1569   :  { %5246 = vmatpush1.msra.mxu0 %v5152_v22  ;;  %5317 = vmatpush1.msra.mxu1 %v5154_v3  ;;  %v5080_v22 = vsel %vm9460_vm11, %v8837_v2, %v8848_v59  ;;  %v5082_v3 = vsel %vm9461_vm12, %v5077_v39, %v5079_v50  ;;  %v5108_v44 = vmul.f32 %v5107_v60, %v9466_v52  ;;  %v9470_v2 = vld [vmem:[#allocation30_spill] sm:$0xff]  ;;  %v4173_v59 = vpop.f32.mrf.mxu1  ;;  %vm9481_vm11 = vmmov %vm9480_vm10 }
0x156a   :  { %5247 = vmatprep.subr.mxu0 %v5149_v30  ;;  %5318 = vmatprep.subr.mxu1 %v5151_v15  ;;  %v5110_v32 = vmul.f32 %v5101_v63, %v9467_v13  ;;  %v9469_v30 = vld [vmem:[#allocation31_spill] sm:$0xff]  ;;  %v5088_v55 = vmul.f32 %v5087_v28, %v9470_v2  ;;  %v9471_v15 = vld [vmem:[#allocation32_spill] sm:$0xff]  ;;  %vm9482_vm12 = vmmov %vm9476_vm5 }
0x156b   :  { %5248 = vmatpush1.msra.mxu0 %v5148_v16  ;;  %5319 = vmatpush1.msra.mxu1 %v5150_v19  ;;  %v9468_v16 = vld [vmem:[#allocation29_spill] sm:$0xff]  ;;  %v5091_v10 = vmul.f32 %v5082_v3, %v9469_v30  ;;  %v5090_v40 = vmul.f32 %v5081_v23, %v9471_v15 }
0x156c   :  { %5249 = vmatprep.subr.mxu0 %v5129_v46  ;;  %5320 = vmatprep.subr.mxu1 %v5131_v58  ;;  %v5089_v35 = vmul.f32 %v5080_v22, %v9468_v16 }
0x156d   :  { %5250 = vmatpush1.msra.mxu0 %v5128_v21  ;;  %5321 = vmatpush1.msra.mxu1 %v5130_v8  ;;  %v4175_v21 = vpop.f32.mrf.mxu1 }
0x156e   :  { %5251 = vmatprep.subr.mxu0 %v5109_v17  ;;  %5322 = vmatprep.subr.mxu1 %v5111_v38 }
0x156f   :  { %5252 = vmatpush1.msra.mxu0 %v5108_v44  ;;  %5323 = vmatpush1.msra.mxu1 %v5110_v32  ;;  %v4315_v39 = vpop.f32.mrf.mxu1  ;;  %v4902_v44 = vld [vmem:[%s6038_s16] sm:$0xff] }
0x1570   :  { %5253 = vmatprep.subr.mxu0 %v5089_v35  ;;  %5324 = vmatprep.subr.mxu1 %v5091_v10  ;;  %v4316_v57 = vadd.f32 %v4315_v39, %v4173_v59 }
0x1571   :  { %5254 = vmatpush1.msra.mxu0 %v5088_v55  ;;  %5325 = vmatpush1.msra.mxu1 %v5090_v40  ;;  %v4317_v19 = vpop.f32.mrf.mxu1 }
0x1572   :  { %5358 = vmatprep.mubr.f32.mxu1 %v9413_v0  ;;  %5287 = vmatprep.mubr.f32.mxu0 %v9413_v0  ;;  %v4318_v3 = vadd.f32 %v4317_v19, %v4175_v21 }
0x1573   :  { %v4597_v43 = vpop.f32.mrf.mxu1  ;;  %6316 = vmatmul.mubr.msk.f32.vlgmr.msra.gmra.mxu1 %vm9472_vm0, %v4902_v44  ;;  %6315 = vmatmul.mubr.msk.f32.vlgmr.msra.gmra.mxu0 %vm9473_vm1, %v4902_v44  ;;  %vm9485_vm0 = vmmov %vm9476_vm5 }
0x1574   :  { %v4604_v46 = vadd.f32 %v4597_v43, %v4316_v57  ;;  %5432 = vmatprep.mubr.f32.mxu0 %v9413_v0  ;;  %5503 = vmatprep.mubr.f32.mxu1 %v9413_v0  ;;  %vm9486_vm1 = vmmov %vm9478_vm8 }
0x1575   :  { %v4599_v50 = vpop.f32.mrf.mxu1 }
0x1576   :  { %v4605_v32 = vadd.f32 %v4599_v50, %v4318_v3 }
0x1620   :  { %v4812_v60 = vpop.f32.mrf.mxu0  ;;  %v4883_v58 = vpop.f32.mrf.mxu1 }
0x1621   :  { %v4888_v63 = vadd.f32 %v4812_v60, %v8840_v1  ;;  %v4890_v8 = vadd.f32 %v4883_v58, %v4604_v46 }
0x1622   :  { %v4814_v22 = vpop.f32.mrf.mxu0  ;;  %v4885_v23 = vpop.f32.mrf.mxu1 }
0x1623   :  { %v8946_v17 = vadd.f32 %v8744_v61, %v4888_v63  ;;  %v8949_v28 = vadd.f32 %v8744_v61, %v4890_v8  ;;  %v4889_v38 = vadd.f32 %v4814_v22, %v8854_v56  ;;  %v4891_v35 = vadd.f32 %v4885_v23, %v4605_v32 }
0x1625   :  { %5056 = vrot.lane.b32.xlu0 %v8949_v28, %s6803_s6  ;;  %5052 = vrot.lane.b32.xlu1 %v8946_v17, %s6803_s6  ;;  %v8959_v1 = vadd.f32 %v8744_v61, %v4889_v38  ;;  %v8968_v56 = vadd.f32 %v8744_v61, %v4891_v35  ;;  %v4903_v61 = vld [vmem:[%s6039_s2] sm:$0xff] }
0x1629   :  { %5034 = vrot.lane.b32.xlu0 %v8959_v1, %s6804_s7  ;;  %5036 = vrot.lane.b32.xlu1 %v8949_v28, %s6804_s7 }
0x162d   :  { %5058 = vrot.lane.b32.xlu0 %v8968_v56, %s6803_s6  ;;  %5032 = vrot.lane.b32.xlu1 %v8946_v17, %s6804_s7 }
0x1631   :  { %5014 = vrot.lane.b32.xlu0 %v8959_v1, %s6805_s8  ;;  %5016 = vrot.lane.b32.xlu1 %v8949_v28, %s6805_s8 }
0x1635   :  { %5038 = vrot.lane.b32.xlu0 %v8968_v56, %s6804_s7  ;;  %5012 = vrot.lane.b32.xlu1 %v8946_v17, %s6805_s8 }
0x1639   :  { %4994 = vrot.lane.b32.xlu0 %v8959_v1, %s6806_s9  ;;  %4996 = vrot.lane.b32.xlu1 %v8949_v28, %s6806_s9 }
0x163d   :  { %5018 = vrot.lane.b32.xlu0 %v8968_v56, %s6805_s8  ;;  %4992 = vrot.lane.b32.xlu1 %v8946_v17, %s6806_s9 }
0x1641   :  { %4998 = vrot.lane.b32.xlu0 %v8968_v56, %s6806_s9  ;;  %4968 = vrot.lane.b32.xlu1 %v8946_v17, %s6807_s10 }
0x1645   :  { %4970 = vrot.lane.b32.xlu0 %v8959_v1, %s6807_s10  ;;  %4948 = vrot.lane.b32.xlu1 %v8946_v17, %s6808_s11 }
0x1649   :  { %4950 = vrot.lane.b32.xlu0 %v8959_v1, %s6808_s11  ;;  %4972 = vrot.lane.b32.xlu1 %v8949_v28, %s6807_s10 }
0x164d   :  { %4974 = vrot.lane.b32.xlu0 %v8968_v56, %s6807_s10  ;;  %5054 = vrot.lane.b32.xlu1 %v8959_v1, %s6803_s6 }
0x1651   :  { %4930 = vrot.lane.b32.xlu0 %v8959_v1, %s6810_s12  ;;  %4928 = vrot.lane.b32.xlu1 %v8946_v17, %s6810_s12 }
0x1655   :  { %4954 = vrot.lane.b32.xlu0 %v8968_v56, %s6808_s11  ;;  %4952 = vrot.lane.b32.xlu1 %v8949_v28, %s6808_s11 }
0x1659   :  { %4910 = vrot.lane.b32.xlu0 %v8959_v1, %s6813_s17  ;;  %4908 = vrot.lane.b32.xlu1 %v8946_v17, %s6813_s17 }
0x165d   :  { %4934 = vrot.lane.b32.xlu0 %v8968_v56, %s6810_s12  ;;  %4932 = vrot.lane.b32.xlu1 %v8949_v28, %s6810_s12 }
0x1661   :  { %4914 = vrot.lane.b32.xlu0 %v8968_v56, %s6813_s17  ;;  %4912 = vrot.lane.b32.xlu1 %v8949_v28, %s6813_s17 }
0x1665   :  { %5512 = vperm.xlu1 %6792, %v4903_v61  }
0x1697   :  { %v5057_v10 = vpop.permute.xlu0 %5056  ;;  %v5053_v55 = vpop.permute.xlu1 %5052 }
0x169b   :  { %v5035_v40 = vpop.permute.xlu0 %5034  ;;  %v5037_v59 = vpop.permute.xlu1 %5036 }
0x169f   :  { %v5059_v21 = vpop.permute.xlu0 %5058  ;;  %v5033_v39 = vpop.permute.xlu1 %5032 }
0x16a0   :  { %v5062_v19 = vsel %vm9474_vm2, %v5057_v10, %v5059_v21  ;;  %v5067_v43 = vsel %vm9475_vm3, %v5059_v21, 0.0  ;;  %vm9487_vm2 = vmmov %vm9486_vm1 }
0x16a1   :  { %v5070_v57 = vmul.f32 %v8845_v42, %v5062_v19  ;;  %v5071_v50 = vmul.f32 %v8802_v45, %v5067_v43  ;;  %vm9488_vm3 = vmmov %vm9480_vm10 }
0x16a3   :  { %5453 = vmatprep.subr.mxu1 %v5071_v50  ;;  %v5015_v46 = vpop.permute.xlu0 %5014  ;;  %v5017_v60 = vpop.permute.xlu1 %5016 }
0x16a4   :  { %5454 = vmatpush1.msra.mxu1 %v5070_v57 }
0x16a7   :  { %v5039_v58 = vpop.permute.xlu0 %5038  ;;  %v5013_v63 = vpop.permute.xlu1 %5012 }
0x16a8   :  { %v5042_v8 = vsel %vm9476_vm5, %v5037_v59, %v5039_v58  ;;  %v5047_v22 = vsel %vm9477_vm7, %v5039_v58, 0.0  ;;  %vm9489_vm5 = vmmov %vm9488_vm3  ;;  %vm9490_vm7 = vcmask 121856  }
0x16a9   :  { %v5050_v3 = vmul.f32 %v5042_v8, %v9439_v34  ;;  %v5051_v38 = vmul.f32 %v5047_v22, %v6998_v37 }
0x16ab   :  { %5455 = vmatprep.subr.mxu1 %v5051_v38  ;;  %v4995_v23 = vpop.permute.xlu0 %4994  ;;  %v4997_v44 = vpop.permute.xlu1 %4996 }
0x16ac   :  { %5456 = vmatpush1.msra.mxu1 %v5050_v3 }
0x16af   :  { %v5019_v32 = vpop.permute.xlu0 %5018  ;;  %v4993_v35 = vpop.permute.xlu1 %4992 }
0x16b0   :  { %v5022_v61 = vsel %vm9478_vm8, %v5017_v60, %v5019_v32  ;;  %v5027_v21 = vsel %vm9479_vm9, %v5019_v32, 0.0  ;;  %v4991_v32 = vmul.f32 %v8968_v56, %v9449_v41  ;;  %vm9491_vm8 = vmmov %vm9490_vm7 }
0x16b1   :  { %v5030_v19 = vmul.f32 %v5022_v61, %v7026_v54  ;;  %v5031_v43 = vmul.f32 %v5027_v21, %v7022_v53  ;;  %v4990_v61 = vmul.f32 %v8949_v28, %v7075_v25  ;;  %v5021_v25 = vsel %vm9486_vm1, %v5015_v46, %v5017_v60  ;;  %vm9492_vm9 = vmmov %vm9490_vm7 }
0x16b3   :  { %v4999_v57 = vpop.permute.xlu0 %4998  ;;  %5457 = vmatprep.subr.mxu1 %v5031_v43  ;;  %v4969_v50 = vpop.permute.xlu1 %4968 }
0x16b4   :  { %v5002_v58 = vsel %vm9480_vm10, %v4997_v44, %v4999_v57  ;;  %v5007_v8 = vsel %vm9481_vm11, %v4999_v57, 0.0  ;;  %5458 = vmatpush1.msra.mxu1 %v5030_v19  ;;  %vm9493_vm10 = vmmov %vm9490_vm7  ;;  %vm9494_vm11 = vcmask 138240  }
0x16b5   :  { %v5010_v22 = vmul.f32 %v5002_v58, %v9443_v9  ;;  %v5011_v3 = vmul.f32 %v5007_v8, %v9441_v29  ;;  %v5041_v8 = vsel %vm9482_vm12, %v5035_v40, %v5037_v59  ;;  %vm9495_vm12 = vmmov %vm9494_vm11 }
0x16b6   :  { %v5049_v59 = vmul.f32 %v5041_v8, %v6976_v27 }
0x16b7   :  { %v4971_v38 = vpop.permute.xlu0 %4970  ;;  %5459 = vmatprep.subr.mxu1 %v5011_v3  ;;  %v4949_v37 = vpop.permute.xlu1 %4948 }
0x16b8   :  { %5460 = vmatpush1.msra.mxu1 %v5010_v22  ;;  %v5040_v22 = vsel %vm9485_vm0, %v5033_v39, %v5035_v40  ;;  %v5001_v40 = vsel %vm9488_vm3, %v4995_v23, %v4997_v44  ;;  %v5000_v39 = vsel %vm9489_vm5, %v4993_v35, %v4995_v23  ;;  %v4976_v8 = vsel %vm303_vm4, %v4969_v50, %v4971_v38 }
0x16b9   :  { %5461 = vmatprep.subr.mxu1 %v4991_v32  ;;  %vm9498_vm0 = vcmask 588800   ;;  %vm9502_vm5 = vcmask 924672  }
0x16ba   :  { %5462 = vmatpush1.msra.mxu1 %v4990_v61  ;;  %vm9499_vm1 = vmmov %vm9498_vm0 }
0x16bb   :  { %v4951_v21 = vpop.permute.xlu0 %4950  ;;  %v4973_v43 = vpop.permute.xlu1 %4972 }
0x16bc   :  { %v4977_v19 = vsel %vm303_vm4, %v4971_v38, %v4973_v43  ;;  %v4988_v38 = vmul.f32 %v8946_v17, %v7058_v20 }
0x16bd   :  { %v4986_v41 = vmul.f32 %v4977_v19, %v9456_v26 }
0x16bf   :  { %v4975_v57 = vpop.permute.xlu0 %4974  ;;  %v5055_v58 = vpop.permute.xlu1 %5054 }
0x16c0   :  { %v4978_v3 = vsel %vm303_vm4, %v4973_v43, %v4975_v57  ;;  %v5060_v9 = vsel %vm9483_vm14, %v5053_v55, %v5055_v58  ;;  %v5061_v56 = vsel %vm9484_vm15, %v5055_v58, %v5057_v10  ;;  %v5020_v43 = vsel %vm9487_vm2, %v5013_v63, %v5015_v46  ;;  %vm9496_vm14 = vmmov %vm9494_vm11 }
0x16c1   :  { %v4987_v28 = vmul.f32 %v4978_v3, %v9454_v4  ;;  %v5068_v32 = vmul.f32 %v8859_v49, %v5060_v9  ;;  %v5069_v61 = vmul.f32 %v8812_v12, %v5061_v56  ;;  %v5048_v10 = vmul.f32 %v5040_v22, %v6994_v36  ;;  %vm9497_vm15 = vmmov %vm9494_vm11 }
0x16c2   :  { %v5029_v9 = vmul.f32 %v5021_v25, %v7012_v47  ;;  %v5028_v60 = vmul.f32 %v5020_v43, %v7017_v51  ;;  %v5009_v46 = vmul.f32 %v5001_v40, %v7042_v6  ;;  %v5008_v58 = vmul.f32 %v5000_v39, %v9445_v18 }
0x16c3   :  { %v4931_v57 = vpop.permute.xlu0 %4930  ;;  %5463 = vmatprep.subr.mxu1 %v4987_v28  ;;  %v4929_v55 = vpop.permute.xlu1 %4928  ;;  %5382 = vmatprep.subr.mxu0 %v5069_v61  ;;  %v4983_v25 = vsel %vm303_vm4, 0.0, %v4969_v50  ;;  %v4989_v3 = vmul.f32 %v8959_v1, %v7046_v11  ;;  %v4956_v56 = vsel %vm9492_vm9, %v4949_v37, %v4951_v21  ;;  %v4985_v50 = vmul.f32 %v4976_v8, %v9450_v24  ;;  %v4901_v8 = vld [vmem:[%s9083_s5] sm:$0xff] }
0x16c4   :  { %5383 = vmatpush1.msra.mxu0 %v5068_v32  ;;  %5464 = vmatpush1.msra.mxu1 %v4986_v41  ;;  %v4963_v22 = vsel %vm9493_vm10, 0.0, %v4949_v37  ;;  %v4984_v1 = vmul.f32 %v4983_v25, %v9448_v33  ;;  %v4965_v17 = vmul.f32 %v4956_v56, %v9457_v5  ;;  %v4943_v61 = vsel %vm229_vm6, 0.0, %v4929_v55  ;;  %v5360_v56 = vpop.f32.mrf.mxu1 }
0x16c5   :  { %5384 = vmatprep.subr.mxu0 %v5049_v59  ;;  %v4964_v59 = vmul.f32 %v4963_v22, %v9453_v14  ;;  %v4944_v39 = vmul.f32 %v4943_v61, %v9466_v52  ;;  %vm9500_vm2 = vcmask 908288  }
0x16c6   :  { %5385 = vmatpush1.msra.mxu0 %v5048_v10  ;;  %vm9501_vm3 = vmmov %vm9500_vm2 }
0x16c7   :  { %v4955_v63 = vpop.permute.xlu0 %4954  ;;  %v4953_v19 = vpop.permute.xlu1 %4952  ;;  %5386 = vmatprep.subr.mxu0 %v5029_v9  ;;  %vm9506_vm10 = vmmov %vm9500_vm2 }
0x16c8   :  { %v4957_v44 = vsel %vm9490_vm7, %v4951_v21, %v4953_v19  ;;  %v4958_v41 = vsel %vm9491_vm8, %v4953_v19, %v4955_v63  ;;  %5387 = vmatpush1.msra.mxu0 %v5028_v60  ;;  %v4936_v21 = vsel %vm229_vm6, %v4929_v55, %v4931_v57  ;;  %vm9503_vm7 = vmmov %vm9502_vm5  ;;  %vm9504_vm8 = vcmask 916480  }
0x16c9   :  { %v4966_v23 = vmul.f32 %v4957_v44, %v9459_v48  ;;  %v4967_v35 = vmul.f32 %v4958_v41, %v9458_v62  ;;  %5388 = vmatprep.subr.mxu0 %v5009_v46  ;;  %v4945_v37 = vmul.f32 %v4936_v21, %v9462_v7  ;;  %vm9505_vm9 = vmmov %vm9504_vm8 }
0x16ca   :  { %5389 = vmatpush1.msra.mxu0 %v5008_v58 }
0x16cb   :  { %v4911_v28 = vpop.permute.xlu0 %4910  ;;  %5465 = vmatprep.subr.mxu1 %v4967_v35  ;;  %v4909_v32 = vpop.permute.xlu1 %4908  ;;  %5390 = vmatprep.subr.mxu0 %v4989_v3 }
0x16cc   :  { %5391 = vmatpush1.msra.mxu0 %v4988_v38  ;;  %5466 = vmatpush1.msra.mxu1 %v4966_v23  ;;  %v4916_v43 = vsel %vm9494_vm11, %v4909_v32, %v4911_v28  ;;  %v4923_v10 = vsel %vm9495_vm12, 0.0, %v4909_v32  ;;  %v5289_v3 = vpop.f32.mrf.mxu0  ;;  %v5362_v32 = vpop.f32.mrf.mxu1  ;;  %vm9507_vm11 = vmmov %vm9500_vm2  ;;  %vm9508_vm12 = vcmask 1039360  }
0x16cd   :  { %5392 = vmatprep.subr.mxu0 %v4985_v50  ;;  %v4925_v46 = vmul.f32 %v4916_v43, %v9468_v16  ;;  %v4924_v58 = vmul.f32 %v4923_v10, %v9470_v2 }
0x16ce   :  { %5393 = vmatpush1.msra.mxu0 %v4984_v1  ;;  %v5291_v38 = vpop.f32.mrf.mxu0 }
0x16cf   :  { %v4935_v40 = vpop.permute.xlu0 %4934  ;;  %v4933_v9 = vpop.permute.xlu1 %4932  ;;  %5394 = vmatprep.subr.mxu0 %v4965_v17 }
0x16d0   :  { %v4937_v60 = vsel %vm229_vm6, %v4931_v57, %v4933_v9  ;;  %v4938_v55 = vsel %vm229_vm6, %v4933_v9, %v4935_v40  ;;  %5395 = vmatpush1.msra.mxu0 %v4964_v59 }
0x16d1   :  { %v4946_v63 = vmul.f32 %v4937_v60, %v9467_v13  ;;  %v4947_v19 = vmul.f32 %v4938_v55, %v9464_v31  ;;  %5396 = vmatprep.subr.mxu0 %v4945_v37 }
0x16d2   :  { %5397 = vmatpush1.msra.mxu0 %v4944_v39 }
0x16d3   :  { %v4915_v44 = vpop.permute.xlu0 %4914  ;;  %5467 = vmatprep.subr.mxu1 %v4947_v19  ;;  %v4913_v41 = vpop.permute.xlu1 %4912  ;;  %5398 = vmatprep.subr.mxu0 %v4925_v46 }
0x16d4   :  { %v4917_v57 = vsel %vm9496_vm14, %v4911_v28, %v4913_v41  ;;  %v4918_v25 = vsel %vm9497_vm15, %v4913_v41, %v4915_v44  ;;  %5399 = vmatpush1.msra.mxu0 %v4924_v58  ;;  %5468 = vmatpush1.msra.mxu1 %v4946_v63  ;;  %vm9509_vm14 = vmmov %vm9508_vm12 }
0x16d5   :  { %v4926_v23 = vmul.f32 %v4917_v57, %v9471_v15  ;;  %v4927_v35 = vmul.f32 %v4918_v25, %v9469_v30  ;;  %6317 = vmatmul.mubr.msk.f32.vlgmr.msra.gmra.mxu0 %vm9498_vm0, %v4901_v8  ;;  %vm9510_vm15 = vmmov %vm9504_vm8 }
0x16d6   :  { %5765 = vmatprep.mubr.f32.mxu0 %v9413_v0  ;;  %vm9511_vm0 = vmmov %vm9504_vm8 }
0x16d7   :  { %5469 = vmatprep.subr.mxu1 %v4927_v35 }
0x16d8   :  { %5470 = vmatpush1.msra.mxu1 %v4926_v23 }
0x16d9   :  { %6318 = vmatmul.mubr.msk.f32.vlgmr.msra.gmra.mxu1 %vm9499_vm1, %v4901_v8  ;;  %vm9513_vm1 = vmmov %vm9508_vm12 }
0x16da   :  { %5836 = vmatprep.mubr.f32.mxu1 %v9413_v0 }
0x16e0   :  { %v5513_v28 = vpop.permute.xlu1 %5512 }
0x1795   :  { %v5434_v50 = vpop.f32.mrf.mxu0 }
0x1796   :  { %v5435_v22 = vadd.f32 %v5434_v50, %v5289_v3 }
0x1797   :  { %v5436_v37 = vpop.f32.mrf.mxu0 }
0x1798   :  { %v5515_v1 = vadd.f32 %v5513_v28, %v5435_v22  ;;  %v5437_v10 = vadd.f32 %v5436_v37, %v5291_v38 }
0x1799   :  { %v5505_v21 = vpop.f32.mrf.mxu1 }
0x179a   :  { %v9111_v17 = vmax.f32 %v5515_v1, 0.0  ;;  %v5506_v61 = vadd.f32 %v5505_v21, %v5360_v56  ;;  %v5516_v40 = vadd.f32 %v5513_v28, %v5437_v10 }
0x179b   :  { %v5507_v9 = vpop.f32.mrf.mxu1 }
0x179c   :  { %v5517_v59 = vadd.f32 %v5513_v28, %v5506_v61  ;;  %5673 = vrot.lane.b32.xlu0 %v9111_v17, %s6803_s6  ;;  %v9137_v39 = vmax.f32 %v5516_v40, 0.0  ;;  %v5508_v60 = vadd.f32 %v5507_v9, %v5362_v32 }
0x179e   :  { %v9115_v43 = vmax.f32 %v5517_v59, 0.0  ;;  %v5518_v55 = vadd.f32 %v5513_v28, %v5508_v60 }
0x17a0   :  { %5677 = vrot.lane.b32.xlu1 %v9115_v43, %s6803_s6  ;;  %5657 = vrot.lane.b32.xlu0 %v9115_v43, %s6804_s7  ;;  %v9147_v46 = vmax.f32 %v5518_v55, 0.0 }
0x17a4   :  { %5653 = vrot.lane.b32.xlu1 %v9111_v17, %s6804_s7  ;;  %5569 = vrot.lane.b32.xlu0 %v9111_v17, %s6808_s11 }
0x17a8   :  { %5637 = vrot.lane.b32.xlu1 %v9115_v43, %s6805_s8  ;;  %5549 = vrot.lane.b32.xlu0 %v9111_v17, %s6810_s12 }
0x17ac   :  { %5633 = vrot.lane.b32.xlu1 %v9111_v17, %s6805_s8  ;;  %5593 = vrot.lane.b32.xlu0 %v9115_v43, %s6807_s10 }
0x17b0   :  { %5617 = vrot.lane.b32.xlu1 %v9115_v43, %s6806_s9  ;;  %5529 = vrot.lane.b32.xlu0 %v9111_v17, %s6813_s17 }
0x17b4   :  { %5613 = vrot.lane.b32.xlu1 %v9111_v17, %s6806_s9  ;;  %5675 = vrot.lane.b32.xlu0 %v9137_v39, %s6803_s6 }
0x17b8   :  { %5589 = vrot.lane.b32.xlu1 %v9111_v17, %s6807_s10  ;;  %5635 = vrot.lane.b32.xlu0 %v9137_v39, %s6805_s8 }
0x17bc   :  { %5655 = vrot.lane.b32.xlu1 %v9137_v39, %s6804_s7  ;;  %5679 = vrot.lane.b32.xlu0 %v9147_v46, %s6803_s6  ;;  %s6851_s6 = smov 29  }
0x17bd   :  { %s6041_s20 = sld [smem:[%s9303_s0 + %s6851_s6]]  }
0x17c0   :  { %5619 = vrot.lane.b32.xlu1 %v9147_v46, %s6806_s9  ;;  %5615 = vrot.lane.b32.xlu0 %v9137_v39, %s6806_s9 }
0x17c3   :  { %v5524_v63 = vld [vmem:[%s6041_s20] sm:$0xff] }
0x17c4   :  { %5571 = vrot.lane.b32.xlu1 %v9137_v39, %s6808_s11  ;;  %5659 = vrot.lane.b32.xlu0 %v9147_v46, %s6804_s7 }
0x17c8   :  { %5551 = vrot.lane.b32.xlu1 %v9137_v39, %s6810_s12  ;;  %5639 = vrot.lane.b32.xlu0 %v9147_v46, %s6805_s8  ;;  %s6852_s8 = smov 31  }
0x17c9   :  { %s6043_s24 = sld [smem:[%s9303_s0 + %s6852_s8]]  }
0x17cc   :  { %5595 = vrot.lane.b32.xlu1 %v9147_v46, %s6807_s10  ;;  %5591 = vrot.lane.b32.xlu0 %v9137_v39, %s6807_s10 }
0x17cf   :  { %v5848_v19 = vld [vmem:[%s6043_s24] sm:$0x7] }
0x17d0   :  { %5531 = vrot.lane.b32.xlu1 %v9137_v39, %s6813_s17  ;;  %5573 = vrot.lane.b32.xlu0 %v9115_v43, %s6808_s11 }
0x17d4   :  { %5575 = vrot.lane.b32.xlu1 %v9147_v46, %s6808_s11  ;;  %5553 = vrot.lane.b32.xlu0 %v9115_v43, %s6810_s12  ;;  %s6853_s11 = smov 28  }
0x17d5   :  { %s9247_s29 = sld [smem:[%s9303_s0 + %s6853_s11]]  }
0x17d8   :  { %5555 = vrot.lane.b32.xlu1 %v9147_v46, %s6810_s12  ;;  %5533 = vrot.lane.b32.xlu0 %v9115_v43, %s6813_s17 }
0x17dc   :  { %5535 = vrot.lane.b32.xlu1 %v9147_v46, %s6813_s17  ;;  %5695 = vperm.xlu0 %6781, %v5524_v63  }
0x17e0   :  { %5851 = vperm.xlu1 %6792, %v5848_v19  }
0x180e   :  { %v5674_v58 = vpop.permute.xlu0 %5673 }
0x1812   :  { %v5678_v8 = vpop.permute.xlu1 %5677  ;;  %v5658_v44 = vpop.permute.xlu0 %5657 }
0x1816   :  { %v5654_v41 = vpop.permute.xlu1 %5653  ;;  %v9189_v57 = vpop.permute.xlu0 %5569 }
0x181a   :  { %v5638_v25 = vpop.permute.xlu1 %5637  ;;  %v9191_v23 = vpop.permute.xlu0 %5549 }
0x181e   :  { %v5634_v35 = vpop.permute.xlu1 %5633  ;;  %v9193_v3 = vpop.permute.xlu0 %5593 }
0x1822   :  { %v5618_v56 = vpop.permute.xlu1 %5617  ;;  %v9195_v38 = vpop.permute.xlu0 %5529 }
0x1826   :  { %v5614_v50 = vpop.permute.xlu1 %5613  ;;  %v5676_v22 = vpop.permute.xlu0 %5675 }
0x1827   :  { %v5681_v28 = vsel %vm9500_vm2, %v5674_v58, %v5676_v22  ;;  %v5682_v32 = vsel %vm9501_vm3, %v5676_v22, %v5678_v8  ;;  %vm9514_vm2 = vmmov %vm9502_vm5 }
0x1828   :  { %v5689_v1 = vmul.f32 %v8859_v49, %v5681_v28  ;;  %v5690_v21 = vmul.f32 %v8812_v12, %v5682_v32  ;;  %vm9515_vm3 = vmmov %vm9514_vm2 }
0x182a   :  { %v5590_v61 = vpop.permute.xlu1 %5589  ;;  %5715 = vmatprep.subr.mxu0 %v5690_v21  ;;  %v5636_v59 = vpop.permute.xlu0 %5635  ;;  %v5609_v21 = vmul.f32 %v9111_v17, %v7058_v20 }
0x182b   :  { %5716 = vmatpush1.msra.mxu0 %v5689_v1  ;;  %v5641_v37 = vsel %vm9502_vm5, %v5634_v35, %v5636_v59  ;;  %v5642_v10 = vsel %vm9503_vm7, %v5636_v59, %v5638_v25  ;;  %vm9516_vm5 = vmmov %vm9513_vm1  ;;  %v5604_v17 = vsel %vm303_vm4, 0.0, %v5590_v61  ;;  %vm9518_vm7 = vcmask 121856  }
0x182c   :  { %v5650_v22 = vmul.f32 %v5642_v10, %v7012_v47  ;;  %v5649_v32 = vmul.f32 %v5641_v37, %v7017_v51 }
0x182e   :  { %v5656_v40 = vpop.permute.xlu1 %5655  ;;  %v5680_v9 = vpop.permute.xlu0 %5679 }
0x182f   :  { %v5661_v60 = vsel %vm9504_vm8, %v5654_v41, %v5656_v40  ;;  %v5662_v55 = vsel %vm9505_vm9, %v5656_v40, %v5658_v44  ;;  %v5683_v63 = vsel %vm9506_vm10, %v5678_v8, %v5680_v9  ;;  %v5688_v49 = vsel %vm9507_vm11, %v5680_v9, 0.0  ;;  %vm9519_vm8 = vmmov %vm9518_vm7 }
0x1830   :  { %v5669_v12 = vmul.f32 %v5661_v60, %v6994_v36  ;;  %v5670_v19 = vmul.f32 %v5662_v55, %v6976_v27  ;;  %v5691_v58 = vmul.f32 %v8845_v42, %v5683_v63  ;;  %v5692_v35 = vmul.f32 %v8802_v45, %v5688_v49  ;;  %v9517_v63 = vld [vmem:[#allocation11_spill] sm:$0xff]  ;;  %vm9524_vm10 = vmmov %vm9518_vm7 }
0x1831   :  { %v5610_v42 = vmul.f32 %v9137_v39, %v7046_v11  ;;  %vm9525_vm11 = vmmov %vm9518_vm7 }
0x1832   :  { %v5620_v28 = vpop.permute.xlu1 %5619  ;;  %5717 = vmatprep.subr.mxu0 %v5670_v19  ;;  %5786 = vmatprep.subr.mxu1 %v5692_v35  ;;  %v5616_v41 = vpop.permute.xlu0 %5615  ;;  %v9520_v19 = vld [vmem:[#allocation12_spill] sm:$0xff] }
0x1833   :  { %v5621_v8 = vsel %vm9508_vm12, %v5614_v50, %v5616_v41  ;;  %v5622_v1 = vsel %vm9509_vm14, %v5616_v41, %v5618_v56  ;;  %5718 = vmatpush1.msra.mxu0 %v5669_v12  ;;  %5787 = vmatpush1.msra.mxu1 %v5691_v58  ;;  %v5628_v11 = vsel %vm9513_vm1, %v5620_v28, 0.0  ;;  %v5623_v40 = vsel %vm9516_vm5, %v5618_v56, %v5620_v28 }
0x1834   :  { %v5629_v27 = vmul.f32 %v5621_v8, %v9445_v18  ;;  %v5630_v36 = vmul.f32 %v5622_v1, %v7042_v6  ;;  %5719 = vmatprep.subr.mxu0 %v5650_v22  ;;  %v9512_v6 = vld [vmem:[#allocation4_spill] sm:$0xff]  ;;  %v5632_v9 = vmul.f32 %v5628_v11, %v9441_v29  ;;  %v5631_v49 = vmul.f32 %v5623_v40, %v9517_v63  ;;  %v9521_v22 = vld [vmem:[#allocation13_spill] sm:$0xff] }
0x1835   :  { %5720 = vmatpush1.msra.mxu0 %v5649_v32  ;;  %v5612_v58 = vmul.f32 %v9147_v46, %v9520_v19  ;;  %v5611_v28 = vmul.f32 %v9115_v43, %v9521_v22  ;;  %vm9526_vm12 = vcmask 588800  }
0x1836   :  { %v9217_v45 = vpop.permute.xlu1 %5571  ;;  %5721 = vmatprep.subr.mxu0 %v5630_v36  ;;  %v5660_v47 = vpop.permute.xlu0 %5659 }
0x1837   :  { %v5663_v51 = vsel %vm9510_vm15, %v5658_v44, %v5660_v47  ;;  %v5668_v50 = vsel %vm9511_vm0, %v5660_v47, 0.0  ;;  %5722 = vmatpush1.msra.mxu0 %v5629_v27 }
0x1838   :  { %v5671_v18 = vmul.f32 %v5663_v51, %v9439_v34  ;;  %v5672_v59 = vmul.f32 %v5668_v50, %v9512_v6  ;;  %5723 = vmatprep.subr.mxu0 %v5610_v42 }
0x1839   :  { %5724 = vmatpush1.msra.mxu0 %v5609_v21 }
0x183a   :  { %v9227_v37 = vpop.permute.xlu1 %5551  ;;  %5788 = vmatprep.subr.mxu1 %v5672_v59  ;;  %v5640_v10 = vpop.permute.xlu0 %5639 }
0x183b   :  { %v5643_v39 = vsel %vm9514_vm2, %v5638_v25, %v5640_v10  ;;  %v5648_v44 = vsel %vm9515_vm3, %v5640_v10, 0.0  ;;  %5789 = vmatpush1.msra.mxu1 %v5671_v18  ;;  %v5577_v25 = vsel %vm9518_vm7, %v9189_v57, %v9217_v45  ;;  %v5557_v35 = vsel %vm229_vm6, %v9191_v23, %v9227_v37 }
0x183c   :  { %v5651_v20 = vmul.f32 %v5643_v39, %v7026_v54  ;;  %v5652_v34 = vmul.f32 %v5648_v44, %v7022_v53  ;;  %v5584_v53 = vsel %vm9519_vm8, 0.0, %v9189_v57  ;;  %v5564_v57 = vsel %vm229_vm6, 0.0, %v9191_v23  ;;  %v5847_v39 = vld [vmem:[%s6042_s28] sm:$0x7] }
0x183e   :  { %v5596_v60 = vpop.permute.xlu1 %5595  ;;  %5790 = vmatprep.subr.mxu1 %v5652_v34  ;;  %v5592_v55 = vpop.permute.xlu0 %5591 }
0x183f   :  { %v5599_v56 = vsel %vm303_vm4, %v9193_v3, %v5596_v60  ;;  %v5597_v54 = vsel %vm303_vm4, %v5590_v61, %v5592_v55  ;;  %5791 = vmatpush1.msra.mxu1 %v5651_v20  ;;  %v5598_v29 = vsel %vm303_vm4, %v5592_v55, %v9193_v3  ;;  %v5605_v61 = vmul.f32 %v5604_v17, %v9448_v33 }
0x1840   :  { %v5606_v12 = vmul.f32 %v5597_v54, %v9450_v24  ;;  %5792 = vmatprep.subr.mxu1 %v5632_v9  ;;  %v5586_v3 = vmul.f32 %v5577_v25, %v9457_v5  ;;  %v5608_v24 = vmul.f32 %v5599_v56, %v9454_v4  ;;  %v5585_v33 = vmul.f32 %v5584_v53, %v9453_v14 }
0x1841   :  { %5793 = vmatpush1.msra.mxu1 %v5631_v49  ;;  %v5607_v32 = vmul.f32 %v5598_v29, %v9456_v26  ;;  %vm9522_vm4 = vcmask 138240   ;;  %v5566_v5 = vmul.f32 %v5557_v35, %v9462_v7  ;;  %v5565_v4 = vmul.f32 %v5564_v57, %v9466_v52  ;;  %v5523_v7 = vld [vmem:[%s9247_s29] sm:$0xff] }
0x1842   :  { %v5532_v41 = vpop.permute.xlu1 %5531  ;;  %5794 = vmatprep.subr.mxu1 %v5612_v58  ;;  %v5574_v46 = vpop.permute.xlu0 %5573  ;;  %5725 = vmatprep.subr.mxu0 %v5606_v12  ;;  %vm9523_vm9 = vmmov %vm9522_vm4 }
0x1843   :  { %v5537_v8 = vsel %vm9522_vm4, %v9195_v38, %v5532_v41  ;;  %5726 = vmatpush1.msra.mxu0 %v5605_v61  ;;  %5795 = vmatpush1.msra.mxu1 %v5611_v28  ;;  %v5544_v43 = vsel %vm9523_vm9, 0.0, %v9195_v38  ;;  %v5578_v26 = vsel %vm9524_vm10, %v9217_v45, %v5574_v46  ;;  %vm9527_vm14 = vmmov %vm9522_vm4 }
0x1844   :  { %5727 = vmatprep.subr.mxu0 %v5586_v3  ;;  %5796 = vmatprep.subr.mxu1 %v5608_v24  ;;  %v5546_v14 = vmul.f32 %v5537_v8, %v9468_v16  ;;  %v5545_v27 = vmul.f32 %v5544_v43, %v9470_v2  ;;  %v5587_v52 = vmul.f32 %v5578_v26, %v9459_v48  ;;  %vm9528_vm15 = vmmov %vm9522_vm4 }
0x1845   :  { %5728 = vmatpush1.msra.mxu0 %v5585_v33  ;;  %5797 = vmatpush1.msra.mxu1 %v5607_v32 }
0x1846   :  { %v5576_v23 = vpop.permute.xlu1 %5575  ;;  %v5554_v1 = vpop.permute.xlu0 %5553  ;;  %5729 = vmatprep.subr.mxu0 %v5566_v5 }
0x1847   :  { %v5579_v38 = vsel %vm9525_vm11, %v5574_v46, %v5576_v23  ;;  %5730 = vmatpush1.msra.mxu0 %v5565_v4  ;;  %v5558_v16 = vsel %vm229_vm6, %v9227_v37, %v5554_v1 }
0x1848   :  { %v5588_v36 = vmul.f32 %v5579_v38, %v9458_v62  ;;  %5731 = vmatprep.subr.mxu0 %v5546_v14  ;;  %v5567_v62 = vmul.f32 %v5558_v16, %v9467_v13 }
0x1849   :  { %5732 = vmatpush1.msra.mxu0 %v5545_v27 }
0x184a   :  { %v5556_v47 = vpop.permute.xlu1 %5555  ;;  %5798 = vmatprep.subr.mxu1 %v5588_v36  ;;  %6319 = vmatmul.mubr.msk.f32.vlgmr.msra.gmra.mxu0 %vm9526_vm12, %v5523_v7  ;;  %v5534_v2 = vpop.permute.xlu0 %5533 }
0x184b   :  { %v5559_v45 = vsel %vm229_vm6, %v5554_v1, %v5556_v47  ;;  %5799 = vmatpush1.msra.mxu1 %v5587_v52  ;;  %5921 = vmatprep.mubr.f32.mxu0 %v9413_v0  ;;  %v5538_v48 = vsel %vm9527_vm14, %v5532_v41, %v5534_v2  ;;  %vm9529_vm6 = vmmov %vm9526_vm12 }
0x184c   :  { %v5568_v42 = vmul.f32 %v5559_v45, %v9464_v31  ;;  %v5547_v18 = vmul.f32 %v5538_v48, %v9471_v15 }
0x184e   :  { %v5536_v51 = vpop.permute.xlu1 %5535  ;;  %5800 = vmatprep.subr.mxu1 %v5568_v42 }
0x184f   :  { %v5539_v50 = vsel %vm9528_vm15, %v5534_v2, %v5536_v51  ;;  %5801 = vmatpush1.msra.mxu1 %v5567_v62 }
0x1850   :  { %v5548_v21 = vmul.f32 %v5539_v50, %v9469_v30 }
0x1852   :  { %5802 = vmatprep.subr.mxu1 %v5548_v21 }
0x1853   :  { %5803 = vmatpush1.msra.mxu1 %v5547_v18 }
0x1854   :  { %6320 = vmatmul.mubr.msk.f32.vlgmr.msra.gmra.mxu1 %vm9529_vm6, %v5523_v7 }
0x1857   :  { %v5696_v13 = vpop.permute.xlu0 %5695 }
0x185b   :  { %v5852_v9 = vpop.permute.xlu1 %5851 }
0x190a   :  { %v5767_v31 = vpop.f32.mrf.mxu0 }
0x190b   :  { %v5768_v6 = vadd.f32 %v5767_v31, %v5696_v13 }
0x190c   :  { %v5769_v59 = vpop.f32.mrf.mxu0 }
0x190d   :  { %v5770_v37 = vadd.f32 %v5769_v59, %v5696_v13  ;;  %v5843_v11 = vmax.f32 %v5768_v6, 0.0 }
0x190f   :  { %v5844_v10 = vmax.f32 %v5770_v37, 0.0 }
0x1911   :  { %5887 = vmatprep.subr.mxu0 %v5844_v10 }
0x1912   :  { %5888 = vmatpush1.msra.mxu0 %v5843_v11 }
0x1913   :  { %6321 = vmatmul.mubr.msk.f32.vlgmr.msra.gmra.mxu0 %vm1249_vm13, %v5847_v39 }
0x1914   :  { %v5838_v30 = vpop.f32.mrf.mxu1  ;;  %5992 = vmatprep.mubr.f32.mxu0 %v9413_v0 }
0x1915   :  { %v5839_v15 = vadd.f32 %v5838_v30, %v5696_v13 }
0x1916   :  { %v5840_v44 = vpop.f32.mrf.mxu1 }
0x1917   :  { %v5841_v40 = vadd.f32 %v5840_v44, %v5696_v13  ;;  %v5845_v34 = vmax.f32 %v5839_v15, 0.0 }
0x1919   :  { %v5846_v20 = vmax.f32 %v5841_v40, 0.0 }
0x191b   :  { %5958 = vmatprep.subr.mxu0 %v5846_v20 }
0x191c   :  { %5959 = vmatpush1.msra.mxu0 %v5845_v34 }
0x191d   :  { %6322 = vmatmul.mubr.msk.f32.vlgmr.msra.gmra.mxu0 %vm1249_vm13, %v5847_v39 }
0x19d3   :  { %v5923_v17 = vpop.f32.mrf.mxu0 }
0x19d4   :  { %v5924_v55 = vadd.f32 %v5923_v17, %v5852_v9 }
0x19d5   :  { %v5925_v60 = vpop.f32.mrf.mxu0 }
0x19d6   :  { %v5926_v63 = vadd.f32 %v5925_v60, %v5852_v9 }
0x19d8   :  { %v6003_v0 = vcombine.low %v5924_v55, %v5926_v63 }
0x19da   :  { %6007 = vst [vmem:[%s6051_s25] sm:$0x77] %v6003_v0 }
0x19dd   :  { %v5994_v49 = vpop.f32.mrf.mxu0 }
0x19de   :  { %v5995_v56 = vadd.f32 %v5994_v49, %v5852_v9 }
0x19df   :  { %v5996_v25 = vpop.f32.mrf.mxu0 }
0x19e0   :  { %v5997_v54 = vadd.f32 %v5996_v25, %v5852_v9 }
0x19e2   :  { %v6004_v53 = vcombine.low %v5995_v56, %v5997_v54 }
0x19e4   :  { %6008 = vst [vmem:[%s6051_s25 + $0x8] sm:$0x77] %v6004_v53 }

</bundles_post_ra>
